<compile_context>
chip_gen: v7x
topology: tpu7x:2x2x1
jax: 0.10.0
libtpu: 0.0.40
codegen_flags: <defaults>
</compile_context>

<pallas_src>
import jax
import jax.numpy as jnp
from jax.experimental import pallas as pl
from jax.experimental.pallas import tpu as pltpu

C_IN = 3
C_OUT = 64
K = 2                    # conv kernel / stride
POOL = 2                 # maxpool kernel / stride
H_IN = W_IN = 200        # required by Linear(64*50*50, 2)
H_CONV = W_CONV = H_IN // K          # 100
H_POOL = W_POOL = H_CONV // POOL     # 50
P = H_POOL * W_POOL                  # 2500 pooled spatial positions (lane axis)
F = POOL * POOL * C_IN * K * K       # 48 patch features per pooled position
C4 = POOL * POOL * C_OUT             # 256 = 4 pool-window positions x 64 chans
N_CLASSES = 2


def catdog_kernel(patch_ref, wconv_ref, bconv_ref, wlin_ref, blin_ref, out_ref):
    # patch_ref: (1, 48, 2500) bf16   wconv_ref: (256, 48) bf16
    # bconv_ref: (256, 1) f32         wlin_ref : (128, 2500) f32
    # blin_ref : (1, 2) f32           out_ref  : (1, 1, 2) f32
    a = patch_ref[0]                                     # (48, P) bf16

    # conv1 as one MXU matmul against a block-diagonal (256, 48) weight.
    conv = jnp.dot(wconv_ref[...], a,
                   preferred_element_type=jnp.float32)   # (256, P) f32
    conv = jnp.maximum(conv + bconv_ref[...], 0.0)       # bias + ReLU

    # MaxPool2d(2,2): the 4 pool-window elements are 4 sublane groups of 64.
    pooled = jnp.maximum(
        jnp.maximum(conv[0 * C_OUT:1 * C_OUT, :], conv[1 * C_OUT:2 * C_OUT, :]),
        jnp.maximum(conv[2 * C_OUT:3 * C_OUT, :], conv[3 * C_OUT:4 * C_OUT, :]),
    )                                                    # (64, P) f32
    # (second ReLU is a no-op on max of ReLU'd values -> dropped)

    # Linear(64*50*50 -> 2): class dim folded into wlin sublanes (rows n*64+c).
    s0 = jnp.sum(pooled * wlin_ref[0 * C_OUT:1 * C_OUT, :],
                 axis=1, keepdims=True)                  # (64, 1)
    s1 = jnp.sum(pooled * wlin_ref[1 * C_OUT:2 * C_OUT, :],
                 axis=1, keepdims=True)                  # (64, 1)
    logits = jnp.sum(jnp.concatenate([s0, s1], axis=1),
                     axis=0, keepdims=True)              # (1, 2)
    out_ref[0] = logits + blin_ref[...]


def catdog_forward(x, params):
    """x: (B, 3, 200, 200) float32 NCHW.  Returns (B, 2) logits."""
    w_conv, b_conv, w_lin, b_lin = params
    B = x.shape[0]

    # --- glue: space-to-depth patch extraction, lane-dense, in bf16 ---------
    # patches[b, (i*2+j)*12 + (c*4 + kh*2 + kw), ph*50 + pw]
    xb = x.astype(jnp.bfloat16)
    p = xb.reshape(B, C_IN, H_POOL, POOL, K, W_POOL, POOL, K)
    # (b, c, ph, i, kh, pw, j, kw) -> (b, i, j, c, kh, kw, ph, pw)
    p = p.transpose(0, 3, 6, 1, 4, 7, 2, 5).reshape(B, F, P)

    # conv weight (64,3,2,2) -> (64,12); block-diagonal (256, 48) so the 4
    # pool-window positions land in 4 sublane groups of 64 output channels.
    w12 = w_conv.reshape(C_OUT, C_IN * K * K)                      # (64, 12)
    w48 = jnp.kron(jnp.eye(POOL * POOL, dtype=w12.dtype), w12)     # (256, 48)
    w48 = w48.astype(jnp.bfloat16)
    b256 = jnp.tile(b_conv, POOL * POOL).reshape(C4, 1)            # (256, 1)

    # Linear weight (2, 64*50*50) in PyTorch C,H,W flatten order is already
    # [n, c*2500 + (h*50+w)]; a plain reshape folds the class dim into
    # sublanes: row index n*64 + c, lane index h*50 + w.
    wlin_k = w_lin.reshape(N_CLASSES * C_OUT, P)                   # (128, 2500)
    blin_k = b_lin.reshape(1, N_CLASSES)

    out = pl.pallas_call(
        catdog_kernel,
        out_shape=jax.ShapeDtypeStruct((B, 1, N_CLASSES), jnp.float32),
        grid_spec=pltpu.PrefetchScalarGridSpec(
            num_scalar_prefetch=0,
            grid=(B,),
            in_specs=[
                pl.BlockSpec((1, F, P), lambda b: (b, 0, 0)),          # patches
                pl.BlockSpec((C4, F), lambda b: (0, 0)),               # w48
                pl.BlockSpec((C4, 1), lambda b: (0, 0)),               # b256
                pl.BlockSpec((N_CLASSES * C_OUT, P), lambda b: (0, 0)),  # wlin
                pl.BlockSpec((1, N_CLASSES), lambda b: (0, 0)),          # blin
            ],
            out_specs=pl.BlockSpec((1, 1, N_CLASSES), lambda b: (b, 0, 0)),
        ),
        compiler_params=pltpu.CompilerParams(
            dimension_semantics=("parallel",)),     # shard B across v7x cores
    )(p, w48, b256, wlin_k, blin_k)
    return out[:, 0, :]


def reference_forward(x, params):
    """Pure-JAX reference mirroring the PyTorch module exactly (f32)."""
    w_conv, b_conv, w_lin, b_lin = params
    conv = jax.lax.conv_general_dilated(
        x, w_conv, window_strides=(K, K), padding="VALID",
        dimension_numbers=("NCHW", "OIHW", "NCHW"))
    conv = conv + b_conv[None, :, None, None]
    conv = jnp.maximum(conv, 0.0)
    pool = jax.lax.reduce_window(conv, -jnp.inf, jax.lax.max,
                                 (1, 1, POOL, POOL), (1, 1, POOL, POOL), "VALID")
    pool = jnp.maximum(pool, 0.0)
    flat = pool.reshape(x.shape[0], -1)          # PyTorch C,H,W flatten order
    return flat @ w_lin.T + b_lin


if __name__ == "__main__":
    key = jax.random.PRNGKey(0)
    kx, kw1, kb1, kw2, kb2 = jax.random.split(key, 5)

    B = 2
    x = jax.random.normal(kx, (B, C_IN, H_IN, W_IN), jnp.float32)
    w_conv = 0.1 * jax.random.normal(kw1, (C_OUT, C_IN, K, K), jnp.float32)
    b_conv = 0.1 * jax.random.normal(kb1, (C_OUT,), jnp.float32)
    w_lin = 0.01 * jax.random.normal(kw2, (N_CLASSES, C_OUT * P), jnp.float32)
    b_lin = 0.01 * jax.random.normal(kb2, (N_CLASSES,), jnp.float32)
    params = (w_conv, b_conv, w_lin, b_lin)

    out = jax.jit(catdog_forward)(x, params)
    out = jax.block_until_ready(out)
    assert out.shape == (B, N_CLASSES)

    ref = jax.block_until_ready(reference_forward(x, params))
    # Tolerance accounts for bf16 quantization of the conv inputs/weights
    # (f32 accumulation); logits are O(1).
    if not jnp.allclose(out, ref, rtol=1e-2, atol=2e-2):
        raise AssertionError(f"kernel mismatch: {out} vs {ref}")

    print("KERNEL_OK")
</pallas_src>

<mosaic_0001>
module attributes {stable_mosaic.version = 11 : i64} {
  func.func @catdog_kernel(%arg0: i32, %arg1: memref<1x48x2500xbf16, #tpu.memory_space<vmem>>, %arg2: memref<256x48xbf16, #tpu.memory_space<vmem>>, %arg3: memref<256x1xf32, #tpu.memory_space<vmem>>, %arg4: memref<128x2500xf32, #tpu.memory_space<vmem>>, %arg5: memref<1x2xf32, #tpu.memory_space<vmem>>, %arg6: memref<1x1x2xf32, #tpu.memory_space<vmem>>) attributes {dimension_semantics = [#tpu.dimension_semantics<parallel>], iteration_bounds = array<i64: 2>, scalar_prefetch = 0 : i64, scratch_operands = 0 : i64, tpu.core_type = #tpu.core_type<tc>, window_params = [{transform_indices = @transform_0, window_bounds = array<i64: 1, 48, 2500>}, {pipeline_mode = #tpu.pipeline_mode<synchronous>, transform_indices = @transform_1, window_bounds = array<i64: 256, 48>}, {pipeline_mode = #tpu.pipeline_mode<synchronous>, transform_indices = @transform_2, window_bounds = array<i64: 256, 1>}, {pipeline_mode = #tpu.pipeline_mode<synchronous>, transform_indices = @transform_3, window_bounds = array<i64: 128, 2500>}, {pipeline_mode = #tpu.pipeline_mode<synchronous>, transform_indices = @transform_4, window_bounds = array<i64: 1, 2>}, {transform_indices = @transform_5, window_bounds = array<i64: 1, 1, 2>}]} {
    %c0 = arith.constant 0 : index
    %c0_0 = arith.constant 0 : index
    %c0_1 = arith.constant 0 : index
    %0 = vector.load %arg1[%c0, %c0_0, %c0_1] : memref<1x48x2500xbf16, #tpu.memory_space<vmem>>, vector<1x48x2500xbf16>
    %1 = vector.shape_cast %0 : vector<1x48x2500xbf16> to vector<48x2500xbf16>
    %c0_2 = arith.constant 0 : index
    %c0_3 = arith.constant 0 : index
    %2 = vector.load %arg2[%c0_2, %c0_3] : memref<256x48xbf16, #tpu.memory_space<vmem>>, vector<256x48xbf16>
    %cst = arith.constant dense<0.000000e+00> : vector<256x2500xf32>
    %3 = tpu.matmul %2, %1, %cst {dimension_numbers = #tpu.dot_dimension_numbers<[1], [0], [0], [1], [0, 0, 1, 1], [], []>} : vector<256x48xbf16>, vector<48x2500xbf16>, vector<256x2500xf32> -> vector<256x2500xf32>
    %c0_4 = arith.constant 0 : index
    %c0_5 = arith.constant 0 : index
    %4 = vector.load %arg3[%c0_4, %c0_5] : memref<256x1xf32, #tpu.memory_space<vmem>>, vector<256x1xf32>
    %5 = vector.broadcast %4 : vector<256x1xf32> to vector<256x2500xf32>
    %6 = arith.addf %3, %5 : vector<256x2500xf32>
    %cst_6 = arith.constant 0.000000e+00 : f32
    %7 = vector.broadcast %cst_6 : f32 to vector<256x2500xf32>
    %8 = arith.maximumf %6, %7 : vector<256x2500xf32>
    %9 = vector.extract_strided_slice %8 {offsets = [0, 0], sizes = [64, 2500], strides = [1, 1]} : vector<256x2500xf32> to vector<64x2500xf32>
    %10 = vector.extract_strided_slice %8 {offsets = [64, 0], sizes = [64, 2500], strides = [1, 1]} : vector<256x2500xf32> to vector<64x2500xf32>
    %11 = arith.maximumf %9, %10 : vector<64x2500xf32>
    %12 = vector.extract_strided_slice %8 {offsets = [128, 0], sizes = [64, 2500], strides = [1, 1]} : vector<256x2500xf32> to vector<64x2500xf32>
    %13 = vector.extract_strided_slice %8 {offsets = [192, 0], sizes = [64, 2500], strides = [1, 1]} : vector<256x2500xf32> to vector<64x2500xf32>
    %14 = arith.maximumf %12, %13 : vector<64x2500xf32>
    %15 = arith.maximumf %11, %14 : vector<64x2500xf32>
    %c0_7 = arith.constant 0 : index
    %c0_8 = arith.constant 0 : index
    %16 = vector.load %arg4[%c0_7, %c0_8] : memref<128x2500xf32, #tpu.memory_space<vmem>>, vector<64x2500xf32>
    %17 = arith.mulf %15, %16 : vector<64x2500xf32>
    %cst_9 = arith.constant dense<0.000000e+00> : vector<64xf32>
    %18 = vector.multi_reduction <add>, %17, %cst_9 [1] : vector<64x2500xf32> to vector<64xf32>
    %19 = vector.shape_cast %18 : vector<64xf32> to vector<64x1xf32>
    %c64 = arith.constant 64 : index
    %c0_10 = arith.constant 0 : index
    %20 = vector.load %arg4[%c64, %c0_10] : memref<128x2500xf32, #tpu.memory_space<vmem>>, vector<64x2500xf32>
    %21 = arith.mulf %15, %20 : vector<64x2500xf32>
    %cst_11 = arith.constant dense<0.000000e+00> : vector<64xf32>
    %22 = vector.multi_reduction <add>, %21, %cst_11 [1] : vector<64x2500xf32> to vector<64xf32>
    %23 = vector.shape_cast %22 : vector<64xf32> to vector<64x1xf32>
    %24 = tpu.concatenate %19, %23 in 1 : vector<64x1xf32>, vector<64x1xf32> -> vector<64x2xf32>
    %cst_12 = arith.constant dense<0.000000e+00> : vector<2xf32>
    %25 = vector.multi_reduction <add>, %24, %cst_12 [0] : vector<64x2xf32> to vector<2xf32>
    %26 = vector.shape_cast %25 : vector<2xf32> to vector<1x2xf32>
    %c0_13 = arith.constant 0 : index
    %c0_14 = arith.constant 0 : index
    %27 = vector.load %arg5[%c0_13, %c0_14] : memref<1x2xf32, #tpu.memory_space<vmem>>, vector<1x2xf32>
    %28 = arith.addf %26, %27 : vector<1x2xf32>
    %c0_15 = arith.constant 0 : index
    %c0_16 = arith.constant 0 : index
    %c0_17 = arith.constant 0 : index
    %29 = vector.load %arg6[%c0_15, %c0_16, %c0_17] : memref<1x1x2xf32, #tpu.memory_space<vmem>>, vector<1x1x2xf32>
    %30 = vector.shape_cast %29 : vector<1x1x2xf32> to vector<1x2xf32>
    %31 = vector.shape_cast %28 : vector<1x2xf32> to vector<1x1x2xf32>
    tpu.vector_store %arg6[%c0_15, %c0_16, %c0_17], %31 {strides = array<i32>} : memref<1x1x2xf32, #tpu.memory_space<vmem>>, vector<1x1x2xf32>,
    return
  }
  func.func @transform_0(%arg0: i32) -> (i32, i32, i32) {
    %c0_i32 = arith.constant 0 : i32
    %c0_i32_0 = arith.constant 0 : i32
    %c0_i32_1 = arith.constant 0 : i32
    return %arg0, %c0_i32, %c0_i32_0 : i32, i32, i32
  }
  func.func @transform_1(%arg0: i32) -> (i32, i32) {
    %c0_i32 = arith.constant 0 : i32
    %c0_i32_0 = arith.constant 0 : i32
    %c0_i32_1 = arith.constant 0 : i32
    return %c0_i32, %c0_i32_0 : i32, i32
  }
  func.func @transform_2(%arg0: i32) -> (i32, i32) {
    %c0_i32 = arith.constant 0 : i32
    %c0_i32_0 = arith.constant 0 : i32
    %c0_i32_1 = arith.constant 0 : i32
    return %c0_i32, %c0_i32_0 : i32, i32
  }
  func.func @transform_3(%arg0: i32) -> (i32, i32) {
    %c0_i32 = arith.constant 0 : i32
    %c0_i32_0 = arith.constant 0 : i32
    %c0_i32_1 = arith.constant 0 : i32
    return %c0_i32, %c0_i32_0 : i32, i32
  }
  func.func @transform_4(%arg0: i32) -> (i32, i32) {
    %c0_i32 = arith.constant 0 : i32
    %c0_i32_0 = arith.constant 0 : i32
    %c0_i32_1 = arith.constant 0 : i32
    return %c0_i32, %c0_i32_0 : i32, i32
  }
  func.func @transform_5(%arg0: i32) -> (i32, i32, i32) {
    %c0_i32 = arith.constant 0 : i32
    %c0_i32_0 = arith.constant 0 : i32
    %c0_i32_1 = arith.constant 0 : i32
    return %arg0, %c0_i32, %c0_i32_0 : i32, i32, i32
  }
}

</mosaic_0001>

<bundles_post_ra>
// kernel: mul.4
= control target key start
LH: loop header
LB: loop body
LE: loop exit
PB: predicated region body
PF: predicated region fallthrough
CT: control target
= control target key end

     0   :  { %vm31_vm0 = vcmask 523264   ;;  %s118_s0 = inlined_call_operand.vmem [shape: f32[64,3,2,2], index: 0, kind: input, shape index: {}]   ;;  %s119_s1 = inlined_call_operand.vmem [shape: f32[64,12], index: 1, kind: output, shape index: {}]  }
   0x1   :  { %v62_v0 = vld [vmem:[%s118_s0 + $0xa] sm:$0x3]  ;;  %v63_v1 = vld [vmem:[%s118_s0 + $0x8] sm:$0x3]  ;;  %v64_v2 = vld [vmem:[%s118_s0 + $0x6] sm:$0x3] }
   0x2   :  { %8 = vst [vmem:[#allocation0 + $0x28] sm:$0x3] %v62_v0  ;;  %13 = vst [vmem:[#allocation0 + $0x20] sm:$0x3] %v63_v1  ;;  %v65_v3 = vld [vmem:[%s118_s0 + $0x4] sm:$0x3] }
   0x3   :  { %18 = vst [vmem:[#allocation0 + $0x18] sm:$0x3] %v64_v2  ;;  %v66_v4 = vld [vmem:[%s118_s0 + $0x2] sm:$0x3]  ;;  %v28_v5 = vld [vmem:[%s118_s0] sm:$0x3] }
   0x4   :  { %23 = vst [vmem:[#allocation0 + $0x10] sm:$0x3] %v65_v3  ;;  %27 = vst [vmem:[#allocation0 + $0x8] sm:$0x3] %v66_v4 }
   0x5   :  { %29 = vst [vmem:[#allocation0] sm:$0x3] %v28_v5 }
   0x9   :  { %v49_v7 = vld [vmem:[#allocation0 + $0x20] sm:$0x3]   ;;  %v54_v8 = vld [vmem:[#allocation0 + $0x28] sm:$0x3]  }
   0xa   :  { %v44_v6 = vld [vmem:[#allocation0 + $0x18] sm:$0x3]   ;;  %70 = vst.msk [vmem:[%s119_s1 + $0x8] sm:$0x3] %vm31_vm0, %v49_v7   ;;  %71 = vst.msk [vmem:[%s119_s1 + $0xa] sm:$0x3] %vm31_vm0, %v54_v8  }
   0xb   :  { %v34_v10 = vld [vmem:[#allocation0 + $0x8] sm:$0x3]   ;;  %v39_v11 = vld [vmem:[#allocation0 + $0x10] sm:$0x3]   ;;  %69 = vst.msk [vmem:[%s119_s1 + $0x6] sm:$0x3] %vm31_vm0, %v44_v6  }
   0xc   :  { %v30_v9 = vld [vmem:[#allocation0] sm:$0x3]   ;;  %67 = vst.msk [vmem:[%s119_s1 + $0x2] sm:$0x3] %vm31_vm0, %v34_v10   ;;  %68 = vst.msk [vmem:[%s119_s1 + $0x4] sm:$0x3] %vm31_vm0, %v39_v11  }
   0xd   :  { %32 = vst.msk [vmem:[%s119_s1] sm:$0x3] %vm31_vm0, %v30_v9  }

// kernel: tile.8
= control target key start
LH: loop header
LB: loop body
LE: loop exit
PB: predicated region body
PF: predicated region fallthrough
CT: control target
= control target key end

     0   :  { %s22_s0 = inlined_call_operand.vmem [shape: f32[64], index: 0, kind: input, shape index: {}]   ;;  %s23_s1 = inlined_call_operand.vmem [shape: f32[4,64], index: 1, kind: output, shape index: {}]  }
   0x1   :  { %v4_v0 = vld [vmem:[%s22_s0] ss:$0 sm:$0xff] }
   0x2   :  { %5 = vst [vmem:[%s23_s1] sm:$0xf] %v4_v0 }

// kernel: tile.0
= control target key start
LH: loop header
LB: loop body
LE: loop exit
PB: predicated region body
PF: predicated region fallthrough
CT: control target
= control target key end

     0   :  { %s1090_s8 = smov 125   ;;  %s1091_s9 = smov 126   ;;  %vm7_vm0 = vcmask 7168   ;;  %s2189_s0 = inlined_call_operand.vmem [shape: f32[4,64], index: 0, kind: input, shape index: {}]   ;;  %s2190_s1 = inlined_call_operand.vmem [shape: f32[256,1], index: 1, kind: output, shape index: {}]  }
   0x1   :  { %v4_v0 = vld [vmem:[%s2189_s0] sm:$0xf]  ;;  %s1089_s0 = smov 127   ;;  %s1092_s10 = smov 124  }
   0x2   :  { %5 = vst [vmem:[#allocation0] sm:$0xf] %v4_v0  ;;  %s1093_s11 = smov 123   ;;  %s1094_s12 = smov 122  }
   0x3   :  { %s1095_s13 = smov 121   ;;  %s1096_s14 = smov 120  }
   0x4   :  { %s1097_s15 = smov 119   ;;  %s1098_s16 = smov 118  }
   0x5   :  { %s1099_s17 = smov 117   ;;  %s1100_s18 = smov 116  }
   0x6   :  { %s1101_s19 = smov 115   ;;  %s1102_s20 = smov 114  }
   0x7   :  { %s1103_s21 = smov 113   ;;  %s1104_s22 = smov 112  }
   0x8   :  { %s1105_s23 = smov 111   ;;  %s1106_s24 = smov 110  }
   0x9   :  { %v15_v1 = vld [vmem:[#allocation0] sm:$0xf]   ;;  %s1107_s25 = smov 109   ;;  %s1108_s26 = smov 108  }
   0xa   :  { %v39_v2 = vld [vmem:[#allocation0] sm:$0xf]   ;;  %16 = vrot.lane.b32.xlu0 %v15_v1, %s1089_s0  ;;  %s1109_s27 = smov 107   ;;  %s1110_s28 = smov 106  }
   0xb   :  { %40 = vrot.lane.b32.xlu1 %v39_v2, %s1090_s8  ;;  %v27_v3 = vld [vmem:[#allocation0] sm:$0xf]   ;;  %s1111_s29 = smov 105   ;;  %s1112_s30 = smov 104  }
   0xc   :  { %v51_v4 = vld [vmem:[#allocation0] sm:$0xf]   ;;  %s1113_s2 = smov 103   ;;  %s1114_s3 = smov 102  }
   0xd   :  { %v63_v5 = vld [vmem:[#allocation0] sm:$0xf]   ;;  %s1115_s4 = smov 101   ;;  %s1116_s5 = smov 100  }
   0xe   :  { %28 = vrot.lane.b32.xlu0 %v27_v3, %s1091_s9  ;;  %v75_v6 = vld [vmem:[#allocation0] sm:$0xf]   ;;  %s1117_s6 = smov 99   ;;  %s1118_s7 = smov 98  }
   0xf   :  { %52 = vrot.lane.b32.xlu1 %v51_v4, %s1092_s10  ;;  %v87_v7 = vld [vmem:[#allocation0] sm:$0xf]   ;;  %s1119_s0 = smov 97   ;;  %s1120_s8 = smov 96  }
  0x10   :  { %v99_v8 = vld [vmem:[#allocation0] sm:$0xf]   ;;  %s1121_s9 = smov 95   ;;  %s1122_s10 = smov 94  }
  0x11   :  { %v111_v9 = vld [vmem:[#allocation0] sm:$0xf]  }
  0x12   :  { %64 = vrot.lane.b32.xlu0 %v63_v5, %s1093_s11  ;;  %v123_v10 = vld [vmem:[#allocation0] sm:$0xf]   ;;  %s1123_s11 = smov 93  }
  0x13   :  { %76 = vrot.lane.b32.xlu1 %v75_v6, %s1094_s12  ;;  %v135_v11 = vld [vmem:[#allocation0] sm:$0xf]   ;;  %s1124_s12 = smov 92  }
  0x14   :  { %v147_v12 = vld [vmem:[#allocation0] sm:$0xf]  }
  0x15   :  { %v159_v13 = vld [vmem:[#allocation0] sm:$0xf]  }
  0x16   :  { %88 = vrot.lane.b32.xlu0 %v87_v7, %s1095_s13  ;;  %v171_v14 = vld [vmem:[#allocation0] sm:$0xf]   ;;  %s1125_s13 = smov 91  }
  0x17   :  { %100 = vrot.lane.b32.xlu1 %v99_v8, %s1096_s14  ;;  %v183_v15 = vld [vmem:[#allocation0] sm:$0xf]   ;;  %s1126_s14 = smov 90  }
  0x18   :  { %v195_v16 = vld [vmem:[#allocation0] sm:$0xf]  }
  0x19   :  { %v207_v17 = vld [vmem:[#allocation0] sm:$0xf]  }
  0x1a   :  { %112 = vrot.lane.b32.xlu0 %v111_v9, %s1097_s15  ;;  %v219_v18 = vld [vmem:[#allocation0] sm:$0xf]   ;;  %s1127_s15 = smov 89  }
  0x1b   :  { %124 = vrot.lane.b32.xlu1 %v123_v10, %s1098_s16  ;;  %v231_v19 = vld [vmem:[#allocation0] sm:$0xf]   ;;  %s1128_s16 = smov 88  }
  0x1c   :  { %v243_v20 = vld [vmem:[#allocation0] sm:$0xf]  }
  0x1d   :  { %v255_v21 = vld [vmem:[#allocation0] sm:$0xf]  }
  0x1e   :  { %136 = vrot.lane.b32.xlu0 %v135_v11, %s1099_s17  ;;  %v267_v22 = vld [vmem:[#allocation0] sm:$0xf]   ;;  %s1129_s17 = smov 87  }
  0x1f   :  { %148 = vrot.lane.b32.xlu1 %v147_v12, %s1100_s18  ;;  %v279_v23 = vld [vmem:[#allocation0] sm:$0xf]   ;;  %s1130_s18 = smov 86  }
  0x20   :  { %v291_v24 = vld [vmem:[#allocation0] sm:$0xf]  }
  0x21   :  { %v303_v25 = vld [vmem:[#allocation0] sm:$0xf]  }
  0x22   :  { %160 = vrot.lane.b32.xlu0 %v159_v13, %s1101_s19  ;;  %v315_v26 = vld [vmem:[#allocation0] sm:$0xf]   ;;  %s1131_s19 = smov 85  }
  0x23   :  { %172 = vrot.lane.b32.xlu1 %v171_v14, %s1102_s20  ;;  %v327_v27 = vld [vmem:[#allocation0] sm:$0xf]   ;;  %s1132_s20 = smov 84  }
  0x24   :  { %v339_v28 = vld [vmem:[#allocation0] sm:$0xf]  }
  0x25   :  { %v351_v29 = vld [vmem:[#allocation0] sm:$0xf]  }
  0x26   :  { %184 = vrot.lane.b32.xlu0 %v183_v15, %s1103_s21  ;;  %v363_v30 = vld [vmem:[#allocation0] sm:$0xf]   ;;  %s1133_s21 = smov 83  }
  0x27   :  { %196 = vrot.lane.b32.xlu1 %v195_v16, %s1104_s22  ;;  %v375_v31 = vld [vmem:[#allocation0] sm:$0xf]   ;;  %s1134_s22 = smov 82  }
  0x28   :  { %v387_v32 = vld [vmem:[#allocation0] sm:$0xf]  }
  0x29   :  { %v399_v33 = vld [vmem:[#allocation0] sm:$0xf]  }
  0x2a   :  { %208 = vrot.lane.b32.xlu0 %v207_v17, %s1105_s23  ;;  %v411_v34 = vld [vmem:[#allocation0] sm:$0xf]   ;;  %s1135_s23 = smov 81  }
  0x2b   :  { %220 = vrot.lane.b32.xlu1 %v219_v18, %s1106_s24  ;;  %v423_v35 = vld [vmem:[#allocation0] sm:$0xf]   ;;  %s1136_s24 = smov 80  }
  0x2c   :  { %v435_v36 = vld [vmem:[#allocation0] sm:$0xf]  }
  0x2d   :  { %v447_v37 = vld [vmem:[#allocation0] sm:$0xf]  }
  0x2e   :  { %232 = vrot.lane.b32.xlu0 %v231_v19, %s1107_s25  ;;  %v459_v38 = vld [vmem:[#allocation0] sm:$0xf]   ;;  %s1137_s25 = smov 79  }
  0x2f   :  { %244 = vrot.lane.b32.xlu1 %v243_v20, %s1108_s26  ;;  %v471_v39 = vld [vmem:[#allocation0] sm:$0xf]   ;;  %s1138_s26 = smov 78  }
  0x30   :  { %v483_v40 = vld [vmem:[#allocation0] sm:$0xf]  }
  0x31   :  { %v495_v41 = vld [vmem:[#allocation0] sm:$0xf]  }
  0x32   :  { %256 = vrot.lane.b32.xlu0 %v255_v21, %s1109_s27  ;;  %v507_v42 = vld [vmem:[#allocation0] sm:$0xf]   ;;  %s1139_s27 = smov 77  }
  0x33   :  { %268 = vrot.lane.b32.xlu1 %v267_v22, %s1110_s28  ;;  %v519_v43 = vld [vmem:[#allocation0] sm:$0xf]   ;;  %s1140_s28 = smov 76  }
  0x34   :  { %v531_v44 = vld [vmem:[#allocation0] sm:$0xf]  }
  0x35   :  { %v543_v45 = vld [vmem:[#allocation0] sm:$0xf]  }
  0x36   :  { %280 = vrot.lane.b32.xlu0 %v279_v23, %s1111_s29  ;;  %v555_v46 = vld [vmem:[#allocation0] sm:$0xf]   ;;  %s1141_s29 = smov 75  }
  0x37   :  { %292 = vrot.lane.b32.xlu1 %v291_v24, %s1112_s30  ;;  %v567_v47 = vld [vmem:[#allocation0] sm:$0xf]   ;;  %s1142_s30 = smov 74  }
  0x38   :  { %v579_v48 = vld [vmem:[#allocation0] sm:$0xf]  }
  0x39   :  { %v591_v49 = vld [vmem:[#allocation0] sm:$0xf]  }
  0x3a   :  { %304 = vrot.lane.b32.xlu0 %v303_v25, %s1113_s2  ;;  %v603_v50 = vld [vmem:[#allocation0] sm:$0xf]   ;;  %s1143_s2 = smov 73  }
  0x3b   :  { %316 = vrot.lane.b32.xlu1 %v315_v26, %s1114_s3  ;;  %v615_v51 = vld [vmem:[#allocation0] sm:$0xf]   ;;  %s1144_s3 = smov 72  }
  0x3c   :  { %v627_v52 = vld [vmem:[#allocation0] sm:$0xf]  }
  0x3d   :  { %v639_v53 = vld [vmem:[#allocation0] sm:$0xf]  }
  0x3e   :  { %328 = vrot.lane.b32.xlu0 %v327_v27, %s1115_s4  ;;  %v651_v54 = vld [vmem:[#allocation0] sm:$0xf]  }
  0x3f   :  { %340 = vrot.lane.b32.xlu1 %v339_v28, %s1116_s5  ;;  %v663_v55 = vld [vmem:[#allocation0] sm:$0xf]  }
  0x40   :  { %v675_v56 = vld [vmem:[#allocation0] sm:$0xf]  }
  0x41   :  { %v687_v57 = vld [vmem:[#allocation0] sm:$0xf]  }
  0x42   :  { %352 = vrot.lane.b32.xlu0 %v351_v29, %s1117_s6  ;;  %v699_v58 = vld [vmem:[#allocation0] sm:$0xf]   ;;  %s1151_s6 = smov 65  }
  0x43   :  { %364 = vrot.lane.b32.xlu1 %v363_v30, %s1118_s7  ;;  %v6_v59 = vld [vmem:[#allocation0] sm:$0xf]  }
  0x44   :  { %8 = vst.msk [vmem:[%s2190_s1] sm:$0x1] %vm7_vm0, %v6_v59   ;;  %771 = vst.msk [vmem:[%s2190_s1 + $0x3f] sm:$0x2] %vm7_vm0, %v6_v59   ;;  %v711_v60 = vld [vmem:[#allocation0] sm:$0xf]  }
  0x45   :  { %772 = vst.msk [vmem:[%s2190_s1 + $0x7e] sm:$0x4] %vm7_vm0, %v6_v59   ;;  %773 = vst.msk [vmem:[%s2190_s1 + $0xbd] sm:$0x8] %vm7_vm0, %v6_v59   ;;  %v723_v61 = vld [vmem:[#allocation0] sm:$0xf]  }
  0x46   :  { %376 = vrot.lane.b32.xlu0 %v375_v31, %s1119_s0  ;;  %v735_v0 = vld [vmem:[#allocation0] sm:$0xf]  }
  0x47   :  { %388 = vrot.lane.b32.xlu1 %v387_v32, %s1120_s8  ;;  %v747_v1 = vld [vmem:[#allocation0] sm:$0xf]  }
  0x48   :  { %v759_v4 = vld [vmem:[#allocation0] sm:$0xf]  }
  0x4a   :  { %400 = vrot.lane.b32.xlu0 %v399_v33, %s1121_s9 }
  0x4b   :  { %412 = vrot.lane.b32.xlu1 %v411_v34, %s1122_s10 }
  0x4e   :  { %424 = vrot.lane.b32.xlu0 %v423_v35, %s1123_s11  ;;  %s1145_s11 = smov 71  }
  0x4f   :  { %436 = vrot.lane.b32.xlu1 %v435_v36, %s1124_s12  ;;  %s1146_s12 = smov 70  }
  0x52   :  { %448 = vrot.lane.b32.xlu0 %v447_v37, %s1125_s13 }
  0x53   :  { %460 = vrot.lane.b32.xlu1 %v459_v38, %s1126_s14 }
  0x56   :  { %472 = vrot.lane.b32.xlu0 %v471_v39, %s1127_s15 }
  0x57   :  { %484 = vrot.lane.b32.xlu1 %v483_v40, %s1128_s16 }
  0x5a   :  { %496 = vrot.lane.b32.xlu0 %v495_v41, %s1129_s17  ;;  %s1149_s17 = smov 67  }
  0x5b   :  { %508 = vrot.lane.b32.xlu1 %v507_v42, %s1130_s18  ;;  %s1150_s18 = smov 66  }
  0x5e   :  { %520 = vrot.lane.b32.xlu0 %v519_v43, %s1131_s19 }
  0x5f   :  { %532 = vrot.lane.b32.xlu1 %v531_v44, %s1132_s20 }
  0x62   :  { %544 = vrot.lane.b32.xlu0 %v543_v45, %s1133_s21 }
  0x63   :  { %556 = vrot.lane.b32.xlu1 %v555_v46, %s1134_s22 }
  0x66   :  { %568 = vrot.lane.b32.xlu0 %v567_v47, %s1135_s23 }
  0x67   :  { %580 = vrot.lane.b32.xlu1 %v579_v48, %s1136_s24 }
  0x6a   :  { %592 = vrot.lane.b32.xlu0 %v591_v49, %s1137_s25 }
  0x6b   :  { %604 = vrot.lane.b32.xlu1 %v603_v50, %s1138_s26 }
  0x6e   :  { %616 = vrot.lane.b32.xlu0 %v615_v51, %s1139_s27 }
  0x6f   :  { %628 = vrot.lane.b32.xlu1 %v627_v52, %s1140_s28 }
  0x72   :  { %640 = vrot.lane.b32.xlu0 %v639_v53, %s1141_s29  ;;  %s1147_s29 = smov 69  }
  0x73   :  { %652 = vrot.lane.b32.xlu1 %v651_v54, %s1142_s30  ;;  %s1148_s30 = smov 68  }
  0x76   :  { %664 = vrot.lane.b32.xlu0 %v663_v55, %s1143_s2 }
  0x77   :  { %676 = vrot.lane.b32.xlu1 %v675_v56, %s1144_s3 }
  0x7a   :  { %688 = vrot.lane.b32.xlu0 %v687_v57, %s1145_s11 }
  0x7b   :  { %700 = vrot.lane.b32.xlu1 %v699_v58, %s1146_s12 }
  0x7c   :  { %v17_v62 = vpop.permute.xlu0 %16  }
  0x7d   :  { %v41_v63 = vpop.permute.xlu1 %40   ;;  %774 = vst.msk [vmem:[%s2190_s1 + $0x1] sm:$0x1] %vm7_vm0, %v17_v62   ;;  %775 = vst.msk [vmem:[%s2190_s1 + $0x40] sm:$0x2] %vm7_vm0, %v17_v62  }
  0x7e   :  { %776 = vst.msk [vmem:[%s2190_s1 + $0x7f] sm:$0x4] %vm7_vm0, %v17_v62   ;;  %777 = vst.msk [vmem:[%s2190_s1 + $0xbe] sm:$0x8] %vm7_vm0, %v17_v62   ;;  %712 = vrot.lane.b32.xlu0 %v711_v60, %s1147_s29 }
  0x7f   :  { %782 = vst.msk [vmem:[%s2190_s1 + $0x3] sm:$0x1] %vm7_vm0, %v41_v63   ;;  %783 = vst.msk [vmem:[%s2190_s1 + $0x42] sm:$0x2] %vm7_vm0, %v41_v63   ;;  %724 = vrot.lane.b32.xlu1 %v723_v61, %s1148_s30 }
  0x80   :  { %784 = vst.msk [vmem:[%s2190_s1 + $0x81] sm:$0x4] %vm7_vm0, %v41_v63   ;;  %785 = vst.msk [vmem:[%s2190_s1 + $0xc0] sm:$0x8] %vm7_vm0, %v41_v63   ;;  %v29_v2 = vpop.permute.xlu0 %28  }
  0x81   :  { %v53_v3 = vpop.permute.xlu1 %52   ;;  %778 = vst.msk [vmem:[%s2190_s1 + $0x2] sm:$0x1] %vm7_vm0, %v29_v2   ;;  %779 = vst.msk [vmem:[%s2190_s1 + $0x41] sm:$0x2] %vm7_vm0, %v29_v2  }
  0x82   :  { %780 = vst.msk [vmem:[%s2190_s1 + $0x80] sm:$0x4] %vm7_vm0, %v29_v2   ;;  %781 = vst.msk [vmem:[%s2190_s1 + $0xbf] sm:$0x8] %vm7_vm0, %v29_v2   ;;  %736 = vrot.lane.b32.xlu0 %v735_v0, %s1149_s17 }
  0x83   :  { %786 = vst.msk [vmem:[%s2190_s1 + $0x4] sm:$0x1] %vm7_vm0, %v53_v3   ;;  %787 = vst.msk [vmem:[%s2190_s1 + $0x43] sm:$0x2] %vm7_vm0, %v53_v3   ;;  %748 = vrot.lane.b32.xlu1 %v747_v1, %s1150_s18 }
  0x84   :  { %788 = vst.msk [vmem:[%s2190_s1 + $0x82] sm:$0x4] %vm7_vm0, %v53_v3   ;;  %789 = vst.msk [vmem:[%s2190_s1 + $0xc1] sm:$0x8] %vm7_vm0, %v53_v3   ;;  %v65_v5 = vpop.permute.xlu0 %64  }
  0x85   :  { %v77_v6 = vpop.permute.xlu1 %76   ;;  %790 = vst.msk [vmem:[%s2190_s1 + $0x5] sm:$0x1] %vm7_vm0, %v65_v5   ;;  %791 = vst.msk [vmem:[%s2190_s1 + $0x44] sm:$0x2] %vm7_vm0, %v65_v5  }
  0x86   :  { %792 = vst.msk [vmem:[%s2190_s1 + $0x83] sm:$0x4] %vm7_vm0, %v65_v5   ;;  %793 = vst.msk [vmem:[%s2190_s1 + $0xc2] sm:$0x8] %vm7_vm0, %v65_v5   ;;  %760 = vrot.lane.b32.xlu0 %v759_v4, %s1151_s6 }
  0x87   :  { %794 = vst.msk [vmem:[%s2190_s1 + $0x6] sm:$0x1] %vm7_vm0, %v77_v6   ;;  %795 = vst.msk [vmem:[%s2190_s1 + $0x45] sm:$0x2] %vm7_vm0, %v77_v6  }
  0x88   :  { %796 = vst.msk [vmem:[%s2190_s1 + $0x84] sm:$0x4] %vm7_vm0, %v77_v6   ;;  %797 = vst.msk [vmem:[%s2190_s1 + $0xc3] sm:$0x8] %vm7_vm0, %v77_v6   ;;  %v89_v7 = vpop.permute.xlu0 %88  }
  0x89   :  { %v101_v8 = vpop.permute.xlu1 %100   ;;  %798 = vst.msk [vmem:[%s2190_s1 + $0x7] sm:$0x1] %vm7_vm0, %v89_v7   ;;  %799 = vst.msk [vmem:[%s2190_s1 + $0x46] sm:$0x2] %vm7_vm0, %v89_v7  }
  0x8a   :  { %800 = vst.msk [vmem:[%s2190_s1 + $0x85] sm:$0x4] %vm7_vm0, %v89_v7   ;;  %801 = vst.msk [vmem:[%s2190_s1 + $0xc4] sm:$0x8] %vm7_vm0, %v89_v7  }
  0x8b   :  { %802 = vst.msk [vmem:[%s2190_s1 + $0x8] sm:$0x1] %vm7_vm0, %v101_v8   ;;  %803 = vst.msk [vmem:[%s2190_s1 + $0x47] sm:$0x2] %vm7_vm0, %v101_v8  }
  0x8c   :  { %804 = vst.msk [vmem:[%s2190_s1 + $0x86] sm:$0x4] %vm7_vm0, %v101_v8   ;;  %805 = vst.msk [vmem:[%s2190_s1 + $0xc5] sm:$0x8] %vm7_vm0, %v101_v8   ;;  %v113_v9 = vpop.permute.xlu0 %112  }
  0x8d   :  { %v125_v10 = vpop.permute.xlu1 %124   ;;  %806 = vst.msk [vmem:[%s2190_s1 + $0x9] sm:$0x1] %vm7_vm0, %v113_v9   ;;  %807 = vst.msk [vmem:[%s2190_s1 + $0x48] sm:$0x2] %vm7_vm0, %v113_v9  }
  0x8e   :  { %808 = vst.msk [vmem:[%s2190_s1 + $0x87] sm:$0x4] %vm7_vm0, %v113_v9   ;;  %809 = vst.msk [vmem:[%s2190_s1 + $0xc6] sm:$0x8] %vm7_vm0, %v113_v9  }
  0x8f   :  { %810 = vst.msk [vmem:[%s2190_s1 + $0xa] sm:$0x1] %vm7_vm0, %v125_v10   ;;  %811 = vst.msk [vmem:[%s2190_s1 + $0x49] sm:$0x2] %vm7_vm0, %v125_v10  }
  0x90   :  { %812 = vst.msk [vmem:[%s2190_s1 + $0x88] sm:$0x4] %vm7_vm0, %v125_v10   ;;  %813 = vst.msk [vmem:[%s2190_s1 + $0xc7] sm:$0x8] %vm7_vm0, %v125_v10   ;;  %v137_v11 = vpop.permute.xlu0 %136  }
  0x91   :  { %v149_v12 = vpop.permute.xlu1 %148   ;;  %814 = vst.msk [vmem:[%s2190_s1 + $0xb] sm:$0x1] %vm7_vm0, %v137_v11   ;;  %815 = vst.msk [vmem:[%s2190_s1 + $0x4a] sm:$0x2] %vm7_vm0, %v137_v11  }
  0x92   :  { %816 = vst.msk [vmem:[%s2190_s1 + $0x89] sm:$0x4] %vm7_vm0, %v137_v11   ;;  %817 = vst.msk [vmem:[%s2190_s1 + $0xc8] sm:$0x8] %vm7_vm0, %v137_v11  }
  0x93   :  { %818 = vst.msk [vmem:[%s2190_s1 + $0xc] sm:$0x1] %vm7_vm0, %v149_v12   ;;  %819 = vst.msk [vmem:[%s2190_s1 + $0x4b] sm:$0x2] %vm7_vm0, %v149_v12  }
  0x94   :  { %820 = vst.msk [vmem:[%s2190_s1 + $0x8a] sm:$0x4] %vm7_vm0, %v149_v12   ;;  %821 = vst.msk [vmem:[%s2190_s1 + $0xc9] sm:$0x8] %vm7_vm0, %v149_v12   ;;  %v161_v13 = vpop.permute.xlu0 %160  }
  0x95   :  { %v173_v14 = vpop.permute.xlu1 %172   ;;  %822 = vst.msk [vmem:[%s2190_s1 + $0xd] sm:$0x1] %vm7_vm0, %v161_v13   ;;  %823 = vst.msk [vmem:[%s2190_s1 + $0x4c] sm:$0x2] %vm7_vm0, %v161_v13  }
  0x96   :  { %824 = vst.msk [vmem:[%s2190_s1 + $0x8b] sm:$0x4] %vm7_vm0, %v161_v13   ;;  %825 = vst.msk [vmem:[%s2190_s1 + $0xca] sm:$0x8] %vm7_vm0, %v161_v13  }
  0x97   :  { %826 = vst.msk [vmem:[%s2190_s1 + $0xe] sm:$0x1] %vm7_vm0, %v173_v14   ;;  %827 = vst.msk [vmem:[%s2190_s1 + $0x4d] sm:$0x2] %vm7_vm0, %v173_v14  }
  0x98   :  { %828 = vst.msk [vmem:[%s2190_s1 + $0x8c] sm:$0x4] %vm7_vm0, %v173_v14   ;;  %829 = vst.msk [vmem:[%s2190_s1 + $0xcb] sm:$0x8] %vm7_vm0, %v173_v14   ;;  %v185_v15 = vpop.permute.xlu0 %184  }
  0x99   :  { %v197_v16 = vpop.permute.xlu1 %196   ;;  %830 = vst.msk [vmem:[%s2190_s1 + $0xf] sm:$0x1] %vm7_vm0, %v185_v15   ;;  %831 = vst.msk [vmem:[%s2190_s1 + $0x4e] sm:$0x2] %vm7_vm0, %v185_v15  }
  0x9a   :  { %832 = vst.msk [vmem:[%s2190_s1 + $0x8d] sm:$0x4] %vm7_vm0, %v185_v15   ;;  %833 = vst.msk [vmem:[%s2190_s1 + $0xcc] sm:$0x8] %vm7_vm0, %v185_v15  }
  0x9b   :  { %834 = vst.msk [vmem:[%s2190_s1 + $0x10] sm:$0x1] %vm7_vm0, %v197_v16   ;;  %835 = vst.msk [vmem:[%s2190_s1 + $0x4f] sm:$0x2] %vm7_vm0, %v197_v16  }
  0x9c   :  { %836 = vst.msk [vmem:[%s2190_s1 + $0x8e] sm:$0x4] %vm7_vm0, %v197_v16   ;;  %837 = vst.msk [vmem:[%s2190_s1 + $0xcd] sm:$0x8] %vm7_vm0, %v197_v16   ;;  %v209_v17 = vpop.permute.xlu0 %208  }
  0x9d   :  { %v221_v18 = vpop.permute.xlu1 %220   ;;  %838 = vst.msk [vmem:[%s2190_s1 + $0x11] sm:$0x1] %vm7_vm0, %v209_v17   ;;  %839 = vst.msk [vmem:[%s2190_s1 + $0x50] sm:$0x2] %vm7_vm0, %v209_v17  }
  0x9e   :  { %840 = vst.msk [vmem:[%s2190_s1 + $0x8f] sm:$0x4] %vm7_vm0, %v209_v17   ;;  %841 = vst.msk [vmem:[%s2190_s1 + $0xce] sm:$0x8] %vm7_vm0, %v209_v17  }
  0x9f   :  { %842 = vst.msk [vmem:[%s2190_s1 + $0x12] sm:$0x1] %vm7_vm0, %v221_v18   ;;  %843 = vst.msk [vmem:[%s2190_s1 + $0x51] sm:$0x2] %vm7_vm0, %v221_v18  }
  0xa0   :  { %844 = vst.msk [vmem:[%s2190_s1 + $0x90] sm:$0x4] %vm7_vm0, %v221_v18   ;;  %845 = vst.msk [vmem:[%s2190_s1 + $0xcf] sm:$0x8] %vm7_vm0, %v221_v18   ;;  %v233_v19 = vpop.permute.xlu0 %232  }
  0xa1   :  { %v245_v20 = vpop.permute.xlu1 %244   ;;  %846 = vst.msk [vmem:[%s2190_s1 + $0x13] sm:$0x1] %vm7_vm0, %v233_v19   ;;  %847 = vst.msk [vmem:[%s2190_s1 + $0x52] sm:$0x2] %vm7_vm0, %v233_v19  }
  0xa2   :  { %848 = vst.msk [vmem:[%s2190_s1 + $0x91] sm:$0x4] %vm7_vm0, %v233_v19   ;;  %849 = vst.msk [vmem:[%s2190_s1 + $0xd0] sm:$0x8] %vm7_vm0, %v233_v19  }
  0xa3   :  { %850 = vst.msk [vmem:[%s2190_s1 + $0x14] sm:$0x1] %vm7_vm0, %v245_v20   ;;  %851 = vst.msk [vmem:[%s2190_s1 + $0x53] sm:$0x2] %vm7_vm0, %v245_v20  }
  0xa4   :  { %852 = vst.msk [vmem:[%s2190_s1 + $0x92] sm:$0x4] %vm7_vm0, %v245_v20   ;;  %853 = vst.msk [vmem:[%s2190_s1 + $0xd1] sm:$0x8] %vm7_vm0, %v245_v20   ;;  %v257_v21 = vpop.permute.xlu0 %256  }
  0xa5   :  { %v269_v22 = vpop.permute.xlu1 %268   ;;  %854 = vst.msk [vmem:[%s2190_s1 + $0x15] sm:$0x1] %vm7_vm0, %v257_v21   ;;  %855 = vst.msk [vmem:[%s2190_s1 + $0x54] sm:$0x2] %vm7_vm0, %v257_v21  }
  0xa6   :  { %856 = vst.msk [vmem:[%s2190_s1 + $0x93] sm:$0x4] %vm7_vm0, %v257_v21   ;;  %857 = vst.msk [vmem:[%s2190_s1 + $0xd2] sm:$0x8] %vm7_vm0, %v257_v21  }
  0xa7   :  { %858 = vst.msk [vmem:[%s2190_s1 + $0x16] sm:$0x1] %vm7_vm0, %v269_v22   ;;  %859 = vst.msk [vmem:[%s2190_s1 + $0x55] sm:$0x2] %vm7_vm0, %v269_v22  }
  0xa8   :  { %860 = vst.msk [vmem:[%s2190_s1 + $0x94] sm:$0x4] %vm7_vm0, %v269_v22   ;;  %861 = vst.msk [vmem:[%s2190_s1 + $0xd3] sm:$0x8] %vm7_vm0, %v269_v22   ;;  %v281_v23 = vpop.permute.xlu0 %280  }
  0xa9   :  { %v293_v24 = vpop.permute.xlu1 %292   ;;  %862 = vst.msk [vmem:[%s2190_s1 + $0x17] sm:$0x1] %vm7_vm0, %v281_v23   ;;  %863 = vst.msk [vmem:[%s2190_s1 + $0x56] sm:$0x2] %vm7_vm0, %v281_v23  }
  0xaa   :  { %864 = vst.msk [vmem:[%s2190_s1 + $0x95] sm:$0x4] %vm7_vm0, %v281_v23   ;;  %865 = vst.msk [vmem:[%s2190_s1 + $0xd4] sm:$0x8] %vm7_vm0, %v281_v23  }
  0xab   :  { %866 = vst.msk [vmem:[%s2190_s1 + $0x18] sm:$0x1] %vm7_vm0, %v293_v24   ;;  %867 = vst.msk [vmem:[%s2190_s1 + $0x57] sm:$0x2] %vm7_vm0, %v293_v24  }
  0xac   :  { %868 = vst.msk [vmem:[%s2190_s1 + $0x96] sm:$0x4] %vm7_vm0, %v293_v24   ;;  %869 = vst.msk [vmem:[%s2190_s1 + $0xd5] sm:$0x8] %vm7_vm0, %v293_v24   ;;  %v305_v25 = vpop.permute.xlu0 %304  }
  0xad   :  { %v317_v26 = vpop.permute.xlu1 %316   ;;  %870 = vst.msk [vmem:[%s2190_s1 + $0x19] sm:$0x1] %vm7_vm0, %v305_v25   ;;  %871 = vst.msk [vmem:[%s2190_s1 + $0x58] sm:$0x2] %vm7_vm0, %v305_v25  }
  0xae   :  { %872 = vst.msk [vmem:[%s2190_s1 + $0x97] sm:$0x4] %vm7_vm0, %v305_v25   ;;  %873 = vst.msk [vmem:[%s2190_s1 + $0xd6] sm:$0x8] %vm7_vm0, %v305_v25  }
  0xaf   :  { %874 = vst.msk [vmem:[%s2190_s1 + $0x1a] sm:$0x1] %vm7_vm0, %v317_v26   ;;  %875 = vst.msk [vmem:[%s2190_s1 + $0x59] sm:$0x2] %vm7_vm0, %v317_v26  }
  0xb0   :  { %876 = vst.msk [vmem:[%s2190_s1 + $0x98] sm:$0x4] %vm7_vm0, %v317_v26   ;;  %877 = vst.msk [vmem:[%s2190_s1 + $0xd7] sm:$0x8] %vm7_vm0, %v317_v26   ;;  %v329_v27 = vpop.permute.xlu0 %328  }
  0xb1   :  { %v341_v28 = vpop.permute.xlu1 %340   ;;  %878 = vst.msk [vmem:[%s2190_s1 + $0x1b] sm:$0x1] %vm7_vm0, %v329_v27   ;;  %879 = vst.msk [vmem:[%s2190_s1 + $0x5a] sm:$0x2] %vm7_vm0, %v329_v27  }
  0xb2   :  { %880 = vst.msk [vmem:[%s2190_s1 + $0x99] sm:$0x4] %vm7_vm0, %v329_v27   ;;  %881 = vst.msk [vmem:[%s2190_s1 + $0xd8] sm:$0x8] %vm7_vm0, %v329_v27  }
  0xb3   :  { %882 = vst.msk [vmem:[%s2190_s1 + $0x1c] sm:$0x1] %vm7_vm0, %v341_v28   ;;  %883 = vst.msk [vmem:[%s2190_s1 + $0x5b] sm:$0x2] %vm7_vm0, %v341_v28  }
  0xb4   :  { %884 = vst.msk [vmem:[%s2190_s1 + $0x9a] sm:$0x4] %vm7_vm0, %v341_v28   ;;  %885 = vst.msk [vmem:[%s2190_s1 + $0xd9] sm:$0x8] %vm7_vm0, %v341_v28   ;;  %v353_v29 = vpop.permute.xlu0 %352  }
  0xb5   :  { %v365_v30 = vpop.permute.xlu1 %364   ;;  %886 = vst.msk [vmem:[%s2190_s1 + $0x1d] sm:$0x1] %vm7_vm0, %v353_v29   ;;  %887 = vst.msk [vmem:[%s2190_s1 + $0x5c] sm:$0x2] %vm7_vm0, %v353_v29  }
  0xb6   :  { %888 = vst.msk [vmem:[%s2190_s1 + $0x9b] sm:$0x4] %vm7_vm0, %v353_v29   ;;  %889 = vst.msk [vmem:[%s2190_s1 + $0xda] sm:$0x8] %vm7_vm0, %v353_v29  }
  0xb7   :  { %890 = vst.msk [vmem:[%s2190_s1 + $0x1e] sm:$0x1] %vm7_vm0, %v365_v30   ;;  %891 = vst.msk [vmem:[%s2190_s1 + $0x5d] sm:$0x2] %vm7_vm0, %v365_v30  }
  0xb8   :  { %892 = vst.msk [vmem:[%s2190_s1 + $0x9c] sm:$0x4] %vm7_vm0, %v365_v30   ;;  %893 = vst.msk [vmem:[%s2190_s1 + $0xdb] sm:$0x8] %vm7_vm0, %v365_v30   ;;  %v377_v31 = vpop.permute.xlu0 %376  }
  0xb9   :  { %v389_v32 = vpop.permute.xlu1 %388   ;;  %894 = vst.msk [vmem:[%s2190_s1 + $0x1f] sm:$0x1] %vm7_vm0, %v377_v31   ;;  %895 = vst.msk [vmem:[%s2190_s1 + $0x5e] sm:$0x2] %vm7_vm0, %v377_v31  }
  0xba   :  { %896 = vst.msk [vmem:[%s2190_s1 + $0x9d] sm:$0x4] %vm7_vm0, %v377_v31   ;;  %897 = vst.msk [vmem:[%s2190_s1 + $0xdc] sm:$0x8] %vm7_vm0, %v377_v31  }
  0xbb   :  { %898 = vst.msk [vmem:[%s2190_s1 + $0x20] sm:$0x1] %vm7_vm0, %v389_v32   ;;  %899 = vst.msk [vmem:[%s2190_s1 + $0x5f] sm:$0x2] %vm7_vm0, %v389_v32  }
  0xbc   :  { %900 = vst.msk [vmem:[%s2190_s1 + $0x9e] sm:$0x4] %vm7_vm0, %v389_v32   ;;  %901 = vst.msk [vmem:[%s2190_s1 + $0xdd] sm:$0x8] %vm7_vm0, %v389_v32   ;;  %v401_v33 = vpop.permute.xlu0 %400  }
  0xbd   :  { %v413_v34 = vpop.permute.xlu1 %412   ;;  %902 = vst.msk [vmem:[%s2190_s1 + $0x21] sm:$0x1] %vm7_vm0, %v401_v33   ;;  %903 = vst.msk [vmem:[%s2190_s1 + $0x60] sm:$0x2] %vm7_vm0, %v401_v33  }
  0xbe   :  { %904 = vst.msk [vmem:[%s2190_s1 + $0x9f] sm:$0x4] %vm7_vm0, %v401_v33   ;;  %905 = vst.msk [vmem:[%s2190_s1 + $0xde] sm:$0x8] %vm7_vm0, %v401_v33  }
  0xbf   :  { %906 = vst.msk [vmem:[%s2190_s1 + $0x22] sm:$0x1] %vm7_vm0, %v413_v34   ;;  %907 = vst.msk [vmem:[%s2190_s1 + $0x61] sm:$0x2] %vm7_vm0, %v413_v34  }
  0xc0   :  { %908 = vst.msk [vmem:[%s2190_s1 + $0xa0] sm:$0x4] %vm7_vm0, %v413_v34   ;;  %909 = vst.msk [vmem:[%s2190_s1 + $0xdf] sm:$0x8] %vm7_vm0, %v413_v34   ;;  %v425_v35 = vpop.permute.xlu0 %424  }
  0xc1   :  { %v437_v36 = vpop.permute.xlu1 %436   ;;  %910 = vst.msk [vmem:[%s2190_s1 + $0x23] sm:$0x1] %vm7_vm0, %v425_v35   ;;  %911 = vst.msk [vmem:[%s2190_s1 + $0x62] sm:$0x2] %vm7_vm0, %v425_v35  }
  0xc2   :  { %912 = vst.msk [vmem:[%s2190_s1 + $0xa1] sm:$0x4] %vm7_vm0, %v425_v35   ;;  %913 = vst.msk [vmem:[%s2190_s1 + $0xe0] sm:$0x8] %vm7_vm0, %v425_v35  }
  0xc3   :  { %914 = vst.msk [vmem:[%s2190_s1 + $0x24] sm:$0x1] %vm7_vm0, %v437_v36   ;;  %915 = vst.msk [vmem:[%s2190_s1 + $0x63] sm:$0x2] %vm7_vm0, %v437_v36  }
  0xc4   :  { %916 = vst.msk [vmem:[%s2190_s1 + $0xa2] sm:$0x4] %vm7_vm0, %v437_v36   ;;  %917 = vst.msk [vmem:[%s2190_s1 + $0xe1] sm:$0x8] %vm7_vm0, %v437_v36   ;;  %v449_v37 = vpop.permute.xlu0 %448  }
  0xc5   :  { %v461_v38 = vpop.permute.xlu1 %460   ;;  %918 = vst.msk [vmem:[%s2190_s1 + $0x25] sm:$0x1] %vm7_vm0, %v449_v37   ;;  %919 = vst.msk [vmem:[%s2190_s1 + $0x64] sm:$0x2] %vm7_vm0, %v449_v37  }
  0xc6   :  { %920 = vst.msk [vmem:[%s2190_s1 + $0xa3] sm:$0x4] %vm7_vm0, %v449_v37   ;;  %921 = vst.msk [vmem:[%s2190_s1 + $0xe2] sm:$0x8] %vm7_vm0, %v449_v37  }
  0xc7   :  { %922 = vst.msk [vmem:[%s2190_s1 + $0x26] sm:$0x1] %vm7_vm0, %v461_v38   ;;  %923 = vst.msk [vmem:[%s2190_s1 + $0x65] sm:$0x2] %vm7_vm0, %v461_v38  }
  0xc8   :  { %924 = vst.msk [vmem:[%s2190_s1 + $0xa4] sm:$0x4] %vm7_vm0, %v461_v38   ;;  %925 = vst.msk [vmem:[%s2190_s1 + $0xe3] sm:$0x8] %vm7_vm0, %v461_v38   ;;  %v473_v39 = vpop.permute.xlu0 %472  }
  0xc9   :  { %v485_v40 = vpop.permute.xlu1 %484   ;;  %926 = vst.msk [vmem:[%s2190_s1 + $0x27] sm:$0x1] %vm7_vm0, %v473_v39   ;;  %927 = vst.msk [vmem:[%s2190_s1 + $0x66] sm:$0x2] %vm7_vm0, %v473_v39  }
  0xca   :  { %928 = vst.msk [vmem:[%s2190_s1 + $0xa5] sm:$0x4] %vm7_vm0, %v473_v39   ;;  %929 = vst.msk [vmem:[%s2190_s1 + $0xe4] sm:$0x8] %vm7_vm0, %v473_v39  }
  0xcb   :  { %930 = vst.msk [vmem:[%s2190_s1 + $0x28] sm:$0x1] %vm7_vm0, %v485_v40   ;;  %931 = vst.msk [vmem:[%s2190_s1 + $0x67] sm:$0x2] %vm7_vm0, %v485_v40  }
  0xcc   :  { %932 = vst.msk [vmem:[%s2190_s1 + $0xa6] sm:$0x4] %vm7_vm0, %v485_v40   ;;  %933 = vst.msk [vmem:[%s2190_s1 + $0xe5] sm:$0x8] %vm7_vm0, %v485_v40   ;;  %v497_v41 = vpop.permute.xlu0 %496  }
  0xcd   :  { %v509_v42 = vpop.permute.xlu1 %508   ;;  %934 = vst.msk [vmem:[%s2190_s1 + $0x29] sm:$0x1] %vm7_vm0, %v497_v41   ;;  %935 = vst.msk [vmem:[%s2190_s1 + $0x68] sm:$0x2] %vm7_vm0, %v497_v41  }
  0xce   :  { %936 = vst.msk [vmem:[%s2190_s1 + $0xa7] sm:$0x4] %vm7_vm0, %v497_v41   ;;  %937 = vst.msk [vmem:[%s2190_s1 + $0xe6] sm:$0x8] %vm7_vm0, %v497_v41  }
  0xcf   :  { %938 = vst.msk [vmem:[%s2190_s1 + $0x2a] sm:$0x1] %vm7_vm0, %v509_v42   ;;  %939 = vst.msk [vmem:[%s2190_s1 + $0x69] sm:$0x2] %vm7_vm0, %v509_v42  }
  0xd0   :  { %940 = vst.msk [vmem:[%s2190_s1 + $0xa8] sm:$0x4] %vm7_vm0, %v509_v42   ;;  %941 = vst.msk [vmem:[%s2190_s1 + $0xe7] sm:$0x8] %vm7_vm0, %v509_v42   ;;  %v521_v43 = vpop.permute.xlu0 %520  }
  0xd1   :  { %v533_v44 = vpop.permute.xlu1 %532   ;;  %942 = vst.msk [vmem:[%s2190_s1 + $0x2b] sm:$0x1] %vm7_vm0, %v521_v43   ;;  %943 = vst.msk [vmem:[%s2190_s1 + $0x6a] sm:$0x2] %vm7_vm0, %v521_v43  }
  0xd2   :  { %944 = vst.msk [vmem:[%s2190_s1 + $0xa9] sm:$0x4] %vm7_vm0, %v521_v43   ;;  %945 = vst.msk [vmem:[%s2190_s1 + $0xe8] sm:$0x8] %vm7_vm0, %v521_v43  }
  0xd3   :  { %946 = vst.msk [vmem:[%s2190_s1 + $0x2c] sm:$0x1] %vm7_vm0, %v533_v44   ;;  %947 = vst.msk [vmem:[%s2190_s1 + $0x6b] sm:$0x2] %vm7_vm0, %v533_v44  }
  0xd4   :  { %948 = vst.msk [vmem:[%s2190_s1 + $0xaa] sm:$0x4] %vm7_vm0, %v533_v44   ;;  %949 = vst.msk [vmem:[%s2190_s1 + $0xe9] sm:$0x8] %vm7_vm0, %v533_v44   ;;  %v545_v45 = vpop.permute.xlu0 %544  }
  0xd5   :  { %v557_v46 = vpop.permute.xlu1 %556   ;;  %950 = vst.msk [vmem:[%s2190_s1 + $0x2d] sm:$0x1] %vm7_vm0, %v545_v45   ;;  %951 = vst.msk [vmem:[%s2190_s1 + $0x6c] sm:$0x2] %vm7_vm0, %v545_v45  }
  0xd6   :  { %952 = vst.msk [vmem:[%s2190_s1 + $0xab] sm:$0x4] %vm7_vm0, %v545_v45   ;;  %953 = vst.msk [vmem:[%s2190_s1 + $0xea] sm:$0x8] %vm7_vm0, %v545_v45  }
  0xd7   :  { %954 = vst.msk [vmem:[%s2190_s1 + $0x2e] sm:$0x1] %vm7_vm0, %v557_v46   ;;  %955 = vst.msk [vmem:[%s2190_s1 + $0x6d] sm:$0x2] %vm7_vm0, %v557_v46  }
  0xd8   :  { %956 = vst.msk [vmem:[%s2190_s1 + $0xac] sm:$0x4] %vm7_vm0, %v557_v46   ;;  %957 = vst.msk [vmem:[%s2190_s1 + $0xeb] sm:$0x8] %vm7_vm0, %v557_v46   ;;  %v569_v47 = vpop.permute.xlu0 %568  }
  0xd9   :  { %v581_v48 = vpop.permute.xlu1 %580   ;;  %958 = vst.msk [vmem:[%s2190_s1 + $0x2f] sm:$0x1] %vm7_vm0, %v569_v47   ;;  %959 = vst.msk [vmem:[%s2190_s1 + $0x6e] sm:$0x2] %vm7_vm0, %v569_v47  }
  0xda   :  { %960 = vst.msk [vmem:[%s2190_s1 + $0xad] sm:$0x4] %vm7_vm0, %v569_v47   ;;  %961 = vst.msk [vmem:[%s2190_s1 + $0xec] sm:$0x8] %vm7_vm0, %v569_v47  }
  0xdb   :  { %962 = vst.msk [vmem:[%s2190_s1 + $0x30] sm:$0x1] %vm7_vm0, %v581_v48   ;;  %963 = vst.msk [vmem:[%s2190_s1 + $0x6f] sm:$0x2] %vm7_vm0, %v581_v48  }
  0xdc   :  { %964 = vst.msk [vmem:[%s2190_s1 + $0xae] sm:$0x4] %vm7_vm0, %v581_v48   ;;  %965 = vst.msk [vmem:[%s2190_s1 + $0xed] sm:$0x8] %vm7_vm0, %v581_v48   ;;  %v593_v49 = vpop.permute.xlu0 %592  }
  0xdd   :  { %v605_v50 = vpop.permute.xlu1 %604   ;;  %966 = vst.msk [vmem:[%s2190_s1 + $0x31] sm:$0x1] %vm7_vm0, %v593_v49   ;;  %967 = vst.msk [vmem:[%s2190_s1 + $0x70] sm:$0x2] %vm7_vm0, %v593_v49  }
  0xde   :  { %968 = vst.msk [vmem:[%s2190_s1 + $0xaf] sm:$0x4] %vm7_vm0, %v593_v49   ;;  %969 = vst.msk [vmem:[%s2190_s1 + $0xee] sm:$0x8] %vm7_vm0, %v593_v49  }
  0xdf   :  { %970 = vst.msk [vmem:[%s2190_s1 + $0x32] sm:$0x1] %vm7_vm0, %v605_v50   ;;  %971 = vst.msk [vmem:[%s2190_s1 + $0x71] sm:$0x2] %vm7_vm0, %v605_v50  }
  0xe0   :  { %972 = vst.msk [vmem:[%s2190_s1 + $0xb0] sm:$0x4] %vm7_vm0, %v605_v50   ;;  %973 = vst.msk [vmem:[%s2190_s1 + $0xef] sm:$0x8] %vm7_vm0, %v605_v50   ;;  %v617_v51 = vpop.permute.xlu0 %616  }
  0xe1   :  { %v629_v52 = vpop.permute.xlu1 %628   ;;  %974 = vst.msk [vmem:[%s2190_s1 + $0x33] sm:$0x1] %vm7_vm0, %v617_v51   ;;  %975 = vst.msk [vmem:[%s2190_s1 + $0x72] sm:$0x2] %vm7_vm0, %v617_v51  }
  0xe2   :  { %976 = vst.msk [vmem:[%s2190_s1 + $0xb1] sm:$0x4] %vm7_vm0, %v617_v51   ;;  %977 = vst.msk [vmem:[%s2190_s1 + $0xf0] sm:$0x8] %vm7_vm0, %v617_v51  }
  0xe3   :  { %978 = vst.msk [vmem:[%s2190_s1 + $0x34] sm:$0x1] %vm7_vm0, %v629_v52   ;;  %979 = vst.msk [vmem:[%s2190_s1 + $0x73] sm:$0x2] %vm7_vm0, %v629_v52  }
  0xe4   :  { %980 = vst.msk [vmem:[%s2190_s1 + $0xb2] sm:$0x4] %vm7_vm0, %v629_v52   ;;  %981 = vst.msk [vmem:[%s2190_s1 + $0xf1] sm:$0x8] %vm7_vm0, %v629_v52   ;;  %v641_v53 = vpop.permute.xlu0 %640  }
  0xe5   :  { %v653_v54 = vpop.permute.xlu1 %652   ;;  %982 = vst.msk [vmem:[%s2190_s1 + $0x35] sm:$0x1] %vm7_vm0, %v641_v53   ;;  %983 = vst.msk [vmem:[%s2190_s1 + $0x74] sm:$0x2] %vm7_vm0, %v641_v53  }
  0xe6   :  { %984 = vst.msk [vmem:[%s2190_s1 + $0xb3] sm:$0x4] %vm7_vm0, %v641_v53   ;;  %985 = vst.msk [vmem:[%s2190_s1 + $0xf2] sm:$0x8] %vm7_vm0, %v641_v53  }
  0xe7   :  { %986 = vst.msk [vmem:[%s2190_s1 + $0x36] sm:$0x1] %vm7_vm0, %v653_v54   ;;  %987 = vst.msk [vmem:[%s2190_s1 + $0x75] sm:$0x2] %vm7_vm0, %v653_v54  }
  0xe8   :  { %988 = vst.msk [vmem:[%s2190_s1 + $0xb4] sm:$0x4] %vm7_vm0, %v653_v54   ;;  %989 = vst.msk [vmem:[%s2190_s1 + $0xf3] sm:$0x8] %vm7_vm0, %v653_v54   ;;  %v665_v55 = vpop.permute.xlu0 %664  }
  0xe9   :  { %v677_v56 = vpop.permute.xlu1 %676   ;;  %990 = vst.msk [vmem:[%s2190_s1 + $0x37] sm:$0x1] %vm7_vm0, %v665_v55   ;;  %991 = vst.msk [vmem:[%s2190_s1 + $0x76] sm:$0x2] %vm7_vm0, %v665_v55  }
  0xea   :  { %992 = vst.msk [vmem:[%s2190_s1 + $0xb5] sm:$0x4] %vm7_vm0, %v665_v55   ;;  %993 = vst.msk [vmem:[%s2190_s1 + $0xf4] sm:$0x8] %vm7_vm0, %v665_v55  }
  0xeb   :  { %994 = vst.msk [vmem:[%s2190_s1 + $0x38] sm:$0x1] %vm7_vm0, %v677_v56   ;;  %995 = vst.msk [vmem:[%s2190_s1 + $0x77] sm:$0x2] %vm7_vm0, %v677_v56  }
  0xec   :  { %996 = vst.msk [vmem:[%s2190_s1 + $0xb6] sm:$0x4] %vm7_vm0, %v677_v56   ;;  %997 = vst.msk [vmem:[%s2190_s1 + $0xf5] sm:$0x8] %vm7_vm0, %v677_v56   ;;  %v689_v57 = vpop.permute.xlu0 %688  }
  0xed   :  { %v701_v58 = vpop.permute.xlu1 %700   ;;  %998 = vst.msk [vmem:[%s2190_s1 + $0x39] sm:$0x1] %vm7_vm0, %v689_v57   ;;  %999 = vst.msk [vmem:[%s2190_s1 + $0x78] sm:$0x2] %vm7_vm0, %v689_v57  }
  0xee   :  { %1000 = vst.msk [vmem:[%s2190_s1 + $0xb7] sm:$0x4] %vm7_vm0, %v689_v57   ;;  %1001 = vst.msk [vmem:[%s2190_s1 + $0xf6] sm:$0x8] %vm7_vm0, %v689_v57  }
  0xef   :  { %1002 = vst.msk [vmem:[%s2190_s1 + $0x3a] sm:$0x1] %vm7_vm0, %v701_v58   ;;  %1003 = vst.msk [vmem:[%s2190_s1 + $0x79] sm:$0x2] %vm7_vm0, %v701_v58  }
  0xf0   :  { %1004 = vst.msk [vmem:[%s2190_s1 + $0xb8] sm:$0x4] %vm7_vm0, %v701_v58   ;;  %1005 = vst.msk [vmem:[%s2190_s1 + $0xf7] sm:$0x8] %vm7_vm0, %v701_v58   ;;  %v713_v59 = vpop.permute.xlu0 %712  }
  0xf1   :  { %v725_v60 = vpop.permute.xlu1 %724   ;;  %1006 = vst.msk [vmem:[%s2190_s1 + $0x3b] sm:$0x1] %vm7_vm0, %v713_v59   ;;  %1007 = vst.msk [vmem:[%s2190_s1 + $0x7a] sm:$0x2] %vm7_vm0, %v713_v59  }
  0xf2   :  { %1008 = vst.msk [vmem:[%s2190_s1 + $0xb9] sm:$0x4] %vm7_vm0, %v713_v59   ;;  %1009 = vst.msk [vmem:[%s2190_s1 + $0xf8] sm:$0x8] %vm7_vm0, %v713_v59  }
  0xf3   :  { %1010 = vst.msk [vmem:[%s2190_s1 + $0x3c] sm:$0x1] %vm7_vm0, %v725_v60   ;;  %1011 = vst.msk [vmem:[%s2190_s1 + $0x7b] sm:$0x2] %vm7_vm0, %v725_v60  }
  0xf4   :  { %1012 = vst.msk [vmem:[%s2190_s1 + $0xba] sm:$0x4] %vm7_vm0, %v725_v60   ;;  %1013 = vst.msk [vmem:[%s2190_s1 + $0xf9] sm:$0x8] %vm7_vm0, %v725_v60   ;;  %v737_v61 = vpop.permute.xlu0 %736  }
  0xf5   :  { %v749_v62 = vpop.permute.xlu1 %748   ;;  %1014 = vst.msk [vmem:[%s2190_s1 + $0x3d] sm:$0x1] %vm7_vm0, %v737_v61   ;;  %1015 = vst.msk [vmem:[%s2190_s1 + $0x7c] sm:$0x2] %vm7_vm0, %v737_v61  }
  0xf6   :  { %1016 = vst.msk [vmem:[%s2190_s1 + $0xbb] sm:$0x4] %vm7_vm0, %v737_v61   ;;  %1017 = vst.msk [vmem:[%s2190_s1 + $0xfa] sm:$0x8] %vm7_vm0, %v737_v61  }
  0xf7   :  { %1018 = vst.msk [vmem:[%s2190_s1 + $0x3e] sm:$0x1] %vm7_vm0, %v749_v62   ;;  %1019 = vst.msk [vmem:[%s2190_s1 + $0x7d] sm:$0x2] %vm7_vm0, %v749_v62  }
  0xf8   :  { %1020 = vst.msk [vmem:[%s2190_s1 + $0xbc] sm:$0x4] %vm7_vm0, %v749_v62   ;;  %1021 = vst.msk [vmem:[%s2190_s1 + $0xfb] sm:$0x8] %vm7_vm0, %v749_v62   ;;  %v761_v63 = vpop.permute.xlu0 %760  }
  0xf9   :  { %1022 = vst.msk [vmem:[%s2190_s1 + $0x3f] sm:$0x1] %vm7_vm0, %v761_v63   ;;  %1023 = vst.msk [vmem:[%s2190_s1 + $0x7e] sm:$0x2] %vm7_vm0, %v761_v63  }
  0xfa   :  { %1024 = vst.msk [vmem:[%s2190_s1 + $0xbd] sm:$0x4] %vm7_vm0, %v761_v63   ;;  %1025 = vst.msk [vmem:[%s2190_s1 + $0xfc] sm:$0x8] %vm7_vm0, %v761_v63  }

// kernel: catdog_forward.1
= control target key start
LH: loop header
LB: loop body
LE: loop exit
PB: predicated region body
PF: predicated region fallthrough
CT: control target
= control target key end

     0   :  { %10 = vsyncpa [#allocation3], 0  ;;  %s11612_s0 = inlined_call_operand.vmem [shape: bf16[2,48,2500], index: 0, kind: input, shape index: {}]   ;;  %s11613_s1 = inlined_call_operand.vmem [shape: bf16[256,48], index: 1, kind: input, shape index: {}]   ;;  %s11614_s2 = inlined_call_operand.vmem [shape: f32[256,1], index: 2, kind: input, shape index: {}]   ;;  %s11615_s3 = inlined_call_operand.vmem [shape: f32[128,2500], index: 3, kind: input, shape index: {}]   ;;  %s11616_s4 = inlined_call_operand.vmem [shape: f32[1,2], index: 4, kind: input, shape index: {}]   ;;  %s11617_s5 = inlined_call_operand.hbm [shape: f32[2,1,2], index: 5, kind: output, shape index: {}]  }
   0x1   :  { %12 = vsyncpa [#allocation3 + $0x1], 0  ;;  %s5617_s18 = smov 0   ;;  %s5619_s19 = smov 0  }
   0x2   :  { %s5621_s20 = smov 0   ;;  %s5623_s21 = smov 0  }
   0x3 LB: > { %s5638_s22 = sadd.s32 4294967295, %s5583_s21   ;;  %s5082_s23 = sadd.s32 4294967294, %s5583_s21   ;;  %s5583_s21 = sphi %s5623_s21, %s12823_s21   ;;  %s5579_s20 = sphi %s5621_s20, %s12822_s20   ;;  %s5575_s19 = sphi %s5619_s19, %s12821_s19   ;;  %s5571_s18 = sphi %s5617_s18, %s12820_s18  }
   0x4   : > { %s5642_s24 = sadd.s32 1, %s5583_s21   ;;  %s135_s25 = sadd.s32 1, %s5579_s20 }
   0x5   : > { %s132_s26 = ssub.s32 %s5583_s21, %s5642_s24  ;;  %p145_p0 = scmp.ne.s32.totalorder %s5579_s20, %s5575_s19 }
   0x6   : > { %p133_p1 = scmp.eq.s32.totalorder %s132_s26, 0  ;;  %p146_p2 = scmp.eq.s32.totalorder %s5638_s22, 1 }
   0x7   : > { %p151_p3 = scmp.ne.s32.totalorder %s5575_s19, %s5571_s18  ;;  %p152_p4 = scmp.eq.s32.totalorder %s5082_s23, 1 }
   0x8   : > { %s5653_s27 = scalar_select %p133_p1, %s5579_s20, %s135_s25  }
   0x9   : > { %p5655_p5 = por %p146_p2, %p145_p0  ;;  %p5659_p6 = por %p152_p4, %p151_p3 }
   0xa   : > { %p5085_p7 = scmp.ge.s32.totalorder %s5583_s21, 1  ;;  %p190_p8 = scmp.lt.s32.totalorder %s5583_s21, 3 }
   0xc   : > { %p191_p9 = pnand %p5085_p7, %p190_p8 }
   0xe   : > { %194 = sbr.rel (%p191_p9) target bundleno = 1145 (0x479), region = 40 }
  0x15   : > { %p217_p10 = scmp.lt.s32.totalorder %s5638_s22, 1  ;;  %v11618_v0 = vmov 0   ;;  %v5693_v15 = vld [vmem:[%s11613_s1] sm:$0xff]   ;;  %vm887_vm0 = vcmask 392192   ;;  %v316_v23 = vld [vmem:[%s11614_s2 + $0x8] sm:$0xff]  ;;  %v5743_v33 = vld [vmem:[%s11613_s1 + $0x10] sm:$0xff]  }
  0x16   : > { %968 = vmatprep.mubr.bf16.mxu0 %v11618_v0  ;;  %1161 = vmatprep.mubr.bf16.mxu1 %v11618_v0  ;;  %v315_v19 = vld [vmem:[%s11614_s2] sm:$0xff]  ;;  %v5716_v24 = vld [vmem:[%s11613_s1 + $0x8] sm:$0xff]   ;;  %v317_v35 = vld [vmem:[%s11614_s2 + $0x10] sm:$0xff]  ;;  %vm4324_vm1 = vcmask 556032   ;;  %vm4979_vm2 = vcmask 7168   ;;  %vm4988_vm3 = vcmask 15360  }
  0x17   : > { %s218_s30 = scalar_select %p217_p10, %s5638_s22, 1  ;;  %5367 = vset.pattern.permute.xlu0 %v11618_v0  ;;  %5368 = vset.pattern.permute.xlu1 %v11618_v0  ;;  %v331_v25 = vld [vmem:[%s11614_s2 + $0x80] sm:$0xff]  ;;  %v324_v29 = vld [vmem:[%s11614_s2 + $0x48] sm:$0xff]  ;;  %v5763_v37 = vld [vmem:[%s11613_s1 + $0x18] sm:$0xff]   ;;  %vm5012_vm4 = vcmask 8192  }
  0x18   : > { %349 = vperm.xlu0 %5367, %v315_v19   ;;  %v323_v26 = vld [vmem:[%s11614_s2 + $0x40] sm:$0xff]  ;;  %v332_v34 = vld [vmem:[%s11614_s2 + $0x88] sm:$0xff]  ;;  %v333_v38 = vld [vmem:[%s11614_s2 + $0x90] sm:$0xff]  ;;  %s215_s26 = sand.u32 1, %s5575_s19   ;;  %s5323_s7 = sshll.u32 %s5638_s22, 4 }
  0x19   : > { %s5326_s6 = smul.u32 480, %s218_s30  ;;  %389 = vperm.xlu1 %5368, %v323_v26   ;;  %v339_v32 = vld [vmem:[%s11614_s2 + $0xc0] sm:$0xff]  ;;  %v340_v36 = vld [vmem:[%s11614_s2 + $0xc8] sm:$0xff]  ;;  %v325_v39 = vld [vmem:[%s11614_s2 + $0x50] sm:$0xff]  ;;  %s216_s8 = scalar_lea.vmem [#allocation2], %s215_s26 }
  0x1a   : > { %v318_v42 = vld [vmem:[%s11614_s2 + $0x18] sm:$0xff]  ;;  %v341_v43 = vld [vmem:[%s11614_s2 + $0xd0] sm:$0xff]  ;;  %v5791_v45 = vld [vmem:[%s11613_s1 + $0x20] sm:$0xff]   ;;  %s5027_s10 = sshll.u32 %s216_s8, 4  ;;  %s11570_s12 = scalar_lea.hbm %s11617_s5, %s5323_s7  ;;  %s11572_s10 = int_to_ptr.vmem [resolvable:$true] %s5027_s10 }
  0x1b   : > { %s5674_s9 = scalar_lea.vmem %s11612_s0, %s5326_s6  ;;  %v334_v44 = vld [vmem:[%s11614_s2 + $0x98] sm:$0xff]  ;;  %v319_v47 = vld [vmem:[%s11614_s2 + $0x20] sm:$0xff]  ;;  %v5814_v50 = vld [vmem:[%s11613_s1 + $0x28] sm:$0xff]   ;;  %s5015_s13 = scalar_lea.sflag [#allocation3], %s215_s26 }
  0x1c   : > { %v5369_v1 = vld [vmem:[%s5674_s9 + $0x4] ss:$80 sps:$4 sm:$0xff]   ;;  %v5371_v2 = vld [vmem:[%s5674_s9 + $0xc] ss:$80 sps:$4 sm:$0xff]   ;;  %v5373_v3 = vld [vmem:[%s5674_s9] ss:$80 sps:$4 sm:$0xff]   ;;  %354 = vperm.xlu0 %5367, %v316_v23  }
  0x1d   : > { %936 = vmatprep.subr.bf16.mxu0 %v5369_v1  ;;  %v5374_v4 = vld [vmem:[%s5674_s9 + $0x8] ss:$80 sps:$4 sm:$0xff]   ;;  %1129 = vmatprep.subr.bf16.mxu1 %v5371_v2  ;;  %v5375_v5 = vld [vmem:[%s5674_s9 + $0xa4] ss:$80 sps:$4 sm:$0xff]   ;;  %v5377_v6 = vld [vmem:[%s5674_s9 + $0xac] ss:$80 sps:$4 sm:$0xff]  }
  0x1e   : > { %937 = vmatpush1.bf16.msra.mxu0 %v5373_v3  ;;  %1130 = vmatpush1.bf16.msra.mxu1 %v5374_v4  ;;  %v5379_v7 = vld [vmem:[%s5674_s9 + $0xa0] ss:$80 sps:$4 sm:$0xff]   ;;  %v5380_v8 = vld [vmem:[%s5674_s9 + $0xa8] ss:$80 sps:$4 sm:$0xff]   ;;  %v5381_v9 = vld [vmem:[%s5674_s9 + $0x144] ss:$80 sps:$4 sm:$0xff]  }
  0x1f   : > { %938 = vmatprep.subr.bf16.mxu0 %v5375_v5  ;;  %1131 = vmatprep.subr.bf16.mxu1 %v5377_v6  ;;  %v5383_v10 = vld [vmem:[%s5674_s9 + $0x14c] ss:$80 sps:$4 sm:$0xff]   ;;  %v5385_v11 = vld [vmem:[%s5674_s9 + $0x140] ss:$80 sps:$4 sm:$0xff]   ;;  %v5386_v12 = vld [vmem:[%s5674_s9 + $0x148] ss:$80 sps:$4 sm:$0xff]  }
  0x20   : > { %v5390_v13 = vld [vmem:[%s5674_s9 + $0x14] ss:$80 sps:$4 sm:$0xff]   ;;  %v5393_v14 = vld [vmem:[%s5674_s9 + $0x1c] ss:$80 sps:$4 sm:$0xff]   ;;  %v5388_v16 = vld [vmem:[%s5674_s9 + $0x10] ss:$80 sps:$4 sm:$0xff]   ;;  %429 = vperm.xlu0 %5367, %v331_v25   ;;  %394 = vperm.xlu1 %5368, %v324_v29  }
  0x21   : > { %v5391_v17 = vld [vmem:[%s5674_s9 + $0x18] ss:$80 sps:$4 sm:$0xff]   ;;  %v5401_v18 = vld [vmem:[%s5674_s9 + $0xb4] ss:$80 sps:$4 sm:$0xff]   ;;  %v5404_v20 = vld [vmem:[%s5674_s9 + $0xbc] ss:$80 sps:$4 sm:$0xff]  }
  0x22   : > { %939 = vmatpush1.bf16.msra.mxu0 %v5379_v7  ;;  %1132 = vmatpush1.bf16.msra.mxu1 %v5380_v8  ;;  %v5399_v21 = vld [vmem:[%s5674_s9 + $0xb0] ss:$80 sps:$4 sm:$0xff]   ;;  %v5402_v22 = vld [vmem:[%s5674_s9 + $0xb8] ss:$80 sps:$4 sm:$0xff]   ;;  %v5412_v28 = vld [vmem:[%s5674_s9 + $0x154] ss:$80 sps:$4 sm:$0xff]  }
  0x23   : > { %940 = vmatprep.subr.bf16.mxu0 %v5381_v9  ;;  %1133 = vmatprep.subr.bf16.mxu1 %v5383_v10  ;;  %v5410_v27 = vld [vmem:[%s5674_s9 + $0x150] ss:$80 sps:$4 sm:$0xff]   ;;  %v5414_v30 = vld [vmem:[%s5674_s9 + $0x158] ss:$80 sps:$4 sm:$0xff]   ;;  %v5416_v31 = vld [vmem:[%s5674_s9 + $0x15c] ss:$80 sps:$4 sm:$0xff]  }
  0x24   : > { %469 = vperm.xlu0 %5367, %v339_v32   ;;  %434 = vperm.xlu1 %5368, %v332_v34   ;;  %v5423_v40 = vld [vmem:[%s5674_s9 + $0x24] ss:$80 sps:$4 sm:$0xff]   ;;  %v5426_v41 = vld [vmem:[%s5674_s9 + $0x2c] ss:$80 sps:$4 sm:$0xff]   ;;  %11859 = vst [vmem:[#allocation5_spill] sm:$0xff] %v5814_v50  ;;  %s5521_s14 = scalar_lea.vmem %s11572_s10, 16 }
  0x25   : > { %v326_v46 = vld [vmem:[%s11614_s2 + $0x58] sm:$0xff]  ;;  %v335_v49 = vld [vmem:[%s11614_s2 + $0xa0] sm:$0xff]  ;;  %v320_v52 = vld [vmem:[%s11614_s2 + $0x28] sm:$0xff]  ;;  %p5522_p11 = scmp.ne.s32.totalorder %s11572_s10, %s5521_s14  ;;  %s5586_s22 = smov [#allocation2]  }
  0x26   : > { %941 = vmatpush1.bf16.msra.mxu0 %v5385_v11  ;;  %1134 = vmatpush1.bf16.msra.mxu1 %v5386_v12  ;;  %v342_v48 = vld [vmem:[%s11614_s2 + $0xd8] sm:$0xff]  ;;  %v327_v51 = vld [vmem:[%s11614_s2 + $0x60] sm:$0xff]  ;;  %v336_v54 = vld [vmem:[%s11614_s2 + $0xa8] sm:$0xff]  ;;  %s5525_s15 = sshll.u32 %s5586_s22, 4  ;;  %s5526_s15 = int_to_ptr.vmem [resolvable:$false] %s5525_s15 }
  0x27   : > { %1322 = vmatprep.subr.bf16.mxu0 %v5390_v13  ;;  %1515 = vmatprep.subr.bf16.mxu1 %v5393_v14  ;;  %v343_v53 = vld [vmem:[%s11614_s2 + $0xe0] sm:$0xff]  ;;  %v5837_v55 = vld [vmem:[%s11613_s1 + $0x30] sm:$0xff]   ;;  %v328_v56 = vld [vmem:[%s11614_s2 + $0x68] sm:$0xff]  ;;  %p5523_p12 = pnand %p5522_p11, %p5655_p5  ;;  %s5527_s16 = scalar_lea.vmem %s5526_s15, 32 }
  0x28   : > { %359 = vperm.xlu0 %5367, %v317_v35   ;;  %474 = vperm.xlu1 %5368, %v340_v36   ;;  %v321_v57 = vld [vmem:[%s11614_s2 + $0x30] sm:$0xff]  ;;  %v344_v58 = vld [vmem:[%s11614_s2 + $0xe8] sm:$0xff]  ;;  %v5860_v60 = vld [vmem:[%s11613_s1 + $0x38] sm:$0xff]   ;;  %p5528_p0 = scmp.lt.s32.totalorder %s11572_s10, %s5526_s15  ;;  %p5529_p1 = scmp.lt.s32.totalorder %s5527_s16, %s5521_s14 }
  0x29   : > { %5163 = vmatmul.mubr.msk.bf16.vlgmr.msra.gmra.mrb[0].mxu0 %vm887_vm0, %v5693_v15  ;;  %5179 = vmatmul.mubr.msk.bf16.vlgmr.msra.gmra.mrb[0].mxu1 %vm887_vm0, %v5693_v15  ;;  %v337_v59 = vld [vmem:[%s11614_s2 + $0xb0] sm:$0xff]  ;;  %v322_v62 = vld [vmem:[%s11614_s2 + $0x38] sm:$0xff]  ;;  %v5883_v2 = vld [vmem:[%s11613_s1 + $0x40] sm:$0xff]   ;;  %p5524_p13 = pneg %p5523_p12 }
  0x2a   : > { %1323 = vmatpush1.bf16.msra.mxu0 %v5388_v16  ;;  %1516 = vmatpush1.bf16.msra.mxu1 %v5391_v17  ;;  %v329_v61 = vld [vmem:[%s11614_s2 + $0x70] sm:$0xff]  ;;  %v338_v1 = vld [vmem:[%s11614_s2 + $0xb8] sm:$0xff]  ;;  %v5897_v4 = vld [vmem:[%s11613_s1 + $0x48] sm:$0xff]   ;;  %p5530_p2 = por %p5529_p1, %p5528_p0 }
  0x2b   : > { %978 = vmatprep.mubr.bf16.mxu0 %v11618_v0  ;;  %1171 = vmatprep.mubr.bf16.mxu1 %v11618_v0  ;;  %v345_v63 = vld [vmem:[%s11614_s2 + $0xf0] sm:$0xff]  ;;  %v330_v3 = vld [vmem:[%s11614_s2 + $0x78] sm:$0xff]  ;;  %v5933_v8 = vld [vmem:[%s11613_s1 + $0x60] sm:$0xff]  }
  0x2c   : > { %1324 = vmatprep.subr.bf16.mxu0 %v5401_v18  ;;  %1517 = vmatprep.subr.bf16.mxu1 %v5404_v20  ;;  %v346_v5 = vld [vmem:[%s11614_s2 + $0xf8] sm:$0xff]  ;;  %v5911_v6 = vld [vmem:[%s11613_s1 + $0x50] sm:$0xff]   ;;  %v5944_v9 = vld [vmem:[%s11613_s1 + $0x68] sm:$0xff]   ;;  %p5531_p3 = pnand %p5530_p2, %p5524_p13 }
  0x2d   : > { %439 = vperm.xlu0 %5367, %v333_v38   ;;  %399 = vperm.xlu1 %5368, %v325_v39   ;;  %v5922_v7 = vld [vmem:[%s11613_s1 + $0x58] sm:$0xff]   ;;  %v5955_v10 = vld [vmem:[%s11613_s1 + $0x70] sm:$0xff]  }
  0x2e   : > { %1325 = vmatpush1.bf16.msra.mxu0 %v5399_v21  ;;  %1518 = vmatpush1.bf16.msra.mxu1 %v5402_v22  ;;  %v5966_v11 = vld [vmem:[%s11613_s1 + $0x78] sm:$0xff]   ;;  %v5421_v12 = vld [vmem:[%s5674_s9 + $0x20] ss:$80 sps:$4 sm:$0xff]   ;;  %v5429_v14 = vld [vmem:[%s5674_s9 + $0xc4] ss:$80 sps:$4 sm:$0xff]  }
  0x2f   : > { %1326 = vmatprep.subr.bf16.mxu0 %v5412_v28  ;;  %1519 = vmatprep.subr.bf16.mxu1 %v5416_v31  ;;  %v5424_v13 = vld [vmem:[%s5674_s9 + $0x28] ss:$80 sps:$4 sm:$0xff]   ;;  %v5432_v16 = vld [vmem:[%s5674_s9 + $0xcc] ss:$80 sps:$4 sm:$0xff]   ;;  %v5427_v17 = vld [vmem:[%s5674_s9 + $0xc0] ss:$80 sps:$4 sm:$0xff]  }
  0x30   : > { %v5430_v18 = vld [vmem:[%s5674_s9 + $0xc8] ss:$80 sps:$4 sm:$0xff]   ;;  %v5435_v19 = vld [vmem:[%s5674_s9 + $0x164] ss:$80 sps:$4 sm:$0xff]   ;;  %v5438_v20 = vld [vmem:[%s5674_s9 + $0x16c] ss:$80 sps:$4 sm:$0xff]  }
  0x31   : > { %5164 = vmatmul.mubr.msk.bf16.gmra.mrb[4].mxu0 %vm887_vm0, %v5716_v24  ;;  %5180 = vmatmul.mubr.msk.bf16.gmra.mrb[4].mxu1 %vm887_vm0, %v5716_v24  ;;  %v5433_v21 = vld [vmem:[%s5674_s9 + $0x160] ss:$80 sps:$4 sm:$0xff]   ;;  %v5436_v22 = vld [vmem:[%s5674_s9 + $0x168] ss:$80 sps:$4 sm:$0xff]   ;;  %v5441_v23 = vld [vmem:[%s5674_s9 + $0x34] ss:$80 sps:$4 sm:$0xff]  }
  0x32   : > { %988 = vmatprep.mubr.bf16.mxu0 %v11618_v0  ;;  %1181 = vmatprep.mubr.bf16.mxu1 %v11618_v0  ;;  %v5444_v25 = vld [vmem:[%s5674_s9 + $0x3c] ss:$80 sps:$4 sm:$0xff]  }
  0x33   : > { %1327 = vmatpush1.bf16.msra.mxu0 %v5410_v27  ;;  %1520 = vmatpush1.bf16.msra.mxu1 %v5414_v30 }
  0x34   : > { %1708 = vmatprep.subr.bf16.mxu0 %v5423_v40  ;;  %1901 = vmatprep.subr.bf16.mxu1 %v5426_v41 }
  0x35   : > { %364 = vperm.xlu0 %5367, %v318_v42   ;;  %479 = vperm.xlu1 %5368, %v341_v43  }
  0x39   : > { %5165 = vmatmul.mubr.msk.bf16.gmra.mrb[8].mxu0 %vm887_vm0, %v5743_v33  ;;  %5181 = vmatmul.mubr.msk.bf16.gmra.mrb[8].mxu1 %vm887_vm0, %v5743_v33 }
  0x3a   : > { %998 = vmatprep.mubr.bf16.mxu0 %v11618_v0  ;;  %1191 = vmatprep.mubr.bf16.mxu1 %v11618_v0 }
  0x3b   : > { %444 = vperm.xlu0 %5367, %v334_v44   ;;  %404 = vperm.xlu1 %5368, %v326_v46  }
  0x3f   : > { %369 = vperm.xlu0 %5367, %v319_v47   ;;  %484 = vperm.xlu1 %5368, %v342_v48  }
  0x41   : > { %5166 = vmatmul.mubr.msk.bf16.gmra.mrb[12].mxu0 %vm887_vm0, %v5763_v37  ;;  %5182 = vmatmul.mubr.msk.bf16.gmra.mrb[12].mxu1 %vm887_vm0, %v5763_v37 }
  0x42   : > { %1008 = vmatprep.mubr.bf16.mxu0 %v11618_v0  ;;  %1201 = vmatprep.mubr.bf16.mxu1 %v11618_v0 }
  0x43   : > { %449 = vperm.xlu0 %5367, %v335_v49   ;;  %409 = vperm.xlu1 %5368, %v327_v51  }
  0x47   : > { %374 = vperm.xlu0 %5367, %v320_v52   ;;  %489 = vperm.xlu1 %5368, %v343_v53  }
  0x49   : > { %5167 = vmatmul.mubr.msk.bf16.gmra.mrb[16].mxu0 %vm887_vm0, %v5791_v45  ;;  %5183 = vmatmul.mubr.msk.bf16.gmra.mrb[16].mxu1 %vm887_vm0, %v5791_v45 }
  0x4a   : > { %1018 = vmatprep.mubr.bf16.mxu0 %v11618_v0  ;;  %1211 = vmatprep.mubr.bf16.mxu1 %v11618_v0 }
  0x4b   : > { %454 = vperm.xlu0 %5367, %v336_v54   ;;  %414 = vperm.xlu1 %5368, %v328_v56  }
  0x4f   : > { %379 = vperm.xlu0 %5367, %v321_v57   ;;  %494 = vperm.xlu1 %5368, %v344_v58  }
  0x51   : > { %5168 = vmatmul.mubr.msk.bf16.gmra.mrb[20].mxu0 %vm887_vm0, %v5814_v50  ;;  %5184 = vmatmul.mubr.msk.bf16.gmra.mrb[20].mxu1 %vm887_vm0, %v5814_v50 }
  0x52   : > { %1028 = vmatprep.mubr.bf16.mxu0 %v11618_v0  ;;  %1221 = vmatprep.mubr.bf16.mxu1 %v11618_v0 }
  0x53   : > { %459 = vperm.xlu0 %5367, %v337_v59   ;;  %419 = vperm.xlu1 %5368, %v329_v61  }
  0x57   : > { %384 = vperm.xlu0 %5367, %v322_v62   ;;  %499 = vperm.xlu1 %5368, %v345_v63  }
  0x59   : > { %5169 = vmatmul.mubr.msk.bf16.gmra.mrb[24].mxu0 %vm887_vm0, %v5837_v55  ;;  %5185 = vmatmul.mubr.msk.bf16.gmra.mrb[24].mxu1 %vm887_vm0, %v5837_v55 }
  0x5a   : > { %1038 = vmatprep.mubr.bf16.mxu0 %v11618_v0  ;;  %1231 = vmatprep.mubr.bf16.mxu1 %v11618_v0 }
  0x5b   : > { %464 = vperm.xlu0 %5367, %v338_v1   ;;  %424 = vperm.xlu1 %5368, %v330_v3  }
  0x5f   : > { %504 = vperm.xlu1 %5368, %v346_v5  }
  0x61   : > { %5170 = vmatmul.mubr.msk.bf16.gmra.mrb[28].mxu0 %vm887_vm0, %v5860_v60  ;;  %5186 = vmatmul.mubr.msk.bf16.gmra.mrb[28].mxu1 %vm887_vm0, %v5860_v60 }
  0x62   : > { %1048 = vmatprep.mubr.bf16.mxu0 %v11618_v0  ;;  %1241 = vmatprep.mubr.bf16.mxu1 %v11618_v0 }
  0x69   : > { %5171 = vmatmul.mubr.msk.bf16.gmra.mrb[32].mxu0 %vm887_vm0, %v5883_v2  ;;  %5187 = vmatmul.mubr.msk.bf16.gmra.mrb[32].mxu1 %vm887_vm0, %v5883_v2 }
  0x6a   : > { %1058 = vmatprep.mubr.bf16.mxu0 %v11618_v0  ;;  %1251 = vmatprep.mubr.bf16.mxu1 %v11618_v0 }
  0x71   : > { %5172 = vmatmul.mubr.msk.bf16.gmra.mrb[36].mxu0 %vm887_vm0, %v5897_v4  ;;  %5188 = vmatmul.mubr.msk.bf16.gmra.mrb[36].mxu1 %vm887_vm0, %v5897_v4 }
  0x72   : > { %1068 = vmatprep.mubr.bf16.mxu0 %v11618_v0  ;;  %1261 = vmatprep.mubr.bf16.mxu1 %v11618_v0 }
  0x79   : > { %5173 = vmatmul.mubr.msk.bf16.gmra.mrb[40].mxu0 %vm887_vm0, %v5911_v6  ;;  %5189 = vmatmul.mubr.msk.bf16.gmra.mrb[40].mxu1 %vm887_vm0, %v5911_v6 }
  0x7a   : > { %1078 = vmatprep.mubr.bf16.mxu0 %v11618_v0  ;;  %1271 = vmatprep.mubr.bf16.mxu1 %v11618_v0 }
  0x81   : > { %5174 = vmatmul.mubr.msk.bf16.gmra.mrb[44].mxu0 %vm887_vm0, %v5922_v7  ;;  %5190 = vmatmul.mubr.msk.bf16.gmra.mrb[44].mxu1 %vm887_vm0, %v5922_v7 }
  0x82   : > { %1088 = vmatprep.mubr.bf16.mxu0 %v11618_v0  ;;  %1281 = vmatprep.mubr.bf16.mxu1 %v11618_v0 }
  0x89   : > { %5175 = vmatmul.mubr.msk.bf16.gmra.mrb[48].mxu0 %vm887_vm0, %v5933_v8  ;;  %5191 = vmatmul.mubr.msk.bf16.gmra.mrb[48].mxu1 %vm887_vm0, %v5933_v8 }
  0x8a   : > { %1098 = vmatprep.mubr.bf16.mxu0 %v11618_v0  ;;  %1291 = vmatprep.mubr.bf16.mxu1 %v11618_v0 }
  0x91   : > { %5176 = vmatmul.mubr.msk.bf16.gmra.mrb[52].mxu0 %vm887_vm0, %v5944_v9  ;;  %5192 = vmatmul.mubr.msk.bf16.gmra.mrb[52].mxu1 %vm887_vm0, %v5944_v9 }
  0x92   : > { %1108 = vmatprep.mubr.bf16.mxu0 %v11618_v0  ;;  %1301 = vmatprep.mubr.bf16.mxu1 %v11618_v0 }
  0x98   : > { %v6024_v27 = vpop.permute.xlu1 %389 }
  0x99   : > { %5177 = vmatmul.mubr.msk.bf16.gmra.mrb[56].mxu0 %vm887_vm0, %v5955_v10  ;;  %5193 = vmatmul.mubr.msk.bf16.gmra.mrb[56].mxu1 %vm887_vm0, %v5955_v10  ;;  %11862 = vst [vmem:[#allocation8_spill] sm:$0xff] %v6024_v27 }
  0x9a   : > { %1118 = vmatprep.mubr.bf16.mxu0 %v11618_v0  ;;  %1311 = vmatprep.mubr.bf16.mxu1 %v11618_v0 }
  0x9f   : > { %v6030_v29 = vpop.permute.xlu1 %394 }
  0xa0   : > { %11864 = vst [vmem:[#allocation10_spill] sm:$0xff] %v6030_v29 }
  0xa1   : > { %5178 = vmatmul.mubr.msk.bf16.gmra.mrb[60].mxu0 %vm887_vm0, %v5966_v11  ;;  %5194 = vmatmul.mubr.msk.bf16.gmra.mrb[60].mxu1 %vm887_vm0, %v5966_v11 }
  0xa2   : > { %1354 = vmatprep.mubr.bf16.mxu0 %v11618_v0  ;;  %1547 = vmatprep.mubr.bf16.mxu1 %v11618_v0 }
  0xa3   : > { %v6040_v31 = vpop.permute.xlu1 %434 }
  0xa4   : > { %11866 = vst [vmem:[#allocation12_spill] sm:$0xff] %v6040_v31 }
  0xa9   : > { %5195 = vmatmul.mubr.msk.bf16.vlgmr.msra.gmra.mrb[64].mxu0 %vm887_vm0, %v5693_v15  ;;  %5211 = vmatmul.mubr.msk.bf16.vlgmr.msra.gmra.mrb[64].mxu1 %vm887_vm0, %v5693_v15 }
  0xaa   : > { %1709 = vmatpush1.bf16.msra.mxu0 %v5421_v12  ;;  %1902 = vmatpush1.bf16.msra.mxu1 %v5424_v13 }
  0xab   : > { %1364 = vmatprep.mubr.bf16.mxu0 %v11618_v0  ;;  %1557 = vmatprep.mubr.bf16.mxu1 %v11618_v0 }
  0xac   : > { %1710 = vmatprep.subr.bf16.mxu0 %v5429_v14  ;;  %1903 = vmatprep.subr.bf16.mxu1 %v5432_v16 }
  0xae   : > { %1711 = vmatpush1.bf16.msra.mxu0 %v5427_v17  ;;  %1904 = vmatpush1.bf16.msra.mxu1 %v5430_v18 }
  0xaf   : > { %1712 = vmatprep.subr.bf16.mxu0 %v5435_v19  ;;  %1905 = vmatprep.subr.bf16.mxu1 %v5438_v20 }
  0xb1   : > { %5196 = vmatmul.mubr.msk.bf16.gmra.mrb[68].mxu0 %vm887_vm0, %v5716_v24  ;;  %5212 = vmatmul.mubr.msk.bf16.gmra.mrb[68].mxu1 %vm887_vm0, %v5716_v24  ;;  %v6016_v24 = vpop.permute.xlu0 %349 }
  0xb2   : > { %1374 = vmatprep.mubr.bf16.mxu0 %v11618_v0  ;;  %1567 = vmatprep.mubr.bf16.mxu1 %v11618_v0  ;;  %11860 = vst [vmem:[#allocation6_spill] sm:$0xff] %v6016_v24 }
  0xb3   : > { %1713 = vmatpush1.bf16.msra.mxu0 %v5433_v21  ;;  %1906 = vmatpush1.bf16.msra.mxu1 %v5436_v22 }
  0xb4   : > { %2094 = vmatprep.subr.bf16.mxu0 %v5441_v23  ;;  %2287 = vmatprep.subr.bf16.mxu1 %v5444_v25 }
  0xb5   : > { %v6022_v26 = vpop.permute.xlu0 %354 }
  0xb6   : > { %11861 = vst [vmem:[#allocation7_spill] sm:$0xff] %v6022_v26 }
  0xb9   : > { %5197 = vmatmul.mubr.msk.bf16.gmra.mrb[72].mxu0 %vm887_vm0, %v5743_v33  ;;  %5213 = vmatmul.mubr.msk.bf16.gmra.mrb[72].mxu1 %vm887_vm0, %v5743_v33  ;;  %v6028_v28 = vpop.permute.xlu0 %429  ;;  %v6050_v33 = vpop.permute.xlu1 %474 }
  0xba   : > { %1384 = vmatprep.mubr.bf16.mxu0 %v11618_v0  ;;  %1577 = vmatprep.mubr.bf16.mxu1 %v11618_v0  ;;  %11863 = vst [vmem:[#allocation9_spill] sm:$0xff] %v6028_v28  ;;  %11868 = vst [vmem:[#allocation14_spill] sm:$0xff] %v6050_v33 }
  0xbd   : > { %v6038_v30 = vpop.permute.xlu0 %469  ;;  %v6058_v35 = vpop.permute.xlu1 %399 }
  0xbe   : > { %11865 = vst [vmem:[#allocation11_spill] sm:$0xff] %v6038_v30  ;;  %11870 = vst [vmem:[#allocation16_spill] sm:$0xff] %v6058_v35 }
  0xc1   : > { %5198 = vmatmul.mubr.msk.bf16.gmra.mrb[76].mxu0 %vm887_vm0, %v5763_v37  ;;  %5214 = vmatmul.mubr.msk.bf16.gmra.mrb[76].mxu1 %vm887_vm0, %v5763_v37  ;;  %v6048_v32 = vpop.permute.xlu0 %359  ;;  %v6064_v37 = vpop.permute.xlu1 %479 }
  0xc2   : > { %1394 = vmatprep.mubr.bf16.mxu0 %v11618_v0  ;;  %1587 = vmatprep.mubr.bf16.mxu1 %v11618_v0  ;;  %11867 = vst [vmem:[#allocation13_spill] sm:$0xff] %v6048_v32  ;;  %11872 = vst [vmem:[#allocation18_spill] sm:$0xff] %v6064_v37 }
  0xc5   : > { %v6056_v34 = vpop.permute.xlu0 %439  ;;  %v6074_v39 = vpop.permute.xlu1 %404 }
  0xc6   : > { %11869 = vst [vmem:[#allocation15_spill] sm:$0xff] %v6056_v34  ;;  %11874 = vst [vmem:[#allocation20_spill] sm:$0xff] %v6074_v39 }
  0xc9   : > { %5199 = vmatmul.mubr.msk.bf16.gmra.mrb[80].mxu0 %vm887_vm0, %v5791_v45  ;;  %5215 = vmatmul.mubr.msk.bf16.gmra.mrb[80].mxu1 %vm887_vm0, %v5791_v45  ;;  %v6062_v36 = vpop.permute.xlu0 %364  ;;  %v6084_v41 = vpop.permute.xlu1 %484 }
  0xca   : > { %1404 = vmatprep.mubr.bf16.mxu0 %v11618_v0  ;;  %1597 = vmatprep.mubr.bf16.mxu1 %v11618_v0  ;;  %11871 = vst [vmem:[#allocation17_spill] sm:$0xff] %v6062_v36  ;;  %11876 = vst [vmem:[#allocation22_spill] sm:$0xff] %v6084_v41 }
  0xcd   : > { %v6072_v38 = vpop.permute.xlu0 %444  ;;  %v6094_v52 = vpop.permute.xlu1 %409 }
  0xce   : > { %11873 = vst [vmem:[#allocation19_spill] sm:$0xff] %v6072_v38  ;;  %11878 = vst [vmem:[#allocation24_spill] sm:$0xff] %v6094_v52 }
  0xd1   : > { %5200 = vmatmul.mubr.msk.bf16.gmra.mrb[84].mxu0 %vm887_vm0, %v5814_v50  ;;  %5216 = vmatmul.mubr.msk.bf16.gmra.mrb[84].mxu1 %vm887_vm0, %v5814_v50  ;;  %v6082_v40 = vpop.permute.xlu0 %369  ;;  %v6104_v62 = vpop.permute.xlu1 %489 }
  0xd2   : > { %1414 = vmatprep.mubr.bf16.mxu0 %v11618_v0  ;;  %1607 = vmatprep.mubr.bf16.mxu1 %v11618_v0  ;;  %11875 = vst [vmem:[#allocation21_spill] sm:$0xff] %v6082_v40  ;;  %11880 = vst [vmem:[#allocation26_spill] sm:$0xff] %v6104_v62 }
  0xd5   : > { %v6092_v51 = vpop.permute.xlu0 %449  ;;  %v6128_v14 = vpop.permute.xlu1 %414 }
  0xd6   : > { %11877 = vst [vmem:[#allocation23_spill] sm:$0xff] %v6092_v51  ;;  %11882 = vst [vmem:[#allocation28_spill] sm:$0xff] %v6128_v14 }
  0xd9   : > { %5201 = vmatmul.mubr.msk.bf16.gmra.mrb[88].mxu0 %vm887_vm0, %v5837_v55  ;;  %5217 = vmatmul.mubr.msk.bf16.gmra.mrb[88].mxu1 %vm887_vm0, %v5837_v55  ;;  %v6102_v61 = vpop.permute.xlu0 %374 }
  0xda   : > { %1424 = vmatprep.mubr.bf16.mxu0 %v11618_v0  ;;  %1617 = vmatprep.mubr.bf16.mxu1 %v11618_v0  ;;  %11879 = vst [vmem:[#allocation25_spill] sm:$0xff] %v6102_v61 }
  0xdd   : > { %v6126_v13 = vpop.permute.xlu0 %454 }
  0xde   : > { %11881 = vst [vmem:[#allocation27_spill] sm:$0xff] %v6126_v13 }
  0xe1   : > { %5202 = vmatmul.mubr.msk.bf16.gmra.mrb[92].mxu0 %vm887_vm0, %v5860_v60  ;;  %5218 = vmatmul.mubr.msk.bf16.gmra.mrb[92].mxu1 %vm887_vm0, %v5860_v60 }
  0xe2   : > { %1434 = vmatprep.mubr.bf16.mxu0 %v11618_v0  ;;  %1627 = vmatprep.mubr.bf16.mxu1 %v11618_v0 }
  0xe9   : > { %5203 = vmatmul.mubr.msk.bf16.gmra.mrb[96].mxu0 %vm887_vm0, %v5883_v2  ;;  %5219 = vmatmul.mubr.msk.bf16.gmra.mrb[96].mxu1 %vm887_vm0, %v5883_v2 }
  0xea   : > { %1444 = vmatprep.mubr.bf16.mxu0 %v11618_v0  ;;  %1637 = vmatprep.mubr.bf16.mxu1 %v11618_v0 }
  0xf1   : > { %5204 = vmatmul.mubr.msk.bf16.gmra.mrb[100].mxu0 %vm887_vm0, %v5897_v4  ;;  %5220 = vmatmul.mubr.msk.bf16.gmra.mrb[100].mxu1 %vm887_vm0, %v5897_v4 }
  0xf2   : > { %1454 = vmatprep.mubr.bf16.mxu0 %v11618_v0  ;;  %1647 = vmatprep.mubr.bf16.mxu1 %v11618_v0 }
  0xf9   : > { %5205 = vmatmul.mubr.msk.bf16.gmra.mrb[104].mxu0 %vm887_vm0, %v5911_v6  ;;  %5221 = vmatmul.mubr.msk.bf16.gmra.mrb[104].mxu1 %vm887_vm0, %v5911_v6 }
  0xfa   : > { %1464 = vmatprep.mubr.bf16.mxu0 %v11618_v0  ;;  %1657 = vmatprep.mubr.bf16.mxu1 %v11618_v0 }
  0xfc   : > { %v970_v42 = vpop.f32.mrb[0].mxu0  ;;  %v1163_v43 = vpop.f32.mrb[0].mxu1 }
  0xfd   : > { %v972_v44 = vpop.f32.mrb[1].mxu0  ;;  %v1165_v45 = vpop.f32.mrb[1].mxu1  ;;  %v6122_v12 = vadd.f32 %v1163_v43, %v6016_v24 }
  0xfe   : > { %v974_v46 = vpop.f32.mrb[2].mxu0  ;;  %v1167_v47 = vpop.f32.mrb[2].mxu1  ;;  %v6131_v16 = vadd.f32 %v972_v44, %v6016_v24  ;;  %v6134_v17 = vadd.f32 %v1165_v45, %v6016_v24 }
  0xff   : > { %v976_v48 = vpop.f32.mrb[3].mxu0  ;;  %v1169_v49 = vpop.f32.mrb[3].mxu1  ;;  %v6142_v20 = vadd.f32 %v974_v46, %v6022_v26  ;;  %v6148_v22 = vadd.f32 %v1167_v47, %v6022_v26 }
 0x100   : > { %v6145_v21 = vadd.f32 %v976_v48, %v6022_v26  ;;  %v6156_v43 = vadd.f32 %v1169_v49, %v6022_v26  ;;  %v2869_v26 = vmax.f32 %v6134_v17, 0.0 }
 0x101   : > { %5206 = vmatmul.mubr.msk.bf16.gmra.mrb[108].mxu0 %vm887_vm0, %v5922_v7  ;;  %5222 = vmatmul.mubr.msk.bf16.gmra.mrb[108].mxu1 %vm887_vm0, %v5922_v7 }
 0x102   : > { %1474 = vmatprep.mubr.bf16.mxu0 %v11618_v0  ;;  %1667 = vmatprep.mubr.bf16.mxu1 %v11618_v0 }
 0x104   : > { %v980_v53 = vpop.f32.mrb[4].mxu0  ;;  %v1173_v54 = vpop.f32.mrb[4].mxu1 }
 0x105   : > { %v982_v55 = vpop.f32.mrb[5].mxu0  ;;  %v1175_v56 = vpop.f32.mrb[5].mxu1  ;;  %v6159_v44 = vadd.f32 %v980_v53, %v6048_v32  ;;  %v6162_v45 = vadd.f32 %v1173_v54, %v6048_v32 }
 0x106   : > { %v984_v57 = vpop.f32.mrb[6].mxu0  ;;  %v1177_v58 = vpop.f32.mrb[6].mxu1  ;;  %v6169_v47 = vadd.f32 %v982_v55, %v6048_v32 }
 0x107   : > { %v986_v59 = vpop.f32.mrb[7].mxu0  ;;  %v1179_v60 = vpop.f32.mrb[7].mxu1  ;;  %v6172_v19 = vadd.f32 %v984_v57, %v6062_v36  ;;  %v6178_v49 = vadd.f32 %v1177_v58, %v6062_v36  ;;  %v2888_v58 = vmax.f32 %v6148_v22, 0.0 }
 0x108   : > { %v6187_v55 = vadd.f32 %v986_v59, %v6062_v36  ;;  %v6190_v57 = vadd.f32 %v1179_v60, %v6062_v36  ;;  %v2889_v59 = vmax.f32 %v6156_v43, 0.0  ;;  %v6214_v43 = vpop.permute.xlu0 %379  ;;  %v6216_v60 = vpop.permute.xlu1 %494 }
 0x109   : > { %5207 = vmatmul.mubr.msk.bf16.gmra.mrb[112].mxu0 %vm887_vm0, %v5933_v8  ;;  %5223 = vmatmul.mubr.msk.bf16.gmra.mrb[112].mxu1 %vm887_vm0, %v5933_v8  ;;  %v6115_v8 = vadd.f32 %v970_v42, %v6016_v24  ;;  %v6175_v42 = vadd.f32 %v1175_v56, %v6048_v32  ;;  %v2886_v56 = vmax.f32 %v6142_v20, 0.0  ;;  %v11883_v20 = vmov 0   ;;  %11884 = vst [vmem:[#allocation29_spill] sm:$0xff] %v6214_v43  ;;  %11885 = vst [vmem:[#allocation30_spill] sm:$0xff] %v6216_v60 }
 0x10a   : > { %1484 = vmatprep.mubr.bf16.mxu0 %v11618_v0  ;;  %1677 = vmatprep.mubr.bf16.mxu1 %v11618_v0 }
 0x10c   : > { %v990_v63 = vpop.f32.mrb[8].mxu0  ;;  %v1183_v1 = vpop.f32.mrb[8].mxu1 }
 0x10d   : > { %v992_v2 = vpop.f32.mrb[9].mxu0  ;;  %v1185_v3 = vpop.f32.mrb[9].mxu1  ;;  %v6196_v24 = vadd.f32 %v990_v63, %v6082_v40  ;;  %v6206_v17 = vadd.f32 %v1183_v1, %v6082_v40 }
 0x10e   : > { %v6106_v4 = vpop.f32.mrb[10].mxu0  ;;  %v6108_v5 = vpop.f32.mrb[10].mxu1  ;;  %v6221_v36 = vadd.f32 %v992_v2, %v6082_v40  ;;  %v6224_v62 = vadd.f32 %v1185_v3, %v6082_v40 }
 0x10f   : > { %v6110_v6 = vpop.f32.mrb[11].mxu0  ;;  %v6112_v7 = vpop.f32.mrb[11].mxu1  ;;  %v6236_v3 = vadd.f32 %v6108_v5, %v6102_v61 }
 0x111   : > { %5208 = vmatmul.mubr.msk.bf16.gmra.mrb[116].mxu0 %vm887_vm0, %v5944_v9  ;;  %5224 = vmatmul.mubr.msk.bf16.gmra.mrb[116].mxu1 %vm887_vm0, %v5944_v9 }
 0x112   : > { %1494 = vmatprep.mubr.bf16.mxu0 %v11618_v0  ;;  %1687 = vmatprep.mubr.bf16.mxu1 %v11618_v0  ;;  %v2867_v0 = vmax.f32 %v6131_v16, 0.0 }
 0x114   : > { %v6136_v18 = vpop.f32.mrb[12].mxu0  ;;  %v6138_v9 = vpop.f32.mrb[12].mxu1 }
 0x115   : > { %v6150_v23 = vpop.f32.mrb[13].mxu0  ;;  %v6152_v25 = vpop.f32.mrb[13].mxu1 }
 0x116   : > { %v6164_v46 = vpop.f32.mrb[14].mxu0  ;;  %v6166_v48 = vpop.f32.mrb[14].mxu1 }
 0x117   : > { %v6180_v53 = vpop.f32.mrb[15].mxu0  ;;  %v6182_v54 = vpop.f32.mrb[15].mxu1 }
 0x119   : > { %5209 = vmatmul.mubr.msk.bf16.gmra.mrb[120].mxu0 %vm887_vm0, %v5955_v10  ;;  %5225 = vmatmul.mubr.msk.bf16.gmra.mrb[120].mxu1 %vm887_vm0, %v5955_v10  ;;  %v6229_v10 = vadd.f32 %v6106_v4, %v6102_v61 }
 0x11a   : > { %1504 = vmatprep.mubr.bf16.mxu0 %v11883_v20  ;;  %1697 = vmatprep.mubr.bf16.mxu1 %v11883_v20 }
 0x11c   : > { %v1010_v63 = vpop.f32.mrb[16].mxu0  ;;  %v1203_v22 = vpop.f32.mrb[16].mxu1 }
 0x11d   : > { %v1011_v60 = vadd.f32 %v1010_v63, %v6024_v27  ;;  %v1204_v16 = vadd.f32 %v1203_v22, %v6024_v27  ;;  %v1012_v41 = vpop.f32.mrb[17].mxu0  ;;  %v1205_v1 = vpop.f32.mrb[17].mxu1 }
 0x11e   : > { %v1013_v40 = vadd.f32 %v1012_v41, %v6024_v27  ;;  %v1206_v32 = vadd.f32 %v1205_v1, %v6024_v27  ;;  %v1014_v37 = vpop.f32.mrb[18].mxu0  ;;  %v1207_v33 = vpop.f32.mrb[18].mxu1  ;;  %v11886_v41 = vmax.f32 %v6115_v8, 0.0  ;;  %v11887_v1 = vmax.f32 %v6122_v12, 0.0 }
 0x11f   : > { %v3026_v4 = vmax.f32 %v1011_v60, 0.0  ;;  %v3028_v30 = vmax.f32 %v1204_v16, 0.0  ;;  %v1015_v63 = vadd.f32 %v1014_v37, %v6030_v29  ;;  %v1208_v22 = vadd.f32 %v1207_v33, %v6030_v29  ;;  %v1016_v13 = vpop.f32.mrb[19].mxu0  ;;  %v1209_v51 = vpop.f32.mrb[19].mxu1 }
 0x120   : > { %v3027_v38 = vmax.f32 %v1013_v40, 0.0  ;;  %v3029_v2 = vmax.f32 %v1206_v32, 0.0  ;;  %v1017_v34 = vadd.f32 %v1016_v13, %v6030_v29  ;;  %v1210_v5 = vadd.f32 %v1209_v51, %v6030_v29  ;;  %v6267_v12 = vpop.permute.xlu0 %459 }
 0x121   : > { %v6246_v50 = vmax.f32 %v11886_v41, %v3026_v4  ;;  %v6250_v60 = vmax.f32 %v11887_v1, %v3028_v30  ;;  %v3046_v16 = vmax.f32 %v1015_v63, 0.0  ;;  %v3048_v37 = vmax.f32 %v1208_v22, 0.0  ;;  %5210 = vmatmul.mubr.msk.bf16.gmra.mrb[124].mxu0 %vm887_vm0, %v5966_v11  ;;  %5226 = vmatmul.mubr.msk.bf16.gmra.mrb[124].mxu1 %vm887_vm0, %v5966_v11  ;;  %11888 = vst [vmem:[#allocation31_spill] sm:$0xff] %v6267_v12  ;;  %v6273_v11 = vpop.permute.xlu1 %419 }
 0x122   : > { %v6256_v32 = vmax.f32 %v2867_v0, %v3027_v38  ;;  %v6258_v33 = vmax.f32 %v2869_v26, %v3029_v2  ;;  %v3047_v40 = vmax.f32 %v1017_v34, 0.0  ;;  %v3049_v51 = vmax.f32 %v1210_v5, 0.0  ;;  %1740 = vmatprep.mubr.bf16.mxu0 %v11883_v20  ;;  %1933 = vmatprep.mubr.bf16.mxu1 %v11883_v20  ;;  %11889 = vst [vmem:[#allocation32_spill] sm:$0xff] %v6273_v11 }
 0x123   : > { %v6265_v8 = vadd.f32 %v6110_v6, %v6102_v61  ;;  %v6269_v13 = vmax.f32 %v2886_v56, %v3046_v16  ;;  %v6271_v0 = vmax.f32 %v2888_v58, %v3048_v37  ;;  %v6278_v34 = vadd.f32 %v6112_v7, %v6102_v61 }
 0x124   : > { %v11890_v38 = vmax.f32 %v6145_v21, 0.0  ;;  %v6284_v6 = vmax.f32 %v2889_v59, %v3049_v51  ;;  %v1020_v56 = vpop.f32.mrb[20].mxu0  ;;  %v1213_v4 = vpop.f32.mrb[20].mxu1  ;;  %v6289_v63 = vadd.f32 %v6136_v18, %v6214_v43  ;;  %v6295_v41 = vadd.f32 %v6150_v23, %v6214_v43  ;;  %v5442_v51 = vld [vmem:[%s5674_s9 + $0x38] ss:$80 sps:$4 sm:$0xff]  }
 0x125   : > { %v1021_v22 = vadd.f32 %v1020_v56, %v6058_v35  ;;  %v1214_v7 = vadd.f32 %v1213_v4, %v6058_v35  ;;  %v1022_v5 = vpop.f32.mrb[21].mxu0  ;;  %v1215_v21 = vpop.f32.mrb[21].mxu1  ;;  %v6299_v59 = vadd.f32 %v6138_v9, %v6214_v43 }
 0x126   : > { %v6282_v2 = vmax.f32 %v11890_v38, %v3047_v40  ;;  %v1023_v1 = vadd.f32 %v1022_v5, %v6058_v35  ;;  %v1216_v18 = vadd.f32 %v1215_v21, %v6058_v35  ;;  %v1024_v16 = vpop.f32.mrb[22].mxu0  ;;  %v1217_v37 = vpop.f32.mrb[22].mxu1  ;;  %v5439_v40 = vld [vmem:[%s5674_s9 + $0x30] ss:$80 sps:$4 sm:$0xff]   ;;  %v5447_v21 = vld [vmem:[%s5674_s9 + $0xd4] ss:$80 sps:$4 sm:$0xff]  }
 0x127   : > { %v3066_v38 = vmax.f32 %v1021_v22, 0.0  ;;  %v3068_v56 = vmax.f32 %v1214_v7, 0.0  ;;  %v1025_v4 = vadd.f32 %v1024_v16, %v6074_v39  ;;  %v1218_v23 = vadd.f32 %v1217_v37, %v6074_v39  ;;  %v1026_v58 = vpop.f32.mrb[23].mxu0  ;;  %v1219_v26 = vpop.f32.mrb[23].mxu1  ;;  %v5450_v35 = vld [vmem:[%s5674_s9 + $0xdc] ss:$80 sps:$4 sm:$0xff]  }
 0x128   : > { %v3067_v9 = vmax.f32 %v1023_v1, 0.0  ;;  %v3069_v30 = vmax.f32 %v1216_v18, 0.0  ;;  %v1027_v5 = vadd.f32 %v1026_v58, %v6074_v39  ;;  %v1220_v29 = vadd.f32 %v1219_v26, %v6074_v39  ;;  %v6311_v27 = vpop.permute.xlu0 %384 }
 0x129   : > { %11891 = vst [vmem:[#allocation33_spill] sm:$0xff] %v6311_v27  ;;  %v11892_v22 = vmax.f32 %v6159_v44, 0.0  ;;  %v11893_v16 = vmax.f32 %v6162_v45, 0.0  ;;  %v3086_v1 = vmax.f32 %v1025_v4, 0.0  ;;  %v3088_v18 = vmax.f32 %v1218_v23, 0.0  ;;  %5227 = vmatmul.mubr.msk.bf16.vlgmr.msra.gmra.mrb[128].mxu0 %vm887_vm0, %v5693_v15  ;;  %5243 = vmatmul.mubr.msk.bf16.vlgmr.msra.gmra.mrb[128].mxu1 %vm887_vm0, %v5693_v15 }
 0x12a   : > { %v11894_v26 = vmax.f32 %v6169_v47, 0.0  ;;  %v11895_v44 = vmax.f32 %v6175_v42, 0.0  ;;  %v3087_v45 = vmax.f32 %v1027_v5, 0.0  ;;  %2095 = vmatpush1.bf16.msra.mxu0 %v5439_v40  ;;  %2288 = vmatpush1.bf16.msra.mxu1 %v5442_v51  ;;  %v5445_v4 = vld [vmem:[%s5674_s9 + $0xd0] ss:$80 sps:$4 sm:$0xff]   ;;  %v6338_v15 = vadd.f32 %v6152_v25, %v6214_v43 }
 0x12b   : > { %v6315_v7 = vmax.f32 %v11892_v22, %v3066_v38  ;;  %v6319_v37 = vmax.f32 %v11893_v16, %v3068_v56  ;;  %v3089_v56 = vmax.f32 %v1220_v29, 0.0  ;;  %v5448_v23 = vld [vmem:[%s5674_s9 + $0xd8] ss:$80 sps:$4 sm:$0xff]   ;;  %v11896_v47 = vmax.f32 %v6172_v19, 0.0  ;;  %1750 = vmatprep.mubr.bf16.mxu0 %v11883_v20  ;;  %1943 = vmatprep.mubr.bf16.mxu1 %v11883_v20  ;;  %v6350_v29 = vpop.permute.xlu1 %499  ;;  %v5453_v40 = vld [vmem:[%s5674_s9 + $0x174] ss:$80 sps:$4 sm:$0xff]  }
 0x12c   : > { %v6327_v58 = vmax.f32 %v11894_v26, %v3067_v9  ;;  %v6331_v38 = vmax.f32 %v11895_v44, %v3069_v30  ;;  %v11897_v42 = vmax.f32 %v6178_v49, 0.0  ;;  %11898 = vst [vmem:[#allocation34_spill] sm:$0xff] %v6350_v29  ;;  %v5456_v51 = vld [vmem:[%s5674_s9 + $0x17c] ss:$80 sps:$4 sm:$0xff]   ;;  %v2967_v5 = vmax.f32 %v6265_v8, 0.0  ;;  %v1223_v26 = vpop.f32.mrb[24].mxu1  ;;  %2096 = vmatprep.subr.bf16.mxu0 %v5447_v21  ;;  %2289 = vmatprep.subr.bf16.mxu1 %v5450_v35 }
 0x12d   : > { %v6342_v9 = vmax.f32 %v11896_v47, %v3086_v1  ;;  %v6357_v25 = vadd.f32 %v6164_v46, %v6311_v27  ;;  %v11899_v19 = vmax.f32 %v6187_v55, 0.0  ;;  %v11900_v49 = vmax.f32 %v6190_v57, 0.0 }
 0x12e   : > { %v6346_v30 = vmax.f32 %v11897_v42, %v3088_v18  ;;  %v1030_v18 = vpop.f32.mrb[24].mxu0  ;;  %v6369_v8 = vadd.f32 %v6180_v53, %v6311_v27  ;;  %v6373_v46 = vadd.f32 %v6166_v48, %v6311_v27  ;;  %v1224_v44 = vadd.f32 %v1223_v26, %v6094_v52  ;;  %2097 = vmatpush1.bf16.msra.mxu0 %v5445_v4  ;;  %v5451_v42 = vld [vmem:[%s5674_s9 + $0x170] ss:$80 sps:$4 sm:$0xff]  }
 0x12f   : > { %v6361_v16 = vmax.f32 %v11899_v19, %v3087_v45  ;;  %v6365_v1 = vmax.f32 %v11900_v49, %v3089_v56  ;;  %v1031_v55 = vadd.f32 %v1030_v18, %v6094_v52  ;;  %v1032_v57 = vpop.f32.mrb[25].mxu0  ;;  %v1225_v45 = vpop.f32.mrb[25].mxu1  ;;  %v2969_v56 = vmax.f32 %v6278_v34, 0.0  ;;  %2290 = vmatpush1.bf16.msra.mxu1 %v5448_v23  ;;  %2098 = vmatprep.subr.bf16.mxu0 %v5453_v40  ;;  %v5459_v23 = vld [vmem:[%s5674_s9 + $0x44] ss:$80 sps:$4 sm:$0xff]  }
 0x130   : > { %v6380_v35 = vadd.f32 %v6182_v54, %v6311_v27  ;;  %v1033_v53 = vadd.f32 %v1032_v57, %v6094_v52  ;;  %v1226_v21 = vadd.f32 %v1225_v45, %v6094_v52  ;;  %v1034_v47 = vpop.f32.mrb[26].mxu0  ;;  %v1227_v48 = vpop.f32.mrb[26].mxu1  ;;  %v3108_v49 = vmax.f32 %v1224_v44, 0.0  ;;  %v5454_v54 = vld [vmem:[%s5674_s9 + $0x178] ss:$80 sps:$4 sm:$0xff]   ;;  %2291 = vmatprep.subr.bf16.mxu1 %v5456_v51 }
 0x131   : > { %v3106_v19 = vmax.f32 %v1031_v55, 0.0  ;;  %v1035_v18 = vadd.f32 %v1034_v47, %v6128_v14  ;;  %v1228_v34 = vadd.f32 %v1227_v48, %v6128_v14  ;;  %v1036_v26 = vpop.f32.mrb[27].mxu0  ;;  %v1229_v22 = vpop.f32.mrb[27].mxu1  ;;  %v11901_v55 = vmax.f32 %v6196_v24, 0.0  ;;  %v5475_v51 = vld [vmem:[%s11613_s1 + $0x8] sm:$0xff]  }
 0x132   : > { %v3107_v57 = vmax.f32 %v1033_v53, 0.0  ;;  %v3109_v39 = vmax.f32 %v1226_v21, 0.0  ;;  %v1037_v45 = vadd.f32 %v1036_v26, %v6128_v14  ;;  %v1230_v4 = vadd.f32 %v1229_v22, %v6128_v14  ;;  %5228 = vmatmul.mubr.msk.bf16.gmra.mrb[132].mxu0 %vm887_vm0, %v5475_v51  ;;  %5244 = vmatmul.mubr.msk.bf16.gmra.mrb[132].mxu1 %vm887_vm0, %v5475_v51 }
 0x133   : > { %v6393_v44 = vmax.f32 %v11901_v55, %v3106_v19  ;;  %v11903_v47 = vmax.f32 %v6206_v17, 0.0  ;;  %v3126_v52 = vmax.f32 %v1035_v18, 0.0  ;;  %v3128_v40 = vmax.f32 %v1228_v34, 0.0  ;;  %1760 = vmatprep.mubr.bf16.mxu0 %v11883_v20  ;;  %1953 = vmatprep.mubr.bf16.mxu1 %v11883_v20 }
 0x134   : > { %v11905_v22 = vmax.f32 %v6221_v36, 0.0  ;;  %v11907_v24 = vmax.f32 %v6224_v62, 0.0  ;;  %v3127_v17 = vmax.f32 %v1037_v45, 0.0  ;;  %v3129_v19 = vmax.f32 %v1230_v4, 0.0  ;;  %2099 = vmatpush1.bf16.msra.mxu0 %v5451_v42  ;;  %2292 = vmatpush1.bf16.msra.mxu1 %v5454_v54 }
 0x135   : > { %11902 = vst [vmem:[#allocation35_spill] sm:$0xff] %v6393_v44  ;;  %v6397_v48 = vmax.f32 %v11903_v47, %v3108_v49  ;;  %v5462_v49 = vld [vmem:[%s5674_s9 + $0x4c] ss:$80 sps:$4 sm:$0xff]   ;;  %v2986_v18 = vmax.f32 %v6289_v63, 0.0  ;;  %v2988_v34 = vmax.f32 %v6299_v59, 0.0  ;;  %v11909_v26 = vmax.f32 %v6229_v10, 0.0  ;;  %2480 = vmatprep.subr.bf16.mxu0 %v5459_v23 }
 0x136   : > { %v6406_v53 = vmax.f32 %v11905_v22, %v3107_v57  ;;  %v6410_v21 = vmax.f32 %v11907_v24, %v3109_v39  ;;  %v11911_v57 = vmax.f32 %v6236_v3, 0.0  ;;  %v6425_v39 = vpop.permute.xlu1 %424  ;;  %v2987_v45 = vmax.f32 %v6295_v41, 0.0  ;;  %v1040_v59 = vpop.f32.mrb[28].mxu0  ;;  %2673 = vmatprep.subr.bf16.mxu1 %v5462_v49 }
 0x137   : > { %11904 = vst [vmem:[#allocation36_spill] sm:$0xff] %v6397_v48  ;;  %v6419_v36 = vmax.f32 %v11909_v26, %v3126_v52  ;;  %11913 = vst [vmem:[#allocation41_spill] sm:$0xff] %v6425_v39  ;;  %v2989_v4 = vmax.f32 %v6338_v15, 0.0  ;;  %v6429_v55 = vmax.f32 %v2967_v5, %v3127_v17  ;;  %v6431_v63 = vmax.f32 %v2969_v56, %v3129_v19  ;;  %v1233_v10 = vpop.f32.mrb[28].mxu1  ;;  %v1042_v54 = vpop.f32.mrb[29].mxu0 }
 0x138   : > { %11906 = vst [vmem:[#allocation37_spill] sm:$0xff] %v6406_v53  ;;  %11908 = vst [vmem:[#allocation38_spill] sm:$0xff] %v6410_v21  ;;  %v6423_v62 = vmax.f32 %v11911_v57, %v3128_v40  ;;  %v3006_v52 = vmax.f32 %v6357_v25, 0.0  ;;  %v3008_v3 = vmax.f32 %v6373_v46, 0.0  ;;  %v1041_v47 = vadd.f32 %v1040_v59, %v6273_v11  ;;  %v1235_v41 = vpop.f32.mrb[29].mxu1  ;;  %v1044_v23 = vpop.f32.mrb[30].mxu0 }
 0x139   : > { %11910 = vst [vmem:[#allocation39_spill] sm:$0xff] %v6419_v36  ;;  %11914 = vst [vmem:[#allocation42_spill] sm:$0xff] %v6429_v55  ;;  %v1234_v42 = vadd.f32 %v1233_v10, %v6273_v11  ;;  %v3007_v15 = vmax.f32 %v6369_v8, 0.0  ;;  %v3009_v5 = vmax.f32 %v6380_v35, 0.0  ;;  %v1043_v56 = vadd.f32 %v1042_v54, %v6273_v11  ;;  %v1237_v51 = vpop.f32.mrb[30].mxu1  ;;  %v1046_v17 = vpop.f32.mrb[31].mxu0 }
 0x13a   : > { %11912 = vst [vmem:[#allocation40_spill] sm:$0xff] %v6423_v62  ;;  %11915 = vst [vmem:[#allocation43_spill] sm:$0xff] %v6431_v63  ;;  %v1236_v40 = vadd.f32 %v1235_v41, %v6273_v11  ;;  %v3146_v22 = vmax.f32 %v1041_v47, 0.0  ;;  %v1045_v46 = vadd.f32 %v1044_v23, %v6425_v39  ;;  %v1238_v24 = vadd.f32 %v1237_v51, %v6425_v39  ;;  %v1239_v19 = vpop.f32.mrb[31].mxu1  ;;  %v5476_v47 = vld [vmem:[%s11613_s1 + $0x10] sm:$0xff]  }
 0x13b   : > { %v3148_v25 = vmax.f32 %v1234_v42, 0.0  ;;  %v3147_v49 = vmax.f32 %v1043_v56, 0.0  ;;  %v1047_v8 = vadd.f32 %v1046_v17, %v6425_v39  ;;  %v1240_v35 = vadd.f32 %v1239_v19, %v6425_v39  ;;  %5229 = vmatmul.mubr.msk.bf16.gmra.mrb[136].mxu0 %vm887_vm0, %v5476_v47  ;;  %5245 = vmatmul.mubr.msk.bf16.gmra.mrb[136].mxu1 %vm887_vm0, %v5476_v47  ;;  %v11929_v62 = vld [vmem:[#allocation27_spill] sm:$0xff] }
 0x13c   : > { %v3149_v26 = vmax.f32 %v1236_v40, 0.0  ;;  %v6445_v57 = vmax.f32 %v2986_v18, %v3146_v22  ;;  %v3166_v10 = vmax.f32 %v1045_v46, 0.0  ;;  %v3168_v54 = vmax.f32 %v1238_v24, 0.0  ;;  %1770 = vmatprep.mubr.bf16.mxu0 %v11883_v20  ;;  %1963 = vmatprep.mubr.bf16.mxu1 %v11883_v20  ;;  %v1050_v22 = vpop.f32.mrb[32].mxu0  ;;  %v11936_v53 = vld [vmem:[#allocation11_spill] sm:$0xff] }
 0x13d   : > { %v6447_v59 = vmax.f32 %v2988_v34, %v3148_v25  ;;  %v6454_v42 = vmax.f32 %v2987_v45, %v3147_v49  ;;  %v3167_v56 = vmax.f32 %v1047_v8, 0.0  ;;  %v3169_v40 = vmax.f32 %v1240_v35, 0.0  ;;  %v1243_v25 = vpop.f32.mrb[32].mxu1  ;;  %v1052_v45 = vpop.f32.mrb[33].mxu0  ;;  %v5477_v49 = vld [vmem:[%s11613_s1 + $0x18] sm:$0xff]  }
 0x13e   : > { %11916 = vst [vmem:[#allocation44_spill] sm:$0xff] %v6445_v57  ;;  %v6456_v41 = vmax.f32 %v2989_v4, %v3149_v26  ;;  %v6460_v18 = vmax.f32 %v3006_v52, %v3166_v10  ;;  %v6462_v34 = vmax.f32 %v3008_v3, %v3168_v54  ;;  %v1245_v46 = vpop.f32.mrb[33].mxu1  ;;  %v1054_v4 = vpop.f32.mrb[34].mxu0  ;;  %v5478_v54 = vld [vmem:[%s11613_s1 + $0x20] sm:$0xff]   ;;  %v6483_v14 = vadd.f32 %v1050_v22, %v6028_v28 }
 0x13f   : > { %11917 = vst [vmem:[#allocation45_spill] sm:$0xff] %v6447_v59  ;;  %11918 = vst [vmem:[#allocation46_spill] sm:$0xff] %v6454_v42  ;;  %v6464_v23 = vmax.f32 %v3007_v15, %v3167_v56  ;;  %v6466_v51 = vmax.f32 %v3009_v5, %v3169_v40  ;;  %v1247_v24 = vpop.f32.mrb[34].mxu1  ;;  %v1056_v17 = vpop.f32.mrb[35].mxu0  ;;  %v6486_v61 = vadd.f32 %v1052_v45, %v6028_v28  ;;  %v11926_v59 = vld [vmem:[#allocation19_spill] sm:$0xff] }
 0x140   : > { %11919 = vst [vmem:[#allocation47_spill] sm:$0xff] %v6456_v41  ;;  %11920 = vst [vmem:[#allocation48_spill] sm:$0xff] %v6460_v18  ;;  %v1249_v19 = vpop.f32.mrb[35].mxu1  ;;  %v6501_v22 = vadd.f32 %v1247_v24, %v6040_v31  ;;  %v11924_v18 = vld [vmem:[#allocation5_spill] sm:$0xff] }
 0x141   : > { %11921 = vst [vmem:[#allocation49_spill] sm:$0xff] %v6462_v34  ;;  %11922 = vst [vmem:[#allocation50_spill] sm:$0xff] %v6464_v23  ;;  %v6495_v23 = vadd.f32 %v1245_v46, %v6028_v28  ;;  %v6498_v34 = vadd.f32 %v1056_v17, %v6040_v31  ;;  %v6508_v45 = vadd.f32 %v1249_v19, %v6040_v31 }
 0x142   : > { %11923 = vst [vmem:[#allocation51_spill] sm:$0xff] %v6466_v51  ;;  %v6492_v51 = vadd.f32 %v1243_v25, %v6028_v28 }
 0x143   : > { %5230 = vmatmul.mubr.msk.bf16.gmra.mrb[140].mxu0 %vm887_vm0, %v5477_v49  ;;  %5246 = vmatmul.mubr.msk.bf16.gmra.mrb[140].mxu1 %vm887_vm0, %v5477_v49 }
 0x144   : > { %1780 = vmatprep.mubr.bf16.mxu0 %v11883_v20  ;;  %1973 = vmatprep.mubr.bf16.mxu1 %v11883_v20  ;;  %v1060_v52 = vpop.f32.mrb[36].mxu0  ;;  %v1253_v3 = vpop.f32.mrb[36].mxu1 }
 0x145   : > { %v1062_v15 = vpop.f32.mrb[37].mxu0  ;;  %v1255_v5 = vpop.f32.mrb[37].mxu1 }
 0x146   : > { %v1064_v26 = vpop.f32.mrb[38].mxu0  ;;  %v1257_v8 = vpop.f32.mrb[38].mxu1 }
 0x147   : > { %v1066_v35 = vpop.f32.mrb[39].mxu0  ;;  %v1259_v10 = vpop.f32.mrb[39].mxu1  ;;  %v6536_v57 = vadd.f32 %v1064_v26, %v11926_v59  ;;  %v6549_v63 = vadd.f32 %v1257_v8, %v11926_v59 }
 0x148   : > { %v6552_v24 = vadd.f32 %v1259_v10, %v11926_v59 }
 0x14b   : > { %5231 = vmatmul.mubr.msk.bf16.gmra.mrb[144].mxu0 %vm887_vm0, %v5478_v54  ;;  %5247 = vmatmul.mubr.msk.bf16.gmra.mrb[144].mxu1 %vm887_vm0, %v5478_v54  ;;  %v6489_v54 = vadd.f32 %v1054_v4, %v6040_v31  ;;  %v11925_v31 = vld [vmem:[#allocation15_spill] sm:$0xff] }
 0x14c   : > { %1790 = vmatprep.mubr.bf16.mxu0 %v11883_v20  ;;  %1983 = vmatprep.mubr.bf16.mxu1 %v11883_v20  ;;  %v1070_v47 = vpop.f32.mrb[40].mxu0  ;;  %v1263_v56 = vpop.f32.mrb[40].mxu1  ;;  %v6522_v42 = vadd.f32 %v1060_v52, %v11925_v31  ;;  %v6525_v25 = vadd.f32 %v1253_v3, %v11925_v31  ;;  %v6533_v17 = vadd.f32 %v1062_v15, %v11925_v31  ;;  %v11927_v15 = vld [vmem:[#allocation23_spill] sm:$0xff] }
 0x14d   : > { %v1072_v40 = vpop.f32.mrb[41].mxu0  ;;  %v1265_v49 = vpop.f32.mrb[41].mxu1  ;;  %v6546_v3 = vadd.f32 %v1066_v35, %v11926_v59  ;;  %v6555_v55 = vadd.f32 %v1070_v47, %v11927_v15  ;;  %v6568_v35 = vadd.f32 %v1263_v56, %v11927_v15 }
 0x14e   : > { %v1074_v39 = vpop.f32.mrb[42].mxu0  ;;  %v1267_v11 = vpop.f32.mrb[42].mxu1  ;;  %v6571_v8 = vadd.f32 %v1265_v49, %v11927_v15 }
 0x14f   : > { %v1076_v27 = vpop.f32.mrb[43].mxu0  ;;  %v1269_v43 = vpop.f32.mrb[43].mxu1  ;;  %v6565_v36 = vadd.f32 %v1074_v39, %v11929_v62  ;;  %11931 = vst [vmem:[#allocation53_spill] sm:$0xff] %v6568_v35  ;;  %v6579_v29 = vadd.f32 %v1267_v11, %v11929_v62  ;;  %v5479_v39 = vld [vmem:[%s11613_s1 + $0x30] sm:$0xff]  }
 0x150   : > { %11932 = vst [vmem:[#allocation54_spill] sm:$0xff] %v6571_v8  ;;  %v6576_v59 = vadd.f32 %v1076_v27, %v11929_v62  ;;  %v6590_v27 = vadd.f32 %v1269_v43, %v11929_v62  ;;  %v11937_v11 = vld [vmem:[#allocation14_spill] sm:$0xff] }
 0x151   : > { %11930 = vst [vmem:[#allocation52_spill] sm:$0xff] %v6565_v36  ;;  %11934 = vst [vmem:[#allocation56_spill] sm:$0xff] %v6579_v29 }
 0x152   : > { %11933 = vst [vmem:[#allocation55_spill] sm:$0xff] %v6576_v59  ;;  %11935 = vst [vmem:[#allocation57_spill] sm:$0xff] %v6590_v27 }
 0x153   : > { %5232 = vmatmul.mubr.msk.bf16.gmra.mrb[148].mxu0 %vm887_vm0, %v11924_v18  ;;  %5248 = vmatmul.mubr.msk.bf16.gmra.mrb[148].mxu1 %vm887_vm0, %v11924_v18  ;;  %v6539_v18 = vadd.f32 %v1255_v5, %v11925_v31  ;;  %v6562_v31 = vadd.f32 %v1072_v40, %v11927_v15 }
 0x154   : > { %1800 = vmatprep.mubr.bf16.mxu0 %v11883_v20  ;;  %1993 = vmatprep.mubr.bf16.mxu1 %v11883_v20  ;;  %v1080_v28 = vpop.f32.mrb[44].mxu0  ;;  %v6517_v41 = vpop.f32.mrb[44].mxu1 }
 0x155   : > { %v6527_v46 = vpop.f32.mrb[45].mxu0  ;;  %v6529_v4 = vpop.f32.mrb[45].mxu1  ;;  %11928 = vst [vmem:[#allocation5_spill] sm:$0xff] %v6562_v31  ;;  %v6608_v40 = vadd.f32 %v1080_v28, %v6267_v12 }
 0x156   : > { %v6541_v52 = vpop.f32.mrb[46].mxu0  ;;  %v6543_v19 = vpop.f32.mrb[46].mxu1 }
 0x157   : > { %v6557_v26 = vpop.f32.mrb[47].mxu0  ;;  %v6559_v5 = vpop.f32.mrb[47].mxu1 }
 0x15b   : > { %5233 = vmatmul.mubr.msk.bf16.gmra.mrb[152].mxu0 %vm887_vm0, %v5479_v39  ;;  %5249 = vmatmul.mubr.msk.bf16.gmra.mrb[152].mxu1 %vm887_vm0, %v5479_v39 }
 0x15c   : > { %1810 = vmatprep.mubr.bf16.mxu0 %v11883_v20  ;;  %2003 = vmatprep.mubr.bf16.mxu1 %v11883_v20  ;;  %v1090_v62 = vpop.f32.mrb[48].mxu0  ;;  %v1283_v15 = vpop.f32.mrb[48].mxu1 }
 0x15d   : > { %v1091_v47 = vadd.f32 %v1090_v62, %v11936_v53  ;;  %v1284_v10 = vadd.f32 %v1283_v15, %v11936_v53  ;;  %v1092_v48 = vpop.f32.mrb[49].mxu0  ;;  %v1285_v39 = vpop.f32.mrb[49].mxu1 }
 0x15e   : > { %v1093_v49 = vadd.f32 %v1092_v48, %v11936_v53  ;;  %v1286_v43 = vadd.f32 %v1285_v39, %v11936_v53  ;;  %v1094_v36 = vpop.f32.mrb[50].mxu0  ;;  %v1287_v8 = vpop.f32.mrb[50].mxu1  ;;  %v11938_v48 = vmax.f32 %v6483_v14, 0.0  ;;  %v11939_v39 = vmax.f32 %v6492_v51, 0.0  ;;  %v4483_v14 = vld [vmem:[%s11615_s3 + $0x500] sm:$0xff] }
 0x15f   : > { %v3346_v21 = vmax.f32 %v1091_v47, 0.0  ;;  %v3348_v59 = vmax.f32 %v1284_v10, 0.0  ;;  %v1095_v29 = vadd.f32 %v1094_v36, %v11937_v11  ;;  %v1288_v62 = vadd.f32 %v1287_v8, %v11937_v11  ;;  %v1096_v15 = vpop.f32.mrb[51].mxu0  ;;  %v1289_v31 = vpop.f32.mrb[51].mxu1  ;;  %v5480_v36 = vld [vmem:[%s11613_s1 + $0x38] sm:$0xff]  }
 0x160   : > { %v3347_v44 = vmax.f32 %v1093_v49, 0.0  ;;  %v3349_v35 = vmax.f32 %v1286_v43, 0.0  ;;  %v1097_v56 = vadd.f32 %v1096_v15, %v11937_v11  ;;  %v1290_v28 = vadd.f32 %v1289_v31, %v11937_v11  ;;  %v3986_v31 = vld [vmem:[%s11615_s3] sm:$0xff]  ;;  %v6637_v43 = vpop.permute.xlu0 %464 }
 0x161   : > { %v3666_v27 = vmax.f32 %v11938_v48, %v3346_v21  ;;  %v3668_v53 = vmax.f32 %v11939_v39, %v3348_v59  ;;  %v3366_v47 = vmax.f32 %v1095_v29, 0.0  ;;  %v3368_v10 = vmax.f32 %v1288_v62, 0.0  ;;  %11942 = vst [vmem:[#allocation58_spill] sm:$0xff] %v6637_v43 }
 0x162   : > { %v11940_v21 = vmax.f32 %v6486_v61, 0.0  ;;  %v11941_v59 = vmax.f32 %v6495_v23, 0.0  ;;  %v3367_v8 = vmax.f32 %v1097_v56, 0.0  ;;  %v3369_v49 = vmax.f32 %v1290_v28, 0.0  ;;  %v3987_v61 = vld [vmem:[%s11615_s3 + $0x8] sm:$0xff] }
 0x163   : > { %5234 = vmatmul.mubr.msk.bf16.gmra.mrb[156].mxu0 %vm887_vm0, %v5480_v36  ;;  %5250 = vmatmul.mubr.msk.bf16.gmra.mrb[156].mxu1 %vm887_vm0, %v5480_v36  ;;  %v3826_v62 = vmax.f32 %v6246_v50, %v3666_v27  ;;  %v6641_v15 = vmax.f32 %v6250_v60, %v3668_v53  ;;  %v11943_v23 = vmax.f32 %v6489_v54, 0.0  ;;  %v11944_v56 = vmax.f32 %v6501_v22, 0.0 }
 0x164   : > { %v3667_v29 = vmax.f32 %v11940_v21, %v3347_v44  ;;  %v3669_v51 = vmax.f32 %v11941_v59, %v3349_v35  ;;  %1820 = vmatprep.mubr.bf16.mxu0 %v11883_v20  ;;  %2013 = vmatprep.mubr.bf16.mxu1 %v11883_v20  ;;  %v4484_v44 = vld [vmem:[%s11615_s3 + $0x508] sm:$0xff]  ;;  %v11945_v60 = vmax.f32 %v6498_v34, 0.0  ;;  %v11946_v27 = vmax.f32 %v6508_v45, 0.0  ;;  %v1100_v36 = vpop.f32.mrb[52].mxu0  ;;  %v1293_v21 = vpop.f32.mrb[52].mxu1 }
 0x165   : > { %v3686_v35 = vmax.f32 %v11943_v23, %v3366_v47  ;;  %v3688_v28 = vmax.f32 %v11944_v56, %v3368_v10  ;;  %v6663_v54 = vadd.f32 %v6527_v46, %v6267_v12  ;;  %v6667_v22 = vadd.f32 %v6517_v41, %v6267_v12  ;;  %v1295_v10 = vpop.f32.mrb[53].mxu1  ;;  %v4006_v46 = vld [vmem:[%s11615_s3 + $0xa0] sm:$0xff] }
 0x166   : > { %v3827_v48 = vmax.f32 %v6256_v32, %v3667_v29  ;;  %v6655_v50 = vmax.f32 %v6258_v33, %v3669_v51  ;;  %v3687_v53 = vmax.f32 %v11945_v60, %v3367_v8  ;;  %v3689_v39 = vmax.f32 %v11946_v27, %v3369_v49  ;;  %v1102_v33 = vpop.f32.mrb[53].mxu0  ;;  %v4503_v41 = vld [vmem:[%s11615_s3 + $0x5a0] sm:$0xff]  ;;  %v4007_v49 = vld [vmem:[%s11615_s3 + $0xa8] sm:$0xff] }
 0x167   : > { %v4146_v32 = vmul.f32 %v3986_v31, %v3826_v62  ;;  %v4643_v47 = vmul.f32 %v4483_v14, %v3826_v62  ;;  %v6672_v45 = vadd.f32 %v6529_v4, %v6267_v12  ;;  %v1104_v31 = vpop.f32.mrb[54].mxu0  ;;  %v1297_v14 = vpop.f32.mrb[54].mxu1  ;;  %v3846_v51 = vmax.f32 %v6269_v13, %v3686_v35  ;;  %v4504_v62 = vld [vmem:[%s11615_s3 + $0x5a8] sm:$0xff] }
 0x168   : > { %v4147_v29 = vmul.f32 %v3987_v61, %v3827_v48  ;;  %v4644_v59 = vmul.f32 %v4484_v44, %v3827_v48  ;;  %v6682_v8 = vmax.f32 %v6271_v0, %v3688_v28  ;;  %v3847_v4 = vmax.f32 %v6282_v2, %v3687_v53  ;;  %v1106_v44 = vpop.f32.mrb[55].mxu0  ;;  %v1299_v23 = vpop.f32.mrb[55].mxu1  ;;  %v11947_v0 = vld [vmem:[#allocation18_spill] sm:$0xff] }
 0x169   : > { %v6692_v61 = vmax.f32 %v6284_v6, %v3689_v39  ;;  %v1101_v35 = vadd.f32 %v1100_v36, %v11947_v0  ;;  %v1294_v2 = vadd.f32 %v1293_v21, %v11947_v0  ;;  %v6702_v28 = vadd.f32 %v6541_v52, %v6637_v43  ;;  %v5481_v6 = vld [vmem:[%s11613_s1 + $0x40] sm:$0xff]  }
 0x16a   : > { %v6694_v56 = vadd.f32 %v4147_v29, %v4146_v32  ;;  %v6696_v13 = vadd.f32 %v4644_v59, %v4643_v47  ;;  %v4166_v60 = vmul.f32 %v4006_v46, %v3846_v51  ;;  %v4663_v53 = vmul.f32 %v4503_v41, %v3846_v51 }
 0x16b   : > { %5235 = vmatmul.mubr.msk.bf16.gmra.mrb[160].mxu0 %vm887_vm0, %v5481_v6  ;;  %v6712_v39 = vadd.f32 %v6543_v19, %v6637_v43  ;;  %v4167_v36 = vmul.f32 %v4007_v49, %v3847_v4  ;;  %v4664_v21 = vmul.f32 %v4504_v62, %v3847_v4  ;;  %5251 = vmatmul.mubr.msk.bf16.gmra.mrb[160].mxu1 %vm887_vm0, %v5481_v6  ;;  %v3386_v52 = vmax.f32 %v1101_v35, 0.0  ;;  %v11948_v19 = vld [vmem:[#allocation22_spill] sm:$0xff] }
 0x16c   : > { %v3388_v32 = vmax.f32 %v1294_v2, 0.0  ;;  %v1103_v47 = vadd.f32 %v1102_v33, %v11947_v0  ;;  %v1296_v29 = vadd.f32 %v1295_v10, %v11947_v0  ;;  %1830 = vmatprep.mubr.bf16.mxu0 %v11883_v20  ;;  %2023 = vmatprep.mubr.bf16.mxu1 %v11883_v20  ;;  %v1105_v41 = vadd.f32 %v1104_v31, %v11948_v19  ;;  %v1110_v4 = vpop.f32.mrb[56].mxu0  ;;  %v1303_v49 = vpop.f32.mrb[56].mxu1  ;;  %v4026_v31 = vld [vmem:[%s11615_s3 + $0x140] sm:$0xff] }
 0x16d   : > { %v6719_v59 = vadd.f32 %v4167_v36, %v4166_v60  ;;  %v6721_v46 = vadd.f32 %v4664_v21, %v4663_v53  ;;  %v1298_v51 = vadd.f32 %v1297_v14, %v11948_v19  ;;  %v11949_v62 = vmax.f32 %v6522_v42, 0.0  ;;  %v6729_v27 = vpop.f32.mrb[57].mxu0  ;;  %v6731_v60 = vpop.f32.mrb[57].mxu1  ;;  %v4523_v14 = vld [vmem:[%s11615_s3 + $0x640] sm:$0xff] }
 0x16e   : > { %v11950_v33 = vmax.f32 %v6525_v25, 0.0  ;;  %v3387_v2 = vmax.f32 %v1103_v47, 0.0  ;;  %v3389_v6 = vmax.f32 %v1296_v29, 0.0  ;;  %v3406_v53 = vmax.f32 %v1105_v41, 0.0  ;;  %v6741_v21 = vpop.f32.mrb[58].mxu0 }
 0x16f   : > { %v3706_v35 = vmax.f32 %v11949_v62, %v3386_v52  ;;  %v3408_v42 = vmax.f32 %v1298_v51, 0.0  ;;  %v1107_v36 = vadd.f32 %v1106_v44, %v11948_v19  ;;  %v1300_v25 = vadd.f32 %v1299_v23, %v11948_v19  ;;  %v6743_v52 = vpop.f32.mrb[58].mxu1  ;;  %v6753_v51 = vpop.f32.mrb[59].mxu0 }
 0x170   : > { %v3708_v10 = vmax.f32 %v11950_v33, %v3388_v32  ;;  %v11951_v29 = vmax.f32 %v6533_v17, 0.0  ;;  %v11952_v33 = vmax.f32 %v6539_v18, 0.0  ;;  %v6755_v44 = vpop.f32.mrb[59].mxu1  ;;  %v11953_v23 = vmax.f32 %v6536_v57, 0.0  ;;  %v4524_v57 = vld [vmem:[%s11615_s3 + $0x648] sm:$0xff] }
 0x171   : > { %v3866_v32 = vmax.f32 %v6315_v7, %v3706_v35  ;;  %v11954_v34 = vmax.f32 %v6549_v63, 0.0  ;;  %v3407_v7 = vmax.f32 %v1107_v36, 0.0  ;;  %v3409_v35 = vmax.f32 %v1300_v25, 0.0  ;;  %v5482_v63 = vld [vmem:[%s11613_s1 + $0x48] sm:$0xff]  }
 0x172   : > { %v6747_v47 = vmax.f32 %v6319_v37, %v3708_v10  ;;  %v3707_v62 = vmax.f32 %v11951_v29, %v3387_v2  ;;  %v3709_v41 = vmax.f32 %v11952_v33, %v3389_v6  ;;  %v3726_v48 = vmax.f32 %v11953_v23, %v3406_v53  ;;  %v4027_v2 = vld [vmem:[%s11615_s3 + $0x148] sm:$0xff] }
 0x173   : > { %v3728_v19 = vmax.f32 %v11954_v34, %v3408_v42  ;;  %v6763_v37 = vadd.f32 %v6557_v26, %v6637_v43  ;;  %v4186_v18 = vmul.f32 %v4026_v31, %v3866_v32  ;;  %v4683_v10 = vmul.f32 %v4523_v14, %v3866_v32  ;;  %5236 = vmatmul.mubr.msk.bf16.gmra.mrb[164].mxu0 %vm887_vm0, %v5482_v63  ;;  %v4046_v31 = vld [vmem:[%s11615_s3 + $0x1e0] sm:$0xff]  ;;  %v4544_v23 = vld [vmem:[%s11615_s3 + $0x6e8] sm:$0xff] }
 0x174   : > { %v3867_v26 = vmax.f32 %v6327_v58, %v3707_v62  ;;  %v6778_v34 = vmax.f32 %v6331_v38, %v3709_v41  ;;  %v3886_v6 = vmax.f32 %v6342_v9, %v3726_v48  ;;  %v4543_v14 = vld [vmem:[%s11615_s3 + $0x6e0] sm:$0xff]  ;;  %5252 = vmatmul.mubr.msk.bf16.gmra.mrb[164].mxu1 %vm887_vm0, %v5482_v63  ;;  %v11955_v58 = vmax.f32 %v6546_v3, 0.0  ;;  %v11957_v9 = vld [vmem:[#allocation26_spill] sm:$0xff]  ;;  %1840 = vmatprep.mubr.bf16.mxu0 %v11883_v20  ;;  %v6808_v62 = vpop.f32.mrb[60].mxu1 }
 0x175   : > { %v6788_v53 = vmax.f32 %v6346_v30, %v3728_v19  ;;  %v11956_v38 = vmax.f32 %v6552_v24, 0.0  ;;  %v1111_v48 = vadd.f32 %v1110_v4, %v11957_v9  ;;  %v1304_v25 = vadd.f32 %v1303_v49, %v11957_v9  ;;  %v3988_v3 = vld [vmem:[%s11615_s3 + $0x10] sm:$0xff]  ;;  %v6806_v24 = vpop.f32.mrb[60].mxu0  ;;  %2033 = vmatprep.mubr.bf16.mxu1 %v11883_v20 }
 0x176   : > { %v3727_v42 = vmax.f32 %v11955_v58, %v3407_v7  ;;  %v6801_v30 = vadd.f32 %v6559_v5, %v6637_v43  ;;  %v4187_v19 = vmul.f32 %v4027_v2, %v3867_v26  ;;  %v4684_v29 = vmul.f32 %v4524_v57, %v3867_v26  ;;  %v4047_v5 = vld [vmem:[%s11615_s3 + $0x1e8] sm:$0xff]  ;;  %v6819_v7 = vpop.f32.mrb[61].mxu0 }
 0x177   : > { %v3729_v36 = vmax.f32 %v11956_v38, %v3409_v35  ;;  %v4206_v33 = vmul.f32 %v4046_v31, %v3886_v6  ;;  %v4703_v41 = vmul.f32 %v4543_v14, %v3886_v6  ;;  %v6821_v35 = vpop.f32.mrb[61].mxu1  ;;  %v6831_v6 = vpop.f32.mrb[62].mxu0  ;;  %v3426_v14 = vmax.f32 %v1111_v48, 0.0  ;;  %v4485_v48 = vld [vmem:[%s11615_s3 + $0x510] sm:$0xff] }
 0x178   : > { %v6823_v2 = vadd.f32 %v4187_v19, %v4186_v18  ;;  %v6825_v57 = vadd.f32 %v4684_v29, %v4683_v10  ;;  %v3887_v63 = vmax.f32 %v6361_v16, %v3727_v42  ;;  %v6833_v31 = vpop.f32.mrb[62].mxu1  ;;  %v3428_v58 = vmax.f32 %v1304_v25, 0.0  ;;  %v6839_v19 = vpop.f32.mrb[63].mxu0  ;;  %v11961_v29 = vld [vmem:[#allocation53_spill] sm:$0xff]  ;;  %v5483_v16 = vld [vmem:[%s11613_s1 + $0x50] sm:$0xff]  }
 0x179   : > { %v6829_v26 = vmax.f32 %v6365_v1, %v3729_v36  ;;  %v1113_v38 = vadd.f32 %v6729_v27, %v11957_v9  ;;  %v1306_v18 = vadd.f32 %v6731_v60, %v11957_v9  ;;  %v6841_v10 = vpop.f32.mrb[63].mxu1  ;;  %v6845_v1 = vmul.f32 %v3988_v3, %v6641_v15  ;;  %v3989_v3 = vld [vmem:[%s11615_s3 + $0x18] sm:$0xff] }
 0x17a   : > { %11958 = vst [vmem:[#allocation59_spill] sm:$0xff] %v6823_v2  ;;  %11959 = vst [vmem:[#allocation60_spill] sm:$0xff] %v6825_v57  ;;  %v4207_v42 = vmul.f32 %v4047_v5, %v3887_v63  ;;  %v4704_v36 = vmul.f32 %v4544_v23, %v3887_v63  ;;  %v11960_v27 = vmax.f32 %v6555_v55, 0.0  ;;  %v11962_v60 = vmax.f32 %v11961_v29, 0.0  ;;  %v4066_v55 = vld [vmem:[%s11615_s3 + $0x280] sm:$0xff] }
 0x17b   : > { %v3427_v49 = vmax.f32 %v1113_v38, 0.0  ;;  %v3429_v32 = vmax.f32 %v1306_v18, 0.0  ;;  %5237 = vmatmul.mubr.msk.bf16.gmra.mrb[168].mxu0 %vm887_vm0, %v5483_v16  ;;  %v4563_v63 = vld [vmem:[%s11615_s3 + $0x780] sm:$0xff] }
 0x17c   : > { %v3746_v25 = vmax.f32 %v11960_v27, %v3426_v14  ;;  %v3748_v4 = vmax.f32 %v11962_v60, %v3428_v58  ;;  %v6861_v5 = vadd.f32 %v4207_v42, %v4206_v33  ;;  %v6863_v23 = vadd.f32 %v4704_v36, %v4703_v41  ;;  %v11965_v14 = vld [vmem:[#allocation30_spill] sm:$0xff]  ;;  %5253 = vmatmul.mubr.msk.bf16.gmra.mrb[168].mxu1 %vm887_vm0, %v5483_v16  ;;  %v11966_v33 = vld [vmem:[#allocation35_spill] sm:$0xff]  ;;  %v11967_v41 = vld [vmem:[#allocation36_spill] sm:$0xff] }
 0x17d   : > { %v1115_v58 = vadd.f32 %v6741_v21, %v11965_v14  ;;  %v1308_v38 = vadd.f32 %v6743_v52, %v11965_v14  ;;  %v11969_v36 = vld [vmem:[#allocation5_spill] sm:$0xff]  ;;  %v11971_v60 = vld [vmem:[#allocation54_spill] sm:$0xff]  ;;  %1850 = vmatprep.mubr.bf16.mxu0 %v11883_v20  ;;  %v4486_v21 = vld [vmem:[%s11615_s3 + $0x518] sm:$0xff]  ;;  %v1117_v16 = vadd.f32 %v6753_v51, %v11965_v14  ;;  %2043 = vmatprep.mubr.bf16.mxu1 %v11883_v20 }
 0x17e   : > { %11963 = vst [vmem:[#allocation53_spill] sm:$0xff] %v6861_v5  ;;  %11964 = vst [vmem:[#allocation61_spill] sm:$0xff] %v6863_v23  ;;  %v3906_v18 = vmax.f32 %v11966_v33, %v3746_v25  ;;  %v6878_v42 = vmax.f32 %v11967_v41, %v3748_v4  ;;  %v11970_v27 = vmax.f32 %v11969_v36, 0.0  ;;  %v11972_v17 = vmax.f32 %v11971_v60, 0.0  ;;  %v6892_v25 = vpop.f32.mrb[64].mxu0  ;;  %v4564_v33 = vld [vmem:[%s11615_s3 + $0x788] sm:$0xff] }
 0x17f   : > { %v3446_v52 = vmax.f32 %v1115_v58, 0.0  ;;  %v3448_v0 = vmax.f32 %v1308_v38, 0.0  ;;  %v1310_v4 = vadd.f32 %v6755_v44, %v11965_v14  ;;  %v4008_v58 = vld [vmem:[%s11615_s3 + $0xb0] sm:$0xff]  ;;  %v4067_v44 = vld [vmem:[%s11615_s3 + $0x288] sm:$0xff]  ;;  %v6912_v41 = vpop.f32.mrb[65].mxu0  ;;  %v11977_v60 = vld [vmem:[#allocation52_spill] sm:$0xff] }
 0x180   : > { %11968 = vst [vmem:[#allocation35_spill] sm:$0xff] %v6878_v42  ;;  %v3747_v29 = vmax.f32 %v11970_v27, %v3427_v49  ;;  %v3749_v9 = vmax.f32 %v11972_v17, %v3429_v32  ;;  %v6894_v49 = vpop.f32.mrb[64].mxu1  ;;  %v6898_v17 = vmul.f32 %v4485_v48, %v6641_v15  ;;  %v6901_v32 = vmul.f32 %v3989_v3, %v6655_v50  ;;  %v11974_v48 = vld [vmem:[#allocation37_spill] sm:$0xff]  ;;  %v11975_v36 = vld [vmem:[#allocation38_spill] sm:$0xff]  ;;  %v6924_v43 = vpop.f32.mrb[66].mxu0 }
 0x181   : > { %v4226_v51 = vmul.f32 %v4066_v55, %v3906_v18  ;;  %v4723_v38 = vmul.f32 %v4563_v63, %v3906_v18  ;;  %v6914_v15 = vpop.f32.mrb[65].mxu1  ;;  %v11978_v55 = vmax.f32 %v11977_v60, 0.0  ;;  %v11979_v18 = vld [vmem:[#allocation56_spill] sm:$0xff]  ;;  %v4505_v23 = vld [vmem:[%s11615_s3 + $0x5b0] sm:$0xff]  ;;  %v3447_v5 = vmax.f32 %v1117_v16, 0.0 }
 0x182   : > { %11973 = vst [vmem:[#allocation36_spill] sm:$0xff] %v6901_v32  ;;  %v3907_v3 = vmax.f32 %v11974_v48, %v3747_v29  ;;  %v6918_v27 = vmax.f32 %v11975_v36, %v3749_v9  ;;  %v11980_v14 = vmax.f32 %v11979_v18, 0.0  ;;  %v6926_v12 = vpop.f32.mrb[66].mxu1  ;;  %v3449_v57 = vmax.f32 %v1310_v4, 0.0  ;;  %v11981_v29 = vld [vmem:[#allocation34_spill] sm:$0xff]  ;;  %v4009_v16 = vld [vmem:[%s11615_s3 + $0xb8] sm:$0xff] }
 0x183   : > { %v3766_v63 = vmax.f32 %v11978_v55, %v3446_v52  ;;  %v1121_v9 = vadd.f32 %v6806_v24, %v11981_v29  ;;  %v1314_v48 = vadd.f32 %v6808_v62, %v11981_v29  ;;  %v6935_v52 = vpop.f32.mrb[67].mxu0  ;;  %v6937_v36 = vpop.f32.mrb[67].mxu1  ;;  %v4086_v24 = vld [vmem:[%s11615_s3 + $0x320] sm:$0xff]  ;;  %v11983_v55 = vld [vmem:[#allocation39_spill] sm:$0xff] }
 0x184   : > { %11976 = vst [vmem:[#allocation5_spill] sm:$0xff] %v6918_v27  ;;  %v3768_v11 = vmax.f32 %v11980_v14, %v3448_v0  ;;  %v6940_v0 = vmul.f32 %v4486_v21, %v6655_v50  ;;  %v6943_v14 = vmul.f32 %v4008_v58, %v6682_v8  ;;  %v4227_v4 = vmul.f32 %v4067_v44, %v3907_v3  ;;  %v4583_v62 = vld [vmem:[%s11615_s3 + $0x820] sm:$0xff]  ;;  %v11986_v58 = vld [vmem:[#allocation55_spill] sm:$0xff] }
 0x185   : > { %v4724_v60 = vmul.f32 %v4564_v33, %v3907_v3  ;;  %v3926_v50 = vmax.f32 %v11983_v55, %v3766_v63  ;;  %v11984_v21 = vld [vmem:[#allocation40_spill] sm:$0xff]  ;;  %v11987_v27 = vmax.f32 %v11986_v58, 0.0  ;;  %v3466_v55 = vmax.f32 %v1121_v9, 0.0  ;;  %v4087_v9 = vld [vmem:[%s11615_s3 + $0x328] sm:$0xff]  ;;  %v7003_v58 = vpop.f32.mrb[68].mxu1 }
 0x186   : > { %11982 = vst [vmem:[#allocation54_spill] sm:$0xff] %v6940_v0  ;;  %v6956_v18 = vmax.f32 %v11984_v21, %v3768_v11  ;;  %v11988_v0 = vld [vmem:[#allocation57_spill] sm:$0xff]  ;;  %v5484_v33 = vld [vmem:[%s11613_s1 + $0x58] sm:$0xff]   ;;  %v6969_v63 = vadd.f32 %v4227_v4, %v4226_v51  ;;  %v3468_v21 = vmax.f32 %v1314_v48, 0.0  ;;  %v4028_v51 = vld [vmem:[%s11615_s3 + $0x150] sm:$0xff]  ;;  %v11997_v4 = vmax.f32 %v6608_v40, 0.0 }
 0x187   : > { %v3767_v2 = vmax.f32 %v11987_v27, %v3447_v5  ;;  %v11989_v32 = vmax.f32 %v11988_v0, 0.0  ;;  %5238 = vmatmul.mubr.msk.bf16.gmra.mrb[172].mxu0 %vm887_vm0, %v5484_v33  ;;  %v4506_v3 = vld [vmem:[%s11615_s3 + $0x5b8] sm:$0xff]  ;;  %v6971_v11 = vadd.f32 %v4724_v60, %v4723_v38  ;;  %v6973_v5 = vpop.permute.xlu1 %504  ;;  %5254 = vmatmul.mubr.msk.bf16.gmra.mrb[172].mxu1 %vm887_vm0, %v5484_v33  ;;  %v4246_v38 = vmul.f32 %v4086_v24, %v3926_v50  ;;  %v4584_v48 = vld [vmem:[%s11615_s3 + $0x828] sm:$0xff]  ;;  %v4525_v33 = vld [vmem:[%s11615_s3 + $0x650] sm:$0xff] }
 0x188   : > { %11985 = vst [vmem:[#allocation37_spill] sm:$0xff] %v6956_v18  ;;  %11990 = vst [vmem:[#allocation38_spill] sm:$0xff] %v6969_v63  ;;  %1860 = vmatprep.mubr.bf16.mxu0 %v11883_v20  ;;  %v4743_v27 = vmul.f32 %v4583_v62, %v3926_v50  ;;  %2053 = vmatprep.mubr.bf16.mxu1 %v11883_v20  ;;  %v11995_v0 = vld [vmem:[#allocation43_spill] sm:$0xff]  ;;  %v3786_v60 = vmax.f32 %v11997_v4, %v3466_v55  ;;  %v11998_v24 = vmax.f32 %v6667_v22, 0.0  ;;  %v7001_v50 = vpop.f32.mrb[68].mxu0 }
 0x189   : > { %v3769_v44 = vmax.f32 %v11989_v32, %v3449_v57  ;;  %11991 = vst [vmem:[#allocation52_spill] sm:$0xff] %v6971_v11  ;;  %11992 = vst [vmem:[#allocation56_spill] sm:$0xff] %v6973_v5  ;;  %v6978_v57 = vmul.f32 %v4505_v23, %v6682_v8  ;;  %v6981_v32 = vmul.f32 %v4009_v16, %v6692_v61  ;;  %v11994_v8 = vld [vmem:[#allocation42_spill] sm:$0xff]  ;;  %v7016_v55 = vpop.f32.mrb[69].mxu0 }
 0x18a   : > { %v3927_v23 = vmax.f32 %v11994_v8, %v3767_v2  ;;  %v3788_v62 = vmax.f32 %v11998_v24, %v3468_v21  ;;  %v1123_v2 = vadd.f32 %v6819_v7, %v11981_v29  ;;  %v1125_v40 = vadd.f32 %v6831_v6, %v6973_v5  ;;  %v7018_v21 = vpop.f32.mrb[69].mxu1  ;;  %v4029_v7 = vld [vmem:[%s11615_s3 + $0x158] sm:$0xff]  ;;  %v4048_v6 = vld [vmem:[%s11615_s3 + $0x1f0] sm:$0xff]  ;;  %v7035_v24 = vpop.f32.mrb[70].mxu0 }
 0x18b   : > { %11993 = vst [vmem:[#allocation39_spill] sm:$0xff] %v6981_v32  ;;  %v6995_v16 = vmax.f32 %v11995_v0, %v3769_v44  ;;  %v1316_v44 = vadd.f32 %v6821_v35, %v11981_v29  ;;  %v1318_v22 = vadd.f32 %v6833_v31, %v6973_v5  ;;  %v7021_v8 = vmul.f32 %v4506_v3, %v6692_v61  ;;  %v4526_v35 = vld [vmem:[%s11615_s3 + $0x658] sm:$0xff]  ;;  %v7037_v61 = vpop.f32.mrb[70].mxu1  ;;  %v12002_v29 = vld [vmem:[#allocation45_spill] sm:$0xff]  ;;  %v7043_v18 = vpop.f32.mrb[71].mxu0 }
 0x18c   : > { %v7024_v0 = vmul.f32 %v4028_v51, %v6747_v47  ;;  %v4247_v31 = vmul.f32 %v4087_v9, %v3927_v23  ;;  %v4744_v4 = vmul.f32 %v4584_v48, %v3927_v23  ;;  %v12001_v3 = vld [vmem:[#allocation44_spill] sm:$0xff]  ;;  %v7041_v11 = vmax.f32 %v12002_v29, %v3788_v62 }
 0x18d   : > { %11996 = vst [vmem:[#allocation40_spill] sm:$0xff] %v6995_v16  ;;  %11999 = vst [vmem:[#allocation55_spill] sm:$0xff] %v7021_v8  ;;  %v3946_v51 = vmax.f32 %v12001_v3, %v3786_v60  ;;  %v3467_v63 = vmax.f32 %v1123_v2, 0.0  ;;  %v3469_v16 = vmax.f32 %v1316_v44, 0.0  ;;  %v4106_v9 = vld [vmem:[%s11615_s3 + $0x3c0] sm:$0xff]  ;;  %v3486_v29 = vmax.f32 %v1125_v40, 0.0 }
 0x18e   : > { %12000 = vst [vmem:[#allocation57_spill] sm:$0xff] %v7024_v0  ;;  %12003 = vst [vmem:[#allocation42_spill] sm:$0xff] %v7041_v11  ;;  %v7045_v0 = vpop.f32.mrb[71].mxu1  ;;  %v7047_v8 = vadd.f32 %v4247_v31, %v4246_v38  ;;  %v7049_v32 = vadd.f32 %v4744_v4, %v4743_v27  ;;  %v4603_v48 = vld [vmem:[%s11615_s3 + $0x8c0] sm:$0xff]  ;;  %v3488_v23 = vmax.f32 %v1318_v22, 0.0  ;;  %v7058_v60 = vmul.f32 %v4525_v33, %v6747_v47  ;;  %v4545_v47 = vld [vmem:[%s11615_s3 + $0x6f0] sm:$0xff] }
 0x18f   : > { %v7061_v62 = vmul.f32 %v4029_v7, %v6778_v34  ;;  %v7064_v38 = vmul.f32 %v4526_v35, %v6778_v34  ;;  %v7067_v27 = vmul.f32 %v4048_v6, %v6788_v53  ;;  %v5485_v2 = vld [vmem:[%s11613_s1 + $0x60] sm:$0xff]   ;;  %v4049_v33 = vld [vmem:[%s11615_s3 + $0x1f8] sm:$0xff]  ;;  %v12009_v44 = vmax.f32 %v6663_v54, 0.0  ;;  %v4068_v3 = vld [vmem:[%s11615_s3 + $0x290] sm:$0xff] }
 0x190   : > { %12004 = vst [vmem:[#allocation43_spill] sm:$0xff] %v7047_v8  ;;  %12005 = vst [vmem:[#allocation44_spill] sm:$0xff] %v7049_v32  ;;  %5239 = vmatmul.mubr.msk.bf16.gmra.mrb[176].mxu0 %vm887_vm0, %v5485_v2  ;;  %v4546_v34 = vld [vmem:[%s11615_s3 + $0x6f8] sm:$0xff]  ;;  %v12010_v22 = vmax.f32 %v6672_v45, 0.0  ;;  %v12011_v35 = vmax.f32 %v6702_v28, 0.0  ;;  %v12012_v31 = vmax.f32 %v6712_v39, 0.0  ;;  %5255 = vmatmul.mubr.msk.bf16.gmra.mrb[176].mxu1 %vm887_vm0, %v5485_v2  ;;  %v4266_v32 = vmul.f32 %v4106_v9, %v3946_v51 }
 0x191   : > { %12006 = vst [vmem:[#allocation45_spill] sm:$0xff] %v7061_v62  ;;  %12007 = vst [vmem:[#allocation62_spill] sm:$0xff] %v7064_v38  ;;  %v3787_v40 = vmax.f32 %v12009_v44, %v3467_v63  ;;  %v4763_v8 = vmul.f32 %v4603_v48, %v3946_v51  ;;  %v4107_v54 = vld [vmem:[%s11615_s3 + $0x3c8] sm:$0xff]  ;;  %v1127_v28 = vadd.f32 %v6839_v19, %v6973_v5  ;;  %1870 = vmatprep.mubr.bf16.mxu0 %v11883_v20  ;;  %v12014_v9 = vld [vmem:[#allocation47_spill] sm:$0xff] }
 0x192   : > { %12008 = vst [vmem:[#allocation63_spill] sm:$0xff] %v7067_v27  ;;  %v3789_v7 = vmax.f32 %v12010_v22, %v3469_v16  ;;  %v3806_v6 = vmax.f32 %v12011_v35, %v3486_v29  ;;  %v3808_v4 = vmax.f32 %v12012_v31, %v3488_v23  ;;  %v4604_v45 = vld [vmem:[%s11615_s3 + $0x8c8] sm:$0xff]  ;;  %v1320_v39 = vadd.f32 %v6841_v10, %v6973_v5  ;;  %v12016_v48 = vld [vmem:[#allocation48_spill] sm:$0xff]  ;;  %v7119_v10 = vpop.f32.mrb[72].mxu0  ;;  %v7121_v22 = vpop.f32.mrb[72].mxu1 }
 0x193   : > { %v12013_v63 = vld [vmem:[#allocation46_spill] sm:$0xff]  ;;  %v4126_v23 = vld [vmem:[%s11615_s3 + $0x460] sm:$0xff]  ;;  %2063 = vmatprep.mubr.bf16.mxu1 %v11883_v20  ;;  %v3487_v35 = vmax.f32 %v1127_v28, 0.0  ;;  %v7130_v31 = vpop.f32.mrb[73].mxu0 }
 0x194   : > { %v3947_v16 = vmax.f32 %v12013_v63, %v3787_v40  ;;  %v7107_v51 = vmax.f32 %v12014_v9, %v3789_v7  ;;  %v3966_v29 = vmax.f32 %v12016_v48, %v3806_v6  ;;  %v4623_v19 = vld [vmem:[%s11615_s3 + $0x960] sm:$0xff]  ;;  %v7125_v40 = vmul.f32 %v4545_v47, %v6788_v53  ;;  %v7132_v63 = vpop.f32.mrb[73].mxu1  ;;  %v7140_v5 = vpop.f32.mrb[74].mxu0  ;;  %v12023_v28 = vld [vmem:[#allocation6_spill] sm:$0xff] }
 0x195   : > { %v12017_v2 = vld [vmem:[#allocation49_spill] sm:$0xff]  ;;  %v7128_v7 = vmul.f32 %v4049_v33, %v6829_v26  ;;  %v3489_v6 = vmax.f32 %v1320_v39, 0.0  ;;  %v7138_v9 = vmul.f32 %v4068_v3, %v6878_v42  ;;  %v7142_v53 = vpop.f32.mrb[74].mxu1  ;;  %v7146_v39 = vadd.f32 %v6892_v25, %v12023_v28 }
 0x196   : > { %12015 = vst [vmem:[#allocation46_spill] sm:$0xff] %v7107_v51  ;;  %v7117_v44 = vmax.f32 %v12017_v2, %v3808_v4  ;;  %12019 = vst [vmem:[#allocation48_spill] sm:$0xff] %v7125_v40  ;;  %v7135_v4 = vmul.f32 %v4546_v34, %v6829_v26  ;;  %v4267_v48 = vmul.f32 %v4107_v54, %v3947_v16  ;;  %v7152_v26 = vpop.f32.mrb[75].mxu0  ;;  %v7154_v34 = vpop.f32.mrb[75].mxu1  ;;  %v4127_v25 = vld [vmem:[%s11615_s3 + $0x468] sm:$0xff] }
 0x197   : > { %12020 = vst [vmem:[#allocation49_spill] sm:$0xff] %v7128_v7  ;;  %12022 = vst [vmem:[#allocation65_spill] sm:$0xff] %v7138_v9  ;;  %v4764_v2 = vmul.f32 %v4604_v45, %v3947_v16  ;;  %v4286_v47 = vmul.f32 %v4126_v23, %v3966_v29  ;;  %v4783_v33 = vmul.f32 %v4623_v19, %v3966_v29  ;;  %v12026_v45 = vmax.f32 %v6763_v37, 0.0  ;;  %v12028_v19 = vld [vmem:[#allocation7_spill] sm:$0xff] }
 0x198   : > { %12018 = vst [vmem:[#allocation47_spill] sm:$0xff] %v7117_v44  ;;  %12021 = vst [vmem:[#allocation64_spill] sm:$0xff] %v7135_v4  ;;  %v7150_v44 = vadd.f32 %v6912_v41, %v12023_v28  ;;  %v7156_v3 = vadd.f32 %v4267_v48, %v4266_v32  ;;  %v12027_v29 = vmax.f32 %v6801_v30, 0.0  ;;  %v4624_v41 = vld [vmem:[%s11615_s3 + $0x968] sm:$0xff]  ;;  %v7172_v32 = vadd.f32 %v6924_v43, %v12028_v19  ;;  %v12030_v48 = vld [vmem:[#allocation51_spill] sm:$0xff] }
 0x199   : > { %v7158_v54 = vadd.f32 %v4764_v2, %v4763_v8  ;;  %v3807_v16 = vmax.f32 %v12026_v45, %v3487_v35  ;;  %v7176_v8 = vadd.f32 %v6894_v49, %v12023_v28  ;;  %v7180_v37 = vadd.f32 %v6935_v52, %v12028_v19  ;;  %v5486_v35 = vld [vmem:[%s11613_s1 + $0x68] sm:$0xff]  }
 0x19a   : > { %12024 = vst [vmem:[#allocation66_spill] sm:$0xff] %v7156_v3  ;;  %v3809_v23 = vmax.f32 %v12027_v29, %v3489_v6  ;;  %v7184_v30 = vadd.f32 %v6914_v15, %v12023_v28  ;;  %5240 = vmatmul.mubr.msk.bf16.gmra.mrb[180].mxu0 %vm887_vm0, %v5486_v35  ;;  %v12029_v43 = vld [vmem:[#allocation50_spill] sm:$0xff]  ;;  %v7196_v49 = vadd.f32 %v6926_v12, %v12028_v19 }
 0x19b   : > { %12025 = vst [vmem:[#allocation67_spill] sm:$0xff] %v7158_v54  ;;  %v3967_v6 = vmax.f32 %v12029_v43, %v3807_v16  ;;  %v7200_v52 = vadd.f32 %v6937_v36, %v12028_v19  ;;  %5256 = vmatmul.mubr.msk.bf16.gmra.mrb[180].mxu1 %vm887_vm0, %v5486_v35  ;;  %1880 = vmatprep.mubr.bf16.mxu0 %v11883_v20  ;;  %v1579_v35 = vpop.f32.mrb[76].mxu1  ;;  %v12032_v19 = vld [vmem:[#allocation13_spill] sm:$0xff] }
 0x19c   : > { %v7192_v2 = vmax.f32 %v12030_v48, %v3809_v23  ;;  %2073 = vmatprep.mubr.bf16.mxu1 %v11883_v20  ;;  %v1386_v48 = vpop.f32.mrb[76].mxu0  ;;  %v7215_v29 = vadd.f32 %v7001_v50, %v12032_v19  ;;  %v7219_v16 = vadd.f32 %v7016_v55, %v12032_v19  ;;  %v12035_v36 = vld [vmem:[#allocation17_spill] sm:$0xff]  ;;  %v7231_v45 = vadd.f32 %v7003_v58, %v12032_v19 }
 0x19d   : > { %v4287_v12 = vmul.f32 %v4127_v25, %v3967_v6  ;;  %v4784_v23 = vmul.f32 %v4624_v41, %v3967_v6  ;;  %v1388_v25 = vpop.f32.mrb[77].mxu0  ;;  %v1581_v41 = vpop.f32.mrb[77].mxu1  ;;  %v7227_v28 = vadd.f32 %v7035_v24, %v12035_v36  ;;  %v7251_v55 = vadd.f32 %v7045_v0, %v12035_v36  ;;  %v12037_v58 = vld [vmem:[#allocation25_spill] sm:$0xff] }
 0x19e   : > { %12031 = vst [vmem:[#allocation50_spill] sm:$0xff] %v7192_v2  ;;  %v1390_v50 = vpop.f32.mrb[78].mxu0  ;;  %v1583_v15 = vpop.f32.mrb[78].mxu1  ;;  %v7271_v54 = vadd.f32 %v7140_v5, %v12037_v58  ;;  %v7283_v0 = vadd.f32 %v7152_v26, %v12037_v58 }
 0x19f   : > { %v7221_v6 = vadd.f32 %v4287_v12, %v4286_v47  ;;  %v7223_v43 = vadd.f32 %v4784_v23, %v4783_v33  ;;  %v7237_v47 = vadd.f32 %v7043_v18, %v12035_v36  ;;  %v7241_v33 = vadd.f32 %v7018_v21, %v12032_v19  ;;  %v1392_v24 = vpop.f32.mrb[79].mxu0  ;;  %v1585_v12 = vpop.f32.mrb[79].mxu1  ;;  %v12036_v21 = vld [vmem:[#allocation21_spill] sm:$0xff] }
 0x1a0   : > { %v7257_v19 = vadd.f32 %v7119_v10, %v12036_v21  ;;  %v7261_v23 = vadd.f32 %v7130_v31, %v12036_v21  ;;  %v7275_v10 = vadd.f32 %v7121_v22, %v12036_v21  ;;  %v7287_v5 = vadd.f32 %v7132_v63, %v12036_v21  ;;  %v1396_v26 = vpop.f32.mrb[80].mxu0  ;;  %v1589_v31 = vpop.f32.mrb[80].mxu1  ;;  %v12038_v21 = vld [vmem:[#allocation29_spill] sm:$0xff] }
 0x1a1   : > { %12033 = vst [vmem:[#allocation51_spill] sm:$0xff] %v7221_v6  ;;  %12034 = vst [vmem:[#allocation68_spill] sm:$0xff] %v7223_v43  ;;  %v7247_v43 = vadd.f32 %v7037_v61, %v12035_v36  ;;  %v5487_v61 = vld [vmem:[%s11613_s1 + $0x70] sm:$0xff]   ;;  %v7294_v18 = vadd.f32 %v7142_v53, %v12037_v58  ;;  %v7298_v36 = vadd.f32 %v7154_v34, %v12037_v58  ;;  %v1591_v9 = vpop.f32.mrb[81].mxu1  ;;  %v12039_v34 = vld [vmem:[#allocation33_spill] sm:$0xff] }
 0x1a2   : > { %5241 = vmatmul.mubr.msk.bf16.gmra.mrb[184].mxu0 %vm887_vm0, %v5487_v61  ;;  %v7303_v3 = vadd.f32 %v1386_v48, %v12038_v21  ;;  %v7306_v22 = vadd.f32 %v1388_v25, %v12038_v21  ;;  %v7311_v58 = vadd.f32 %v1390_v50, %v12039_v34  ;;  %v7314_v51 = vadd.f32 %v1579_v35, %v12038_v21  ;;  %v1593_v63 = vpop.f32.mrb[82].mxu1  ;;  %v12040_v48 = vld [vmem:[#allocation8_spill] sm:$0xff] }
 0x1a3   : > { %5257 = vmatmul.mubr.msk.bf16.gmra.mrb[184].mxu1 %vm887_vm0, %v5487_v61  ;;  %1890 = vmatprep.mubr.bf16.mxu0 %v11883_v20  ;;  %v1398_v61 = vpop.f32.mrb[81].mxu0  ;;  %v7319_v25 = vadd.f32 %v1392_v24, %v12039_v34  ;;  %v7322_v4 = vadd.f32 %v1581_v41, %v12038_v21  ;;  %v1595_v2 = vpop.f32.mrb[83].mxu1  ;;  %v7327_v35 = vadd.f32 %v1583_v15, %v12039_v34  ;;  %v5488_v50 = vld [vmem:[%s11613_s1 + $0x78] sm:$0xff]   ;;  %v12041_v24 = vld [vmem:[#allocation10_spill] sm:$0xff] }
 0x1a4   : > { %2083 = vmatprep.mubr.bf16.mxu1 %v11883_v20  ;;  %v1400_v6 = vpop.f32.mrb[82].mxu0  ;;  %v7330_v38 = vadd.f32 %v1585_v12, %v12039_v34  ;;  %v1397_v62 = vadd.f32 %v1396_v26, %v12040_v48  ;;  %v1590_v41 = vadd.f32 %v1589_v31, %v12040_v48  ;;  %v1399_v12 = vadd.f32 %v1398_v61, %v12040_v48 }
 0x1a5   : > { %v1402_v53 = vpop.f32.mrb[83].mxu0  ;;  %v1592_v11 = vadd.f32 %v1591_v9, %v12040_v48  ;;  %v1401_v34 = vadd.f32 %v1400_v6, %v12041_v24  ;;  %v1594_v21 = vadd.f32 %v1593_v63, %v12041_v24  ;;  %v1596_v61 = vadd.f32 %v1595_v2, %v12041_v24  ;;  %v1599_v48 = vpop.f32.mrb[84].mxu1 }
 0x1a6   : > { %v3030_v26 = vmax.f32 %v1397_v62, 0.0  ;;  %v3032_v31 = vmax.f32 %v1590_v41, 0.0  ;;  %v3031_v42 = vmax.f32 %v1399_v12, 0.0  ;;  %v1403_v7 = vadd.f32 %v1402_v53, %v12041_v24  ;;  %v1406_v9 = vpop.f32.mrb[84].mxu0 }
 0x1a7   : > { %v3033_v15 = vmax.f32 %v1592_v11, 0.0  ;;  %v12043_v62 = vmax.f32 %v7176_v8, 0.0  ;;  %v3050_v63 = vmax.f32 %v1401_v34, 0.0  ;;  %v3052_v41 = vmax.f32 %v1594_v21, 0.0  ;;  %v1408_v12 = vpop.f32.mrb[85].mxu0  ;;  %v1601_v11 = vpop.f32.mrb[85].mxu1 }
 0x1a8   : > { %v12045_v53 = vmax.f32 %v7150_v44, 0.0  ;;  %v12046_v2 = vmax.f32 %v7184_v30, 0.0  ;;  %v1603_v8 = vpop.f32.mrb[86].mxu1  ;;  %v12047_v34 = vmax.f32 %v7172_v32, 0.0  ;;  %v12053_v32 = vmax.f32 %v7200_v52, 0.0 }
 0x1a9   : > { %v7357_v6 = vmax.f32 %v12043_v62, %v3032_v31  ;;  %v5457_v31 = vld [vmem:[%s5674_s9 + $0x40] ss:$80 sps:$4 sm:$0xff]   ;;  %v12049_v62 = vmax.f32 %v7196_v49, 0.0  ;;  %v5468_v52 = vld [vmem:[%s5674_s9 + $0xec] ss:$80 sps:$4 sm:$0xff]  }
 0x1aa   : > { %5242 = vmatmul.mubr.msk.bf16.gmra.mrb[188].mxu0 %vm887_vm0, %v5488_v50  ;;  %v7361_v27 = vmax.f32 %v12045_v53, %v3031_v42  ;;  %v7365_v24 = vmax.f32 %v12046_v2, %v3033_v15  ;;  %v7370_v21 = vmax.f32 %v12047_v34, %v3050_v63  ;;  %v12051_v42 = vld [vmem:[#allocation16_spill] sm:$0xff] }
 0x1ab   : > { %5258 = vmatmul.mubr.msk.bf16.gmra.mrb[188].mxu1 %vm887_vm0, %v5488_v50  ;;  %2126 = vmatprep.mubr.bf16.mxu0 %v11883_v20  ;;  %v12042_v50 = vmax.f32 %v7146_v39, 0.0  ;;  %12044 = vst [vmem:[#allocation69_spill] sm:$0xff] %v7357_v6  ;;  %v3051_v39 = vmax.f32 %v1403_v7, 0.0  ;;  %v7374_v6 = vmax.f32 %v12049_v62, %v3052_v41  ;;  %v1407_v44 = vadd.f32 %v1406_v9, %v12051_v42  ;;  %v1605_v7 = vpop.f32.mrb[87].mxu1  ;;  %v5460_v53 = vld [vmem:[%s5674_s9 + $0x48] ss:$80 sps:$4 sm:$0xff]  }
 0x1ac   : > { %2319 = vmatprep.mubr.bf16.mxu1 %v11883_v20  ;;  %12048 = vst [vmem:[#allocation70_spill] sm:$0xff] %v7370_v21  ;;  %v1600_v30 = vadd.f32 %v1599_v48, %v12051_v42  ;;  %v1409_v49 = vadd.f32 %v1408_v12, %v12051_v42  ;;  %v1602_v41 = vadd.f32 %v1601_v11, %v12051_v42  ;;  %v5465_v9 = vld [vmem:[%s5674_s9 + $0xe4] ss:$80 sps:$4 sm:$0xff]   ;;  %v12054_v48 = vld [vmem:[#allocation20_spill] sm:$0xff] }
 0x1ad   : > { %v7353_v40 = vmax.f32 %v12042_v50, %v3030_v26  ;;  %v3053_v26 = vmax.f32 %v1596_v61, 0.0  ;;  %v1410_v50 = vpop.f32.mrb[86].mxu0  ;;  %12050 = vst [vmem:[#allocation71_spill] sm:$0xff] %v7374_v6  ;;  %v12052_v61 = vmax.f32 %v7180_v37, 0.0  ;;  %v3070_v34 = vmax.f32 %v1407_v44, 0.0  ;;  %v5489_v37 = vld [vmem:[%s11613_s1] sm:$0xff]  }
 0x1ae   : > { %v1412_v15 = vpop.f32.mrb[87].mxu0  ;;  %v3072_v62 = vmax.f32 %v1600_v30, 0.0  ;;  %v1411_v6 = vadd.f32 %v1410_v50, %v12054_v48  ;;  %v1604_v21 = vadd.f32 %v1603_v8, %v12054_v48  ;;  %v3071_v12 = vmax.f32 %v1409_v49, 0.0  ;;  %v5463_v50 = vld [vmem:[%s5674_s9 + $0xe0] ss:$80 sps:$4 sm:$0xff]   ;;  %v4129_v42 = vld [vmem:[%s11615_s3 + $0x478] sm:$0xff] }
 0x1af   : > { %v7381_v2 = vmax.f32 %v12052_v61, %v3051_v39  ;;  %v7385_v63 = vmax.f32 %v12053_v32, %v3053_v26  ;;  %v3073_v39 = vmax.f32 %v1602_v41, 0.0  ;;  %v1413_v11 = vadd.f32 %v1412_v15, %v12054_v48  ;;  %v5466_v15 = vld [vmem:[%s5674_s9 + $0xe8] ss:$80 sps:$4 sm:$0xff]  }
 0x1b0   : > { %v1606_v26 = vadd.f32 %v1605_v7, %v12054_v48  ;;  %v12055_v8 = vmax.f32 %v7215_v29, 0.0  ;;  %v12056_v30 = vmax.f32 %v7231_v45, 0.0  ;;  %v3090_v32 = vmax.f32 %v1411_v6, 0.0  ;;  %v5471_v7 = vld [vmem:[%s5674_s9 + $0x184] ss:$80 sps:$4 sm:$0xff]  }
 0x1b1   : > { %v3092_v49 = vmax.f32 %v1604_v21, 0.0  ;;  %v12057_v41 = vmax.f32 %v7219_v16, 0.0  ;;  %v12058_v29 = vmax.f32 %v7241_v33, 0.0  ;;  %v5474_v6 = vld [vmem:[%s5674_s9 + $0x18c] ss:$80 sps:$4 sm:$0xff]   ;;  %v12059_v21 = vmax.f32 %v7227_v28, 0.0 }
 0x1b2   : > { %5259 = vmatmul.mubr.msk.bf16.vlgmr.msra.gmra.mrb[192].mxu0 %vm887_vm0, %v5489_v37  ;;  %v7403_v44 = vmax.f32 %v12055_v8, %v3070_v34  ;;  %v7407_v61 = vmax.f32 %v12056_v30, %v3072_v62  ;;  %v3093_v45 = vmax.f32 %v1606_v26, 0.0  ;;  %v1416_v8 = vpop.f32.mrb[88].mxu0  ;;  %v1609_v62 = vpop.f32.mrb[88].mxu1  ;;  %v12060_v16 = vmax.f32 %v7247_v43, 0.0  ;;  %v12061_v30 = vld [vmem:[#allocation24_spill] sm:$0xff]  ;;  %v4625_v48 = vld [vmem:[%s11615_s3 + $0x970] sm:$0xff] }
 0x1b3   : > { %5275 = vmatmul.mubr.msk.bf16.vlgmr.msra.gmra.mrb[192].mxu1 %vm887_vm0, %v5489_v37  ;;  %2481 = vmatpush1.bf16.msra.mxu0 %v5457_v31  ;;  %v7414_v31 = vmax.f32 %v12057_v41, %v3071_v12  ;;  %v7418_v34 = vmax.f32 %v12058_v29, %v3073_v39  ;;  %v3091_v37 = vmax.f32 %v1413_v11, 0.0  ;;  %v1417_v33 = vadd.f32 %v1416_v8, %v12061_v30  ;;  %v1418_v11 = vpop.f32.mrb[89].mxu0  ;;  %v1611_v26 = vpop.f32.mrb[89].mxu1 }
 0x1b4   : > { %2674 = vmatpush1.bf16.msra.mxu1 %v5460_v53  ;;  %2136 = vmatprep.mubr.bf16.mxu0 %v11883_v20  ;;  %v7424_v53 = vmax.f32 %v12059_v21, %v3090_v32  ;;  %v7428_v12 = vmax.f32 %v12060_v16, %v3092_v49  ;;  %v1610_v39 = vadd.f32 %v1609_v62, %v12061_v30  ;;  %v12062_v41 = vmax.f32 %v7237_v47, 0.0  ;;  %v1420_v49 = vpop.f32.mrb[90].mxu0  ;;  %v1613_v8 = vpop.f32.mrb[90].mxu1  ;;  %v12064_v16 = vld [vmem:[#allocation28_spill] sm:$0xff] }
 0x1b5   : > { %2329 = vmatprep.mubr.bf16.mxu1 %v11883_v20  ;;  %2482 = vmatprep.subr.bf16.mxu0 %v5465_v9  ;;  %v12063_v9 = vmax.f32 %v7251_v55, 0.0  ;;  %v1419_v32 = vadd.f32 %v1418_v11, %v12061_v30  ;;  %v1612_v43 = vadd.f32 %v1611_v26, %v12061_v30  ;;  %v3110_v62 = vmax.f32 %v1417_v33, 0.0 }
 0x1b6   : > { %2675 = vmatprep.subr.bf16.mxu1 %v5468_v52  ;;  %v7434_v29 = vmax.f32 %v12062_v41, %v3091_v37  ;;  %v3112_v21 = vmax.f32 %v1610_v39, 0.0  ;;  %v1421_v52 = vadd.f32 %v1420_v49, %v12064_v16  ;;  %v1614_v47 = vadd.f32 %v1613_v8, %v12064_v16  ;;  %v1422_v37 = vpop.f32.mrb[91].mxu0  ;;  %v1615_v41 = vpop.f32.mrb[91].mxu1 }
 0x1b7   : > { %v7438_v28 = vmax.f32 %v12063_v9, %v3093_v45  ;;  %2483 = vmatpush1.bf16.msra.mxu0 %v5463_v50  ;;  %v3111_v55 = vmax.f32 %v1419_v32, 0.0  ;;  %v3113_v45 = vmax.f32 %v1612_v43, 0.0  ;;  %v1423_v11 = vadd.f32 %v1422_v37, %v12064_v16  ;;  %v5469_v9 = vld [vmem:[%s5674_s9 + $0x180] ss:$80 sps:$4 sm:$0xff]  }
 0x1b8   : > { %2676 = vmatpush1.bf16.msra.mxu1 %v5466_v15  ;;  %2484 = vmatprep.subr.bf16.mxu0 %v5471_v7  ;;  %v1616_v26 = vadd.f32 %v1615_v41, %v12064_v16  ;;  %v12065_v50 = vmax.f32 %v7257_v19, 0.0  ;;  %v12067_v39 = vmax.f32 %v7275_v10, 0.0  ;;  %v3130_v8 = vmax.f32 %v1421_v52, 0.0  ;;  %v5490_v15 = vld [vmem:[%s11613_s1 + $0x8] sm:$0xff]  }
 0x1b9   : > { %2677 = vmatprep.subr.bf16.mxu1 %v5474_v6  ;;  %v3132_v30 = vmax.f32 %v1614_v47, 0.0  ;;  %v5472_v7 = vld [vmem:[%s5674_s9 + $0x188] ss:$80 sps:$4 sm:$0xff]   ;;  %v12069_v32 = vmax.f32 %v7261_v23, 0.0  ;;  %v12071_v19 = vmax.f32 %v7287_v5, 0.0  ;;  %v3131_v10 = vmax.f32 %v1423_v11, 0.0 }
 0x1ba   : > { %v7449_v33 = vmax.f32 %v12065_v50, %v3110_v62  ;;  %v7453_v49 = vmax.f32 %v12067_v39, %v3112_v21  ;;  %5260 = vmatmul.mubr.msk.bf16.gmra.mrb[196].mxu0 %vm887_vm0, %v5490_v15  ;;  %v3133_v62 = vmax.f32 %v1616_v26, 0.0  ;;  %v12073_v21 = vmax.f32 %v7271_v54, 0.0  ;;  %v1426_v11 = vpop.f32.mrb[92].mxu0  ;;  %v12082_v50 = vld [vmem:[#allocation36_spill] sm:$0xff]  ;;  %v12111_v16 = vld [vmem:[#allocation5_spill] sm:$0xff] }
 0x1bb   : > { %v7462_v6 = vmax.f32 %v12069_v32, %v3111_v55  ;;  %v7466_v43 = vmax.f32 %v12071_v19, %v3113_v45  ;;  %5276 = vmatmul.mubr.msk.bf16.gmra.mrb[196].mxu1 %vm887_vm0, %v5490_v15  ;;  %2146 = vmatprep.mubr.bf16.mxu0 %v11883_v20  ;;  %v12075_v47 = vmax.f32 %v7294_v18, 0.0  ;;  %v4307_v23 = vadd.f32 %v6694_v56, %v6845_v1  ;;  %v1619_v18 = vpop.f32.mrb[92].mxu1  ;;  %v12081_v56 = vld [vmem:[#allocation32_spill] sm:$0xff]  ;;  %v12085_v32 = vld [vmem:[#allocation55_spill] sm:$0xff] }
 0x1bc   : > { %12066 = vst [vmem:[#allocation72_spill] sm:$0xff] %v7449_v33  ;;  %12068 = vst [vmem:[#allocation73_spill] sm:$0xff] %v7453_v49  ;;  %v7472_v52 = vmax.f32 %v12073_v21, %v3130_v8  ;;  %2339 = vmatprep.mubr.bf16.mxu1 %v11883_v20  ;;  %v4804_v5 = vadd.f32 %v6696_v13, %v6898_v17  ;;  %v12077_v41 = vmax.f32 %v7283_v0, 0.0  ;;  %v12079_v54 = vmax.f32 %v7298_v36, 0.0  ;;  %v1428_v17 = vpop.f32.mrb[93].mxu0  ;;  %v1621_v0 = vpop.f32.mrb[93].mxu1 }
 0x1bd   : > { %12070 = vst [vmem:[#allocation74_spill] sm:$0xff] %v7462_v6  ;;  %12072 = vst [vmem:[#allocation75_spill] sm:$0xff] %v7466_v43  ;;  %v7476_v37 = vmax.f32 %v12075_v47, %v3132_v30  ;;  %v4330_v30 = vadd.f32 %v6719_v59, %v6943_v14  ;;  %v4826_v26 = vadd.f32 %v6721_v46, %v6978_v57  ;;  %2485 = vmatpush1.bf16.msra.mxu0 %v5469_v9  ;;  %v12083_v36 = vld [vmem:[#allocation54_spill] sm:$0xff]  ;;  %v1430_v14 = vpop.f32.mrb[94].mxu0  ;;  %v1623_v46 = vpop.f32.mrb[94].mxu1  ;;  %v12084_v57 = vld [vmem:[#allocation39_spill] sm:$0xff] }
 0x1be   : > { %12074 = vst [vmem:[#allocation76_spill] sm:$0xff] %v7472_v52  ;;  %v7485_v55 = vmax.f32 %v12077_v41, %v3131_v10  ;;  %v7489_v45 = vmax.f32 %v12079_v54, %v3133_v62  ;;  %v1427_v1 = vadd.f32 %v1426_v11, %v12081_v56  ;;  %v1620_v13 = vadd.f32 %v1619_v18, %v12081_v56  ;;  %v12086_v21 = vld [vmem:[#allocation41_spill] sm:$0xff]  ;;  %v12129_v52 = vld [vmem:[#allocation66_spill] sm:$0xff]  ;;  %v12133_v43 = vld [vmem:[#allocation51_spill] sm:$0xff] }
 0x1bf   : > { %12076 = vst [vmem:[#allocation77_spill] sm:$0xff] %v7476_v37  ;;  %v7498_v39 = vadd.f32 %v4307_v23, %v12082_v50  ;;  %v7501_v8 = vadd.f32 %v4804_v5, %v12083_v36  ;;  %2678 = vmatpush1.bf16.msra.mxu1 %v5472_v7  ;;  %v1429_v15 = vadd.f32 %v1428_v17, %v12081_v56  ;;  %v1432_v5 = vpop.f32.mrb[95].mxu0  ;;  %v1625_v7 = vpop.f32.mrb[95].mxu1  ;;  %v5491_v50 = vld [vmem:[%s11613_s1 + $0x10] sm:$0xff]  }
 0x1c0   : > { %12078 = vst [vmem:[#allocation78_spill] sm:$0xff] %v7485_v55  ;;  %12080 = vst [vmem:[#allocation79_spill] sm:$0xff] %v7489_v45  ;;  %v1622_v59 = vadd.f32 %v1621_v0, %v12081_v56  ;;  %v7506_v9 = vadd.f32 %v4330_v30, %v12084_v57  ;;  %v7509_v19 = vadd.f32 %v4826_v26, %v12085_v32  ;;  %v3150_v10 = vmax.f32 %v1427_v1, 0.0  ;;  %v4565_v36 = vld [vmem:[%s11615_s3 + $0x790] sm:$0xff] }
 0x1c1   : > { %v3152_v62 = vmax.f32 %v1620_v13, 0.0  ;;  %v1431_v47 = vadd.f32 %v1430_v14, %v12086_v21  ;;  %v1624_v23 = vadd.f32 %v1623_v46, %v12086_v21  ;;  %v3151_v41 = vmax.f32 %v1429_v15, 0.0  ;;  %v12123_v55 = vld [vmem:[#allocation38_spill] sm:$0xff] }
 0x1c2   : > { %v3153_v54 = vmax.f32 %v1622_v59, 0.0  ;;  %v1433_v11 = vadd.f32 %v1432_v5, %v12086_v21  ;;  %v1626_v18 = vadd.f32 %v1625_v7, %v12086_v21  ;;  %v12087_v30 = vmax.f32 %v7303_v3, 0.0  ;;  %5261 = vmatmul.mubr.msk.bf16.gmra.mrb[200].mxu0 %vm887_vm0, %v5491_v50  ;;  %v4069_v3 = vld [vmem:[%s11615_s3 + $0x298] sm:$0xff]  ;;  %v12099_v7 = vld [vmem:[#allocation57_spill] sm:$0xff] }
 0x1c3   : > { %v12089_v26 = vmax.f32 %v7314_v51, 0.0  ;;  %v3170_v13 = vmax.f32 %v1431_v47, 0.0  ;;  %v3172_v0 = vmax.f32 %v1624_v23, 0.0  ;;  %v4566_v51 = vld [vmem:[%s11615_s3 + $0x798] sm:$0xff]  ;;  %v12091_v15 = vmax.f32 %v7306_v22, 0.0  ;;  %5277 = vmatmul.mubr.msk.bf16.gmra.mrb[200].mxu1 %vm887_vm0, %v5491_v50  ;;  %2156 = vmatprep.mubr.bf16.mxu0 %v11883_v20  ;;  %v4585_v22 = vld [vmem:[%s11615_s3 + $0x830] sm:$0xff] }
 0x1c4   : > { %v7517_v17 = vmax.f32 %v12087_v30, %v3150_v10  ;;  %v12093_v14 = vmax.f32 %v7322_v4, 0.0  ;;  %v3171_v57 = vmax.f32 %v1433_v11, 0.0  ;;  %v3173_v32 = vmax.f32 %v1626_v18, 0.0  ;;  %v4088_v10 = vld [vmem:[%s11615_s3 + $0x330] sm:$0xff]  ;;  %v4089_v4 = vld [vmem:[%s11615_s3 + $0x338] sm:$0xff]  ;;  %2349 = vmatprep.mubr.bf16.mxu1 %v11883_v20 }
 0x1c5   : > { %v7521_v1 = vmax.f32 %v12089_v26, %v3152_v62  ;;  %v7538_v59 = vmax.f32 %v12091_v15, %v3151_v41  ;;  %v12095_v62 = vmax.f32 %v7311_v58, 0.0  ;;  %v12097_v23 = vmax.f32 %v7327_v35, 0.0  ;;  %v12100_v41 = vld [vmem:[#allocation59_spill] sm:$0xff]  ;;  %v12101_v11 = vld [vmem:[#allocation60_spill] sm:$0xff]  ;;  %v7587_v15 = vpop.f32.mrb[96].mxu1 }
 0x1c6   : > { %12088 = vst [vmem:[#allocation36_spill] sm:$0xff] %v7517_v17  ;;  %v7542_v46 = vmax.f32 %v12093_v14, %v3153_v54  ;;  %v4352_v54 = vadd.f32 %v12100_v41, %v12099_v7  ;;  %v4848_v18 = vadd.f32 %v12101_v11, %v7058_v60  ;;  %v4586_v30 = vld [vmem:[%s11615_s3 + $0x838] sm:$0xff]  ;;  %v4108_v58 = vld [vmem:[%s11615_s3 + $0x3d0] sm:$0xff]  ;;  %v12102_v26 = vmax.f32 %v7319_v25, 0.0  ;;  %v7585_v60 = vpop.f32.mrb[96].mxu0  ;;  %v12109_v41 = vld [vmem:[#allocation61_spill] sm:$0xff] }
 0x1c7   : > { %12090 = vst [vmem:[#allocation54_spill] sm:$0xff] %v7521_v1  ;;  %12092 = vst [vmem:[#allocation39_spill] sm:$0xff] %v7538_v59  ;;  %v7557_v47 = vmax.f32 %v12095_v62, %v3170_v13  ;;  %v7561_v5 = vmax.f32 %v12097_v23, %v3172_v0  ;;  %v4605_v35 = vld [vmem:[%s11615_s3 + $0x8d0] sm:$0xff]  ;;  %v12104_v0 = vmax.f32 %v7330_v38, 0.0  ;;  %v12107_v62 = vld [vmem:[#allocation53_spill] sm:$0xff]  ;;  %v4229_v25 = vmul.f32 %v4069_v3, %v12111_v16 }
 0x1c8   : > { %12094 = vst [vmem:[#allocation55_spill] sm:$0xff] %v7542_v46  ;;  %v7579_v13 = vmax.f32 %v12102_v26, %v3171_v57  ;;  %v12106_v14 = vld [vmem:[#allocation63_spill] sm:$0xff]  ;;  %v12108_v7 = vld [vmem:[#allocation48_spill] sm:$0xff]  ;;  %v7604_v26 = vpop.f32.mrb[97].mxu0 }
 0x1c9   : > { %12096 = vst [vmem:[#allocation80_spill] sm:$0xff] %v7557_v47  ;;  %12098 = vst [vmem:[#allocation81_spill] sm:$0xff] %v7561_v5  ;;  %v7583_v50 = vmax.f32 %v12104_v0, %v3173_v32  ;;  %v4374_v23 = vadd.f32 %v12107_v62, %v12106_v14  ;;  %v4870_v11 = vadd.f32 %v12109_v41, %v12108_v7  ;;  %v12110_v21 = vld [vmem:[#allocation35_spill] sm:$0xff]  ;;  %v7606_v0 = vpop.f32.mrb[97].mxu1  ;;  %v12112_v14 = vld [vmem:[#allocation45_spill] sm:$0xff] }
 0x1ca   : > { %12103 = vst [vmem:[#allocation57_spill] sm:$0xff] %v7579_v13  ;;  %v4725_v56 = vmul.f32 %v4565_v36, %v12110_v21  ;;  %v4109_v38 = vld [vmem:[%s11615_s3 + $0x3d8] sm:$0xff]  ;;  %v4128_v32 = vld [vmem:[%s11615_s3 + $0x470] sm:$0xff]  ;;  %v7609_v21 = vadd.f32 %v4352_v54, %v12112_v14  ;;  %v4726_v62 = vmul.f32 %v4566_v51, %v12111_v16  ;;  %v12114_v7 = vld [vmem:[#allocation37_spill] sm:$0xff]  ;;  %v7622_v13 = vpop.f32.mrb[98].mxu1 }
 0x1cb   : > { %12105 = vst [vmem:[#allocation59_spill] sm:$0xff] %v7583_v50  ;;  %v4606_v57 = vld [vmem:[%s11615_s3 + $0x8d8] sm:$0xff]  ;;  %v12113_v36 = vld [vmem:[#allocation62_spill] sm:$0xff]  ;;  %v4248_v41 = vmul.f32 %v4088_v10, %v12114_v7  ;;  %v1440_v50 = vpop.f32.mrb[98].mxu0  ;;  %v12115_v54 = vld [vmem:[#allocation49_spill] sm:$0xff]  ;;  %v4745_v16 = vmul.f32 %v4585_v22, %v12114_v7  ;;  %v1635_v17 = vpop.f32.mrb[99].mxu1 }
 0x1cc   : > { %v7612_v3 = vadd.f32 %v4848_v18, %v12113_v36  ;;  %v7625_v14 = vadd.f32 %v4374_v23, %v12115_v54  ;;  %v12116_v18 = vld [vmem:[#allocation64_spill] sm:$0xff]  ;;  %v12118_v47 = vld [vmem:[#allocation42_spill] sm:$0xff]  ;;  %v1442_v1 = vpop.f32.mrb[99].mxu0 }
 0x1cd   : > { %v7628_v36 = vadd.f32 %v4870_v11, %v12116_v18  ;;  %v12117_v51 = vld [vmem:[#allocation40_spill] sm:$0xff]  ;;  %v4268_v46 = vmul.f32 %v4108_v58, %v12118_v47  ;;  %v4765_v23 = vmul.f32 %v4605_v35, %v12118_v47  ;;  %v12119_v54 = vld [vmem:[#allocation46_spill] sm:$0xff]  ;;  %v12120_v18 = vld [vmem:[#allocation47_spill] sm:$0xff] }
 0x1ce   : > { %v4249_v10 = vmul.f32 %v4089_v4, %v12117_v51  ;;  %v4746_v5 = vmul.f32 %v4586_v30, %v12117_v51  ;;  %v4626_v59 = vld [vmem:[%s11615_s3 + $0x978] sm:$0xff]  ;;  %v4269_v45 = vmul.f32 %v4109_v38, %v12119_v54  ;;  %v4766_v11 = vmul.f32 %v4606_v57, %v12119_v54  ;;  %v12121_v7 = vld [vmem:[#allocation50_spill] sm:$0xff]  ;;  %v12122_v51 = vld [vmem:[#allocation65_spill] sm:$0xff] }
 0x1cf   : > { %v4288_v22 = vmul.f32 %v4128_v32, %v12120_v18  ;;  %v4785_v4 = vmul.f32 %v4625_v48, %v12120_v18  ;;  %v4289_v30 = vmul.f32 %v4129_v42, %v12121_v7  ;;  %v5492_v58 = vld [vmem:[%s11613_s1 + $0x18] sm:$0xff]   ;;  %v4396_v37 = vadd.f32 %v12123_v55, %v12122_v51 }
 0x1d0   : > { %5262 = vmatmul.mubr.msk.bf16.gmra.mrb[204].mxu0 %vm887_vm0, %v5492_v58  ;;  %v12124_v47 = vld [vmem:[#allocation52_spill] sm:$0xff]  ;;  %v4786_v38 = vmul.f32 %v4626_v59, %v12121_v7  ;;  %5278 = vmatmul.mubr.msk.bf16.gmra.mrb[204].mxu1 %vm887_vm0, %v5492_v58  ;;  %v12125_v48 = vld [vmem:[#allocation43_spill] sm:$0xff]  ;;  %v4440_v55 = vadd.f32 %v12129_v52, %v4268_v46  ;;  %v1639_v59 = vpop.f32.mrb[100].mxu1 }
 0x1d1   : > { %v4892_v35 = vadd.f32 %v12124_v47, %v4725_v56  ;;  %2166 = vmatprep.mubr.bf16.mxu0 %v11883_v20  ;;  %v4418_v57 = vadd.f32 %v12125_v48, %v4248_v41  ;;  %v12126_v42 = vld [vmem:[#allocation44_spill] sm:$0xff]  ;;  %2359 = vmatprep.mubr.bf16.mxu1 %v11883_v20  ;;  %v7656_v54 = vadd.f32 %v4396_v37, %v4229_v25  ;;  %v12130_v51 = vld [vmem:[#allocation67_spill] sm:$0xff]  ;;  %v1446_v47 = vpop.f32.mrb[100].mxu0  ;;  %v1641_v6 = vpop.f32.mrb[101].mxu1 }
 0x1d2   : > { %v4914_v32 = vadd.f32 %v12126_v42, %v4745_v16  ;;  %v4936_v56 = vadd.f32 %v12130_v51, %v4765_v23  ;;  %v4462_v41 = vadd.f32 %v12133_v43, %v4288_v22  ;;  %v12134_v48 = vld [vmem:[#allocation68_spill] sm:$0xff]  ;;  %v1448_v42 = vpop.f32.mrb[101].mxu0  ;;  %v7668_v37 = vadd.f32 %v4440_v55, %v4269_v45  ;;  %v1643_v52 = vpop.f32.mrb[102].mxu1 }
 0x1d3   : > { %12127 = vst [vmem:[#allocation60_spill] sm:$0xff] %v7656_v54  ;;  %v7658_v18 = vadd.f32 %v4892_v35, %v4726_v62  ;;  %v7662_v7 = vadd.f32 %v4418_v57, %v4249_v10  ;;  %v4958_v16 = vadd.f32 %v12134_v48, %v4785_v4  ;;  %v1450_v62 = vpop.f32.mrb[102].mxu0  ;;  %v1645_v35 = vpop.f32.mrb[103].mxu1  ;;  %v5493_v43 = vld [vmem:[%s11613_s1 + $0x20] sm:$0xff]   ;;  %v12153_v54 = vld [vmem:[#allocation31_spill] sm:$0xff] }
 0x1d4   : > { %v7664_v58 = vadd.f32 %v4914_v32, %v4746_v5  ;;  %12135 = vst [vmem:[#allocation61_spill] sm:$0xff] %v7668_v37  ;;  %v7670_v25 = vadd.f32 %v4936_v56, %v4766_v11  ;;  %v7672_v46 = vadd.f32 %v4462_v41, %v4289_v30  ;;  %v1452_v10 = vpop.f32.mrb[103].mxu0  ;;  %v1649_v5 = vpop.f32.mrb[104].mxu1  ;;  %v12139_v11 = vld [vmem:[#allocation9_spill] sm:$0xff]  ;;  %v12140_v56 = vld [vmem:[#allocation12_spill] sm:$0xff] }
 0x1d5   : > { %12128 = vst [vmem:[#allocation63_spill] sm:$0xff] %v7658_v18  ;;  %12131 = vst [vmem:[#allocation53_spill] sm:$0xff] %v7662_v7  ;;  %v7674_v23 = vadd.f32 %v4958_v16, %v4786_v38  ;;  %v1456_v45 = vpop.f32.mrb[104].mxu0  ;;  %v7685_v22 = vadd.f32 %v7585_v60, %v12139_v11  ;;  %v7689_v4 = vadd.f32 %v7587_v15, %v12139_v11  ;;  %v1651_v38 = vpop.f32.mrb[105].mxu1  ;;  %v12148_v7 = vld [vmem:[#allocation27_spill] sm:$0xff] }
 0x1d6   : > { %12132 = vst [vmem:[#allocation48_spill] sm:$0xff] %v7664_v58  ;;  %12136 = vst [vmem:[#allocation35_spill] sm:$0xff] %v7670_v25  ;;  %v1458_v30 = vpop.f32.mrb[105].mxu0  ;;  %v7693_v57 = vadd.f32 %v7604_v26, %v12139_v11  ;;  %v7697_v32 = vadd.f32 %v7606_v0, %v12139_v11  ;;  %v1653_v51 = vpop.f32.mrb[106].mxu1  ;;  %v7700_v41 = vadd.f32 %v1440_v50, %v12140_v56  ;;  %v12143_v25 = vld [vmem:[#allocation23_spill] sm:$0xff] }
 0x1d7   : > { %12137 = vst [vmem:[#allocation5_spill] sm:$0xff] %v7672_v46  ;;  %12138 = vst [vmem:[#allocation45_spill] sm:$0xff] %v7674_v23  ;;  %v1460_v55 = vpop.f32.mrb[106].mxu0  ;;  %v7703_v60 = vadd.f32 %v1442_v1, %v12140_v56  ;;  %v7707_v15 = vadd.f32 %v7622_v13, %v12140_v56  ;;  %v7710_v48 = vadd.f32 %v1635_v17, %v12140_v56  ;;  %v1655_v16 = vpop.f32.mrb[107].mxu1  ;;  %v12142_v17 = vld [vmem:[#allocation19_spill] sm:$0xff] }
 0x1d8   : > { %5263 = vmatmul.mubr.msk.bf16.gmra.mrb[208].mxu0 %vm887_vm0, %v5493_v43  ;;  %5279 = vmatmul.mubr.msk.bf16.gmra.mrb[208].mxu1 %vm887_vm0, %v5493_v43  ;;  %v1462_v26 = vpop.f32.mrb[107].mxu0  ;;  %v12141_v43 = vld [vmem:[#allocation15_spill] sm:$0xff]  ;;  %v7727_v56 = vadd.f32 %v1450_v62, %v12142_v17  ;;  %v7730_v46 = vadd.f32 %v1643_v52, %v12142_v17  ;;  %v7742_v23 = vadd.f32 %v1645_v35, %v12142_v17 }
 0x1d9   : > { %2176 = vmatprep.mubr.bf16.mxu0 %v11883_v20  ;;  %2369 = vmatprep.mubr.bf16.mxu1 %v11883_v20  ;;  %v7713_v0 = vadd.f32 %v1446_v47, %v12141_v43  ;;  %v7716_v11 = vadd.f32 %v1448_v42, %v12141_v43  ;;  %v7719_v50 = vadd.f32 %v1639_v59, %v12141_v43  ;;  %v5494_v47 = vld [vmem:[%s11613_s1 + $0x28] sm:$0xff]  }
 0x1da   : > { %v7722_v1 = vadd.f32 %v1641_v6, %v12141_v43  ;;  %v7739_v42 = vadd.f32 %v1452_v10, %v12142_v17  ;;  %v1466_v17 = vpop.f32.mrb[108].mxu0  ;;  %v1659_v43 = vpop.f32.mrb[108].mxu1  ;;  %v7758_v13 = vadd.f32 %v1456_v45, %v12143_v25  ;;  %v7761_v59 = vadd.f32 %v1649_v5, %v12143_v25 }
 0x1db   : > { %v1468_v37 = vpop.f32.mrb[109].mxu0  ;;  %v1661_v10 = vpop.f32.mrb[109].mxu1  ;;  %v7769_v58 = vadd.f32 %v1651_v38, %v12143_v25  ;;  %v7772_v45 = vadd.f32 %v1460_v55, %v12148_v7  ;;  %v7775_v5 = vadd.f32 %v1462_v26, %v12148_v7  ;;  %v7778_v18 = vadd.f32 %v1653_v51, %v12148_v7 }
 0x1dc   : > { %12144 = vst [vmem:[#allocation62_spill] sm:$0xff] %v7758_v13  ;;  %12145 = vst [vmem:[#allocation37_spill] sm:$0xff] %v7761_v59  ;;  %v1470_v62 = vpop.f32.mrb[110].mxu0  ;;  %v1663_v52 = vpop.f32.mrb[110].mxu1  ;;  %v7781_v6 = vadd.f32 %v1655_v16, %v12148_v7  ;;  %v7784_v49 = vadd.f32 %v1466_v17, %v12153_v54  ;;  %v7787_v38 = vadd.f32 %v1468_v37, %v12153_v54  ;;  %v12158_v16 = vld [vmem:[#allocation58_spill] sm:$0xff] }
 0x1dd   : > { %12147 = vst [vmem:[#allocation64_spill] sm:$0xff] %v7769_v58  ;;  %12149 = vst [vmem:[#allocation40_spill] sm:$0xff] %v7772_v45  ;;  %v1472_v35 = vpop.f32.mrb[111].mxu0  ;;  %v7790_v55 = vadd.f32 %v1659_v43, %v12153_v54  ;;  %v7793_v26 = vadd.f32 %v1661_v10, %v12153_v54  ;;  %v7798_v7 = vadd.f32 %v1470_v62, %v12158_v16  ;;  %v5495_v37 = vld [vmem:[%s11613_s1 + $0x30] sm:$0xff]  }
 0x1de   : > { %12150 = vst [vmem:[#allocation42_spill] sm:$0xff] %v7775_v5  ;;  %12151 = vst [vmem:[#allocation46_spill] sm:$0xff] %v7778_v18  ;;  %v7801_v33 = vadd.f32 %v1663_v52, %v12158_v16  ;;  %v7810_v10 = vadd.f32 %v1472_v35, %v12158_v16  ;;  %v12163_v5 = vld [vmem:[#allocation11_spill] sm:$0xff] }
 0x1df   : > { %12152 = vst [vmem:[#allocation47_spill] sm:$0xff] %v7781_v6  ;;  %12154 = vst [vmem:[#allocation50_spill] sm:$0xff] %v7784_v49 }
 0x1e0   : > { %5264 = vmatmul.mubr.msk.bf16.gmra.mrb[212].mxu0 %vm887_vm0, %v5494_v47  ;;  %5280 = vmatmul.mubr.msk.bf16.gmra.mrb[212].mxu1 %vm887_vm0, %v5494_v47  ;;  %v7766_v47 = vadd.f32 %v1458_v30, %v12143_v25  ;;  %v1665_v30 = vpop.f32.mrb[111].mxu1  ;;  %12155 = vst [vmem:[#allocation65_spill] sm:$0xff] %v7787_v38  ;;  %12156 = vst [vmem:[#allocation38_spill] sm:$0xff] %v7790_v55 }
 0x1e1   : > { %2186 = vmatprep.mubr.bf16.mxu0 %v11883_v20  ;;  %2379 = vmatprep.mubr.bf16.mxu1 %v11883_v20  ;;  %12157 = vst [vmem:[#allocation52_spill] sm:$0xff] %v7793_v26  ;;  %12159 = vst [vmem:[#allocation43_spill] sm:$0xff] %v7798_v7  ;;  %v7813_v25 = vadd.f32 %v1665_v30, %v12158_v16  ;;  %v1476_v16 = vpop.f32.mrb[112].mxu0  ;;  %v1669_v54 = vpop.f32.mrb[112].mxu1  ;;  %v12164_v7 = vld [vmem:[#allocation14_spill] sm:$0xff] }
 0x1e2   : > { %12146 = vst [vmem:[#allocation49_spill] sm:$0xff] %v7766_v47  ;;  %12160 = vst [vmem:[#allocation44_spill] sm:$0xff] %v7801_v33  ;;  %v1477_v51 = vadd.f32 %v1476_v16, %v12163_v5  ;;  %v1670_v43 = vadd.f32 %v1669_v54, %v12163_v5  ;;  %v1478_v6 = vpop.f32.mrb[113].mxu0  ;;  %v1671_v18 = vpop.f32.mrb[113].mxu1 }
 0x1e3   : > { %12161 = vst [vmem:[#allocation66_spill] sm:$0xff] %v7810_v10  ;;  %12162 = vst [vmem:[#allocation67_spill] sm:$0xff] %v7813_v25  ;;  %v1479_v30 = vadd.f32 %v1478_v6, %v12163_v5  ;;  %v1480_v26 = vpop.f32.mrb[114].mxu0  ;;  %v1673_v38 = vpop.f32.mrb[114].mxu1  ;;  %v12165_v6 = vmax.f32 %v7685_v22, 0.0  ;;  %v3992_v22 = vld [vmem:[%s11615_s3 + $0x30] sm:$0xff] }
 0x1e4   : > { %v3350_v55 = vmax.f32 %v1477_v51, 0.0  ;;  %v3352_v62 = vmax.f32 %v1670_v43, 0.0  ;;  %v1481_v52 = vadd.f32 %v1480_v26, %v12164_v7  ;;  %v1674_v16 = vadd.f32 %v1673_v38, %v12164_v7  ;;  %v1482_v33 = vpop.f32.mrb[115].mxu0  ;;  %v1675_v54 = vpop.f32.mrb[115].mxu1  ;;  %v4487_v26 = vld [vmem:[%s11615_s3 + $0x520] sm:$0xff] }
 0x1e5   : > { %v3351_v49 = vmax.f32 %v1479_v30, 0.0  ;;  %v1483_v35 = vadd.f32 %v1482_v33, %v12164_v7  ;;  %v1676_v17 = vadd.f32 %v1675_v54, %v12164_v7  ;;  %v12166_v38 = vmax.f32 %v7689_v4, 0.0  ;;  %v5496_v33 = vld [vmem:[%s11613_s1 + $0x38] sm:$0xff]   ;;  %v12169_v7 = vld [vmem:[#allocation69_spill] sm:$0xff]  ;;  %v1486_v10 = vpop.f32.mrb[116].mxu0  ;;  %v1679_v58 = vpop.f32.mrb[116].mxu1 }
 0x1e6   : > { %v3670_v25 = vmax.f32 %v12165_v6, %v3350_v55  ;;  %v3370_v43 = vmax.f32 %v1481_v52, 0.0  ;;  %v3372_v30 = vmax.f32 %v1674_v16, 0.0  ;;  %v4489_v55 = vld [vmem:[%s11615_s3 + $0x530] sm:$0xff]  ;;  %v12168_v52 = vmax.f32 %v7697_v32, 0.0  ;;  %v4490_v32 = vld [vmem:[%s11615_s3 + $0x538] sm:$0xff] }
 0x1e7   : > { %v3672_v51 = vmax.f32 %v12166_v38, %v3352_v62  ;;  %v3991_v62 = vld [vmem:[%s11615_s3 + $0x28] sm:$0xff]  ;;  %v3371_v54 = vmax.f32 %v1483_v35, 0.0  ;;  %v3373_v6 = vmax.f32 %v1676_v17, 0.0  ;;  %v12171_v35 = vmax.f32 %v7707_v15, 0.0  ;;  %v1488_v15 = vpop.f32.mrb[117].mxu0 }
 0x1e8   : > { %5265 = vmatmul.mubr.msk.bf16.gmra.mrb[216].mxu0 %vm887_vm0, %v5495_v37  ;;  %5281 = vmatmul.mubr.msk.bf16.gmra.mrb[216].mxu1 %vm887_vm0, %v5495_v37  ;;  %v1672_v37 = vadd.f32 %v1671_v18, %v12163_v5  ;;  %v3990_v18 = vld [vmem:[%s11615_s3 + $0x20] sm:$0xff]  ;;  %v3830_v38 = vmax.f32 %v7353_v40, %v3670_v25 }
 0x1e9   : > { %2196 = vmatprep.mubr.bf16.mxu0 %v11883_v20  ;;  %2389 = vmatprep.mubr.bf16.mxu1 %v11883_v20  ;;  %v3832_v5 = vmax.f32 %v12169_v7, %v3672_v51  ;;  %v3692_v40 = vmax.f32 %v12171_v35, %v3372_v30  ;;  %v12172_v51 = vmax.f32 %v7703_v60, 0.0  ;;  %v1681_v30 = vpop.f32.mrb[117].mxu1  ;;  %v4507_v60 = vld [vmem:[%s11615_s3 + $0x5c0] sm:$0xff] }
 0x1ea   : > { %v3353_v45 = vmax.f32 %v1672_v37, 0.0  ;;  %v12167_v37 = vmax.f32 %v7693_v57, 0.0  ;;  %v3993_v57 = vld [vmem:[%s11615_s3 + $0x38] sm:$0xff]  ;;  %v4150_v47 = vmul.f32 %v3990_v18, %v3830_v38  ;;  %v1490_v18 = vpop.f32.mrb[118].mxu0 }
 0x1ec   : > { %v3671_v4 = vmax.f32 %v12167_v37, %v3351_v49  ;;  %v3673_v16 = vmax.f32 %v12168_v52, %v3353_v45  ;;  %v4488_v49 = vld [vmem:[%s11615_s3 + $0x528] sm:$0xff]  ;;  %v12170_v45 = vmax.f32 %v7700_v41, 0.0  ;;  %v12173_v37 = vmax.f32 %v7710_v48, 0.0  ;;  %v4012_v48 = vld [vmem:[%s11615_s3 + $0xd0] sm:$0xff] }
 0x1ed   : > { %v4647_v41 = vmul.f32 %v4487_v26, %v3830_v38  ;;  %v4309_v26 = vadd.f32 %v7498_v39, %v4150_v47  ;;  %v4508_v38 = vld [vmem:[%s11615_s3 + $0x5c8] sm:$0xff] }
 0x1ee   : > { %v3690_v17 = vmax.f32 %v12170_v45, %v3370_v43  ;;  %v3831_v7 = vmax.f32 %v7361_v27, %v3671_v4  ;;  %v3833_v25 = vmax.f32 %v7365_v24, %v3673_v16  ;;  %v3693_v52 = vmax.f32 %v12173_v37, %v3373_v6  ;;  %v4010_v24 = vld [vmem:[%s11615_s3 + $0xc0] sm:$0xff]  ;;  %v4011_v6 = vld [vmem:[%s11615_s3 + $0xc8] sm:$0xff]  ;;  %v4013_v37 = vld [vmem:[%s11615_s3 + $0xd8] sm:$0xff] }
 0x1ef   : > { %v4152_v43 = vmul.f32 %v3992_v22, %v3832_v5  ;;  %v4649_v45 = vmul.f32 %v4489_v55, %v3832_v5  ;;  %v1683_v5 = vpop.f32.mrb[118].mxu1  ;;  %v4806_v22 = vadd.f32 %v7501_v8, %v4647_v41  ;;  %v12174_v55 = vld [vmem:[#allocation70_spill] sm:$0xff]  ;;  %v4510_v41 = vld [vmem:[%s11615_s3 + $0x5d8] sm:$0xff] }
 0x1f0   : > { %5266 = vmatmul.mubr.msk.bf16.gmra.mrb[220].mxu0 %vm887_vm0, %v5496_v33  ;;  %5282 = vmatmul.mubr.msk.bf16.gmra.mrb[220].mxu1 %vm887_vm0, %v5496_v33  ;;  %v3691_v33 = vmax.f32 %v12172_v51, %v3371_v54  ;;  %v4151_v35 = vmul.f32 %v3991_v62, %v3831_v7  ;;  %v4648_v59 = vmul.f32 %v4488_v49, %v3831_v7  ;;  %v12175_v62 = vld [vmem:[#allocation71_spill] sm:$0xff]  ;;  %v7911_v49 = vpop.f32.mrb[119].mxu0  ;;  %v7913_v39 = vpop.f32.mrb[119].mxu1 }
 0x1f1   : > { %2206 = vmatprep.mubr.bf16.mxu0 %v11883_v20  ;;  %2399 = vmatprep.mubr.bf16.mxu1 %v11883_v20  ;;  %v4153_v13 = vmul.f32 %v3993_v57, %v3833_v25  ;;  %v4650_v27 = vmul.f32 %v4490_v32, %v3833_v25  ;;  %v3850_v4 = vmax.f32 %v12174_v55, %v3690_v17  ;;  %v4509_v54 = vld [vmem:[%s11615_s3 + $0x5d0] sm:$0xff] }
 0x1f2   : > { %v3852_v16 = vmax.f32 %v12175_v62, %v3692_v40  ;;  %v3851_v8 = vmax.f32 %v7381_v2, %v3691_v33  ;;  %v3853_v47 = vmax.f32 %v7385_v63, %v3693_v52  ;;  %v12176_v57 = vld [vmem:[#allocation18_spill] sm:$0xff]  ;;  %v4310_v40 = vadd.f32 %v4309_v26, %v4151_v35  ;;  %v5497_v2 = vld [vmem:[%s11613_s1 + $0x40] sm:$0xff]  }
 0x1f3   : > { %v1487_v32 = vadd.f32 %v1486_v10, %v12176_v57  ;;  %v1680_v17 = vadd.f32 %v1679_v58, %v12176_v57  ;;  %v4807_v7 = vadd.f32 %v4806_v22, %v4648_v59  ;;  %v4170_v25 = vmul.f32 %v4010_v24, %v3850_v4 }
 0x1f4   : > { %v4667_v51 = vmul.f32 %v4507_v60, %v3850_v4  ;;  %v4172_v63 = vmul.f32 %v4012_v48, %v3852_v16  ;;  %v4669_v58 = vmul.f32 %v4509_v54, %v3852_v16  ;;  %v4171_v10 = vmul.f32 %v4011_v6, %v3851_v8  ;;  %v7933_v4 = vpop.f32.mrb[120].mxu0  ;;  %v7935_v48 = vpop.f32.mrb[120].mxu1 }
 0x1f5   : > { %v4668_v59 = vmul.f32 %v4508_v38, %v3851_v8  ;;  %v4311_v33 = vadd.f32 %v4310_v40, %v4152_v43  ;;  %v4808_v52 = vadd.f32 %v4807_v7, %v4649_v45  ;;  %v4332_v35 = vadd.f32 %v7506_v9, %v4170_v25  ;;  %v7942_v16 = vpop.f32.mrb[121].mxu0  ;;  %v4030_v38 = vld [vmem:[%s11615_s3 + $0x160] sm:$0xff]  ;;  %v4032_v25 = vld [vmem:[%s11615_s3 + $0x170] sm:$0xff] }
 0x1f6   : > { %v4828_v24 = vadd.f32 %v7509_v19, %v4667_v51  ;;  %v4173_v60 = vmul.f32 %v4013_v37, %v3853_v47  ;;  %v4670_v26 = vmul.f32 %v4510_v41, %v3853_v47  ;;  %v3390_v22 = vmax.f32 %v1487_v32, 0.0  ;;  %v7944_v19 = vpop.f32.mrb[121].mxu1  ;;  %v7955_v32 = vpop.f32.mrb[122].mxu0 }
 0x1f7   : > { %v3392_v55 = vmax.f32 %v1680_v17, 0.0  ;;  %v7938_v62 = vadd.f32 %v4311_v33, %v4153_v13  ;;  %v7940_v43 = vadd.f32 %v4808_v52, %v4650_v27  ;;  %v4333_v45 = vadd.f32 %v4332_v35, %v4171_v10  ;;  %v7957_v17 = vpop.f32.mrb[122].mxu1  ;;  %v7970_v37 = vpop.f32.mrb[123].mxu0 }
 0x1f8   : > { %5267 = vmatmul.mubr.msk.bf16.gmra.mrb[224].mxu0 %vm887_vm0, %v5497_v2  ;;  %5283 = vmatmul.mubr.msk.bf16.gmra.mrb[224].mxu1 %vm887_vm0, %v5497_v2  ;;  %v4829_v9 = vadd.f32 %v4828_v24, %v4668_v59  ;;  %v12179_v54 = vmax.f32 %v7713_v0, 0.0  ;;  %v12180_v8 = vmax.f32 %v7719_v50, 0.0  ;;  %v1489_v13 = vadd.f32 %v1488_v15, %v12176_v57  ;;  %v4527_v0 = vld [vmem:[%s11615_s3 + $0x660] sm:$0xff]  ;;  %v4529_v50 = vld [vmem:[%s11615_s3 + $0x670] sm:$0xff]  ;;  %v7972_v41 = vpop.f32.mrb[123].mxu1 }
 0x1f9   : > { %2216 = vmatprep.mubr.bf16.mxu0 %v11883_v20  ;;  %2409 = vmatprep.mubr.bf16.mxu1 %v11883_v20  ;;  %12177 = vst [vmem:[#allocation51_spill] sm:$0xff] %v7938_v62  ;;  %12178 = vst [vmem:[#allocation68_spill] sm:$0xff] %v7940_v43  ;;  %v1682_v27 = vadd.f32 %v1681_v30, %v12176_v57  ;;  %v4334_v40 = vadd.f32 %v4333_v45, %v4172_v63  ;;  %v12181_v15 = vld [vmem:[#allocation22_spill] sm:$0xff]  ;;  %v12185_v45 = vmax.f32 %v7722_v1, 0.0  ;;  %v4530_v1 = vld [vmem:[%s11615_s3 + $0x678] sm:$0xff] }
 0x1fa   : > { %v3710_v6 = vmax.f32 %v12179_v54, %v3390_v22  ;;  %v3712_v47 = vmax.f32 %v12180_v8, %v3392_v55  ;;  %v4830_v7 = vadd.f32 %v4829_v9, %v4669_v58  ;;  %v1491_v30 = vadd.f32 %v1490_v18, %v12181_v15  ;;  %v5498_v18 = vld [vmem:[%s11613_s1 + $0x48] sm:$0xff]  }
 0x1fb   : > { %v1684_v51 = vadd.f32 %v1683_v5, %v12181_v15  ;;  %v3391_v58 = vmax.f32 %v1489_v13, 0.0  ;;  %v3393_v10 = vmax.f32 %v1682_v27, 0.0  ;;  %v7976_v59 = vadd.f32 %v4334_v40, %v4173_v60  ;;  %v4528_v55 = vld [vmem:[%s11615_s3 + $0x668] sm:$0xff]  ;;  %v4033_v13 = vld [vmem:[%s11615_s3 + $0x178] sm:$0xff]  ;;  %v8015_v27 = vpop.f32.mrb[124].mxu0 }
 0x1fc   : > { %v3870_v2 = vmax.f32 %v7403_v44, %v3710_v6  ;;  %v3872_v63 = vmax.f32 %v7407_v61, %v3712_v47  ;;  %v7978_v33 = vadd.f32 %v4830_v7, %v4670_v26  ;;  %v3410_v52 = vmax.f32 %v1491_v30, 0.0  ;;  %v4031_v26 = vld [vmem:[%s11615_s3 + $0x168] sm:$0xff]  ;;  %v8033_v30 = vpop.f32.mrb[125].mxu0 }
 0x1fd   : > { %12182 = vst [vmem:[#allocation69_spill] sm:$0xff] %v7976_v59  ;;  %v3412_v35 = vmax.f32 %v1684_v51, 0.0  ;;  %v12184_v61 = vmax.f32 %v7716_v11, 0.0  ;;  %v3713_v9 = vmax.f32 %v12185_v45, %v3393_v10  ;;  %v12186_v54 = vmax.f32 %v7727_v56, 0.0  ;;  %v4050_v56 = vld [vmem:[%s11615_s3 + $0x200] sm:$0xff]  ;;  %v12188_v51 = vld [vmem:[#allocation26_spill] sm:$0xff] }
 0x1fe   : > { %12183 = vst [vmem:[#allocation70_spill] sm:$0xff] %v7978_v33  ;;  %v4190_v5 = vmul.f32 %v4030_v38, %v3870_v2  ;;  %v4687_v24 = vmul.f32 %v4527_v0, %v3870_v2  ;;  %v4192_v22 = vmul.f32 %v4032_v25, %v3872_v63  ;;  %v4689_v44 = vmul.f32 %v4529_v50, %v3872_v63  ;;  %v4547_v25 = vld [vmem:[%s11615_s3 + $0x700] sm:$0xff]  ;;  %v4549_v50 = vld [vmem:[%s11615_s3 + $0x710] sm:$0xff]  ;;  %v8041_v63 = vpop.f32.mrb[126].mxu0 }
 0x1ff   : > { %v3711_v60 = vmax.f32 %v12184_v61, %v3391_v58  ;;  %v3730_v6 = vmax.f32 %v12186_v54, %v3410_v52  ;;  %v12187_v38 = vmax.f32 %v7730_v46, 0.0  ;;  %v1493_v46 = vadd.f32 %v7911_v49, %v12181_v15 }
 0x200   : > { %5268 = vmatmul.mubr.msk.bf16.gmra.mrb[228].mxu0 %vm887_vm0, %v5498_v18  ;;  %5284 = vmatmul.mubr.msk.bf16.gmra.mrb[228].mxu1 %vm887_vm0, %v5498_v18  ;;  %v4354_v11 = vadd.f32 %v7609_v21, %v4190_v5  ;;  %v4850_v47 = vadd.f32 %v7612_v3, %v4687_v24  ;;  %v1686_v21 = vadd.f32 %v7913_v39, %v12181_v15  ;;  %v8017_v3 = vpop.f32.mrb[124].mxu1  ;;  %v4052_v39 = vld [vmem:[%s11615_s3 + $0x210] sm:$0xff]  ;;  %v8045_v5 = vpop.f32.mrb[127].mxu0 }
 0x201   : > { %v3732_v8 = vmax.f32 %v12187_v38, %v3412_v35  ;;  %2226 = vmatprep.mubr.bf16.mxu0 %v11883_v20  ;;  %2419 = vmatprep.mubr.bf16.mxu1 %v11883_v20  ;;  %v3871_v40 = vmax.f32 %v7414_v31, %v3711_v60  ;;  %v3873_v7 = vmax.f32 %v7418_v34, %v3713_v9  ;;  %v8035_v31 = vpop.f32.mrb[125].mxu1  ;;  %v3411_v34 = vmax.f32 %v1493_v46, 0.0  ;;  %v4053_v46 = vld [vmem:[%s11615_s3 + $0x218] sm:$0xff] }
 0x202   : > { %v3890_v0 = vmax.f32 %v7424_v53, %v3730_v6  ;;  %v3413_v53 = vmax.f32 %v1686_v21, 0.0  ;;  %v1497_v2 = vadd.f32 %v7933_v4, %v12188_v51  ;;  %v8043_v58 = vpop.f32.mrb[126].mxu1  ;;  %v12190_v38 = vmax.f32 %v7742_v23, 0.0  ;;  %v4550_v21 = vld [vmem:[%s11615_s3 + $0x718] sm:$0xff] }
 0x203   : > { %v3892_v49 = vmax.f32 %v7428_v12, %v3732_v8  ;;  %v1690_v12 = vadd.f32 %v7935_v48, %v12188_v51  ;;  %v4191_v10 = vmul.f32 %v4031_v26, %v3871_v40  ;;  %v4688_v52 = vmul.f32 %v4528_v55, %v3871_v40  ;;  %v8047_v24 = vpop.f32.mrb[127].mxu1  ;;  %v5499_v26 = vld [vmem:[%s11613_s1 + $0x50] sm:$0xff]  }
 0x204   : > { %v4193_v35 = vmul.f32 %v4033_v13, %v3873_v7  ;;  %v4690_v18 = vmul.f32 %v4530_v1, %v3873_v7  ;;  %v4210_v61 = vmul.f32 %v4050_v56, %v3890_v0  ;;  %v4707_v60 = vmul.f32 %v4547_v25, %v3890_v0  ;;  %v12191_v40 = vld [vmem:[#allocation62_spill] sm:$0xff] }
 0x205   : > { %v4212_v45 = vmul.f32 %v4052_v39, %v3892_v49  ;;  %v4709_v9 = vmul.f32 %v4549_v50, %v3892_v49  ;;  %v4355_v4 = vadd.f32 %v4354_v11, %v4191_v10  ;;  %v4851_v54 = vadd.f32 %v4850_v47, %v4688_v52  ;;  %v4051_v11 = vld [vmem:[%s11615_s3 + $0x208] sm:$0xff]  ;;  %v8087_v39 = vpop.f32.mrb[128].mxu0  ;;  %v8089_v50 = vpop.f32.mrb[128].mxu1  ;;  %v4567_v10 = vld [vmem:[%s11615_s3 + $0x7a0] sm:$0xff] }
 0x206   : > { %v12189_v48 = vmax.f32 %v7739_v42, 0.0  ;;  %v3733_v8 = vmax.f32 %v12190_v38, %v3413_v53  ;;  %v4376_v55 = vadd.f32 %v7625_v14, %v4210_v61  ;;  %v4872_v13 = vadd.f32 %v7628_v36, %v4707_v60  ;;  %v4548_v42 = vld [vmem:[%s11615_s3 + $0x708] sm:$0xff]  ;;  %v8104_v52 = vpop.f32.mrb[129].mxu0  ;;  %v12197_v60 = vld [vmem:[#allocation72_spill] sm:$0xff] }
 0x207   : > { %v3430_v23 = vmax.f32 %v1497_v2, 0.0  ;;  %v3432_v47 = vmax.f32 %v1690_v12, 0.0  ;;  %v4356_v1 = vadd.f32 %v4355_v4, %v4192_v22  ;;  %v4852_v56 = vadd.f32 %v4851_v54, %v4689_v44  ;;  %v4070_v22 = vld [vmem:[%s11615_s3 + $0x2a0] sm:$0xff] }
 0x208   : > { %v3731_v6 = vmax.f32 %v12189_v48, %v3411_v34  ;;  %5269 = vmatmul.mubr.msk.bf16.gmra.mrb[232].mxu0 %vm887_vm0, %v5499_v26  ;;  %5285 = vmatmul.mubr.msk.bf16.gmra.mrb[232].mxu1 %vm887_vm0, %v5499_v26  ;;  %v3893_v36 = vmax.f32 %v7438_v28, %v3733_v8  ;;  %v12192_v7 = vmax.f32 %v12191_v40, 0.0  ;;  %v1499_v25 = vadd.f32 %v7942_v16, %v12188_v51  ;;  %v4072_v16 = vld [vmem:[%s11615_s3 + $0x2b0] sm:$0xff]  ;;  %v12198_v54 = vld [vmem:[#allocation73_spill] sm:$0xff] }
 0x209   : > { %2236 = vmatprep.mubr.bf16.mxu0 %v11883_v20  ;;  %2429 = vmatprep.mubr.bf16.mxu1 %v11883_v20  ;;  %v1692_v49 = vadd.f32 %v7944_v19, %v12188_v51  ;;  %v8091_v34 = vadd.f32 %v4356_v1, %v4193_v35  ;;  %v8093_v53 = vadd.f32 %v4852_v56, %v4690_v18  ;;  %v4569_v19 = vld [vmem:[%s11615_s3 + $0x7b0] sm:$0xff]  ;;  %v8106_v35 = vpop.f32.mrb[129].mxu1  ;;  %v12199_v40 = vld [vmem:[#allocation49_spill] sm:$0xff] }
 0x20a   : > { %v3891_v14 = vmax.f32 %v7434_v29, %v3731_v6  ;;  %v3750_v0 = vmax.f32 %v12192_v7, %v3430_v23  ;;  %v12193_v29 = vld [vmem:[#allocation37_spill] sm:$0xff]  ;;  %v4213_v18 = vmul.f32 %v4053_v46, %v3893_v36  ;;  %v4710_v61 = vmul.f32 %v4550_v21, %v3893_v36  ;;  %v8110_v6 = vpop.f32.mrb[130].mxu0  ;;  %v8112_v38 = vpop.f32.mrb[130].mxu1 }
 0x20b   : > { %v12194_v44 = vmax.f32 %v12193_v29, 0.0  ;;  %12195 = vst [vmem:[#allocation71_spill] sm:$0xff] %v8091_v34  ;;  %12196 = vst [vmem:[#allocation62_spill] sm:$0xff] %v8093_v53  ;;  %v8114_v23 = vpop.f32.mrb[131].mxu0  ;;  %v12200_v7 = vmax.f32 %v12199_v40, 0.0 }
 0x20c   : > { %v4211_v2 = vmul.f32 %v4051_v11, %v3891_v14  ;;  %v4708_v12 = vmul.f32 %v4548_v42, %v3891_v14  ;;  %v3910_v4 = vmax.f32 %v12197_v60, %v3750_v0  ;;  %v3431_v11 = vmax.f32 %v1499_v25, 0.0 }
 0x20d   : > { %v3752_v28 = vmax.f32 %v12194_v44, %v3432_v47  ;;  %v3433_v42 = vmax.f32 %v1692_v49, 0.0  ;;  %v8116_v47 = vpop.f32.mrb[131].mxu1  ;;  %v4568_v49 = vld [vmem:[%s11615_s3 + $0x7a8] sm:$0xff] }
 0x20e   : > { %v4377_v8 = vadd.f32 %v4376_v55, %v4211_v2  ;;  %v4873_v26 = vadd.f32 %v4872_v13, %v4708_v12  ;;  %v4230_v1 = vmul.f32 %v4070_v22, %v3910_v4  ;;  %v4727_v56 = vmul.f32 %v4567_v10, %v3910_v4  ;;  %v4071_v55 = vld [vmem:[%s11615_s3 + $0x2a8] sm:$0xff]  ;;  %v12201_v13 = vld [vmem:[#allocation64_spill] sm:$0xff] }
 0x20f   : > { %v3912_v48 = vmax.f32 %v12198_v54, %v3752_v28  ;;  %v3751_v0 = vmax.f32 %v12200_v7, %v3431_v11  ;;  %v12202_v29 = vmax.f32 %v12201_v13, 0.0  ;;  %v5500_v28 = vld [vmem:[%s11613_s1 + $0x58] sm:$0xff]   ;;  %v12205_v10 = vld [vmem:[#allocation30_spill] sm:$0xff] }
 0x210   : > { %v4378_v46 = vadd.f32 %v4377_v8, %v4212_v45  ;;  %v4874_v21 = vadd.f32 %v4873_v26, %v4709_v9  ;;  %5270 = vmatmul.mubr.msk.bf16.gmra.mrb[236].mxu0 %vm887_vm0, %v5500_v28  ;;  %v12203_v22 = vld [vmem:[#allocation60_spill] sm:$0xff]  ;;  %v12204_v45 = vld [vmem:[#allocation63_spill] sm:$0xff]  ;;  %5286 = vmatmul.mubr.msk.bf16.gmra.mrb[236].mxu1 %vm887_vm0, %v5500_v28  ;;  %v12208_v54 = vld [vmem:[#allocation74_spill] sm:$0xff] }
 0x211   : > { %v4232_v14 = vmul.f32 %v4072_v16, %v3912_v48  ;;  %v4729_v36 = vmul.f32 %v4569_v19, %v3912_v48  ;;  %v3753_v44 = vmax.f32 %v12202_v29, %v3433_v42  ;;  %v4398_v25 = vadd.f32 %v12203_v22, %v4230_v1  ;;  %v4073_v2 = vld [vmem:[%s11615_s3 + $0x2b8] sm:$0xff]  ;;  %2246 = vmatprep.mubr.bf16.mxu0 %v11883_v20  ;;  %v8156_v1 = vpop.f32.mrb[132].mxu0  ;;  %v12212_v29 = vld [vmem:[#allocation46_spill] sm:$0xff] }
 0x212   : > { %v4894_v9 = vadd.f32 %v12204_v45, %v4727_v56  ;;  %v4570_v12 = vld [vmem:[%s11615_s3 + $0x7b8] sm:$0xff]  ;;  %v1501_v16 = vadd.f32 %v7955_v32, %v12205_v10  ;;  %v1694_v19 = vadd.f32 %v7957_v17, %v12205_v10  ;;  %v8145_v60 = vadd.f32 %v4378_v46, %v4213_v18  ;;  %v8158_v18 = vpop.f32.mrb[132].mxu1  ;;  %2439 = vmatprep.mubr.bf16.mxu1 %v11883_v20  ;;  %v8161_v40 = vpop.f32.mrb[133].mxu0 }
 0x213   : > { %v8147_v4 = vadd.f32 %v4874_v21, %v4710_v61  ;;  %v3911_v48 = vmax.f32 %v12208_v54, %v3751_v0  ;;  %v12209_v8 = vld [vmem:[#allocation75_spill] sm:$0xff]  ;;  %v1503_v32 = vadd.f32 %v7970_v37, %v12205_v10  ;;  %v1696_v17 = vadd.f32 %v7972_v41, %v12205_v10  ;;  %v8163_v7 = vpop.f32.mrb[133].mxu1  ;;  %v12210_v0 = vld [vmem:[#allocation40_spill] sm:$0xff] }
 0x214   : > { %12206 = vst [vmem:[#allocation37_spill] sm:$0xff] %v8145_v60  ;;  %v3913_v26 = vmax.f32 %v12209_v8, %v3753_v44  ;;  %v3450_v11 = vmax.f32 %v1501_v16, 0.0  ;;  %v3452_v42 = vmax.f32 %v1694_v19, 0.0  ;;  %v12211_v13 = vmax.f32 %v12210_v0, 0.0  ;;  %v4090_v41 = vld [vmem:[%s11615_s3 + $0x340] sm:$0xff]  ;;  %v4092_v19 = vld [vmem:[%s11615_s3 + $0x350] sm:$0xff] }
 0x215   : > { %12207 = vst [vmem:[#allocation72_spill] sm:$0xff] %v8147_v4  ;;  %v4231_v61 = vmul.f32 %v4071_v55, %v3911_v48  ;;  %v4728_v56 = vmul.f32 %v4568_v49, %v3911_v48  ;;  %v12213_v44 = vmax.f32 %v12212_v29, 0.0  ;;  %v3451_v22 = vmax.f32 %v1503_v32, 0.0  ;;  %v8172_v55 = vpop.f32.mrb[134].mxu0  ;;  %v8174_v49 = vpop.f32.mrb[134].mxu1  ;;  %v4587_v16 = vld [vmem:[%s11615_s3 + $0x840] sm:$0xff] }
 0x216   : > { %v4233_v46 = vmul.f32 %v4073_v2, %v3913_v26  ;;  %v4730_v21 = vmul.f32 %v4570_v12, %v3913_v26  ;;  %v3770_v37 = vmax.f32 %v12211_v13, %v3450_v11  ;;  %v3453_v45 = vmax.f32 %v1696_v17, 0.0  ;;  %v4589_v54 = vld [vmem:[%s11615_s3 + $0x850] sm:$0xff]  ;;  %v12215_v11 = vld [vmem:[#allocation76_spill] sm:$0xff]  ;;  %v12216_v32 = vld [vmem:[#allocation77_spill] sm:$0xff] }
 0x217   : > { %v3772_v28 = vmax.f32 %v12213_v44, %v3452_v42  ;;  %v4399_v2 = vadd.f32 %v4398_v25, %v4231_v61  ;;  %v4895_v12 = vadd.f32 %v4894_v9, %v4728_v56  ;;  %v12214_v48 = vld [vmem:[#allocation34_spill] sm:$0xff]  ;;  %v8189_v25 = vpop.f32.mrb[135].mxu0  ;;  %v8191_v9 = vpop.f32.mrb[135].mxu1  ;;  %v12219_v13 = vld [vmem:[#allocation47_spill] sm:$0xff] }
 0x218   : > { %v1507_v8 = vadd.f32 %v8015_v27, %v12214_v48  ;;  %v1700_v26 = vadd.f32 %v8017_v3, %v12214_v48  ;;  %v3930_v42 = vmax.f32 %v12215_v11, %v3770_v37  ;;  %v12217_v61 = vld [vmem:[#allocation42_spill] sm:$0xff]  ;;  %v12220_v29 = vmax.f32 %v12219_v13, 0.0  ;;  %v5501_v37 = vld [vmem:[%s11613_s1 + $0x60] sm:$0xff]  }
 0x219   : > { %v3932_v17 = vmax.f32 %v12216_v32, %v3772_v28  ;;  %v12218_v56 = vmax.f32 %v12217_v61, 0.0  ;;  %v4400_v10 = vadd.f32 %v4399_v2, %v4232_v14  ;;  %v4896_v4 = vadd.f32 %v4895_v12, %v4729_v36  ;;  %v4091_v27 = vld [vmem:[%s11615_s3 + $0x348] sm:$0xff]  ;;  %5271 = vmatmul.mubr.msk.bf16.gmra.mrb[240].mxu0 %vm887_vm0, %v5501_v37  ;;  %v4093_v36 = vld [vmem:[%s11615_s3 + $0x358] sm:$0xff]  ;;  %5287 = vmatmul.mubr.msk.bf16.gmra.mrb[240].mxu1 %vm887_vm0, %v5501_v37 }
 0x21a   : > { %v3773_v44 = vmax.f32 %v12220_v29, %v3453_v45  ;;  %v3470_v3 = vmax.f32 %v1507_v8, 0.0  ;;  %v3472_v60 = vmax.f32 %v1700_v26, 0.0  ;;  %v4250_v28 = vmul.f32 %v4090_v41, %v3930_v42  ;;  %v4588_v14 = vld [vmem:[%s11615_s3 + $0x848] sm:$0xff]  ;;  %v4590_v45 = vld [vmem:[%s11615_s3 + $0x858] sm:$0xff]  ;;  %2256 = vmatprep.mubr.bf16.mxu0 %v11883_v20  ;;  %v8232_v29 = vpop.f32.mrb[136].mxu0  ;;  %2449 = vmatprep.mubr.bf16.mxu1 %v11883_v20 }
 0x21b   : > { %v3771_v0 = vmax.f32 %v12218_v56, %v3451_v22  ;;  %v4747_v11 = vmul.f32 %v4587_v16, %v3930_v42  ;;  %v4252_v22 = vmul.f32 %v4092_v19, %v3932_v17  ;;  %v4749_v32 = vmul.f32 %v4589_v54, %v3932_v17  ;;  %v12223_v12 = vld [vmem:[#allocation78_spill] sm:$0xff]  ;;  %v12224_v19 = vld [vmem:[#allocation79_spill] sm:$0xff]  ;;  %v12225_v8 = vld [vmem:[#allocation53_spill] sm:$0xff] }
 0x21c   : > { %v8216_v2 = vadd.f32 %v4400_v10, %v4233_v46  ;;  %v8218_v41 = vadd.f32 %v4896_v4, %v4730_v21  ;;  %v3933_v54 = vmax.f32 %v12224_v19, %v3773_v44  ;;  %v4420_v26 = vadd.f32 %v12225_v8, %v4250_v28  ;;  %v12226_v42 = vld [vmem:[#allocation48_spill] sm:$0xff]  ;;  %v12227_v61 = vld [vmem:[#allocation50_spill] sm:$0xff]  ;;  %v8246_v19 = vpop.f32.mrb[137].mxu0 }
 0x21d   : > { %v3931_v16 = vmax.f32 %v12223_v12, %v3771_v0  ;;  %v4916_v17 = vadd.f32 %v12226_v42, %v4747_v11  ;;  %v12228_v56 = vmax.f32 %v12227_v61, 0.0  ;;  %v4110_v10 = vld [vmem:[%s11615_s3 + $0x3e0] sm:$0xff]  ;;  %v12229_v46 = vld [vmem:[#allocation38_spill] sm:$0xff]  ;;  %v8234_v0 = vpop.f32.mrb[136].mxu1  ;;  %v8256_v42 = vpop.f32.mrb[138].mxu0 }
 0x21e   : > { %12221 = vst [vmem:[#allocation73_spill] sm:$0xff] %v8216_v2  ;;  %12222 = vst [vmem:[#allocation49_spill] sm:$0xff] %v8218_v41  ;;  %v12230_v4 = vmax.f32 %v12229_v46, 0.0  ;;  %v4253_v28 = vmul.f32 %v4093_v36, %v3933_v54  ;;  %v4750_v11 = vmul.f32 %v4590_v45, %v3933_v54  ;;  %v4112_v12 = vld [vmem:[%s11615_s3 + $0x3f0] sm:$0xff]  ;;  %v8248_v8 = vpop.f32.mrb[137].mxu1  ;;  %v1702_v54 = vadd.f32 %v8035_v31, %v12214_v48 }
 0x21f   : > { %v3790_v13 = vmax.f32 %v12228_v56, %v3470_v3  ;;  %v4251_v44 = vmul.f32 %v4091_v27, %v3931_v16  ;;  %v4748_v37 = vmul.f32 %v4588_v14, %v3931_v16  ;;  %v4607_v3 = vld [vmem:[%s11615_s3 + $0x8e0] sm:$0xff]  ;;  %v12232_v36 = vld [vmem:[#allocation54_spill] sm:$0xff]  ;;  %v1509_v16 = vadd.f32 %v8033_v30, %v12214_v48  ;;  %v8258_v61 = vpop.f32.mrb[138].mxu1 }
 0x220   : > { %v3792_v21 = vmax.f32 %v12230_v4, %v3472_v60  ;;  %v4609_v60 = vld [vmem:[%s11615_s3 + $0x8f0] sm:$0xff]  ;;  %v12231_v27 = vld [vmem:[#allocation36_spill] sm:$0xff] }
 0x221   : > { %v3950_v14 = vmax.f32 %v12231_v27, %v3790_v13  ;;  %v4421_v56 = vadd.f32 %v4420_v26, %v4251_v44  ;;  %v4917_v46 = vadd.f32 %v4916_v17, %v4748_v37  ;;  %v12233_v4 = vld [vmem:[#allocation56_spill] sm:$0xff]  ;;  %v8264_v27 = vpop.f32.mrb[139].mxu0  ;;  %v3471_v26 = vmax.f32 %v1509_v16, 0.0  ;;  %v12235_v37 = vld [vmem:[#allocation35_spill] sm:$0xff] }
 0x222   : > { %v3952_v45 = vmax.f32 %v12232_v36, %v3792_v21  ;;  %v1511_v41 = vadd.f32 %v8041_v63, %v12233_v4  ;;  %v1704_v13 = vadd.f32 %v8043_v58, %v12233_v4  ;;  %v8266_v21 = vpop.f32.mrb[139].mxu1  ;;  %v3473_v17 = vmax.f32 %v1702_v54, 0.0  ;;  %v5502_v63 = vld [vmem:[%s11613_s1 + $0x68] sm:$0xff]   ;;  %v12240_v16 = vld [vmem:[#allocation52_spill] sm:$0xff] }
 0x223   : > { %v4270_v30 = vmul.f32 %v4110_v10, %v3950_v14  ;;  %v4767_v36 = vmul.f32 %v4607_v3, %v3950_v14  ;;  %v4422_v48 = vadd.f32 %v4421_v56, %v4252_v22  ;;  %v4918_v51 = vadd.f32 %v4917_v46, %v4749_v32  ;;  %5272 = vmatmul.mubr.msk.bf16.gmra.mrb[244].mxu0 %vm887_vm0, %v5502_v63  ;;  %v12234_v58 = vld [vmem:[#allocation61_spill] sm:$0xff] }
 0x224   : > { %v8268_v2 = vmul.f32 %v4112_v12, %v3952_v45  ;;  %v8270_v31 = vmul.f32 %v4609_v60, %v3952_v45  ;;  %v3490_v10 = vmax.f32 %v1511_v41, 0.0  ;;  %v3492_v3 = vmax.f32 %v1704_v13, 0.0  ;;  %5288 = vmatmul.mubr.msk.bf16.gmra.mrb[244].mxu1 %vm887_vm0, %v5502_v63  ;;  %2266 = vmatprep.mubr.bf16.mxu0 %v11883_v20  ;;  %v12238_v12 = vld [vmem:[#allocation65_spill] sm:$0xff] }
 0x225   : > { %v4442_v44 = vadd.f32 %v12234_v58, %v4270_v30  ;;  %v4938_v53 = vadd.f32 %v12235_v37, %v4767_v36  ;;  %v8280_v22 = vadd.f32 %v4422_v48, %v4253_v28  ;;  %v8282_v32 = vadd.f32 %v4918_v51, %v4750_v11  ;;  %v4111_v45 = vld [vmem:[%s11615_s3 + $0x3e8] sm:$0xff]  ;;  %2459 = vmatprep.mubr.bf16.mxu1 %v11883_v20  ;;  %v4113_v51 = vld [vmem:[%s11615_s3 + $0x3f8] sm:$0xff]  ;;  %v4130_v13 = vld [vmem:[%s11615_s3 + $0x480] sm:$0xff]  ;;  %v8312_v58 = vpop.f32.mrb[140].mxu0  ;;  %v8314_v37 = vpop.f32.mrb[140].mxu1 }
 0x226   : > { %v12239_v60 = vmax.f32 %v12238_v12, 0.0  ;;  %v4608_v41 = vld [vmem:[%s11615_s3 + $0x8e8] sm:$0xff]  ;;  %v12241_v54 = vmax.f32 %v12240_v16, 0.0  ;;  %v4610_v48 = vld [vmem:[%s11615_s3 + $0x8f8] sm:$0xff]  ;;  %v1706_v63 = vadd.f32 %v8047_v24, %v12233_v4  ;;  %12246 = vst [vmem:[#allocation63_spill] sm:$0xff] %v8314_v37 }
 0x227   : > { %12236 = vst [vmem:[#allocation64_spill] sm:$0xff] %v8280_v22  ;;  %12237 = vst [vmem:[#allocation60_spill] sm:$0xff] %v8282_v32  ;;  %v12242_v28 = vld [vmem:[#allocation43_spill] sm:$0xff]  ;;  %v12244_v30 = vld [vmem:[#allocation44_spill] sm:$0xff] }
 0x228   : > { %v3791_v14 = vmax.f32 %v12239_v60, %v3471_v26  ;;  %v3793_v56 = vmax.f32 %v12241_v54, %v3473_v17  ;;  %v12243_v11 = vmax.f32 %v12242_v28, 0.0  ;;  %v12245_v36 = vmax.f32 %v12244_v30, 0.0  ;;  %v12247_v12 = vld [vmem:[#allocation39_spill] sm:$0xff]  ;;  %v4627_v54 = vld [vmem:[%s11615_s3 + $0x980] sm:$0xff]  ;;  %v12249_v24 = vld [vmem:[#allocation6_spill] sm:$0xff] }
 0x229   : > { %v1513_v17 = vadd.f32 %v8045_v5, %v12233_v4  ;;  %v4629_v5 = vld [vmem:[%s11615_s3 + $0x990] sm:$0xff]  ;;  %v8329_v28 = vadd.f32 %v8087_v39, %v12249_v24  ;;  %v12251_v30 = vld [vmem:[#allocation80_spill] sm:$0xff]  ;;  %v3493_v32 = vmax.f32 %v1706_v63, 0.0 }
 0x22a   : > { %v3810_v46 = vmax.f32 %v12243_v11, %v3490_v10  ;;  %v3812_v26 = vmax.f32 %v12245_v36, %v3492_v3  ;;  %v3951_v60 = vmax.f32 %v12247_v12, %v3791_v14  ;;  %v12248_v10 = vld [vmem:[#allocation55_spill] sm:$0xff]  ;;  %v8333_v14 = vadd.f32 %v8104_v52, %v12249_v24  ;;  %v8337_v11 = vpop.f32.mrb[141].mxu1  ;;  %v12252_v12 = vld [vmem:[#allocation81_spill] sm:$0xff] }
 0x22b   : > { %v3953_v16 = vmax.f32 %v12248_v10, %v3793_v56  ;;  %v4132_v3 = vld [vmem:[%s11615_s3 + $0x490] sm:$0xff]  ;;  %v8335_v56 = vpop.f32.mrb[141].mxu0  ;;  %12250 = vst [vmem:[#allocation74_spill] sm:$0xff] %v8337_v11  ;;  %v3491_v4 = vmax.f32 %v1513_v17, 0.0  ;;  %v8343_v34 = vpop.f32.mrb[142].mxu1 }
 0x22c   : > { %v3970_v36 = vmax.f32 %v12251_v30, %v3810_v46  ;;  %v3972_v10 = vmax.f32 %v12252_v12, %v3812_v26  ;;  %v8341_v22 = vpop.f32.mrb[142].mxu0  ;;  %12254 = vst [vmem:[#allocation40_spill] sm:$0xff] %v8343_v34  ;;  %v4271_v39 = vmul.f32 %v4111_v45, %v3951_v60  ;;  %v4768_v15 = vmul.f32 %v4608_v41, %v3951_v60  ;;  %v8347_v57 = vpop.f32.mrb[143].mxu1  ;;  %v12255_v17 = vld [vmem:[#allocation66_spill] sm:$0xff]  ;;  %v12257_v37 = vld [vmem:[#allocation67_spill] sm:$0xff]  ;;  %v12259_v41 = vld [vmem:[#allocation5_spill] sm:$0xff] }
 0x22d   : > { %12253 = vst [vmem:[#allocation75_spill] sm:$0xff] %v8341_v22  ;;  %v4273_v33 = vmul.f32 %v4113_v51, %v3953_v16  ;;  %v4770_v59 = vmul.f32 %v4610_v48, %v3953_v16  ;;  %v8345_v52 = vpop.f32.mrb[143].mxu0  ;;  %v12256_v63 = vmax.f32 %v12255_v17, 0.0  ;;  %v12258_v22 = vmax.f32 %v12257_v37, 0.0  ;;  %v5503_v45 = vld [vmem:[%s11613_s1 + $0x70] sm:$0xff]   ;;  %v12260_v48 = vld [vmem:[#allocation45_spill] sm:$0xff] }
 0x22e   : > { %v4290_v43 = vmul.f32 %v4130_v13, %v3970_v36  ;;  %v4787_v62 = vmul.f32 %v4627_v54, %v3970_v36  ;;  %v4292_v11 = vmul.f32 %v4132_v3, %v3972_v10  ;;  %v4789_v46 = vmul.f32 %v4629_v5, %v3972_v10  ;;  %5273 = vmatmul.mubr.msk.bf16.gmra.mrb[248].mxu0 %vm887_vm0, %v5503_v45  ;;  %v12262_v37 = vld [vmem:[#allocation59_spill] sm:$0xff]  ;;  %v8396_v36 = vpop.f32.mrb[144].mxu0  ;;  %v8398_v10 = vpop.f32.mrb[144].mxu1 }
 0x22f   : > { %v4443_v30 = vadd.f32 %v4442_v44, %v4271_v39  ;;  %v4939_v26 = vadd.f32 %v4938_v53, %v4768_v15  ;;  %v3811_v12 = vmax.f32 %v12256_v63, %v3491_v4  ;;  %v3813_v34 = vmax.f32 %v12258_v22, %v3493_v32  ;;  %v4131_v15 = vld [vmem:[%s11615_s3 + $0x488] sm:$0xff]  ;;  %5289 = vmatmul.mubr.msk.bf16.gmra.mrb[248].mxu1 %vm887_vm0, %v5503_v45  ;;  %v4133_v16 = vld [vmem:[%s11615_s3 + $0x498] sm:$0xff]  ;;  %v8406_v17 = vpop.f32.mrb[145].mxu1 }
 0x230   : > { %v4464_v51 = vadd.f32 %v12259_v41, %v4290_v43  ;;  %v4960_v13 = vadd.f32 %v12260_v48, %v4787_v62  ;;  %v4628_v53 = vld [vmem:[%s11615_s3 + $0x988] sm:$0xff]  ;;  %2276 = vmatprep.mubr.bf16.mxu0 %v11883_v20  ;;  %v4630_v54 = vld [vmem:[%s11615_s3 + $0x998] sm:$0xff]  ;;  %2469 = vmatprep.mubr.bf16.mxu1 %v11883_v20  ;;  %v8412_v41 = vpop.f32.mrb[146].mxu1 }
 0x231   : > { %v4444_v43 = vadd.f32 %v4443_v30, %v8268_v2  ;;  %v4940_v62 = vadd.f32 %v4939_v26, %v8270_v31  ;;  %v12261_v22 = vld [vmem:[#allocation57_spill] sm:$0xff]  ;;  %v3973_v60 = vmax.f32 %v12262_v37, %v3813_v34  ;;  %v12263_v3 = vld [vmem:[#allocation7_spill] sm:$0xff]  ;;  %v8386_v2 = vadd.f32 %v8089_v50, %v12249_v24  ;;  %v8404_v50 = vpop.f32.mrb[145].mxu0 }
 0x232   : > { %v3971_v32 = vmax.f32 %v12261_v22, %v3811_v12  ;;  %v8382_v5 = vadd.f32 %v8110_v6, %v12263_v3  ;;  %v8390_v34 = vadd.f32 %v8114_v23, %v12263_v3  ;;  %v8394_v31 = vadd.f32 %v8106_v35, %v12249_v24  ;;  %v8410_v45 = vpop.f32.mrb[146].mxu0  ;;  %v12277_v4 = vld [vmem:[#allocation63_spill] sm:$0xff] }
 0x233   : > { %v8400_v39 = vadd.f32 %v4444_v43, %v4273_v33  ;;  %v8402_v6 = vadd.f32 %v4940_v62, %v4770_v59  ;;  %v4293_v23 = vmul.f32 %v4133_v16, %v3973_v60  ;;  %v4790_v63 = vmul.f32 %v4630_v54, %v3973_v60  ;;  %v8418_v43 = vpop.f32.mrb[147].mxu1  ;;  %v12267_v16 = vld [vmem:[#allocation17_spill] sm:$0xff] }
 0x234   : > { %v4291_v30 = vmul.f32 %v4131_v15, %v3971_v32  ;;  %v4788_v26 = vmul.f32 %v4628_v53, %v3971_v32  ;;  %v8416_v53 = vpop.f32.mrb[147].mxu0  ;;  %v8422_v62 = vadd.f32 %v8112_v38, %v12263_v3  ;;  %v8426_v22 = vadd.f32 %v8116_v47, %v12263_v3  ;;  %v12266_v32 = vld [vmem:[#allocation13_spill] sm:$0xff]  ;;  %v5504_v47 = vld [vmem:[%s11613_s1 + $0x78] sm:$0xff]  }
 0x235   : > { %12264 = vst [vmem:[#allocation46_spill] sm:$0xff] %v8400_v39  ;;  %12265 = vst [vmem:[#allocation76_spill] sm:$0xff] %v8402_v6  ;;  %v8438_v54 = vadd.f32 %v8172_v55, %v12267_v16  ;;  %v8442_v38 = vadd.f32 %v8158_v18, %v12266_v32  ;;  %v12275_v35 = vld [vmem:[#allocation75_spill] sm:$0xff] }
 0x236   : > { %v4465_v33 = vadd.f32 %v4464_v51, %v4291_v30  ;;  %v4961_v48 = vadd.f32 %v4960_v13, %v4788_v26  ;;  %v8430_v51 = vadd.f32 %v8156_v1, %v12266_v32  ;;  %v8434_v13 = vadd.f32 %v8161_v40, %v12266_v32  ;;  %5274 = vmatmul.mubr.msk.bf16.gmra.mrb[252].mxu0 %vm887_vm0, %v5504_v47  ;;  %v12271_v30 = vld [vmem:[#allocation25_spill] sm:$0xff] }
 0x237   : > { %5290 = vmatmul.mubr.msk.bf16.gmra.mrb[252].mxu1 %vm887_vm0, %v5504_v47  ;;  %2512 = vmatprep.mubr.bf16.mxu0 %v11883_v20  ;;  %v12270_v47 = vld [vmem:[#allocation21_spill] sm:$0xff]  ;;  %v8519_v40 = vadd.f32 %v8264_v27, %v12271_v30  ;;  %v8527_v1 = vadd.f32 %v8258_v61, %v12271_v30  ;;  %v8531_v12 = vadd.f32 %v8266_v21, %v12271_v30 }
 0x238   : > { %v4466_v37 = vadd.f32 %v4465_v33, %v4292_v11  ;;  %v4962_v60 = vadd.f32 %v4961_v48, %v4789_v46  ;;  %2705 = vmatprep.mubr.bf16.mxu1 %v11883_v20  ;;  %v8463_v33 = vadd.f32 %v8189_v25, %v12267_v16  ;;  %v8467_v48 = vadd.f32 %v8163_v7, %v12266_v32  ;;  %v5505_v21 = vld [vmem:[%s11613_s1] sm:$0xff]  }
 0x239   : > { %v8483_v25 = vadd.f32 %v8232_v29, %v12270_v47  ;;  %v8487_v7 = vadd.f32 %v8246_v19, %v12270_v47  ;;  %v8523_v19 = vadd.f32 %v8248_v8, %v12270_v47  ;;  %v12274_v29 = vld [vmem:[#allocation33_spill] sm:$0xff] }
 0x23a   : > { %v8454_v18 = vadd.f32 %v4466_v37, %v4293_v23  ;;  %v8456_v55 = vadd.f32 %v4962_v60, %v4790_v63  ;;  %v8471_v23 = vadd.f32 %v8174_v49, %v12267_v16  ;;  %v8475_v63 = vadd.f32 %v8191_v9, %v12267_v16  ;;  %v8477_v37 = vpop.f32.mrb[148].mxu0  ;;  %v8479_v60 = vpop.f32.mrb[148].mxu1 }
 0x23b   : > { %v8491_v49 = vadd.f32 %v8256_v42, %v12271_v30  ;;  %v8495_v9 = vadd.f32 %v8234_v0, %v12270_v47  ;;  %v8497_v46 = vpop.f32.mrb[149].mxu0  ;;  %v8499_v26 = vpop.f32.mrb[149].mxu1  ;;  %v12272_v0 = vld [vmem:[#allocation29_spill] sm:$0xff]  ;;  %v8543_v8 = vadd.f32 %v12275_v35, %v12274_v29  ;;  %v12279_v47 = vld [vmem:[#allocation74_spill] sm:$0xff]  ;;  %v8578_v35 = vadd.f32 %v8347_v57, %v12274_v29 }
 0x23c   : > { %12268 = vst [vmem:[#allocation77_spill] sm:$0xff] %v8454_v18  ;;  %12269 = vst [vmem:[#allocation42_spill] sm:$0xff] %v8456_v55  ;;  %v8505_v59 = vpop.f32.mrb[150].mxu0  ;;  %v8507_v42 = vpop.f32.mrb[150].mxu1  ;;  %v8535_v15 = vadd.f32 %v8312_v58, %v12272_v0  ;;  %v8539_v27 = vadd.f32 %v8335_v56, %v12272_v0  ;;  %v8547_v61 = vadd.f32 %v12277_v4, %v12272_v0  ;;  %v12282_v4 = vld [vmem:[#allocation8_spill] sm:$0xff] }
 0x23d   : > { %v8513_v44 = vpop.f32.mrb[151].mxu0  ;;  %v8515_v11 = vpop.f32.mrb[151].mxu1  ;;  %12276 = vst [vmem:[#allocation78_spill] sm:$0xff] %v8543_v8  ;;  %v8566_v58 = vadd.f32 %v8345_v52, %v12274_v29  ;;  %v8570_v56 = vadd.f32 %v12279_v47, %v12272_v0  ;;  %12281 = vst [vmem:[#allocation53_spill] sm:$0xff] %v8578_v35  ;;  %v1783_v52 = vadd.f32 %v8396_v36, %v12282_v4  ;;  %v12286_v35 = vmax.f32 %v8333_v14, 0.0  ;;  %v12288_v14 = vld [vmem:[#allocation16_spill] sm:$0xff] }
 0x23e   : > { %12273 = vst [vmem:[#allocation47_spill] sm:$0xff] %v8539_v27  ;;  %5291 = vmatmul.mubr.msk.bf16.vlgmr.msra.gmra.mrb[0].mxu0 %vm887_vm0, %v5505_v21  ;;  %v8580_v16 = vpop.f32.mrb[152].mxu0  ;;  %v8582_v32 = vpop.f32.mrb[152].mxu1  ;;  %v1976_v3 = vadd.f32 %v8398_v10, %v12282_v4  ;;  %v1785_v47 = vadd.f32 %v8404_v50, %v12282_v4  ;;  %v12283_v27 = vld [vmem:[#allocation10_spill] sm:$0xff] }
 0x23f   : > { %5307 = vmatmul.mubr.msk.bf16.vlgmr.msra.gmra.mrb[0].mxu1 %vm887_vm0, %v5505_v21  ;;  %2522 = vmatprep.mubr.bf16.mxu0 %v11883_v20  ;;  %12278 = vst [vmem:[#allocation79_spill] sm:$0xff] %v8566_v58  ;;  %v12280_v21 = vld [vmem:[#allocation40_spill] sm:$0xff]  ;;  %v8592_v0 = vpop.f32.mrb[153].mxu0  ;;  %v8594_v57 = vpop.f32.mrb[153].mxu1  ;;  %v3034_v50 = vmax.f32 %v1783_v52, 0.0  ;;  %v1980_v18 = vadd.f32 %v8412_v41, %v12283_v27  ;;  %v1789_v36 = vadd.f32 %v8416_v53, %v12283_v27  ;;  %v12287_v41 = vmax.f32 %v8394_v31, 0.0 }
 0x240   : > { %2715 = vmatprep.mubr.bf16.mxu1 %v11883_v20  ;;  %v8574_v30 = vadd.f32 %v12280_v21, %v12274_v29  ;;  %v1978_v21 = vadd.f32 %v8406_v17, %v12282_v4  ;;  %v8600_v24 = vpop.f32.mrb[154].mxu0  ;;  %v8602_v10 = vpop.f32.mrb[154].mxu1  ;;  %v3036_v6 = vmax.f32 %v1976_v3, 0.0  ;;  %v3035_v39 = vmax.f32 %v1785_v47, 0.0  ;;  %v5506_v53 = vld [vmem:[%s11613_s1 + $0x8] sm:$0xff]  }
 0x241   : > { %v8604_v4 = vpop.f32.mrb[155].mxu0  ;;  %v8606_v8 = vpop.f32.mrb[155].mxu1  ;;  %v1787_v29 = vadd.f32 %v8410_v45, %v12283_v27  ;;  %v1982_v55 = vadd.f32 %v8418_v43, %v12283_v27  ;;  %v12284_v3 = vmax.f32 %v8329_v28, 0.0  ;;  %v12285_v47 = vmax.f32 %v8386_v2, 0.0 }
 0x242   : > { %v3037_v17 = vmax.f32 %v1978_v21, 0.0  ;;  %v8626_v45 = vmax.f32 %v12286_v35, %v3035_v39  ;;  %v3056_v43 = vmax.f32 %v1980_v18, 0.0  ;;  %v1793_v39 = vadd.f32 %v8477_v37, %v12288_v14 }
 0x243   : > { %v8618_v52 = vmax.f32 %v12284_v3, %v3034_v50  ;;  %v8622_v21 = vmax.f32 %v12285_v47, %v3036_v6  ;;  %v3054_v28 = vmax.f32 %v1787_v29, 0.0  ;;  %v3055_v50 = vmax.f32 %v1789_v36, 0.0  ;;  %v1812_v3 = vpop.f32.mrb[156].mxu0 }
 0x244   : > { %v8630_v58 = vmax.f32 %v12287_v41, %v3037_v17  ;;  %v3057_v2 = vmax.f32 %v1982_v55, 0.0  ;;  %v1986_v31 = vadd.f32 %v8479_v60, %v12288_v14  ;;  %v1795_v6 = vadd.f32 %v8497_v46, %v12288_v14 }
 0x245   : > { %v1988_v35 = vadd.f32 %v8499_v26, %v12288_v14  ;;  %v12289_v18 = vmax.f32 %v8382_v5, 0.0  ;;  %v12290_v29 = vmax.f32 %v8422_v62, 0.0  ;;  %v12291_v37 = vmax.f32 %v8390_v34, 0.0  ;;  %v2005_v26 = vpop.f32.mrb[156].mxu1  ;;  %v12293_v14 = vld [vmem:[#allocation20_spill] sm:$0xff] }
 0x246   : > { %5292 = vmatmul.mubr.msk.bf16.gmra.mrb[4].mxu0 %vm887_vm0, %v5506_v53  ;;  %v12292_v60 = vmax.f32 %v8426_v22, 0.0  ;;  %v3074_v47 = vmax.f32 %v1793_v39, 0.0  ;;  %v3076_v41 = vmax.f32 %v1986_v31, 0.0  ;;  %v1797_v62 = vadd.f32 %v8505_v59, %v12293_v14 }
 0x247   : > { %5308 = vmatmul.mubr.msk.bf16.gmra.mrb[4].mxu1 %vm887_vm0, %v5506_v53  ;;  %2532 = vmatprep.mubr.bf16.mxu0 %v11883_v20  ;;  %v8649_v55 = vmax.f32 %v12289_v18, %v3054_v28  ;;  %v8653_v36 = vmax.f32 %v12290_v29, %v3056_v43  ;;  %v8657_v17 = vmax.f32 %v12291_v37, %v3055_v50  ;;  %v3075_v53 = vmax.f32 %v1795_v6, 0.0  ;;  %v1814_v28 = vpop.f32.mrb[157].mxu0  ;;  %v2007_v18 = vpop.f32.mrb[157].mxu1 }
 0x248   : > { %2725 = vmatprep.mubr.bf16.mxu1 %v11883_v20  ;;  %v8661_v46 = vmax.f32 %v12292_v60, %v3057_v2  ;;  %v3077_v5 = vmax.f32 %v1988_v35, 0.0  ;;  %v1990_v34 = vadd.f32 %v8507_v42, %v12293_v14  ;;  %v1799_v43 = vadd.f32 %v8513_v44, %v12293_v14  ;;  %v8671_v50 = vpop.f32.mrb[158].mxu0  ;;  %v8673_v2 = vpop.f32.mrb[158].mxu1 }
 0x249   : > { %v1992_v22 = vadd.f32 %v8515_v11, %v12293_v14  ;;  %v12294_v39 = vmax.f32 %v8430_v51, 0.0  ;;  %v12295_v6 = vmax.f32 %v8442_v38, 0.0  ;;  %v12296_v42 = vmax.f32 %v8434_v13, 0.0  ;;  %v1818_v11 = vpop.f32.mrb[159].mxu0  ;;  %v2011_v37 = vpop.f32.mrb[159].mxu1 }
 0x24a   : > { %v12297_v44 = vmax.f32 %v8467_v48, 0.0  ;;  %v3094_v60 = vmax.f32 %v1797_v62, 0.0  ;;  %v3096_v14 = vmax.f32 %v1990_v34, 0.0  ;;  %v3095_v27 = vmax.f32 %v1799_v43, 0.0 }
 0x24b   : > { %v8677_v31 = vmax.f32 %v12294_v39, %v3074_v47  ;;  %v8681_v59 = vmax.f32 %v12295_v6, %v3076_v41  ;;  %v8685_v35 = vmax.f32 %v12296_v42, %v3075_v53  ;;  %v3097_v51 = vmax.f32 %v1992_v22, 0.0  ;;  %v12298_v47 = vld [vmem:[#allocation24_spill] sm:$0xff]  ;;  %v5507_v41 = vld [vmem:[%s11613_s1 + $0x10] sm:$0xff]   ;;  %v8730_v42 = vpop.f32.mrb[160].mxu0 }
 0x24c   : > { %v8689_v29 = vmax.f32 %v12297_v44, %v3077_v5  ;;  %v1803_v39 = vadd.f32 %v8580_v16, %v12298_v47  ;;  %v1996_v38 = vadd.f32 %v8582_v32, %v12298_v47  ;;  %v1805_v13 = vadd.f32 %v8592_v0, %v12298_v47 }
 0x24d   : > { %v1998_v48 = vadd.f32 %v8594_v57, %v12298_v47  ;;  %v12299_v53 = vmax.f32 %v8438_v54, 0.0  ;;  %v12300_v16 = vmax.f32 %v8471_v23, 0.0  ;;  %v12301_v32 = vmax.f32 %v8463_v33, 0.0  ;;  %v12303_v23 = vld [vmem:[#allocation28_spill] sm:$0xff]  ;;  %v12342_v47 = vld [vmem:[#allocation15_spill] sm:$0xff] }
 0x24e   : > { %5293 = vmatmul.mubr.msk.bf16.gmra.mrb[8].mxu0 %vm887_vm0, %v5507_v41  ;;  %v12302_v57 = vmax.f32 %v8475_v63, 0.0  ;;  %v3114_v43 = vmax.f32 %v1803_v39, 0.0  ;;  %v3116_v22 = vmax.f32 %v1996_v38, 0.0  ;;  %v3115_v6 = vmax.f32 %v1805_v13, 0.0  ;;  %v1824_v13 = vpop.f32.mrb[161].mxu0 }
 0x24f   : > { %v8705_v5 = vmax.f32 %v12299_v53, %v3094_v60  ;;  %v8709_v62 = vmax.f32 %v12300_v16, %v3096_v14  ;;  %v8713_v0 = vmax.f32 %v12301_v32, %v3095_v27  ;;  %5309 = vmatmul.mubr.msk.bf16.gmra.mrb[8].mxu1 %vm887_vm0, %v5507_v41  ;;  %v3117_v54 = vmax.f32 %v1998_v48, 0.0  ;;  %2542 = vmatprep.mubr.bf16.mxu0 %v11883_v20  ;;  %v1826_v16 = vpop.f32.mrb[162].mxu0 }
 0x250   : > { %v8717_v34 = vmax.f32 %v12302_v57, %v3097_v51  ;;  %2735 = vmatprep.mubr.bf16.mxu1 %v11883_v20  ;;  %v1807_v14 = vadd.f32 %v8600_v24, %v12303_v23  ;;  %v2000_v33 = vadd.f32 %v8602_v10, %v12303_v23  ;;  %v1809_v63 = vadd.f32 %v8604_v4, %v12303_v23 }
 0x251   : > { %v2002_v27 = vadd.f32 %v8606_v8, %v12303_v23  ;;  %v12304_v44 = vmax.f32 %v8483_v25, 0.0  ;;  %v12305_v51 = vmax.f32 %v8495_v9, 0.0  ;;  %v12306_v24 = vmax.f32 %v8487_v7, 0.0  ;;  %v8748_v8 = vpop.f32.mrb[160].mxu1  ;;  %v12310_v9 = vld [vmem:[#allocation32_spill] sm:$0xff] }
 0x252   : > { %v12308_v10 = vmax.f32 %v8523_v19, 0.0  ;;  %v3134_v48 = vmax.f32 %v1807_v14, 0.0  ;;  %v3136_v41 = vmax.f32 %v2000_v33, 0.0  ;;  %v3135_v25 = vmax.f32 %v1809_v63, 0.0  ;;  %v2017_v32 = vpop.f32.mrb[161].mxu1  ;;  %v1828_v19 = vpop.f32.mrb[163].mxu0 }
 0x253   : > { %v8734_v60 = vmax.f32 %v12304_v44, %v3114_v43  ;;  %v8738_v39 = vmax.f32 %v12305_v51, %v3116_v22  ;;  %v8742_v38 = vmax.f32 %v12306_v24, %v3115_v6  ;;  %v3137_v53 = vmax.f32 %v2002_v27, 0.0  ;;  %v2019_v6 = vpop.f32.mrb[162].mxu1 }
 0x254   : > { %v8746_v4 = vmax.f32 %v12308_v10, %v3117_v54  ;;  %v1813_v57 = vadd.f32 %v1812_v3, %v12310_v9  ;;  %v2006_v43 = vadd.f32 %v2005_v26, %v12310_v9  ;;  %v1815_v7 = vadd.f32 %v1814_v28, %v12310_v9  ;;  %v2021_v28 = vpop.f32.mrb[163].mxu1 }
 0x255   : > { %12307 = vst [vmem:[#allocation48_spill] sm:$0xff] %v8742_v38  ;;  %v2008_v22 = vadd.f32 %v2007_v18, %v12310_v9  ;;  %v12311_v54 = vmax.f32 %v8491_v49, 0.0  ;;  %v12313_v14 = vmax.f32 %v8527_v1, 0.0  ;;  %v12315_v63 = vmax.f32 %v8519_v40, 0.0  ;;  %v5508_v49 = vld [vmem:[%s11613_s1 + $0x18] sm:$0xff]   ;;  %v12319_v1 = vld [vmem:[#allocation41_spill] sm:$0xff] }
 0x256   : > { %12309 = vst [vmem:[#allocation50_spill] sm:$0xff] %v8746_v4  ;;  %v12317_v3 = vmax.f32 %v8531_v12, 0.0  ;;  %v3154_v18 = vmax.f32 %v1813_v57, 0.0  ;;  %v3156_v51 = vmax.f32 %v2006_v43, 0.0  ;;  %v3155_v24 = vmax.f32 %v1815_v7, 0.0  ;;  %5294 = vmatmul.mubr.msk.bf16.gmra.mrb[12].mxu0 %vm887_vm0, %v5508_v49  ;;  %v12324_v7 = vld [vmem:[#allocation47_spill] sm:$0xff] }
 0x257   : > { %v8756_v44 = vmax.f32 %v12311_v54, %v3134_v48  ;;  %v8760_v33 = vmax.f32 %v12313_v14, %v3136_v41  ;;  %v8764_v27 = vmax.f32 %v12315_v63, %v3135_v25  ;;  %v3157_v10 = vmax.f32 %v2008_v22, 0.0  ;;  %5310 = vmatmul.mubr.msk.bf16.gmra.mrb[12].mxu1 %vm887_vm0, %v5508_v49  ;;  %2552 = vmatprep.mubr.bf16.mxu0 %v11883_v20  ;;  %v1832_v63 = vpop.f32.mrb[164].mxu0 }
 0x258   : > { %v8768_v26 = vmax.f32 %v12317_v3, %v3137_v53  ;;  %v1817_v40 = vadd.f32 %v8671_v50, %v12319_v1  ;;  %v2010_v48 = vadd.f32 %v8673_v2, %v12319_v1  ;;  %v1819_v12 = vadd.f32 %v1818_v11, %v12319_v1  ;;  %2745 = vmatprep.mubr.bf16.mxu1 %v11883_v20  ;;  %v2025_v3 = vpop.f32.mrb[164].mxu1 }
 0x259   : > { %12312 = vst [vmem:[#allocation38_spill] sm:$0xff] %v8756_v44  ;;  %12314 = vst [vmem:[#allocation36_spill] sm:$0xff] %v8760_v33  ;;  %v2012_v41 = vadd.f32 %v2011_v37, %v12319_v1  ;;  %v12320_v25 = vmax.f32 %v8535_v15, 0.0  ;;  %v12322_v57 = vmax.f32 %v8547_v61, 0.0  ;;  %v12325_v22 = vmax.f32 %v12324_v7, 0.0  ;;  %v1834_v61 = vpop.f32.mrb[165].mxu0 }
 0x25a   : > { %12316 = vst [vmem:[#allocation54_spill] sm:$0xff] %v8764_v27  ;;  %12318 = vst [vmem:[#allocation61_spill] sm:$0xff] %v8768_v26  ;;  %v12327_v2 = vmax.f32 %v8570_v56, 0.0  ;;  %v3174_v11 = vmax.f32 %v1817_v40, 0.0  ;;  %v3176_v37 = vmax.f32 %v2010_v48, 0.0  ;;  %v3175_v14 = vmax.f32 %v1819_v12, 0.0 }
 0x25b   : > { %v8783_v53 = vmax.f32 %v12320_v25, %v3154_v18  ;;  %v8787_v43 = vmax.f32 %v12322_v57, %v3156_v51  ;;  %v8791_v50 = vmax.f32 %v12325_v22, %v3155_v24  ;;  %v3177_v15 = vmax.f32 %v2012_v41, 0.0  ;;  %v12329_v18 = vld [vmem:[#allocation78_spill] sm:$0xff]  ;;  %v12337_v40 = vld [vmem:[#allocation53_spill] sm:$0xff]  ;;  %v1836_v41 = vpop.f32.mrb[166].mxu0  ;;  %v2027_v7 = vpop.f32.mrb[165].mxu1  ;;  %v12349_v26 = vld [vmem:[#allocation31_spill] sm:$0xff] }
 0x25c   : > { %v8795_v54 = vmax.f32 %v12327_v2, %v3157_v10  ;;  %v12330_v51 = vmax.f32 %v12329_v18, 0.0  ;;  %v12332_v24 = vmax.f32 %v8574_v30, 0.0  ;;  %v12334_v10 = vld [vmem:[#allocation79_spill] sm:$0xff]  ;;  %v12338_v48 = vmax.f32 %v12337_v40, 0.0  ;;  %v1838_v22 = vpop.f32.mrb[167].mxu0  ;;  %v2029_v2 = vpop.f32.mrb[166].mxu1 }
 0x25d   : > { %12321 = vst [vmem:[#allocation35_spill] sm:$0xff] %v8783_v53  ;;  %12323 = vst [vmem:[#allocation65_spill] sm:$0xff] %v8787_v43  ;;  %v12335_v25 = vmax.f32 %v12334_v10, 0.0  ;;  %v2031_v1 = vpop.f32.mrb[167].mxu1  ;;  %v1842_v30 = vpop.f32.mrb[168].mxu0  ;;  %v12352_v33 = vld [vmem:[#allocation58_spill] sm:$0xff] }
 0x25e   : > { %12326 = vst [vmem:[#allocation52_spill] sm:$0xff] %v8791_v50  ;;  %12328 = vst [vmem:[#allocation43_spill] sm:$0xff] %v8795_v54  ;;  %v8801_v49 = vmax.f32 %v12330_v51, %v3174_v11  ;;  %v8805_v56 = vmax.f32 %v12332_v24, %v3176_v37  ;;  %v8813_v12 = vmax.f32 %v12338_v48, %v3177_v15  ;;  %v5509_v11 = vld [vmem:[%s11613_s1 + $0x20] sm:$0xff]   ;;  %v1844_v15 = vpop.f32.mrb[169].mxu0  ;;  %v2035_v18 = vpop.f32.mrb[168].mxu1 }
 0x25f   : > { %v8809_v57 = vmax.f32 %v12335_v25, %v3175_v14  ;;  %5295 = vmatmul.mubr.msk.bf16.gmra.mrb[16].mxu0 %vm887_vm0, %v5509_v11  ;;  %5311 = vmatmul.mubr.msk.bf16.gmra.mrb[16].mxu1 %vm887_vm0, %v5509_v11  ;;  %v12340_v37 = vld [vmem:[#allocation9_spill] sm:$0xff]  ;;  %v12341_v24 = vld [vmem:[#allocation12_spill] sm:$0xff]  ;;  %v1846_v25 = vpop.f32.mrb[170].mxu0  ;;  %v2037_v40 = vpop.f32.mrb[169].mxu1 }
 0x260   : > { %12331 = vst [vmem:[#allocation44_spill] sm:$0xff] %v8801_v49  ;;  %12333 = vst [vmem:[#allocation39_spill] sm:$0xff] %v8805_v56  ;;  %2562 = vmatprep.mubr.bf16.mxu0 %v11883_v20  ;;  %2755 = vmatprep.mubr.bf16.mxu1 %v11883_v20  ;;  %v8824_v14 = vadd.f32 %v8730_v42, %v12340_v37  ;;  %v8827_v51 = vadd.f32 %v1824_v13, %v12340_v37  ;;  %v1848_v9 = vpop.f32.mrb[171].mxu0  ;;  %v2039_v23 = vpop.f32.mrb[170].mxu1  ;;  %v12343_v56 = vld [vmem:[#allocation19_spill] sm:$0xff] }
 0x261   : > { %12336 = vst [vmem:[#allocation55_spill] sm:$0xff] %v8809_v57  ;;  %12339 = vst [vmem:[#allocation80_spill] sm:$0xff] %v8813_v12  ;;  %v8830_v10 = vadd.f32 %v1826_v16, %v12341_v24  ;;  %v8834_v48 = vadd.f32 %v8748_v8, %v12340_v37  ;;  %v8837_v11 = vadd.f32 %v1828_v19, %v12341_v24  ;;  %v2041_v57 = vpop.f32.mrb[171].mxu1 }
 0x262   : > { %v8840_v42 = vadd.f32 %v2017_v32, %v12340_v37  ;;  %v8843_v13 = vadd.f32 %v2019_v6, %v12341_v24  ;;  %v8846_v16 = vadd.f32 %v2021_v28, %v12341_v24  ;;  %v8849_v12 = vadd.f32 %v1832_v63, %v12342_v47  ;;  %v5510_v6 = vld [vmem:[%s11613_s1 + $0x28] sm:$0xff]   ;;  %v2045_v50 = vpop.f32.mrb[172].mxu1 }
 0x263   : > { %v8852_v8 = vadd.f32 %v1834_v61, %v12342_v47  ;;  %v8856_v32 = vadd.f32 %v1836_v41, %v12343_v56  ;;  %v8859_v37 = vadd.f32 %v2025_v3, %v12342_v47  ;;  %v8868_v61 = vadd.f32 %v1838_v22, %v12343_v56  ;;  %v2047_v41 = vpop.f32.mrb[173].mxu1 }
 0x264   : > { %v8871_v19 = vadd.f32 %v2027_v7, %v12342_v47  ;;  %v8879_v28 = vadd.f32 %v2029_v2, %v12343_v56  ;;  %v1852_v47 = vpop.f32.mrb[172].mxu0  ;;  %v8889_v24 = vadd.f32 %v2031_v1, %v12343_v56  ;;  %v12344_v2 = vld [vmem:[#allocation23_spill] sm:$0xff]  ;;  %v2049_v53 = vpop.f32.mrb[174].mxu1 }
 0x265   : > { %v8892_v49 = vadd.f32 %v1842_v30, %v12344_v2  ;;  %v1854_v54 = vpop.f32.mrb[173].mxu0  ;;  %v8897_v63 = vadd.f32 %v1844_v15, %v12344_v2  ;;  %v8904_v56 = vadd.f32 %v2035_v18, %v12344_v2  ;;  %v8910_v22 = vadd.f32 %v2037_v40, %v12344_v2  ;;  %v2051_v1 = vpop.f32.mrb[175].mxu1 }
 0x266   : > { %v1856_v3 = vpop.f32.mrb[174].mxu0  ;;  %v8919_v27 = vadd.f32 %v1852_v47, %v12349_v26  ;;  %v8922_v18 = vadd.f32 %v1854_v54, %v12349_v26  ;;  %v8929_v2 = vadd.f32 %v2045_v50, %v12349_v26  ;;  %v5511_v47 = vld [vmem:[%s11613_s1 + $0x30] sm:$0xff]   ;;  %v2055_v44 = vpop.f32.mrb[176].mxu1 }
 0x267   : > { %5296 = vmatmul.mubr.msk.bf16.gmra.mrb[20].mxu0 %vm887_vm0, %v5510_v6  ;;  %5312 = vmatmul.mubr.msk.bf16.gmra.mrb[20].mxu1 %vm887_vm0, %v5510_v6  ;;  %v12345_v6 = vld [vmem:[#allocation27_spill] sm:$0xff]  ;;  %v1858_v7 = vpop.f32.mrb[175].mxu0  ;;  %v8926_v40 = vadd.f32 %v1856_v3, %v12352_v33 }
 0x268   : > { %2572 = vmatprep.mubr.bf16.mxu0 %v11883_v20  ;;  %2765 = vmatprep.mubr.bf16.mxu1 %v11883_v20  ;;  %v8900_v43 = vadd.f32 %v1846_v25, %v12345_v6  ;;  %v8907_v30 = vadd.f32 %v1848_v9, %v12345_v6  ;;  %v8913_v15 = vadd.f32 %v2039_v23, %v12345_v6  ;;  %v1862_v54 = vpop.f32.mrb[176].mxu0 }
 0x269   : > { %v8916_v25 = vadd.f32 %v2041_v57, %v12345_v6  ;;  %12350 = vst [vmem:[#allocation5_spill] sm:$0xff] %v8919_v27  ;;  %12351 = vst [vmem:[#allocation45_spill] sm:$0xff] %v8922_v18  ;;  %v8932_v23 = vadd.f32 %v2047_v41, %v12349_v26  ;;  %v8942_v3 = vadd.f32 %v1858_v7, %v12352_v33  ;;  %v1864_v4 = vpop.f32.mrb[177].mxu0  ;;  %v2057_v7 = vpop.f32.mrb[177].mxu1 }
 0x26a   : > { %12346 = vst [vmem:[#allocation81_spill] sm:$0xff] %v8907_v30  ;;  %12347 = vst [vmem:[#allocation66_spill] sm:$0xff] %v8913_v15  ;;  %v8950_v6 = vadd.f32 %v2049_v53, %v12352_v33  ;;  %v12358_v30 = vld [vmem:[#allocation11_spill] sm:$0xff]  ;;  %v8963_v9 = vadd.f32 %v2051_v1, %v12352_v33  ;;  %v1866_v18 = vpop.f32.mrb[178].mxu0 }
 0x26b   : > { %12348 = vst [vmem:[#allocation67_spill] sm:$0xff] %v8916_v25  ;;  %12353 = vst [vmem:[#allocation57_spill] sm:$0xff] %v8926_v40  ;;  %v1863_v53 = vadd.f32 %v1862_v54, %v12358_v30  ;;  %v2056_v57 = vadd.f32 %v2055_v44, %v12358_v30  ;;  %v2058_v26 = vadd.f32 %v2057_v7, %v12358_v30  ;;  %v12360_v40 = vld [vmem:[#allocation14_spill] sm:$0xff] }
 0x26c   : > { %12354 = vst [vmem:[#allocation59_spill] sm:$0xff] %v8929_v2  ;;  %12355 = vst [vmem:[#allocation75_spill] sm:$0xff] %v8932_v23  ;;  %v1867_v54 = vadd.f32 %v1866_v18, %v12360_v40  ;;  %v2059_v23 = vpop.f32.mrb[178].mxu1  ;;  %v1868_v2 = vpop.f32.mrb[179].mxu0  ;;  %v5512_v18 = vld [vmem:[%s11613_s1 + $0x38] sm:$0xff]  }
 0x26d   : > { %12356 = vst [vmem:[#allocation63_spill] sm:$0xff] %v8942_v3  ;;  %12357 = vst [vmem:[#allocation74_spill] sm:$0xff] %v8950_v6  ;;  %v3354_v41 = vmax.f32 %v1863_v53, 0.0  ;;  %v3356_v27 = vmax.f32 %v2056_v57, 0.0  ;;  %v2060_v1 = vadd.f32 %v2059_v23, %v12360_v40  ;;  %v1869_v33 = vadd.f32 %v1868_v2, %v12360_v40  ;;  %v2061_v44 = vpop.f32.mrb[179].mxu1  ;;  %v3994_v23 = vld [vmem:[%s11615_s3 + $0x40] sm:$0xff] }
 0x26e   : > { %12359 = vst [vmem:[#allocation40_spill] sm:$0xff] %v8963_v9  ;;  %v3357_v9 = vmax.f32 %v2058_v26, 0.0  ;;  %v3374_v25 = vmax.f32 %v1867_v54, 0.0  ;;  %v2062_v53 = vadd.f32 %v2061_v44, %v12360_v40  ;;  %v4491_v2 = vld [vmem:[%s11615_s3 + $0x540] sm:$0xff]  ;;  %v3996_v57 = vld [vmem:[%s11615_s3 + $0x50] sm:$0xff] }
 0x26f   : > { %5297 = vmatmul.mubr.msk.bf16.gmra.mrb[24].mxu0 %vm887_vm0, %v5511_v47  ;;  %5313 = vmatmul.mubr.msk.bf16.gmra.mrb[24].mxu1 %vm887_vm0, %v5511_v47  ;;  %v1865_v47 = vadd.f32 %v1864_v4, %v12358_v30  ;;  %v12361_v4 = vmax.f32 %v8824_v14, 0.0  ;;  %v12362_v14 = vmax.f32 %v8834_v48, 0.0  ;;  %v3375_v54 = vmax.f32 %v1869_v33, 0.0  ;;  %v4493_v48 = vld [vmem:[%s11615_s3 + $0x550] sm:$0xff] }
 0x270   : > { %2582 = vmatprep.mubr.bf16.mxu0 %v11883_v20  ;;  %2775 = vmatprep.mubr.bf16.mxu1 %v11883_v20  ;;  %v12364_v33 = vmax.f32 %v8840_v42, 0.0  ;;  %v12366_v42 = vmax.f32 %v8843_v13, 0.0  ;;  %v2065_v13 = vpop.f32.mrb[180].mxu1  ;;  %v4016_v40 = vld [vmem:[%s11615_s3 + $0xf0] sm:$0xff] }
 0x271   : > { %v3355_v38 = vmax.f32 %v1865_v47, 0.0  ;;  %v3674_v3 = vmax.f32 %v12361_v4, %v3354_v41  ;;  %v3676_v26 = vmax.f32 %v12362_v14, %v3356_v27  ;;  %v12363_v41 = vmax.f32 %v8827_v51, 0.0  ;;  %v3995_v27 = vld [vmem:[%s11615_s3 + $0x48] sm:$0xff]  ;;  %v3997_v14 = vld [vmem:[%s11615_s3 + $0x58] sm:$0xff]  ;;  %v4513_v30 = vld [vmem:[%s11615_s3 + $0x5f0] sm:$0xff] }
 0x272   : > { %v3376_v47 = vmax.f32 %v2060_v1, 0.0  ;;  %v3677_v51 = vmax.f32 %v12364_v33, %v3357_v9  ;;  %v12365_v1 = vmax.f32 %v8830_v10, 0.0  ;;  %v12367_v10 = vmax.f32 %v8837_v11, 0.0 }
 0x273   : > { %v3675_v7 = vmax.f32 %v12363_v41, %v3355_v38  ;;  %v3834_v44 = vmax.f32 %v8618_v52, %v3674_v3  ;;  %v4492_v38 = vld [vmem:[%s11615_s3 + $0x548] sm:$0xff]  ;;  %v3836_v52 = vmax.f32 %v8622_v21, %v3676_v26  ;;  %v4494_v41 = vld [vmem:[%s11615_s3 + $0x558] sm:$0xff]  ;;  %v4014_v26 = vld [vmem:[%s11615_s3 + $0xe0] sm:$0xff] }
 0x274   : > { %v3694_v4 = vmax.f32 %v12365_v1, %v3374_v25  ;;  %v3696_v9 = vmax.f32 %v12366_v42, %v3376_v47  ;;  %v3695_v25 = vmax.f32 %v12367_v10, %v3375_v54  ;;  %v3837_v21 = vmax.f32 %v8630_v58, %v3677_v51  ;;  %v12369_v51 = vld [vmem:[#allocation68_spill] sm:$0xff] }
 0x275   : > { %v3835_v3 = vmax.f32 %v8626_v45, %v3675_v7  ;;  %v4154_v33 = vmul.f32 %v3994_v23, %v3834_v44  ;;  %v4651_v1 = vmul.f32 %v4491_v2, %v3834_v44  ;;  %v4511_v7 = vld [vmem:[%s11615_s3 + $0x5e0] sm:$0xff]  ;;  %v4156_v42 = vmul.f32 %v3996_v57, %v3836_v52  ;;  %v2067_v23 = vpop.f32.mrb[181].mxu1  ;;  %v12368_v44 = vld [vmem:[#allocation51_spill] sm:$0xff] }
 0x276   : > { %v3854_v45 = vmax.f32 %v8649_v55, %v3694_v4  ;;  %v4653_v11 = vmul.f32 %v4493_v48, %v3836_v52  ;;  %v4157_v4 = vmul.f32 %v3997_v14, %v3837_v21  ;;  %v4654_v50 = vmul.f32 %v4494_v41, %v3837_v21  ;;  %v2069_v57 = vpop.f32.mrb[182].mxu1  ;;  %v4015_v14 = vld [vmem:[%s11615_s3 + $0xe8] sm:$0xff] }
 0x277   : > { %5298 = vmatmul.mubr.msk.bf16.gmra.mrb[28].mxu0 %vm887_vm0, %v5512_v18  ;;  %5314 = vmatmul.mubr.msk.bf16.gmra.mrb[28].mxu1 %vm887_vm0, %v5512_v18  ;;  %v3377_v18 = vmax.f32 %v2062_v53, 0.0  ;;  %v1872_v53 = vpop.f32.mrb[180].mxu0  ;;  %v4155_v54 = vmul.f32 %v3995_v27, %v3835_v3  ;;  %v4652_v10 = vmul.f32 %v4492_v38, %v3835_v3  ;;  %v4313_v58 = vadd.f32 %v12368_v44, %v4154_v33  ;;  %v4512_v41 = vld [vmem:[%s11615_s3 + $0x5e8] sm:$0xff]  ;;  %v9047_v33 = vpop.f32.mrb[183].mxu1 }
 0x278   : > { %2592 = vmatprep.mubr.bf16.mxu0 %v11883_v20  ;;  %2785 = vmatprep.mubr.bf16.mxu1 %v11883_v20  ;;  %v1874_v47 = vpop.f32.mrb[181].mxu0  ;;  %v4810_v55 = vadd.f32 %v12369_v51, %v4651_v1  ;;  %v4174_v27 = vmul.f32 %v4014_v26, %v3854_v45  ;;  %v4671_v38 = vmul.f32 %v4511_v7, %v3854_v45  ;;  %v12370_v44 = vmax.f32 %v8846_v16, 0.0  ;;  %v12371_v45 = vld [vmem:[#allocation18_spill] sm:$0xff] }
 0x279   : > { %v1876_v2 = vpop.f32.mrb[182].mxu0  ;;  %v3856_v52 = vmax.f32 %v8653_v36, %v3696_v9  ;;  %v3855_v3 = vmax.f32 %v8657_v17, %v3695_v25  ;;  %v4314_v1 = vadd.f32 %v4313_v58, %v4155_v54  ;;  %v1873_v7 = vadd.f32 %v1872_v53, %v12371_v45  ;;  %v5513_v36 = vld [vmem:[%s11613_s1 + $0x40] sm:$0xff]   ;;  %v12373_v25 = vld [vmem:[#allocation70_spill] sm:$0xff]  ;;  %v4017_v53 = vld [vmem:[%s11615_s3 + $0xf8] sm:$0xff] }
 0x27a   : > { %v9037_v48 = vpop.f32.mrb[183].mxu0  ;;  %v4811_v21 = vadd.f32 %v4810_v55, %v4652_v10  ;;  %v3697_v26 = vmax.f32 %v12370_v44, %v3377_v18  ;;  %v12372_v17 = vld [vmem:[#allocation69_spill] sm:$0xff]  ;;  %v4832_v51 = vadd.f32 %v12373_v25, %v4671_v38  ;;  %v4514_v58 = vld [vmem:[%s11615_s3 + $0x5f8] sm:$0xff] }
 0x27b   : > { %v4336_v9 = vadd.f32 %v12372_v17, %v4174_v27  ;;  %v4176_v6 = vmul.f32 %v4016_v40, %v3856_v52  ;;  %v4673_v15 = vmul.f32 %v4513_v30, %v3856_v52  ;;  %v4315_v54 = vadd.f32 %v4314_v1, %v4156_v42 }
 0x27c   : > { %v4812_v10 = vadd.f32 %v4811_v21, %v4653_v11  ;;  %v4175_v16 = vmul.f32 %v4015_v14, %v3855_v3  ;;  %v4672_v18 = vmul.f32 %v4512_v41, %v3855_v3  ;;  %v3857_v55 = vmax.f32 %v8661_v46, %v3697_v26  ;;  %v9069_v11 = vpop.f32.mrb[184].mxu0  ;;  %v9076_v14 = vpop.f32.mrb[184].mxu1 }
 0x27d   : > { %v3394_v40 = vmax.f32 %v1873_v7, 0.0  ;;  %v2066_v30 = vadd.f32 %v2065_v13, %v12371_v45  ;;  %v1875_v42 = vadd.f32 %v1874_v47, %v12371_v45  ;;  %v9072_v27 = vadd.f32 %v4315_v54, %v4157_v4  ;;  %v9078_v41 = vpop.f32.mrb[185].mxu0  ;;  %v9082_v44 = vpop.f32.mrb[185].mxu1  ;;  %v12378_v54 = vld [vmem:[#allocation22_spill] sm:$0xff] }
 0x27e   : > { %v9074_v38 = vadd.f32 %v4812_v10, %v4654_v50  ;;  %v4337_v52 = vadd.f32 %v4336_v9, %v4175_v16  ;;  %v4833_v3 = vadd.f32 %v4832_v51, %v4672_v18  ;;  %v4177_v46 = vmul.f32 %v4017_v53, %v3857_v55  ;;  %v9084_v26 = vpop.f32.mrb[186].mxu0  ;;  %v4034_v50 = vld [vmem:[%s11615_s3 + $0x180] sm:$0xff] }
 0x27f   : > { %5299 = vmatmul.mubr.msk.bf16.gmra.mrb[32].mxu0 %vm887_vm0, %v5513_v36  ;;  %5315 = vmatmul.mubr.msk.bf16.gmra.mrb[32].mxu1 %vm887_vm0, %v5513_v36  ;;  %12374 = vst [vmem:[#allocation47_spill] sm:$0xff] %v9072_v27  ;;  %v4674_v1 = vmul.f32 %v4514_v58, %v3857_v55  ;;  %v12376_v13 = vmax.f32 %v8849_v12, 0.0  ;;  %v3396_v47 = vmax.f32 %v2066_v30, 0.0  ;;  %v4531_v36 = vld [vmem:[%s11615_s3 + $0x680] sm:$0xff]  ;;  %v3395_v17 = vmax.f32 %v1875_v42, 0.0  ;;  %v9093_v12 = vpop.f32.mrb[186].mxu1 }
 0x280   : > { %2602 = vmatprep.mubr.bf16.mxu0 %v11883_v20  ;;  %2795 = vmatprep.mubr.bf16.mxu1 %v11883_v20  ;;  %12375 = vst [vmem:[#allocation78_spill] sm:$0xff] %v9074_v38  ;;  %v4338_v4 = vadd.f32 %v4337_v52, %v4176_v6  ;;  %v4834_v7 = vadd.f32 %v4833_v3, %v4673_v15  ;;  %v9095_v25 = vpop.f32.mrb[187].mxu0  ;;  %v12377_v6 = vmax.f32 %v8859_v37, 0.0  ;;  %v9102_v18 = vpop.f32.mrb[187].mxu1  ;;  %v12381_v37 = vmax.f32 %v8852_v8, 0.0  ;;  %v4035_v52 = vld [vmem:[%s11615_s3 + $0x188] sm:$0xff] }
 0x281   : > { %v3714_v21 = vmax.f32 %v12376_v13, %v3394_v40  ;;  %v2068_v9 = vadd.f32 %v2067_v23, %v12371_v45  ;;  %v1877_v10 = vadd.f32 %v1876_v2, %v12378_v54  ;;  %v2070_v16 = vadd.f32 %v2069_v57, %v12378_v54  ;;  %v4036_v23 = vld [vmem:[%s11615_s3 + $0x190] sm:$0xff]  ;;  %v5514_v57 = vld [vmem:[%s11613_s1 + $0x48] sm:$0xff]  }
 0x282   : > { %v3716_v15 = vmax.f32 %v12377_v6, %v3396_v47  ;;  %v9104_v53 = vadd.f32 %v4338_v4, %v4177_v46  ;;  %v9106_v58 = vadd.f32 %v4834_v7, %v4674_v1  ;;  %v3715_v55 = vmax.f32 %v12381_v37, %v3395_v17  ;;  %v4532_v8 = vld [vmem:[%s11615_s3 + $0x688] sm:$0xff]  ;;  %v12383_v47 = vld [vmem:[#allocation71_spill] sm:$0xff] }
 0x283   : > { %v3874_v51 = vmax.f32 %v8677_v31, %v3714_v21  ;;  %v4533_v31 = vld [vmem:[%s11615_s3 + $0x690] sm:$0xff]  ;;  %v3397_v2 = vmax.f32 %v2068_v9, 0.0  ;;  %v3414_v3 = vmax.f32 %v1877_v10, 0.0  ;;  %v12382_v1 = vmax.f32 %v8871_v19, 0.0  ;;  %v4037_v9 = vld [vmem:[%s11615_s3 + $0x198] sm:$0xff]  ;;  %v9143_v19 = vpop.f32.mrb[188].mxu0 }
 0x284   : > { %12379 = vst [vmem:[#allocation79_spill] sm:$0xff] %v9104_v53  ;;  %12380 = vst [vmem:[#allocation53_spill] sm:$0xff] %v9106_v58  ;;  %v3876_v42 = vmax.f32 %v8681_v59, %v3716_v15  ;;  %v3875_v46 = vmax.f32 %v8685_v35, %v3715_v55  ;;  %v3416_v21 = vmax.f32 %v2070_v16, 0.0  ;;  %v1879_v59 = vadd.f32 %v9037_v48, %v12378_v54  ;;  %v12384_v7 = vld [vmem:[#allocation62_spill] sm:$0xff]  ;;  %v4534_v35 = vld [vmem:[%s11615_s3 + $0x698] sm:$0xff]  ;;  %v9148_v16 = vpop.f32.mrb[188].mxu1 }
 0x285   : > { %v4194_v40 = vmul.f32 %v4034_v50, %v3874_v51  ;;  %v4691_v30 = vmul.f32 %v4531_v36, %v3874_v51  ;;  %v3717_v13 = vmax.f32 %v12382_v1, %v3397_v2  ;;  %v12385_v15 = vmax.f32 %v8856_v32, 0.0  ;;  %v9161_v32 = vpop.f32.mrb[189].mxu1  ;;  %v4136_v53 = vld [vmem:[%s11615_s3 + $0x4b0] sm:$0xff] }
 0x286   : > { %v4196_v36 = vmul.f32 %v4036_v23, %v3876_v42  ;;  %v4693_v17 = vmul.f32 %v4533_v31, %v3876_v42  ;;  %v4195_v51 = vmul.f32 %v4035_v52, %v3875_v46  ;;  %v4692_v48 = vmul.f32 %v4532_v8, %v3875_v46  ;;  %v9150_v23 = vpop.f32.mrb[189].mxu0  ;;  %v4054_v31 = vld [vmem:[%s11615_s3 + $0x220] sm:$0xff]  ;;  %v4056_v46 = vld [vmem:[%s11615_s3 + $0x230] sm:$0xff] }
 0x287   : > { %5300 = vmatmul.mubr.msk.bf16.gmra.mrb[36].mxu0 %vm887_vm0, %v5514_v57  ;;  %5316 = vmatmul.mubr.msk.bf16.gmra.mrb[36].mxu1 %vm887_vm0, %v5514_v57  ;;  %v4358_v4 = vadd.f32 %v12383_v47, %v4194_v40  ;;  %v4854_v50 = vadd.f32 %v12384_v7, %v4691_v30  ;;  %v3877_v6 = vmax.f32 %v8689_v29, %v3717_v13  ;;  %v12386_v37 = vmax.f32 %v8879_v28, 0.0  ;;  %v12387_v40 = vld [vmem:[#allocation26_spill] sm:$0xff]  ;;  %v9163_v30 = vpop.f32.mrb[190].mxu0  ;;  %v4551_v28 = vld [vmem:[%s11615_s3 + $0x720] sm:$0xff] }
 0x288   : > { %2612 = vmatprep.mubr.bf16.mxu0 %v11883_v20  ;;  %2805 = vmatprep.mubr.bf16.mxu1 %v11883_v20  ;;  %v3734_v10 = vmax.f32 %v12385_v15, %v3414_v3  ;;  %v3415_v2 = vmax.f32 %v1879_v59, 0.0  ;;  %v2072_v57 = vadd.f32 %v9047_v33, %v12378_v54  ;;  %v1883_v29 = vadd.f32 %v9069_v11, %v12387_v40  ;;  %v4553_v33 = vld [vmem:[%s11615_s3 + $0x730] sm:$0xff]  ;;  %v9174_v11 = vpop.f32.mrb[190].mxu1  ;;  %v9176_v1 = vpop.f32.mrb[191].mxu0  ;;  %v4055_v15 = vld [vmem:[%s11615_s3 + $0x228] sm:$0xff] }
 0x289   : > { %v3736_v55 = vmax.f32 %v12386_v37, %v3416_v21  ;;  %v4359_v42 = vadd.f32 %v4358_v4, %v4195_v51  ;;  %v4855_v52 = vadd.f32 %v4854_v50, %v4692_v48  ;;  %v4197_v8 = vmul.f32 %v4037_v9, %v3877_v6  ;;  %v9182_v7 = vpop.f32.mrb[191].mxu1  ;;  %v5515_v48 = vld [vmem:[%s11613_s1 + $0x50] sm:$0xff]  }
 0x28a   : > { %v4694_v3 = vmul.f32 %v4534_v35, %v3877_v6  ;;  %v3894_v13 = vmax.f32 %v8705_v5, %v3734_v10  ;;  %v12388_v59 = vmax.f32 %v8868_v61, 0.0  ;;  %v3417_v4 = vmax.f32 %v2072_v57, 0.0  ;;  %v12393_v57 = vld [vmem:[#allocation72_spill] sm:$0xff] }
 0x28b   : > { %v3896_v21 = vmax.f32 %v8709_v62, %v3736_v55  ;;  %v4360_v50 = vadd.f32 %v4359_v42, %v4196_v36  ;;  %v4856_v9 = vadd.f32 %v4855_v52, %v4693_v17  ;;  %v3434_v35 = vmax.f32 %v1883_v29, 0.0  ;;  %v4552_v36 = vld [vmem:[%s11615_s3 + $0x728] sm:$0xff]  ;;  %v4057_v42 = vld [vmem:[%s11615_s3 + $0x238] sm:$0xff] }
 0x28c   : > { %v3735_v47 = vmax.f32 %v12388_v59, %v3415_v2  ;;  %v2076_v51 = vadd.f32 %v9076_v14, %v12387_v40  ;;  %v4214_v5 = vmul.f32 %v4054_v31, %v3894_v13  ;;  %v4711_v62 = vmul.f32 %v4551_v28, %v3894_v13  ;;  %v12392_v55 = vld [vmem:[#allocation37_spill] sm:$0xff]  ;;  %v4554_v52 = vld [vmem:[%s11615_s3 + $0x738] sm:$0xff] }
 0x28d   : > { %v4216_v6 = vmul.f32 %v4056_v46, %v3896_v21  ;;  %v4713_v61 = vmul.f32 %v4553_v33, %v3896_v21  ;;  %v9197_v14 = vadd.f32 %v4360_v50, %v4197_v8  ;;  %v9199_v17 = vadd.f32 %v4856_v9, %v4694_v3  ;;  %v4074_v13 = vld [vmem:[%s11615_s3 + $0x2c0] sm:$0xff] }
 0x28e   : > { %v3895_v10 = vmax.f32 %v8713_v0, %v3735_v47  ;;  %v12391_v31 = vmax.f32 %v8889_v24, 0.0  ;;  %v4380_v2 = vadd.f32 %v12392_v55, %v4214_v5  ;;  %v4876_v29 = vadd.f32 %v12393_v57, %v4711_v62  ;;  %v9215_v24 = vpop.f32.mrb[192].mxu0  ;;  %v4571_v21 = vld [vmem:[%s11615_s3 + $0x7c0] sm:$0xff]  ;;  %v9229_v47 = vpop.f32.mrb[192].mxu1 }
 0x28f   : > { %5301 = vmatmul.mubr.msk.bf16.gmra.mrb[40].mxu0 %vm887_vm0, %v5515_v48  ;;  %5317 = vmatmul.mubr.msk.bf16.gmra.mrb[40].mxu1 %vm887_vm0, %v5515_v48  ;;  %12389 = vst [vmem:[#allocation51_spill] sm:$0xff] %v9197_v14  ;;  %12390 = vst [vmem:[#allocation68_spill] sm:$0xff] %v9199_v17  ;;  %v12394_v8 = vmax.f32 %v8892_v49, 0.0  ;;  %v3436_v3 = vmax.f32 %v2076_v51, 0.0  ;;  %v1885_v49 = vadd.f32 %v9078_v41, %v12387_v40  ;;  %v9227_v59 = vpop.f32.mrb[193].mxu0  ;;  %v12395_v50 = vmax.f32 %v8904_v56, 0.0 }
 0x290   : > { %v3737_v37 = vmax.f32 %v12391_v31, %v3417_v4  ;;  %2622 = vmatprep.mubr.bf16.mxu0 %v11883_v20  ;;  %2815 = vmatprep.mubr.bf16.mxu1 %v11883_v20  ;;  %v4215_v28 = vmul.f32 %v4055_v15, %v3895_v10  ;;  %v4712_v46 = vmul.f32 %v4552_v36, %v3895_v10  ;;  %v9238_v48 = vpop.f32.mrb[194].mxu0  ;;  %v9240_v5 = vpop.f32.mrb[193].mxu1  ;;  %v4573_v56 = vld [vmem:[%s11615_s3 + $0x7d0] sm:$0xff] }
 0x291   : > { %v3754_v0 = vmax.f32 %v12394_v8, %v3434_v35  ;;  %v2078_v9 = vadd.f32 %v9082_v44, %v12387_v40  ;;  %v12396_v35 = vld [vmem:[#allocation30_spill] sm:$0xff]  ;;  %v9248_v44 = vpop.f32.mrb[195].mxu0  ;;  %v9250_v10 = vpop.f32.mrb[194].mxu1  ;;  %v3435_v55 = vmax.f32 %v1885_v49, 0.0  ;;  %v5516_v8 = vld [vmem:[%s11613_s1 + $0x58] sm:$0xff]  }
 0x292   : > { %v3897_v33 = vmax.f32 %v8717_v34, %v3737_v37  ;;  %v3756_v34 = vmax.f32 %v12395_v50, %v3436_v3  ;;  %v1887_v51 = vadd.f32 %v9084_v26, %v12396_v35  ;;  %v4381_v41 = vadd.f32 %v4380_v2, %v4215_v28  ;;  %v9253_v2 = vpop.f32.mrb[195].mxu1  ;;  %v12398_v28 = vld [vmem:[#allocation49_spill] sm:$0xff] }
 0x293   : > { %v3914_v4 = vmax.f32 %v8734_v60, %v3754_v0  ;;  %v4877_v62 = vadd.f32 %v4876_v29, %v4712_v46  ;;  %v4076_v60 = vld [vmem:[%s11615_s3 + $0x2d0] sm:$0xff]  ;;  %v12397_v0 = vld [vmem:[#allocation73_spill] sm:$0xff] }
 0x294   : > { %v4217_v15 = vmul.f32 %v4057_v42, %v3897_v33  ;;  %v4714_v36 = vmul.f32 %v4554_v52, %v3897_v33  ;;  %v3916_v37 = vmax.f32 %v8738_v39, %v3756_v34  ;;  %v4382_v57 = vadd.f32 %v4381_v41, %v4216_v6  ;;  %v4075_v49 = vld [vmem:[%s11615_s3 + $0x2c8] sm:$0xff] }
 0x295   : > { %v4234_v26 = vmul.f32 %v4074_v13, %v3914_v4  ;;  %v4731_v31 = vmul.f32 %v4571_v21, %v3914_v4  ;;  %v4878_v29 = vadd.f32 %v4877_v62, %v4713_v61  ;;  %v3437_v42 = vmax.f32 %v2078_v9, 0.0  ;;  %v4572_v34 = vld [vmem:[%s11615_s3 + $0x7c8] sm:$0xff]  ;;  %v4077_v9 = vld [vmem:[%s11615_s3 + $0x2d8] sm:$0xff] }
 0x296   : > { %v3454_v52 = vmax.f32 %v1887_v51, 0.0  ;;  %v4236_v33 = vmul.f32 %v4076_v60, %v3916_v37  ;;  %v4733_v13 = vmul.f32 %v4573_v56, %v3916_v37  ;;  %v9262_v39 = vadd.f32 %v4382_v57, %v4217_v15  ;;  %v12404_v60 = vld [vmem:[#allocation48_spill] sm:$0xff]  ;;  %v9310_v57 = vpop.f32.mrb[196].mxu1 }
 0x297   : > { %5302 = vmatmul.mubr.msk.bf16.gmra.mrb[44].mxu0 %vm887_vm0, %v5516_v8  ;;  %v4402_v3 = vadd.f32 %v12397_v0, %v4234_v26  ;;  %v4898_v46 = vadd.f32 %v12398_v28, %v4731_v31  ;;  %5318 = vmatmul.mubr.msk.bf16.gmra.mrb[44].mxu1 %vm887_vm0, %v5516_v8  ;;  %v9264_v6 = vadd.f32 %v4878_v29, %v4714_v36  ;;  %v12401_v61 = vmax.f32 %v8897_v63, 0.0  ;;  %v4574_v63 = vld [vmem:[%s11615_s3 + $0x7d8] sm:$0xff]  ;;  %v9291_v36 = vpop.f32.mrb[196].mxu0  ;;  %v12405_v26 = vld [vmem:[#allocation50_spill] sm:$0xff] }
 0x298   : > { %12399 = vst [vmem:[#allocation69_spill] sm:$0xff] %v9262_v39  ;;  %v12402_v4 = vmax.f32 %v8910_v22, 0.0  ;;  %2632 = vmatprep.mubr.bf16.mxu0 %v11883_v20  ;;  %v12403_v51 = vmax.f32 %v8900_v43, 0.0  ;;  %v2080_v22 = vadd.f32 %v9093_v12, %v12396_v35  ;;  %v1889_v62 = vadd.f32 %v9095_v25, %v12396_v35  ;;  %2825 = vmatprep.mubr.bf16.mxu1 %v11883_v20  ;;  %v4094_v43 = vld [vmem:[%s11615_s3 + $0x360] sm:$0xff]  ;;  %v12406_v25 = vld [vmem:[#allocation34_spill] sm:$0xff] }
 0x299   : > { %12400 = vst [vmem:[#allocation70_spill] sm:$0xff] %v9264_v6  ;;  %v3755_v21 = vmax.f32 %v12401_v61, %v3435_v55  ;;  %v2082_v15 = vadd.f32 %v9102_v18, %v12396_v35  ;;  %v4591_v12 = vld [vmem:[%s11615_s3 + $0x860] sm:$0xff]  ;;  %v1893_v37 = vadd.f32 %v9143_v19, %v12406_v25  ;;  %v9306_v18 = vadd.f32 %v9148_v16, %v12406_v25  ;;  %v9308_v55 = vpop.f32.mrb[197].mxu0  ;;  %v12407_v29 = vld [vmem:[#allocation38_spill] sm:$0xff]  ;;  %v9315_v61 = vpop.f32.mrb[197].mxu1 }
 0x29a   : > { %v3757_v50 = vmax.f32 %v12402_v4, %v3437_v42  ;;  %v3774_v41 = vmax.f32 %v12403_v51, %v3454_v52  ;;  %v3456_v52 = vmax.f32 %v2080_v22, 0.0  ;;  %v3455_v8 = vmax.f32 %v1889_v62, 0.0  ;;  %v9313_v28 = vpop.f32.mrb[198].mxu0  ;;  %v9319_v16 = vpop.f32.mrb[198].mxu1  ;;  %v12408_v35 = vld [vmem:[#allocation66_spill] sm:$0xff]  ;;  %v12410_v62 = vld [vmem:[#allocation81_spill] sm:$0xff] }
 0x29b   : > { %v3915_v56 = vmax.f32 %v12404_v60, %v3755_v21  ;;  %v3457_v0 = vmax.f32 %v2082_v15, 0.0  ;;  %v9317_v51 = vpop.f32.mrb[199].mxu0  ;;  %v12409_v6 = vmax.f32 %v12408_v35, 0.0  ;;  %v4096_v22 = vld [vmem:[%s11615_s3 + $0x370] sm:$0xff]  ;;  %v12411_v15 = vmax.f32 %v12410_v62, 0.0  ;;  %v4095_v35 = vld [vmem:[%s11615_s3 + $0x368] sm:$0xff] }
 0x29c   : > { %v3917_v31 = vmax.f32 %v12405_v26, %v3757_v50  ;;  %v3934_v42 = vmax.f32 %v12407_v29, %v3774_v41  ;;  %v12417_v62 = vld [vmem:[#allocation54_spill] sm:$0xff]  ;;  %v12418_v39 = vld [vmem:[#allocation61_spill] sm:$0xff]  ;;  %v9360_v40 = vpop.f32.mrb[200].mxu0 }
 0x29d   : > { %v4235_v21 = vmul.f32 %v4075_v49, %v3915_v56  ;;  %v4732_v4 = vmul.f32 %v4572_v34, %v3915_v56  ;;  %v3776_v41 = vmax.f32 %v12409_v6, %v3456_v52  ;;  %v3775_v29 = vmax.f32 %v12411_v15, %v3455_v8  ;;  %v9328_v49 = vpop.f32.mrb[199].mxu1  ;;  %v4592_v6 = vld [vmem:[%s11615_s3 + $0x868] sm:$0xff]  ;;  %v12412_v56 = vld [vmem:[#allocation67_spill] sm:$0xff]  ;;  %v12415_v52 = vld [vmem:[#allocation60_spill] sm:$0xff] }
 0x29e   : > { %v4237_v19 = vmul.f32 %v4077_v9, %v3917_v31  ;;  %v4734_v50 = vmul.f32 %v4574_v63, %v3917_v31  ;;  %v4254_v60 = vmul.f32 %v4094_v43, %v3934_v42  ;;  %v4751_v26 = vmul.f32 %v4591_v12, %v3934_v42  ;;  %v4593_v63 = vld [vmem:[%s11615_s3 + $0x870] sm:$0xff] }
 0x29f   : > { %v4403_v34 = vadd.f32 %v4402_v3, %v4235_v21  ;;  %v4899_v9 = vadd.f32 %v4898_v46, %v4732_v4  ;;  %v12413_v31 = vmax.f32 %v12412_v56, 0.0  ;;  %v3474_v12 = vmax.f32 %v1893_v37, 0.0  ;;  %v5517_v3 = vld [vmem:[%s11613_s1 + $0x60] sm:$0xff]   ;;  %v4097_v56 = vld [vmem:[%s11615_s3 + $0x378] sm:$0xff] }
 0x2a0   : > { %5303 = vmatmul.mubr.msk.bf16.gmra.mrb[48].mxu0 %vm887_vm0, %v5517_v3  ;;  %v12414_v46 = vld [vmem:[#allocation64_spill] sm:$0xff]  ;;  %v4920_v8 = vadd.f32 %v12415_v52, %v4751_v26  ;;  %v3935_v15 = vmax.f32 %v12417_v62, %v3775_v29  ;;  %5319 = vmatmul.mubr.msk.bf16.gmra.mrb[48].mxu1 %vm887_vm0, %v5517_v3 }
 0x2a1   : > { %v3777_v43 = vmax.f32 %v12413_v31, %v3457_v0  ;;  %v4424_v42 = vadd.f32 %v12414_v46, %v4254_v60  ;;  %v12416_v21 = vld [vmem:[#allocation36_spill] sm:$0xff]  ;;  %v4404_v0 = vadd.f32 %v4403_v34, %v4236_v33  ;;  %v4900_v31 = vadd.f32 %v4899_v9, %v4733_v13  ;;  %v12419_v46 = vld [vmem:[#allocation5_spill] sm:$0xff]  ;;  %2642 = vmatprep.mubr.bf16.mxu0 %v11883_v20  ;;  %v9373_v34 = vpop.f32.mrb[201].mxu0  ;;  %v9375_v9 = vpop.f32.mrb[200].mxu1 }
 0x2a2   : > { %v3936_v4 = vmax.f32 %v12416_v21, %v3776_v41  ;;  %v4594_v37 = vld [vmem:[%s11615_s3 + $0x878] sm:$0xff]  ;;  %v12420_v26 = vmax.f32 %v12419_v46, 0.0  ;;  %v4255_v21 = vmul.f32 %v4095_v35, %v3935_v15  ;;  %v4752_v62 = vmul.f32 %v4592_v6, %v3935_v15  ;;  %2835 = vmatprep.mubr.bf16.mxu1 %v11883_v20 }
 0x2a3   : > { %v3937_v60 = vmax.f32 %v12418_v39, %v3777_v43  ;;  %v9363_v17 = vadd.f32 %v4404_v0, %v4237_v19  ;;  %v9365_v3 = vadd.f32 %v4900_v31, %v4734_v50  ;;  %v4114_v39 = vld [vmem:[%s11615_s3 + $0x400] sm:$0xff]  ;;  %v12423_v19 = vld [vmem:[#allocation35_spill] sm:$0xff]  ;;  %v3476_v50 = vmax.f32 %v9306_v18, 0.0  ;;  %v9379_v43 = vpop.f32.mrb[202].mxu0 }
 0x2a4   : > { %v3794_v52 = vmax.f32 %v12420_v26, %v3474_v12  ;;  %v4256_v41 = vmul.f32 %v4096_v22, %v3936_v4  ;;  %v4753_v29 = vmul.f32 %v4593_v63, %v3936_v4  ;;  %v4611_v22 = vld [vmem:[%s11615_s3 + $0x900] sm:$0xff]  ;;  %v4425_v63 = vadd.f32 %v4424_v42, %v4255_v21  ;;  %v9381_v12 = vpop.f32.mrb[201].mxu1 }
 0x2a5   : > { %12421 = vst [vmem:[#allocation71_spill] sm:$0xff] %v9363_v17  ;;  %12422 = vst [vmem:[#allocation62_spill] sm:$0xff] %v9365_v3  ;;  %v4257_v33 = vmul.f32 %v4097_v56, %v3937_v60  ;;  %v4754_v13 = vmul.f32 %v4594_v37, %v3937_v60  ;;  %v4921_v35 = vadd.f32 %v4920_v8, %v4752_v62  ;;  %v12424_v56 = vld [vmem:[#allocation56_spill] sm:$0xff]  ;;  %v9391_v8 = vpop.f32.mrb[203].mxu0  ;;  %v9393_v0 = vpop.f32.mrb[202].mxu1 }
 0x2a6   : > { %v3954_v6 = vmax.f32 %v12423_v19, %v3794_v52  ;;  %v1895_v4 = vadd.f32 %v9150_v23, %v12406_v25  ;;  %v2088_v15 = vadd.f32 %v9161_v32, %v12406_v25  ;;  %v1897_v37 = vadd.f32 %v9163_v30, %v12424_v56  ;;  %v9395_v26 = vpop.f32.mrb[203].mxu1  ;;  %v12425_v23 = vld [vmem:[#allocation59_spill] sm:$0xff]  ;;  %v5518_v30 = vld [vmem:[%s11613_s1 + $0x68] sm:$0xff]  }
 0x2a7   : > { %v2090_v42 = vadd.f32 %v9174_v11, %v12424_v56  ;;  %v4426_v18 = vadd.f32 %v4425_v63, %v4256_v41  ;;  %v4922_v31 = vadd.f32 %v4921_v35, %v4753_v29  ;;  %v12426_v52 = vmax.f32 %v12425_v23, 0.0  ;;  %v12429_v29 = vld [vmem:[#allocation46_spill] sm:$0xff] }
 0x2a8   : > { %v4274_v60 = vmul.f32 %v4114_v39, %v3954_v6  ;;  %v4771_v46 = vmul.f32 %v4611_v22, %v3954_v6  ;;  %v3475_v32 = vmax.f32 %v1895_v4, 0.0  ;;  %v3477_v62 = vmax.f32 %v2088_v15, 0.0  ;;  %5304 = vmatmul.mubr.msk.bf16.gmra.mrb[52].mxu0 %vm887_vm0, %v5518_v30  ;;  %v12430_v22 = vld [vmem:[#allocation76_spill] sm:$0xff]  ;;  %v4116_v35 = vld [vmem:[%s11615_s3 + $0x410] sm:$0xff]  ;;  %5320 = vmatmul.mubr.msk.bf16.gmra.mrb[52].mxu1 %vm887_vm0, %v5518_v30  ;;  %v12431_v6 = vld [vmem:[#allocation65_spill] sm:$0xff] }
 0x2a9   : > { %v3796_v21 = vmax.f32 %v12426_v52, %v3476_v50  ;;  %v3494_v19 = vmax.f32 %v1897_v37, 0.0  ;;  %v9403_v11 = vadd.f32 %v4426_v18, %v4257_v33  ;;  %v9405_v41 = vadd.f32 %v4922_v31, %v4754_v13  ;;  %v4613_v4 = vld [vmem:[%s11615_s3 + $0x910] sm:$0xff]  ;;  %v12432_v33 = vld [vmem:[#allocation45_spill] sm:$0xff]  ;;  %2652 = vmatprep.mubr.bf16.mxu0 %v11883_v20  ;;  %v12438_v52 = vld [vmem:[#allocation40_spill] sm:$0xff]  ;;  %2845 = vmatprep.mubr.bf16.mxu1 %v11883_v20 }
 0x2aa   : > { %v4446_v39 = vadd.f32 %v12429_v29, %v4274_v60  ;;  %v4942_v63 = vadd.f32 %v12430_v22, %v4771_v46  ;;  %v12433_v15 = vmax.f32 %v12432_v33, 0.0  ;;  %v12434_v37 = vld [vmem:[#allocation75_spill] sm:$0xff]  ;;  %v12436_v60 = vld [vmem:[#allocation57_spill] sm:$0xff]  ;;  %v3337_v29 = vmax.f32 %v12438_v52, 0.0 }
 0x2ab   : > { %12427 = vst [vmem:[#allocation37_spill] sm:$0xff] %v9403_v11  ;;  %12428 = vst [vmem:[#allocation72_spill] sm:$0xff] %v9405_v41  ;;  %v3956_v50 = vmax.f32 %v12431_v6, %v3796_v21  ;;  %v12435_v18 = vmax.f32 %v12434_v37, 0.0  ;;  %v12437_v46 = vmax.f32 %v12436_v60, 0.0  ;;  %v4115_v21 = vld [vmem:[%s11615_s3 + $0x408] sm:$0xff]  ;;  %v2092_v22 = vadd.f32 %v9182_v7, %v12424_v56  ;;  %v9438_v6 = vpop.f32.mrb[204].mxu0 }
 0x2ac   : > { %v3795_v13 = vmax.f32 %v12433_v15, %v3475_v32  ;;  %v4612_v30 = vld [vmem:[%s11615_s3 + $0x908] sm:$0xff]  ;;  %v4117_v32 = vld [vmem:[%s11615_s3 + $0x418] sm:$0xff]  ;;  %v9453_v52 = vpop.f32.mrb[205].mxu0 }
 0x2ad   : > { %v3797_v31 = vmax.f32 %v12435_v18, %v3477_v62  ;;  %v3814_v23 = vmax.f32 %v12437_v46, %v3494_v19  ;;  %v3496_v62 = vmax.f32 %v2090_v42, 0.0  ;;  %v1899_v19 = vadd.f32 %v9176_v1, %v12424_v56  ;;  %v12439_v15 = vld [vmem:[#allocation52_spill] sm:$0xff]  ;;  %v12440_v18 = vld [vmem:[#allocation43_spill] sm:$0xff]  ;;  %v12441_v42 = vld [vmem:[#allocation6_spill] sm:$0xff]  ;;  %v9455_v56 = vpop.f32.mrb[204].mxu1  ;;  %v9463_v3 = vpop.f32.mrb[206].mxu0 }
 0x2ae   : > { %v4276_v33 = vmul.f32 %v4116_v35, %v3956_v50  ;;  %v3955_v37 = vmax.f32 %v12439_v15, %v3795_v13  ;;  %v4134_v46 = vld [vmem:[%s11615_s3 + $0x4a0] sm:$0xff]  ;;  %v9451_v7 = vadd.f32 %v9215_v24, %v12441_v42  ;;  %v4614_v35 = vld [vmem:[%s11615_s3 + $0x918] sm:$0xff]  ;;  %v12443_v15 = vld [vmem:[#allocation74_spill] sm:$0xff]  ;;  %v3497_v25 = vmax.f32 %v2092_v22, 0.0  ;;  %v9465_v17 = vpop.f32.mrb[205].mxu1  ;;  %v9470_v45 = vpop.f32.mrb[207].mxu0 }
 0x2af   : > { %v3957_v60 = vmax.f32 %v12440_v18, %v3797_v31  ;;  %v4631_v1 = vld [vmem:[%s11615_s3 + $0x9a0] sm:$0xff]  ;;  %v12444_v18 = vmax.f32 %v12443_v15, 0.0  ;;  %v3495_v11 = vmax.f32 %v1899_v19, 0.0  ;;  %v4773_v24 = vmul.f32 %v4613_v4, %v3956_v50  ;;  %v12445_v19 = vld [vmem:[#allocation39_spill] sm:$0xff] }
 0x2b0   : > { %v12442_v13 = vld [vmem:[#allocation44_spill] sm:$0xff]  ;;  %v4275_v14 = vmul.f32 %v4115_v21, %v3955_v37  ;;  %v4772_v54 = vmul.f32 %v4612_v30, %v3955_v37  ;;  %v12446_v15 = vld [vmem:[#allocation63_spill] sm:$0xff] }
 0x2b1   : > { %v3974_v31 = vmax.f32 %v12442_v13, %v3814_v23  ;;  %v3816_v41 = vmax.f32 %v12444_v18, %v3496_v62  ;;  %v4277_v58 = vmul.f32 %v4117_v32, %v3957_v60  ;;  %v9472_v23 = vpop.f32.mrb[206].mxu1  ;;  %v12447_v18 = vmax.f32 %v12446_v15, 0.0  ;;  %v4633_v30 = vld [vmem:[%s11615_s3 + $0x9b0] sm:$0xff] }
 0x2b2   : > { %v9477_v27 = vpop.f32.mrb[207].mxu1  ;;  %v4447_v50 = vadd.f32 %v4446_v39, %v4275_v14  ;;  %v4943_v4 = vadd.f32 %v4942_v63, %v4772_v54  ;;  %v4774_v21 = vmul.f32 %v4614_v35, %v3957_v60  ;;  %v3817_v32 = vmax.f32 %v3337_v29, %v3497_v25  ;;  %v5519_v37 = vld [vmem:[%s11613_s1 + $0x70] sm:$0xff]   ;;  %v4135_v54 = vld [vmem:[%s11615_s3 + $0x4a8] sm:$0xff]  ;;  %v12451_v35 = vld [vmem:[#allocation80_spill] sm:$0xff] }
 0x2b3   : > { %v4294_v13 = vmul.f32 %v4134_v46, %v3974_v31  ;;  %v4791_v62 = vmul.f32 %v4631_v1, %v3974_v31  ;;  %v3976_v22 = vmax.f32 %v12445_v19, %v3816_v41  ;;  %v3815_v38 = vmax.f32 %v12447_v18, %v3495_v11  ;;  %5305 = vmatmul.mubr.msk.bf16.gmra.mrb[56].mxu0 %vm887_vm0, %v5519_v37  ;;  %v12448_v41 = vld [vmem:[#allocation77_spill] sm:$0xff]  ;;  %v12449_v1 = vld [vmem:[#allocation42_spill] sm:$0xff]  ;;  %v12450_v29 = vld [vmem:[#allocation55_spill] sm:$0xff]  ;;  %v9517_v18 = vpop.f32.mrb[208].mxu0 }
 0x2b4   : > { %v4632_v14 = vld [vmem:[%s11615_s3 + $0x9a8] sm:$0xff]  ;;  %5321 = vmatmul.mubr.msk.bf16.gmra.mrb[56].mxu1 %vm887_vm0, %v5519_v37  ;;  %v4448_v39 = vadd.f32 %v4447_v50, %v4276_v33  ;;  %v4944_v63 = vadd.f32 %v4943_v4, %v4773_v24  ;;  %2662 = vmatprep.mubr.bf16.mxu0 %v11883_v20  ;;  %v9507_v15 = vadd.f32 %v9227_v59, %v12441_v42  ;;  %v12452_v33 = vld [vmem:[#allocation7_spill] sm:$0xff]  ;;  %v9524_v59 = vpop.f32.mrb[208].mxu1 }
 0x2b5   : > { %v4468_v46 = vadd.f32 %v12448_v41, %v4294_v13  ;;  %v4964_v11 = vadd.f32 %v12449_v1, %v4791_v62  ;;  %v4296_v31 = vmul.f32 %v4136_v53, %v3976_v22  ;;  %v3975_v60 = vmax.f32 %v12450_v29, %v3815_v38  ;;  %v4137_v53 = vld [vmem:[%s11615_s3 + $0x4b8] sm:$0xff]  ;;  %2855 = vmatprep.mubr.bf16.mxu1 %v11883_v20  ;;  %v9533_v1 = vpop.f32.mrb[209].mxu1 }
 0x2b6   : > { %v3977_v13 = vmax.f32 %v12451_v35, %v3817_v32  ;;  %v4634_v62 = vld [vmem:[%s11615_s3 + $0x9b8] sm:$0xff]  ;;  %v4793_v19 = vmul.f32 %v4633_v30, %v3976_v22  ;;  %v9511_v38 = vadd.f32 %v9238_v48, %v12452_v33  ;;  %v9515_v24 = vadd.f32 %v9229_v47, %v12441_v42  ;;  %v9526_v32 = vpop.f32.mrb[209].mxu0 }
 0x2b7   : > { %v9520_v50 = vadd.f32 %v4448_v39, %v4277_v58  ;;  %v9522_v4 = vadd.f32 %v4944_v63, %v4774_v21  ;;  %v4295_v22 = vmul.f32 %v4135_v54, %v3975_v60  ;;  %v4792_v30 = vmul.f32 %v4632_v14, %v3975_v60  ;;  %v9535_v20 = vpop.f32.mrb[210].mxu0  ;;  %v9539_v39 = vpop.f32.mrb[210].mxu1 }
 0x2b8   : > { %v4297_v48 = vmul.f32 %v4137_v53, %v3977_v13  ;;  %v4794_v37 = vmul.f32 %v4634_v62, %v3977_v13  ;;  %v9531_v47 = vadd.f32 %v9248_v44, %v12452_v33  ;;  %v9541_v63 = vpop.f32.mrb[211].mxu0  ;;  %v9545_v29 = vadd.f32 %v9240_v5, %v12441_v42  ;;  %v9559_v35 = vpop.f32.mrb[211].mxu1  ;;  %v12456_v62 = vld [vmem:[#allocation17_spill] sm:$0xff] }
 0x2b9   : > { %12453 = vst [vmem:[#allocation73_spill] sm:$0xff] %v9520_v50  ;;  %12454 = vst [vmem:[#allocation49_spill] sm:$0xff] %v9522_v4  ;;  %v4469_v58 = vadd.f32 %v4468_v46, %v4295_v22  ;;  %v4965_v21 = vadd.f32 %v4964_v11, %v4792_v30  ;;  %v9549_v44 = vadd.f32 %v9250_v10, %v12452_v33  ;;  %v12455_v11 = vld [vmem:[#allocation13_spill] sm:$0xff] }
 0x2ba   : > { %v9553_v46 = vadd.f32 %v9253_v2, %v12452_v33  ;;  %v9557_v60 = vadd.f32 %v9291_v36, %v12455_v11  ;;  %v9563_v5 = vadd.f32 %v9308_v55, %v12455_v11  ;;  %v9567_v10 = vadd.f32 %v9313_v28, %v12456_v62  ;;  %v5520_v2 = vld [vmem:[%s11613_s1 + $0x78] sm:$0xff]  }
 0x2bb   : > { %v4470_v13 = vadd.f32 %v4469_v58, %v4296_v31  ;;  %v4966_v53 = vadd.f32 %v4965_v21, %v4793_v19  ;;  %5306 = vmatmul.mubr.msk.bf16.gmra.mrb[60].mxu0 %vm887_vm0, %v5520_v2  ;;  %v9586_v21 = vadd.f32 %v9310_v57, %v12455_v11  ;;  %v9590_v36 = vadd.f32 %v9317_v51, %v12456_v62  ;;  %v12468_v33 = vld [vmem:[#allocation8_spill] sm:$0xff] }
 0x2bc   : > { %5322 = vmatmul.mubr.msk.bf16.gmra.mrb[60].mxu1 %vm887_vm0, %v5520_v2  ;;  %v9594_v19 = vadd.f32 %v9315_v61, %v12455_v11  ;;  %v9605_v57 = vadd.f32 %v9328_v49, %v12456_v62  ;;  %v9615_v2 = vpop.f32.mrb[212].mxu1  ;;  %v12460_v49 = vld [vmem:[#allocation25_spill] sm:$0xff] }
 0x2bd   : > { %v9578_v55 = vadd.f32 %v4470_v13, %v4297_v48  ;;  %v9580_v28 = vadd.f32 %v4966_v53, %v4794_v37  ;;  %v9598_v48 = vadd.f32 %v9319_v16, %v12456_v62  ;;  %v9600_v37 = vpop.f32.mrb[212].mxu0  ;;  %v12459_v53 = vld [vmem:[#allocation21_spill] sm:$0xff]  ;;  %v9624_v31 = vadd.f32 %v9379_v43, %v12460_v49 }
 0x2be   : > { %v9609_v51 = vadd.f32 %v9360_v40, %v12459_v53  ;;  %v9613_v61 = vadd.f32 %v9373_v34, %v12459_v53  ;;  %v9617_v16 = vpop.f32.mrb[213].mxu0  ;;  %v9626_v40 = vpop.f32.mrb[213].mxu1  ;;  %v9640_v43 = vadd.f32 %v9375_v9, %v12459_v53  ;;  %v9644_v30 = vadd.f32 %v9391_v8, %v12460_v49  ;;  %v12461_v9 = vld [vmem:[#allocation29_spill] sm:$0xff] }
 0x2bf   : > { %12457 = vst [vmem:[#allocation48_spill] sm:$0xff] %v9578_v55  ;;  %12458 = vst [vmem:[#allocation50_spill] sm:$0xff] %v9580_v28  ;;  %v9628_v54 = vpop.f32.mrb[214].mxu0  ;;  %v9634_v14 = vpop.f32.mrb[214].mxu1  ;;  %v9648_v34 = vadd.f32 %v9381_v12, %v12459_v53  ;;  %v9652_v41 = vadd.f32 %v9393_v0, %v12460_v49  ;;  %v9658_v22 = vadd.f32 %v9395_v26, %v12460_v49  ;;  %v12463_v12 = vld [vmem:[#allocation33_spill] sm:$0xff] }
 0x2c0   : > { %v9636_v13 = vpop.f32.mrb[215].mxu0  ;;  %v9654_v58 = vpop.f32.mrb[215].mxu1  ;;  %v9662_v25 = vadd.f32 %v9438_v6, %v12461_v9  ;;  %v9666_v8 = vadd.f32 %v9453_v52, %v12461_v9  ;;  %v9670_v53 = vadd.f32 %v9463_v3, %v12463_v12  ;;  %v9682_v3 = vadd.f32 %v9455_v56, %v12461_v9 }
 0x2c1   : > { %v9686_v0 = vadd.f32 %v9470_v45, %v12463_v12  ;;  %v9690_v11 = vadd.f32 %v9465_v17, %v12461_v9  ;;  %v9694_v49 = vadd.f32 %v9472_v23, %v12463_v12  ;;  %v9696_v6 = vpop.f32.mrb[216].mxu0  ;;  %v2169_v56 = vadd.f32 %v9517_v18, %v12468_v33  ;;  %v2381_v62 = vpop.f32.mrb[216].mxu1  ;;  %v12470_v9 = vld [vmem:[#allocation10_spill] sm:$0xff] }
 0x2c2   : > { %12462 = vst [vmem:[#allocation38_spill] sm:$0xff] %v9666_v8  ;;  %12464 = vst [vmem:[#allocation66_spill] sm:$0xff] %v9670_v53  ;;  %v2362_v26 = vadd.f32 %v9524_v59, %v12468_v33  ;;  %v2171_v45 = vadd.f32 %v9526_v32, %v12468_v33  ;;  %v2190_v17 = vpop.f32.mrb[217].mxu0  ;;  %v9710_v52 = vadd.f32 %v9477_v27, %v12463_v12  ;;  %v9712_v55 = vpop.f32.mrb[217].mxu1  ;;  %v12471_v59 = vmax.f32 %v9451_v7, 0.0  ;;  %v12474_v8 = vld [vmem:[#allocation16_spill] sm:$0xff] }
 0x2c3   : > { %12465 = vst [vmem:[#allocation81_spill] sm:$0xff] %v9686_v0  ;;  %12466 = vst [vmem:[#allocation67_spill] sm:$0xff] %v9690_v11  ;;  %v9714_v18 = vpop.f32.mrb[218].mxu0  ;;  %v3038_v42 = vmax.f32 %v2169_v56, 0.0  ;;  %v2385_v50 = vpop.f32.mrb[218].mxu1  ;;  %v2364_v23 = vadd.f32 %v9533_v1, %v12468_v33  ;;  %v2173_v28 = vadd.f32 %v9535_v20, %v12470_v9  ;;  %v2366_v27 = vadd.f32 %v9539_v39, %v12470_v9 }
 0x2c4   : > { %12467 = vst [vmem:[#allocation64_spill] sm:$0xff] %v9694_v49  ;;  %12469 = vst [vmem:[#allocation60_spill] sm:$0xff] %v9710_v52  ;;  %v3040_v32 = vmax.f32 %v2362_v26, 0.0  ;;  %v3039_v4 = vmax.f32 %v2171_v45, 0.0  ;;  %v2194_v53 = vpop.f32.mrb[219].mxu0  ;;  %v2175_v12 = vadd.f32 %v9541_v63, %v12470_v9  ;;  %v2387_v0 = vpop.f32.mrb[219].mxu1  ;;  %v2368_v20 = vadd.f32 %v9559_v35, %v12470_v9 }
 0x2c5   : > { %v9727_v56 = vmax.f32 %v12471_v59, %v3038_v42  ;;  %v12472_v26 = vmax.f32 %v9515_v24, 0.0  ;;  %v12473_v1 = vmax.f32 %v9507_v15, 0.0  ;;  %v3041_v39 = vmax.f32 %v2364_v23, 0.0 }
 0x2c6   : > { %v3058_v49 = vmax.f32 %v2173_v28, 0.0  ;;  %v3060_v11 = vmax.f32 %v2366_v27, 0.0  ;;  %v3059_v63 = vmax.f32 %v2175_v12, 0.0  ;;  %v3061_v52 = vmax.f32 %v2368_v20, 0.0 }
 0x2c7   : > { %v9731_v45 = vmax.f32 %v12472_v26, %v3040_v32  ;;  %v9735_v33 = vmax.f32 %v12473_v1, %v3039_v4  ;;  %v2179_v42 = vadd.f32 %v9600_v37, %v12474_v8  ;;  %v2372_v7 = vadd.f32 %v9615_v2, %v12474_v8  ;;  %v2198_v2 = vpop.f32.mrb[220].mxu0  ;;  %v2391_v1 = vpop.f32.mrb[220].mxu1 }
 0x2c8   : > { %v2181_v24 = vadd.f32 %v9617_v16, %v12474_v8  ;;  %v12475_v15 = vmax.f32 %v9545_v29, 0.0  ;;  %v12476_v35 = vmax.f32 %v9511_v38, 0.0  ;;  %v12477_v28 = vmax.f32 %v9549_v44, 0.0  ;;  %v2200_v38 = vpop.f32.mrb[221].mxu0  ;;  %v12480_v44 = vld [vmem:[#allocation20_spill] sm:$0xff] }
 0x2c9   : > { %v12478_v37 = vmax.f32 %v9531_v47, 0.0  ;;  %v12479_v32 = vmax.f32 %v9553_v46, 0.0  ;;  %v3078_v29 = vmax.f32 %v2179_v42, 0.0  ;;  %v3080_v27 = vmax.f32 %v2372_v7, 0.0  ;;  %v2393_v46 = vpop.f32.mrb[221].mxu1 }
 0x2ca   : > { %v9747_v4 = vmax.f32 %v12475_v15, %v3041_v39  ;;  %v9751_v23 = vmax.f32 %v12476_v35, %v3058_v49  ;;  %v9755_v12 = vmax.f32 %v12477_v28, %v3060_v11  ;;  %v3079_v26 = vmax.f32 %v2181_v24, 0.0 }
 0x2cb   : > { %v9759_v59 = vmax.f32 %v12478_v37, %v3059_v63  ;;  %v9763_v16 = vmax.f32 %v12479_v32, %v3061_v52  ;;  %v2374_v49 = vadd.f32 %v9626_v40, %v12474_v8  ;;  %v2183_v11 = vadd.f32 %v9628_v54, %v12480_v44  ;;  %v2202_v52 = vpop.f32.mrb[222].mxu0 }
 0x2cc   : > { %v2376_v47 = vadd.f32 %v9634_v14, %v12480_v44  ;;  %v2185_v20 = vadd.f32 %v9636_v13, %v12480_v44  ;;  %v12481_v39 = vmax.f32 %v9557_v60, 0.0  ;;  %v12482_v42 = vmax.f32 %v9586_v21, 0.0  ;;  %v2395_v14 = vpop.f32.mrb[222].mxu1  ;;  %v2204_v15 = vpop.f32.mrb[223].mxu0 }
 0x2cd   : > { %v12483_v40 = vmax.f32 %v9563_v5, 0.0  ;;  %v2378_v54 = vadd.f32 %v9654_v58, %v12480_v44  ;;  %v3081_v13 = vmax.f32 %v2374_v49, 0.0  ;;  %v3098_v35 = vmax.f32 %v2183_v11, 0.0  ;;  %v2397_v60 = vpop.f32.mrb[223].mxu1 }
 0x2ce   : > { %v9775_v63 = vmax.f32 %v12481_v39, %v3078_v29  ;;  %v9779_v7 = vmax.f32 %v12482_v42, %v3080_v27  ;;  %v3100_v28 = vmax.f32 %v2376_v47, 0.0  ;;  %v3099_v37 = vmax.f32 %v2185_v20, 0.0  ;;  %v12484_v29 = vld [vmem:[#allocation24_spill] sm:$0xff] }
 0x2cf   : > { %v9783_v24 = vmax.f32 %v12483_v40, %v3079_v26  ;;  %v3101_v32 = vmax.f32 %v2378_v54, 0.0  ;;  %v2189_v21 = vadd.f32 %v9696_v6, %v12484_v29  ;;  %v2382_v27 = vadd.f32 %v2381_v62, %v12484_v29  ;;  %v12490_v54 = vld [vmem:[#allocation28_spill] sm:$0xff] }
 0x2d0   : > { %v2191_v5 = vadd.f32 %v2190_v17, %v12484_v29  ;;  %v12485_v26 = vmax.f32 %v9594_v19, 0.0  ;;  %v12486_v58 = vmax.f32 %v9567_v10, 0.0  ;;  %v12487_v49 = vmax.f32 %v9598_v48, 0.0 }
 0x2d1   : > { %v12488_v47 = vmax.f32 %v9590_v36, 0.0  ;;  %v12489_v62 = vmax.f32 %v9605_v57, 0.0  ;;  %v3118_v17 = vmax.f32 %v2189_v21, 0.0  ;;  %v3120_v19 = vmax.f32 %v2382_v27, 0.0  ;;  %v2208_v36 = vpop.f32.mrb[224].mxu0 }
 0x2d2   : > { %v9793_v39 = vmax.f32 %v12485_v26, %v3081_v13  ;;  %v9797_v42 = vmax.f32 %v12486_v58, %v3098_v35  ;;  %v9801_v11 = vmax.f32 %v12487_v49, %v3100_v28  ;;  %v3119_v40 = vmax.f32 %v2191_v5, 0.0  ;;  %v2401_v5 = vpop.f32.mrb[224].mxu1 }
 0x2d3   : > { %v9805_v20 = vmax.f32 %v12488_v47, %v3099_v37  ;;  %v9809_v6 = vmax.f32 %v12489_v62, %v3101_v32  ;;  %v2384_v10 = vadd.f32 %v9712_v55, %v12484_v29  ;;  %v2193_v13 = vadd.f32 %v9714_v18, %v12490_v54  ;;  %v2210_v18 = vpop.f32.mrb[225].mxu0  ;;  %v12495_v62 = vld [vmem:[#allocation32_spill] sm:$0xff]  ;;  %v12528_v29 = vld [vmem:[#allocation9_spill] sm:$0xff] }
 0x2d4   : > { %v2386_v48 = vadd.f32 %v2385_v50, %v12490_v54  ;;  %v2195_v35 = vadd.f32 %v2194_v53, %v12490_v54  ;;  %v12491_v28 = vmax.f32 %v9609_v51, 0.0  ;;  %v12492_v57 = vmax.f32 %v9640_v43, 0.0  ;;  %v2212_v49 = vpop.f32.mrb[226].mxu0  ;;  %v2403_v51 = vpop.f32.mrb[225].mxu1 }
 0x2d5   : > { %v12493_v21 = vmax.f32 %v9613_v61, 0.0  ;;  %v2388_v55 = vadd.f32 %v2387_v0, %v12490_v54  ;;  %v3121_v50 = vmax.f32 %v2384_v10, 0.0  ;;  %v3138_v26 = vmax.f32 %v2193_v13, 0.0  ;;  %v2214_v61 = vpop.f32.mrb[227].mxu0 }
 0x2d6   : > { %v9819_v37 = vmax.f32 %v12491_v28, %v3118_v17  ;;  %v9823_v32 = vmax.f32 %v12492_v57, %v3120_v19  ;;  %v3140_v53 = vmax.f32 %v2386_v48, 0.0  ;;  %v3139_v58 = vmax.f32 %v2195_v35, 0.0 }
 0x2d7   : > { %v9827_v27 = vmax.f32 %v12493_v21, %v3119_v40  ;;  %v3141_v47 = vmax.f32 %v2388_v55, 0.0  ;;  %v2199_v17 = vadd.f32 %v2198_v2, %v12495_v62  ;;  %v2392_v43 = vadd.f32 %v2391_v1, %v12495_v62  ;;  %v2405_v40 = vpop.f32.mrb[226].mxu1 }
 0x2d8   : > { %v2201_v19 = vadd.f32 %v2200_v38, %v12495_v62  ;;  %v12496_v28 = vmax.f32 %v9648_v34, 0.0  ;;  %v12498_v10 = vmax.f32 %v9624_v31, 0.0  ;;  %v12500_v48 = vmax.f32 %v9652_v41, 0.0  ;;  %v2407_v1 = vpop.f32.mrb[227].mxu1 }
 0x2d9   : > { %12494 = vst [vmem:[#allocation36_spill] sm:$0xff] %v9827_v27  ;;  %v12502_v2 = vmax.f32 %v9644_v30, 0.0  ;;  %v12504_v38 = vmax.f32 %v9658_v22, 0.0  ;;  %v3158_v34 = vmax.f32 %v2199_v17, 0.0  ;;  %v3160_v55 = vmax.f32 %v2392_v43, 0.0 }
 0x2da   : > { %v9835_v0 = vmax.f32 %v12496_v28, %v3121_v50  ;;  %v9839_v13 = vmax.f32 %v12498_v10, %v3138_v26  ;;  %v9843_v35 = vmax.f32 %v12500_v48, %v3140_v53  ;;  %v3159_v50 = vmax.f32 %v2201_v19, 0.0  ;;  %v12506_v26 = vld [vmem:[#allocation41_spill] sm:$0xff] }
 0x2db   : > { %v9847_v57 = vmax.f32 %v12502_v2, %v3139_v58  ;;  %v9851_v21 = vmax.f32 %v12504_v38, %v3141_v47  ;;  %v2394_v31 = vadd.f32 %v2393_v46, %v12495_v62  ;;  %v2203_v28 = vadd.f32 %v2202_v52, %v12506_v26  ;;  %v12511_v47 = vld [vmem:[#allocation38_spill] sm:$0xff]  ;;  %v2218_v2 = vpop.f32.mrb[228].mxu0  ;;  %v12515_v62 = vld [vmem:[#allocation67_spill] sm:$0xff] }
 0x2dc   : > { %12497 = vst [vmem:[#allocation54_spill] sm:$0xff] %v9835_v0  ;;  %12499 = vst [vmem:[#allocation61_spill] sm:$0xff] %v9839_v13  ;;  %v2396_v41 = vadd.f32 %v2395_v14, %v12506_v26  ;;  %v2205_v53 = vadd.f32 %v2204_v15, %v12506_v26  ;;  %v12507_v30 = vmax.f32 %v9662_v25, 0.0  ;;  %v12509_v10 = vmax.f32 %v9682_v3, 0.0  ;;  %v12514_v15 = vld [vmem:[#allocation60_spill] sm:$0xff] }
 0x2dd   : > { %12501 = vst [vmem:[#allocation5_spill] sm:$0xff] %v9843_v35  ;;  %12503 = vst [vmem:[#allocation35_spill] sm:$0xff] %v9847_v57  ;;  %v12512_v17 = vmax.f32 %v12511_v47, 0.0  ;;  %v2398_v46 = vadd.f32 %v2397_v60, %v12506_v26  ;;  %v3161_v19 = vmax.f32 %v2394_v31, 0.0  ;;  %v3178_v52 = vmax.f32 %v2203_v28, 0.0  ;;  %v12524_v28 = vld [vmem:[#allocation81_spill] sm:$0xff] }
 0x2de   : > { %12505 = vst [vmem:[#allocation59_spill] sm:$0xff] %v9851_v21  ;;  %v9859_v58 = vmax.f32 %v12507_v30, %v3158_v34  ;;  %v9863_v22 = vmax.f32 %v12509_v10, %v3160_v55  ;;  %v3180_v48 = vmax.f32 %v2396_v41, 0.0  ;;  %v3179_v14 = vmax.f32 %v2205_v53, 0.0  ;;  %v2220_v34 = vpop.f32.mrb[229].mxu0  ;;  %v2411_v30 = vpop.f32.mrb[228].mxu1  ;;  %v12518_v10 = vld [vmem:[#allocation66_spill] sm:$0xff] }
 0x2df   : > { %v9867_v43 = vmax.f32 %v12512_v17, %v3159_v50  ;;  %v3021_v38 = vmax.f32 %v12514_v15, 0.0  ;;  %v3181_v25 = vmax.f32 %v2398_v46, 0.0  ;;  %v12516_v3 = vmax.f32 %v12515_v62, 0.0  ;;  %v12521_v17 = vld [vmem:[#allocation64_spill] sm:$0xff]  ;;  %v2222_v15 = vpop.f32.mrb[230].mxu0  ;;  %v2413_v46 = vpop.f32.mrb[229].mxu1 }
 0x2e0   : > { %12508 = vst [vmem:[#allocation46_spill] sm:$0xff] %v9859_v58  ;;  %12510 = vst [vmem:[#allocation76_spill] sm:$0xff] %v9863_v22  ;;  %v12519_v47 = vmax.f32 %v12518_v10, 0.0  ;;  %v12522_v60 = vmax.f32 %v12521_v17, 0.0  ;;  %v12525_v41 = vmax.f32 %v12524_v28, 0.0  ;;  %v2224_v54 = vpop.f32.mrb[231].mxu0  ;;  %v9890_v10 = vadd.f32 %v2208_v36, %v12528_v29 }
 0x2e1   : > { %12513 = vst [vmem:[#allocation65_spill] sm:$0xff] %v9867_v43  ;;  %v9873_v55 = vmax.f32 %v12516_v3, %v3161_v19  ;;  %v9887_v26 = vmax.f32 %v3021_v38, %v3181_v25  ;;  %v2415_v62 = vpop.f32.mrb[230].mxu1  ;;  %v2228_v3 = vpop.f32.mrb[232].mxu0  ;;  %v12529_v17 = vld [vmem:[#allocation12_spill] sm:$0xff]  ;;  %v9899_v38 = vadd.f32 %v2401_v5, %v12528_v29  ;;  %v12539_v58 = vld [vmem:[#allocation31_spill] sm:$0xff]  ;;  %v12542_v57 = vld [vmem:[#allocation58_spill] sm:$0xff] }
 0x2e2   : > { %v9877_v50 = vmax.f32 %v12519_v47, %v3178_v52  ;;  %v9881_v31 = vmax.f32 %v12522_v60, %v3180_v48  ;;  %v9885_v53 = vmax.f32 %v12525_v41, %v3179_v14  ;;  %v2417_v19 = vpop.f32.mrb[231].mxu1  ;;  %v2230_v52 = vpop.f32.mrb[233].mxu0  ;;  %v9893_v48 = vadd.f32 %v2210_v18, %v12528_v29 }
 0x2e3   : > { %12517 = vst [vmem:[#allocation45_spill] sm:$0xff] %v9873_v55  ;;  %12527 = vst [vmem:[#allocation52_spill] sm:$0xff] %v9887_v26  ;;  %v2421_v47 = vpop.f32.mrb[232].mxu1  ;;  %v9896_v60 = vadd.f32 %v2212_v49, %v12529_v17  ;;  %v2232_v14 = vpop.f32.mrb[234].mxu0  ;;  %v9902_v25 = vadd.f32 %v2214_v61, %v12529_v17  ;;  %v9905_v41 = vadd.f32 %v2403_v51, %v12528_v29  ;;  %v12530_v49 = vld [vmem:[#allocation15_spill] sm:$0xff] }
 0x2e4   : > { %12520 = vst [vmem:[#allocation75_spill] sm:$0xff] %v9877_v50  ;;  %12523 = vst [vmem:[#allocation57_spill] sm:$0xff] %v9881_v31  ;;  %v2423_v28 = vpop.f32.mrb[233].mxu1  ;;  %v2234_v36 = vpop.f32.mrb[235].mxu0  ;;  %v9908_v8 = vadd.f32 %v2405_v40, %v12529_v17  ;;  %v9911_v18 = vadd.f32 %v2407_v1, %v12529_v17  ;;  %v9914_v9 = vadd.f32 %v2218_v2, %v12530_v49 }
 0x2e5   : > { %12526 = vst [vmem:[#allocation40_spill] sm:$0xff] %v9885_v53  ;;  %v2425_v44 = vpop.f32.mrb[234].mxu1  ;;  %v9917_v5 = vadd.f32 %v2220_v34, %v12530_v49  ;;  %v12531_v53 = vld [vmem:[#allocation19_spill] sm:$0xff]  ;;  %v9924_v29 = vadd.f32 %v2411_v30, %v12530_v49  ;;  %v9932_v2 = vadd.f32 %v2413_v46, %v12530_v49  ;;  %v2238_v50 = vpop.f32.mrb[236].mxu0 }
 0x2e6   : > { %v2427_v26 = vpop.f32.mrb[235].mxu1  ;;  %v9921_v51 = vadd.f32 %v2222_v15, %v12531_v53  ;;  %v9929_v17 = vadd.f32 %v2224_v54, %v12531_v53  ;;  %v9938_v31 = vadd.f32 %v2415_v62, %v12531_v53  ;;  %v9947_v61 = vadd.f32 %v2417_v19, %v12531_v53  ;;  %v12532_v15 = vld [vmem:[#allocation23_spill] sm:$0xff]  ;;  %v2240_v62 = vpop.f32.mrb[237].mxu0 }
 0x2e7   : > { %v9950_v49 = vadd.f32 %v2228_v3, %v12532_v15  ;;  %v2431_v55 = vpop.f32.mrb[236].mxu1  ;;  %v9955_v1 = vadd.f32 %v2230_v52, %v12532_v15  ;;  %v12533_v54 = vld [vmem:[#allocation27_spill] sm:$0xff]  ;;  %v2242_v46 = vpop.f32.mrb[238].mxu0  ;;  %v9962_v53 = vadd.f32 %v2421_v47, %v12532_v15  ;;  %v9968_v30 = vadd.f32 %v2423_v28, %v12532_v15 }
 0x2e8   : > { %v9958_v43 = vadd.f32 %v2232_v14, %v12533_v54  ;;  %v2433_v34 = vpop.f32.mrb[237].mxu1  ;;  %v9965_v3 = vadd.f32 %v2234_v36, %v12533_v54  ;;  %v2244_v40 = vpop.f32.mrb[239].mxu0  ;;  %v9971_v52 = vadd.f32 %v2425_v44, %v12533_v54  ;;  %v9974_v14 = vadd.f32 %v2427_v26, %v12533_v54 }
 0x2e9   : > { %12536 = vst [vmem:[#allocation74_spill] sm:$0xff] %v9968_v30  ;;  %v2435_v22 = vpop.f32.mrb[238].mxu1  ;;  %v9977_v21 = vadd.f32 %v2238_v50, %v12539_v58  ;;  %v9980_v47 = vadd.f32 %v2240_v62, %v12539_v58  ;;  %v9984_v28 = vadd.f32 %v2242_v46, %v12542_v57  ;;  %v9987_v15 = vadd.f32 %v2431_v55, %v12539_v58 }
 0x2ea   : > { %12534 = vst [vmem:[#allocation43_spill] sm:$0xff] %v9958_v43  ;;  %12535 = vst [vmem:[#allocation44_spill] sm:$0xff] %v9965_v3  ;;  %v2437_v19 = vpop.f32.mrb[239].mxu1  ;;  %v9990_v44 = vadd.f32 %v2433_v34, %v12539_v58  ;;  %v9996_v62 = vadd.f32 %v2244_v40, %v12542_v57  ;;  %v10002_v55 = vadd.f32 %v2435_v22, %v12542_v57  ;;  %v12548_v3 = vld [vmem:[#allocation11_spill] sm:$0xff]  ;;  %v12556_v40 = vmax.f32 %v9908_v8, 0.0 }
 0x2eb   : > { %12537 = vst [vmem:[#allocation39_spill] sm:$0xff] %v9971_v52  ;;  %12538 = vst [vmem:[#allocation63_spill] sm:$0xff] %v9974_v14  ;;  %v10014_v34 = vadd.f32 %v2437_v19, %v12542_v57 }
 0x2ec   : > { %12540 = vst [vmem:[#allocation77_spill] sm:$0xff] %v9977_v21  ;;  %12541 = vst [vmem:[#allocation42_spill] sm:$0xff] %v9980_v47  ;;  %v2248_v58 = vpop.f32.mrb[240].mxu0  ;;  %v2441_v13 = vpop.f32.mrb[240].mxu1 }
 0x2ed   : > { %12543 = vst [vmem:[#allocation55_spill] sm:$0xff] %v9984_v28  ;;  %12544 = vst [vmem:[#allocation80_spill] sm:$0xff] %v9987_v15  ;;  %v2249_v35 = vadd.f32 %v2248_v58, %v12548_v3  ;;  %v2250_v22 = vpop.f32.mrb[241].mxu0  ;;  %v2442_v50 = vadd.f32 %v2441_v13, %v12548_v3  ;;  %v2443_v26 = vpop.f32.mrb[241].mxu1  ;;  %v12550_v28 = vld [vmem:[#allocation14_spill] sm:$0xff] }
 0x2ee   : > { %12545 = vst [vmem:[#allocation38_spill] sm:$0xff] %v9990_v44  ;;  %12546 = vst [vmem:[#allocation60_spill] sm:$0xff] %v9996_v62  ;;  %v2251_v54 = vadd.f32 %v2250_v22, %v12548_v3  ;;  %v2252_v47 = vpop.f32.mrb[242].mxu0  ;;  %v2444_v46 = vadd.f32 %v2443_v26, %v12548_v3  ;;  %v2445_v44 = vpop.f32.mrb[242].mxu1  ;;  %v12551_v22 = vmax.f32 %v9890_v10, 0.0  ;;  %v4000_v10 = vld [vmem:[%s11615_s3 + $0x70] sm:$0xff] }
 0x2ef   : > { %12547 = vst [vmem:[#allocation67_spill] sm:$0xff] %v10002_v55  ;;  %12549 = vst [vmem:[#allocation66_spill] sm:$0xff] %v10014_v34  ;;  %v3358_v36 = vmax.f32 %v2249_v35, 0.0  ;;  %v2253_v58 = vadd.f32 %v2252_v47, %v12550_v28  ;;  %v2254_v15 = vpop.f32.mrb[243].mxu0  ;;  %v3360_v21 = vmax.f32 %v2442_v50, 0.0  ;;  %v2446_v19 = vadd.f32 %v2445_v44, %v12550_v28  ;;  %v2447_v13 = vpop.f32.mrb[243].mxu1 }
 0x2f0   : > { %v3359_v0 = vmax.f32 %v2251_v54, 0.0  ;;  %v2255_v57 = vadd.f32 %v2254_v15, %v12550_v28  ;;  %v3361_v34 = vmax.f32 %v2444_v46, 0.0  ;;  %v2448_v35 = vadd.f32 %v2447_v13, %v12550_v28  ;;  %v3998_v47 = vld [vmem:[%s11615_s3 + $0x60] sm:$0xff]  ;;  %v4497_v13 = vld [vmem:[%s11615_s3 + $0x570] sm:$0xff] }
 0x2f1   : > { %v3678_v62 = vmax.f32 %v12551_v22, %v3358_v36  ;;  %v3378_v14 = vmax.f32 %v2253_v58, 0.0  ;;  %v4495_v54 = vld [vmem:[%s11615_s3 + $0x560] sm:$0xff]  ;;  %v12552_v44 = vmax.f32 %v9899_v38, 0.0  ;;  %v12553_v15 = vmax.f32 %v9893_v48, 0.0  ;;  %v3999_v38 = vld [vmem:[%s11615_s3 + $0x68] sm:$0xff]  ;;  %v4020_v28 = vld [vmem:[%s11615_s3 + $0x110] sm:$0xff] }
 0x2f2   : > { %v3380_v50 = vmax.f32 %v2446_v19, 0.0  ;;  %v3379_v46 = vmax.f32 %v2255_v57, 0.0  ;;  %v12554_v22 = vmax.f32 %v9905_v41, 0.0  ;;  %v3381_v19 = vmax.f32 %v2448_v35, 0.0  ;;  %v4517_v3 = vld [vmem:[%s11615_s3 + $0x610] sm:$0xff] }
 0x2f3   : > { %v3680_v26 = vmax.f32 %v12552_v44, %v3360_v21  ;;  %v3679_v36 = vmax.f32 %v12553_v15, %v3359_v0  ;;  %v3838_v58 = vmax.f32 %v9727_v56, %v3678_v62  ;;  %v4496_v21 = vld [vmem:[%s11615_s3 + $0x568] sm:$0xff]  ;;  %v12555_v0 = vmax.f32 %v9896_v60, 0.0  ;;  %v4001_v44 = vld [vmem:[%s11615_s3 + $0x78] sm:$0xff] }
 0x2f4   : > { %v3681_v48 = vmax.f32 %v12554_v22, %v3361_v34  ;;  %v4498_v15 = vld [vmem:[%s11615_s3 + $0x578] sm:$0xff]  ;;  %v3700_v41 = vmax.f32 %v12556_v40, %v3380_v50  ;;  %v12557_v34 = vmax.f32 %v9902_v25, 0.0 }
 0x2f5   : > { %v3698_v57 = vmax.f32 %v12555_v0, %v3378_v14  ;;  %v3840_v56 = vmax.f32 %v9731_v45, %v3680_v26  ;;  %v3839_v62 = vmax.f32 %v9735_v33, %v3679_v36  ;;  %v4158_v35 = vmul.f32 %v3998_v47, %v3838_v58  ;;  %v4018_v26 = vld [vmem:[%s11615_s3 + $0x100] sm:$0xff] }
 0x2f6   : > { %v3699_v60 = vmax.f32 %v12557_v34, %v3379_v46  ;;  %v2258_v14 = vpop.f32.mrb[244].mxu0  ;;  %v4655_v22 = vmul.f32 %v4495_v54, %v3838_v58  ;;  %v3841_v45 = vmax.f32 %v9747_v4, %v3681_v48  ;;  %v4515_v36 = vld [vmem:[%s11615_s3 + $0x600] sm:$0xff]  ;;  %v12558_v58 = vld [vmem:[#allocation47_spill] sm:$0xff]  ;;  %v12559_v48 = vld [vmem:[#allocation78_spill] sm:$0xff] }
 0x2f7   : > { %v3858_v33 = vmax.f32 %v9751_v23, %v3698_v57  ;;  %v2451_v8 = vpop.f32.mrb[244].mxu1  ;;  %v2260_v40 = vpop.f32.mrb[245].mxu0  ;;  %v4160_v50 = vmul.f32 %v4000_v10, %v3840_v56  ;;  %v4657_v25 = vmul.f32 %v4497_v13, %v3840_v56  ;;  %v4159_v46 = vmul.f32 %v3999_v38, %v3839_v62 }
 0x2f8   : > { %v4656_v0 = vmul.f32 %v4496_v21, %v3839_v62  ;;  %v2453_v47 = vpop.f32.mrb[245].mxu1  ;;  %v2262_v54 = vpop.f32.mrb[246].mxu0  ;;  %v4317_v4 = vadd.f32 %v12558_v58, %v4158_v35  ;;  %v4814_v23 = vadd.f32 %v12559_v48, %v4655_v22  ;;  %v4161_v57 = vmul.f32 %v4001_v44, %v3841_v45  ;;  %v4019_v44 = vld [vmem:[%s11615_s3 + $0x108] sm:$0xff] }
 0x2f9   : > { %v4658_v34 = vmul.f32 %v4498_v15, %v3841_v45  ;;  %v2455_v10 = vpop.f32.mrb[246].mxu1  ;;  %v10081_v13 = vpop.f32.mrb[247].mxu0  ;;  %v4178_v38 = vmul.f32 %v4018_v26, %v3858_v33  ;;  %v4675_v21 = vmul.f32 %v4515_v36, %v3858_v33  ;;  %v3860_v56 = vmax.f32 %v9755_v12, %v3700_v41  ;;  %v4516_v15 = vld [vmem:[%s11615_s3 + $0x608] sm:$0xff]  ;;  %v12562_v12 = vld [vmem:[#allocation79_spill] sm:$0xff] }
 0x2fa   : > { %v3859_v62 = vmax.f32 %v9759_v59, %v3699_v60  ;;  %v10091_v35 = vpop.f32.mrb[247].mxu1  ;;  %v4318_v22 = vadd.f32 %v4317_v4, %v4159_v46  ;;  %v4815_v45 = vadd.f32 %v4814_v23, %v4656_v0  ;;  %v12560_v58 = vmax.f32 %v9911_v18, 0.0  ;;  %v12561_v33 = vld [vmem:[#allocation18_spill] sm:$0xff]  ;;  %v12563_v59 = vld [vmem:[#allocation53_spill] sm:$0xff]  ;;  %v4021_v46 = vld [vmem:[%s11615_s3 + $0x118] sm:$0xff] }
 0x2fb   : > { %v2259_v36 = vadd.f32 %v2258_v14, %v12561_v33  ;;  %v4340_v41 = vadd.f32 %v12562_v12, %v4178_v38  ;;  %v4836_v60 = vadd.f32 %v12563_v59, %v4675_v21  ;;  %v4180_v48 = vmul.f32 %v4020_v28, %v3860_v56  ;;  %v4518_v18 = vld [vmem:[%s11615_s3 + $0x618] sm:$0xff] }
 0x2fc   : > { %v3701_v26 = vmax.f32 %v12560_v58, %v3381_v19  ;;  %v4677_v55 = vmul.f32 %v4517_v3, %v3860_v56  ;;  %v4319_v52 = vadd.f32 %v4318_v22, %v4160_v50  ;;  %v4816_v27 = vadd.f32 %v4815_v45, %v4657_v25 }
 0x2fd   : > { %v4179_v43 = vmul.f32 %v4019_v44, %v3859_v62  ;;  %v4676_v30 = vmul.f32 %v4516_v15, %v3859_v62  ;;  %v3398_v14 = vmax.f32 %v2259_v36, 0.0  ;;  %v2452_v0 = vadd.f32 %v2451_v8, %v12561_v33 }
 0x2fe   : > { %v3861_v19 = vmax.f32 %v9763_v16, %v3701_v26  ;;  %v2261_v28 = vadd.f32 %v2260_v40, %v12561_v33  ;;  %v10107_v50 = vadd.f32 %v4319_v52, %v4161_v57  ;;  %v10109_v25 = vadd.f32 %v4816_v27, %v4658_v34  ;;  %v4038_v27 = vld [vmem:[%s11615_s3 + $0x1a0] sm:$0xff]  ;;  %v12568_v26 = vld [vmem:[#allocation22_spill] sm:$0xff] }
 0x2ff   : > { %v4341_v4 = vadd.f32 %v4340_v41, %v4179_v43  ;;  %v4837_v23 = vadd.f32 %v4836_v60, %v4676_v30  ;;  %v12566_v16 = vmax.f32 %v9914_v9, 0.0  ;;  %v3400_v15 = vmax.f32 %v2452_v0, 0.0  ;;  %v4535_v43 = vld [vmem:[%s11615_s3 + $0x6a0] sm:$0xff] }
 0x300   : > { %12564 = vst [vmem:[#allocation64_spill] sm:$0xff] %v10107_v50  ;;  %12565 = vst [vmem:[#allocation81_spill] sm:$0xff] %v10109_v25  ;;  %v4181_v56 = vmul.f32 %v4021_v46, %v3861_v19  ;;  %v4678_v62 = vmul.f32 %v4518_v18, %v3861_v19  ;;  %v3399_v30 = vmax.f32 %v2261_v28, 0.0  ;;  %v2454_v34 = vadd.f32 %v2453_v47, %v12561_v33  ;;  %v4040_v47 = vld [vmem:[%s11615_s3 + $0x1b0] sm:$0xff]  ;;  %v4039_v19 = vld [vmem:[%s11615_s3 + $0x1a8] sm:$0xff] }
 0x301   : > { %v2268_v3 = vpop.f32.mrb[248].mxu0  ;;  %v3718_v44 = vmax.f32 %v12566_v16, %v3398_v14  ;;  %v4342_v52 = vadd.f32 %v4341_v4, %v4180_v48  ;;  %v4838_v57 = vadd.f32 %v4837_v23, %v4677_v55  ;;  %v12567_v58 = vmax.f32 %v9924_v29, 0.0  ;;  %v4536_v14 = vld [vmem:[%s11615_s3 + $0x6a8] sm:$0xff]  ;;  %v12574_v16 = vld [vmem:[#allocation68_spill] sm:$0xff]  ;;  %v4140_v50 = vld [vmem:[%s11615_s3 + $0x4d0] sm:$0xff] }
 0x302   : > { %v10111_v38 = vpop.f32.mrb[248].mxu1  ;;  %v10113_v21 = vpop.f32.mrb[249].mxu0  ;;  %v2263_v36 = vadd.f32 %v2262_v54, %v12568_v26  ;;  %v2456_v12 = vadd.f32 %v2455_v10, %v12568_v26  ;;  %v12571_v29 = vmax.f32 %v9917_v5, 0.0  ;;  %v3401_v54 = vmax.f32 %v2454_v34, 0.0 }
 0x303   : > { %v10117_v8 = vpop.f32.mrb[249].mxu1  ;;  %v10119_v40 = vpop.f32.mrb[250].mxu0  ;;  %v3878_v45 = vmax.f32 %v9775_v63, %v3718_v44  ;;  %v3720_v55 = vmax.f32 %v12567_v58, %v3400_v15  ;;  %v10139_v59 = vadd.f32 %v4342_v52, %v4181_v56  ;;  %v10141_v60 = vadd.f32 %v4838_v57, %v4678_v62  ;;  %v4537_v63 = vld [vmem:[%s11615_s3 + $0x6b0] sm:$0xff]  ;;  %v4041_v57 = vld [vmem:[%s11615_s3 + $0x1b8] sm:$0xff] }
 0x304   : > { %v10128_v9 = vpop.f32.mrb[250].mxu1  ;;  %v10130_v22 = vpop.f32.mrb[251].mxu0  ;;  %v3719_v48 = vmax.f32 %v12571_v29, %v3399_v30  ;;  %v3418_v0 = vmax.f32 %v2263_v36, 0.0  ;;  %v12572_v4 = vmax.f32 %v9932_v2, 0.0  ;;  %v3420_v23 = vmax.f32 %v2456_v12, 0.0  ;;  %v12573_v62 = vld [vmem:[#allocation51_spill] sm:$0xff] }
 0x305   : > { %v10137_v41 = vpop.f32.mrb[251].mxu1  ;;  %12569 = vst [vmem:[#allocation47_spill] sm:$0xff] %v10139_v59  ;;  %12570 = vst [vmem:[#allocation78_spill] sm:$0xff] %v10141_v60  ;;  %v4198_v46 = vmul.f32 %v4038_v27, %v3878_v45  ;;  %v4695_v10 = vmul.f32 %v4535_v43, %v3878_v45  ;;  %v3880_v18 = vmax.f32 %v9779_v7, %v3720_v55  ;;  %v12575_v30 = vmax.f32 %v9921_v51, 0.0  ;;  %v4058_v55 = vld [vmem:[%s11615_s3 + $0x240] sm:$0xff]  ;;  %v12577_v29 = vld [vmem:[#allocation26_spill] sm:$0xff] }
 0x306   : > { %v3879_v28 = vmax.f32 %v9783_v24, %v3719_v48  ;;  %v3721_v5 = vmax.f32 %v12572_v4, %v3401_v54  ;;  %v2265_v56 = vadd.f32 %v10081_v13, %v12568_v26  ;;  %v4538_v24 = vld [vmem:[%s11615_s3 + $0x6b8] sm:$0xff]  ;;  %v12576_v36 = vmax.f32 %v9938_v31, 0.0  ;;  %v4060_v31 = vld [vmem:[%s11615_s3 + $0x250] sm:$0xff] }
 0x307   : > { %v4362_v7 = vadd.f32 %v12573_v62, %v4198_v46  ;;  %v4858_v44 = vadd.f32 %v12574_v16, %v4695_v10  ;;  %v4200_v15 = vmul.f32 %v4040_v47, %v3880_v18  ;;  %v4697_v52 = vmul.f32 %v4537_v63, %v3880_v18 }
 0x308   : > { %v4199_v27 = vmul.f32 %v4039_v19, %v3879_v28  ;;  %v4696_v43 = vmul.f32 %v4536_v14, %v3879_v28  ;;  %v3881_v13 = vmax.f32 %v9793_v39, %v3721_v5  ;;  %v3738_v34 = vmax.f32 %v12575_v30, %v3418_v0  ;;  %v4555_v19 = vld [vmem:[%s11615_s3 + $0x740] sm:$0xff] }
 0x309   : > { %v10171_v2 = vpop.f32.mrb[252].mxu0  ;;  %v3740_v12 = vmax.f32 %v12576_v36, %v3420_v23  ;;  %v3419_v47 = vmax.f32 %v2265_v56, 0.0  ;;  %v2458_v63 = vadd.f32 %v10091_v35, %v12568_v26  ;;  %v2269_v39 = vadd.f32 %v2268_v3, %v12577_v29  ;;  %v4557_v35 = vld [vmem:[%s11615_s3 + $0x750] sm:$0xff]  ;;  %v12582_v30 = vld [vmem:[#allocation69_spill] sm:$0xff] }
 0x30a   : > { %v10176_v45 = vpop.f32.mrb[252].mxu1  ;;  %v10178_v58 = vpop.f32.mrb[253].mxu0  ;;  %v4363_v54 = vadd.f32 %v4362_v7, %v4199_v27  ;;  %v4859_v46 = vadd.f32 %v4858_v44, %v4696_v43  ;;  %v4201_v10 = vmul.f32 %v4041_v57, %v3881_v13  ;;  %v4698_v18 = vmul.f32 %v4538_v24, %v3881_v13 }
 0x30b   : > { %v10188_v48 = vpop.f32.mrb[253].mxu1  ;;  %v10190_v51 = vpop.f32.mrb[254].mxu0  ;;  %v3898_v0 = vmax.f32 %v9797_v42, %v3738_v34  ;;  %v3900_v28 = vmax.f32 %v9801_v11, %v3740_v12  ;;  %v12578_v4 = vmax.f32 %v9929_v17, 0.0  ;;  %v3421_v23 = vmax.f32 %v2458_v63, 0.0  ;;  %v4059_v42 = vld [vmem:[%s11615_s3 + $0x248] sm:$0xff]  ;;  %v4061_v12 = vld [vmem:[%s11615_s3 + $0x258] sm:$0xff] }
 0x30c   : > { %v10201_v3 = vpop.f32.mrb[254].mxu1  ;;  %v10203_v14 = vpop.f32.mrb[255].mxu0  ;;  %v4364_v62 = vadd.f32 %v4363_v54, %v4200_v15  ;;  %v4860_v7 = vadd.f32 %v4859_v46, %v4697_v52  ;;  %v3438_v16 = vmax.f32 %v2269_v39, 0.0  ;;  %v2462_v44 = vadd.f32 %v10111_v38, %v12577_v29  ;;  %v4556_v11 = vld [vmem:[%s11615_s3 + $0x748] sm:$0xff] }
 0x30d   : > { %v3739_v5 = vmax.f32 %v12578_v4, %v3419_v47  ;;  %v10209_v56 = vpop.f32.mrb[255].mxu1  ;;  %v4218_v57 = vmul.f32 %v4058_v55, %v3898_v0  ;;  %v4715_v24 = vmul.f32 %v4555_v19, %v3898_v0  ;;  %v4220_v27 = vmul.f32 %v4060_v31, %v3900_v28  ;;  %v12583_v55 = vld [vmem:[#allocation70_spill] sm:$0xff]  ;;  %v4558_v47 = vld [vmem:[%s11615_s3 + $0x758] sm:$0xff]  ;;  %v4575_v19 = vld [vmem:[%s11615_s3 + $0x7e0] sm:$0xff] }
 0x30e   : > { %v4717_v43 = vmul.f32 %v4557_v35, %v3900_v28  ;;  %v10219_v17 = vadd.f32 %v4364_v62, %v4201_v10  ;;  %v10221_v15 = vadd.f32 %v4860_v7, %v4698_v18  ;;  %v12581_v38 = vmax.f32 %v9947_v61, 0.0  ;;  %v4078_v18 = vld [vmem:[%s11615_s3 + $0x2e0] sm:$0xff] }
 0x30f   : > { %v3899_v52 = vmax.f32 %v9805_v20, %v3739_v5  ;;  %v4384_v34 = vadd.f32 %v12582_v30, %v4218_v57  ;;  %v4880_v36 = vadd.f32 %v12583_v55, %v4715_v24  ;;  %v12584_v63 = vmax.f32 %v9950_v49, 0.0  ;;  %v12586_v5 = vld [vmem:[#allocation30_spill] sm:$0xff] }
 0x310   : > { %12579 = vst [vmem:[#allocation79_spill] sm:$0xff] %v10219_v17  ;;  %12580 = vst [vmem:[#allocation53_spill] sm:$0xff] %v10221_v15  ;;  %v3741_v13 = vmax.f32 %v12581_v38, %v3421_v23  ;;  %v3440_v54 = vmax.f32 %v2462_v44, 0.0  ;;  %v2271_v31 = vadd.f32 %v10113_v21, %v12577_v29  ;;  %v12585_v28 = vmax.f32 %v9962_v53, 0.0  ;;  %v4577_v53 = vld [vmem:[%s11615_s3 + $0x7f0] sm:$0xff]  ;;  %v4598_v15 = vld [vmem:[%s11615_s3 + $0x898] sm:$0xff] }
 0x311   : > { %v3758_v39 = vmax.f32 %v12584_v63, %v3438_v16  ;;  %v10236_v20 = vpop.f32.mrb[0].mxu0  ;;  %v4219_v61 = vmul.f32 %v4059_v42, %v3899_v52  ;;  %v4716_v46 = vmul.f32 %v4556_v11, %v3899_v52  ;;  %v2464_v4 = vadd.f32 %v10117_v8, %v12577_v29 }
 0x312   : > { %v3901_v10 = vmax.f32 %v9809_v6, %v3741_v13  ;;  %v10247_v49 = vpop.f32.mrb[1].mxu0  ;;  %v10249_v35 = vpop.f32.mrb[0].mxu1  ;;  %v3760_v6 = vmax.f32 %v12585_v28, %v3440_v54  ;;  %v2273_v23 = vadd.f32 %v10119_v40, %v12586_v5  ;;  %v3439_v52 = vmax.f32 %v2271_v31, 0.0  ;;  %v4576_v31 = vld [vmem:[%s11615_s3 + $0x7e8] sm:$0xff]  ;;  %v12594_v28 = vld [vmem:[#allocation43_spill] sm:$0xff] }
 0x313   : > { %v3918_v0 = vmax.f32 %v9819_v37, %v3758_v39  ;;  %v10258_v62 = vpop.f32.mrb[2].mxu0  ;;  %v10260_v7 = vpop.f32.mrb[1].mxu1  ;;  %v4385_v21 = vadd.f32 %v4384_v34, %v4219_v61  ;;  %v4881_v16 = vadd.f32 %v4880_v36, %v4716_v46  ;;  %v4080_v37 = vld [vmem:[%s11615_s3 + $0x2f0] sm:$0xff]  ;;  %v3441_v34 = vmax.f32 %v2464_v4, 0.0 }
 0x314   : > { %v4221_v44 = vmul.f32 %v4061_v12, %v3901_v10  ;;  %v4718_v57 = vmul.f32 %v4558_v47, %v3901_v10  ;;  %v10268_v8 = vpop.f32.mrb[3].mxu0  ;;  %v10270_v24 = vpop.f32.mrb[2].mxu1  ;;  %v3920_v11 = vmax.f32 %v9823_v32, %v3760_v6  ;;  %v3458_v55 = vmax.f32 %v2273_v23, 0.0  ;;  %v12587_v36 = vld [vmem:[#allocation71_spill] sm:$0xff]  ;;  %v12588_v47 = vld [vmem:[#allocation62_spill] sm:$0xff] }
 0x315   : > { %v4238_v40 = vmul.f32 %v4078_v18, %v3918_v0  ;;  %v4735_v42 = vmul.f32 %v4575_v19, %v3918_v0  ;;  %v10273_v38 = vpop.f32.mrb[3].mxu1  ;;  %v4386_v13 = vadd.f32 %v4385_v21, %v4220_v27  ;;  %v4882_v30 = vadd.f32 %v4881_v16, %v4717_v43  ;;  %v4079_v27 = vld [vmem:[%s11615_s3 + $0x2e8] sm:$0xff]  ;;  %v4081_v0 = vld [vmem:[%s11615_s3 + $0x2f8] sm:$0xff] }
 0x316   : > { %v4240_v39 = vmul.f32 %v4080_v37, %v3920_v11  ;;  %v4737_v54 = vmul.f32 %v4577_v53, %v3920_v11  ;;  %v12591_v10 = vmax.f32 %v9955_v1, 0.0  ;;  %v12592_v43 = vld [vmem:[#allocation74_spill] sm:$0xff]  ;;  %v4578_v1 = vld [vmem:[%s11615_s3 + $0x7f8] sm:$0xff]  ;;  %v12595_v6 = vmax.f32 %v12594_v28, 0.0 }
 0x317   : > { %v4406_v12 = vadd.f32 %v12587_v36, %v4238_v40  ;;  %v4902_v63 = vadd.f32 %v12588_v47, %v4735_v42  ;;  %v10277_v61 = vadd.f32 %v4386_v13, %v4221_v44  ;;  %v10279_v46 = vadd.f32 %v4882_v30, %v4718_v57  ;;  %v12596_v57 = vld [vmem:[#allocation36_spill] sm:$0xff]  ;;  %v12597_v53 = vld [vmem:[#allocation54_spill] sm:$0xff]  ;;  %v12599_v30 = vld [vmem:[#allocation61_spill] sm:$0xff] }
 0x318   : > { %v3759_v32 = vmax.f32 %v12591_v10, %v3439_v52  ;;  %v12593_v18 = vmax.f32 %v12592_v43, 0.0  ;;  %v3778_v4 = vmax.f32 %v12595_v6, %v3458_v55  ;;  %v2466_v23 = vadd.f32 %v10128_v9, %v12586_v5  ;;  %v4098_v42 = vld [vmem:[%s11615_s3 + $0x380] sm:$0xff]  ;;  %v12598_v11 = vld [vmem:[#allocation34_spill] sm:$0xff] }
 0x319   : > { %12589 = vst [vmem:[#allocation51_spill] sm:$0xff] %v10277_v61  ;;  %12590 = vst [vmem:[#allocation68_spill] sm:$0xff] %v10279_v46  ;;  %v2275_v21 = vadd.f32 %v10130_v22, %v12586_v5  ;;  %v2468_v16 = vadd.f32 %v10137_v41, %v12586_v5  ;;  %v10305_v44 = vpop.f32.mrb[4].mxu0  ;;  %v4595_v9 = vld [vmem:[%s11615_s3 + $0x880] sm:$0xff]  ;;  %v2279_v22 = vadd.f32 %v10171_v2, %v12598_v11 }
 0x31a   : > { %v3761_v19 = vmax.f32 %v12593_v18, %v3441_v34  ;;  %v3919_v37 = vmax.f32 %v12596_v57, %v3759_v32  ;;  %v10319_v41 = vadd.f32 %v10176_v45, %v12598_v11  ;;  %v10321_v52 = vpop.f32.mrb[5].mxu0  ;;  %v10323_v13 = vpop.f32.mrb[4].mxu1  ;;  %v3938_v34 = vmax.f32 %v12599_v30, %v3778_v4 }
 0x31b   : > { %v3460_v55 = vmax.f32 %v2466_v23, 0.0  ;;  %v3459_v36 = vmax.f32 %v2275_v21, 0.0  ;;  %v3461_v47 = vmax.f32 %v2468_v16, 0.0  ;;  %v10326_v10 = vpop.f32.mrb[6].mxu0  ;;  %v10328_v32 = vpop.f32.mrb[5].mxu1  ;;  %v4100_v23 = vld [vmem:[%s11615_s3 + $0x390] sm:$0xff] }
 0x31c   : > { %v3921_v40 = vmax.f32 %v12597_v53, %v3761_v19  ;;  %v4239_v43 = vmul.f32 %v4079_v27, %v3919_v37  ;;  %v4736_v18 = vmul.f32 %v4576_v31, %v3919_v37  ;;  %v10330_v28 = vpop.f32.mrb[7].mxu0  ;;  %v10332_v45 = vpop.f32.mrb[6].mxu1  ;;  %v4258_v6 = vmul.f32 %v4098_v42, %v3938_v34  ;;  %v12600_v53 = vld [vmem:[#allocation39_spill] sm:$0xff]  ;;  %v12602_v21 = vld [vmem:[#allocation44_spill] sm:$0xff]  ;;  %v4099_v37 = vld [vmem:[%s11615_s3 + $0x388] sm:$0xff] }
 0x31d   : > { %v4755_v57 = vmul.f32 %v4595_v9, %v3938_v34  ;;  %v12601_v46 = vmax.f32 %v12600_v53, 0.0  ;;  %v12603_v16 = vmax.f32 %v12602_v21, 0.0  ;;  %v10341_v27 = vpop.f32.mrb[7].mxu1  ;;  %v3478_v34 = vmax.f32 %v2279_v22, 0.0  ;;  %v12609_v53 = vld [vmem:[#allocation35_spill] sm:$0xff] }
 0x31e   : > { %v4241_v2 = vmul.f32 %v4081_v0, %v3921_v40  ;;  %v4738_v19 = vmul.f32 %v4578_v1, %v3921_v40  ;;  %v4407_v31 = vadd.f32 %v4406_v12, %v4239_v43  ;;  %v4903_v0 = vadd.f32 %v4902_v63, %v4736_v18  ;;  %v4597_v1 = vld [vmem:[%s11615_s3 + $0x890] sm:$0xff]  ;;  %v12607_v12 = vld [vmem:[#allocation72_spill] sm:$0xff]  ;;  %v12608_v43 = vld [vmem:[#allocation5_spill] sm:$0xff] }
 0x31f   : > { %v3780_v4 = vmax.f32 %v12601_v46, %v3460_v55  ;;  %v3779_v30 = vmax.f32 %v12603_v16, %v3459_v36  ;;  %v4596_v46 = vld [vmem:[%s11615_s3 + $0x888] sm:$0xff]  ;;  %v12604_v40 = vld [vmem:[#allocation63_spill] sm:$0xff]  ;;  %v4924_v63 = vadd.f32 %v12607_v12, %v4755_v57 }
 0x320   : > { %v12605_v42 = vmax.f32 %v12604_v40, 0.0  ;;  %v12606_v55 = vld [vmem:[#allocation37_spill] sm:$0xff]  ;;  %v4101_v16 = vld [vmem:[%s11615_s3 + $0x398] sm:$0xff]  ;;  %v4408_v61 = vadd.f32 %v4407_v31, %v4240_v39  ;;  %v4904_v40 = vadd.f32 %v4903_v0, %v4737_v54 }
 0x321   : > { %v4428_v36 = vadd.f32 %v12606_v55, %v4258_v6  ;;  %v3940_v18 = vmax.f32 %v12608_v43, %v3780_v4  ;;  %v3939_v21 = vmax.f32 %v12609_v53, %v3779_v30  ;;  %v10367_v30 = vpop.f32.mrb[8].mxu0  ;;  %v4118_v39 = vld [vmem:[%s11615_s3 + $0x420] sm:$0xff] }
 0x322   : > { %v3781_v9 = vmax.f32 %v12605_v42, %v3461_v47  ;;  %v12610_v47 = vld [vmem:[#allocation59_spill] sm:$0xff]  ;;  %v12611_v42 = vld [vmem:[#allocation77_spill] sm:$0xff]  ;;  %v10369_v53 = vadd.f32 %v4408_v61, %v4241_v2  ;;  %v10371_v60 = vadd.f32 %v4904_v40, %v4738_v19  ;;  %v10381_v31 = vpop.f32.mrb[8].mxu1  ;;  %v12615_v61 = vld [vmem:[#allocation46_spill] sm:$0xff]  ;;  %v3480_v19 = vmax.f32 %v10319_v41, 0.0 }
 0x323   : > { %v12612_v6 = vmax.f32 %v12611_v42, 0.0  ;;  %v4260_v57 = vmul.f32 %v4100_v23, %v3940_v18  ;;  %v4757_v12 = vmul.f32 %v4597_v1, %v3940_v18  ;;  %v4259_v4 = vmul.f32 %v4099_v37, %v3939_v21  ;;  %v4615_v54 = vld [vmem:[%s11615_s3 + $0x920] sm:$0xff]  ;;  %v10379_v23 = vpop.f32.mrb[9].mxu0 }
 0x324   : > { %v3941_v22 = vmax.f32 %v12610_v47, %v3781_v9  ;;  %v4756_v43 = vmul.f32 %v4596_v46, %v3939_v21  ;;  %12613 = vst [vmem:[#allocation69_spill] sm:$0xff] %v10369_v53  ;;  %12614 = vst [vmem:[#allocation70_spill] sm:$0xff] %v10371_v60  ;;  %v10385_v37 = vpop.f32.mrb[10].mxu0  ;;  %v2281_v46 = vadd.f32 %v10178_v58, %v12598_v11  ;;  %v12617_v58 = vld [vmem:[#allocation80_spill] sm:$0xff]  ;;  %v12622_v60 = vld [vmem:[#allocation49_spill] sm:$0xff] }
 0x325   : > { %v3798_v55 = vmax.f32 %v12612_v6, %v3478_v34  ;;  %v4429_v0 = vadd.f32 %v4428_v36, %v4259_v4  ;;  %v2474_v9 = vadd.f32 %v10188_v48, %v12598_v11  ;;  %v12616_v34 = vld [vmem:[#allocation56_spill] sm:$0xff]  ;;  %v12618_v42 = vmax.f32 %v12617_v58, 0.0 }
 0x326   : > { %v4261_v17 = vmul.f32 %v4101_v16, %v3941_v22  ;;  %v4758_v25 = vmul.f32 %v4598_v15, %v3941_v22  ;;  %v4925_v1 = vadd.f32 %v4924_v63, %v4756_v43  ;;  %v10387_v15 = vpop.f32.mrb[9].mxu1  ;;  %v2283_v18 = vadd.f32 %v10190_v51, %v12616_v34  ;;  %v10397_v63 = vpop.f32.mrb[11].mxu0 }
 0x327   : > { %v3958_v2 = vmax.f32 %v12615_v61, %v3798_v55  ;;  %v2476_v36 = vadd.f32 %v10201_v3, %v12616_v34  ;;  %v10399_v21 = vpop.f32.mrb[10].mxu1  ;;  %v4430_v41 = vadd.f32 %v4429_v0, %v4260_v57  ;;  %v3800_v6 = vmax.f32 %v12618_v42, %v3480_v19  ;;  %v12621_v3 = vld [vmem:[#allocation73_spill] sm:$0xff]  ;;  %v4120_v57 = vld [vmem:[%s11615_s3 + $0x430] sm:$0xff] }
 0x328   : > { %v4926_v16 = vadd.f32 %v4925_v1, %v4757_v12  ;;  %v10401_v22 = vpop.f32.mrb[11].mxu1  ;;  %v3479_v48 = vmax.f32 %v2281_v46, 0.0  ;;  %v3481_v55 = vmax.f32 %v2474_v9, 0.0  ;;  %v3498_v4 = vmax.f32 %v2283_v18, 0.0  ;;  %v12623_v12 = vld [vmem:[#allocation76_spill] sm:$0xff]  ;;  %v12624_v0 = vld [vmem:[#allocation42_spill] sm:$0xff] }
 0x329   : > { %v4278_v40 = vmul.f32 %v4118_v39, %v3958_v2  ;;  %v4775_v47 = vmul.f32 %v4615_v54, %v3958_v2  ;;  %v10405_v51 = vadd.f32 %v4430_v41, %v4261_v17  ;;  %v3960_v39 = vmax.f32 %v12623_v12, %v3800_v6  ;;  %v4617_v54 = vld [vmem:[%s11615_s3 + $0x930] sm:$0xff]  ;;  %v12632_v12 = vld [vmem:[#allocation45_spill] sm:$0xff] }
 0x32a   : > { %v10407_v43 = vadd.f32 %v4926_v16, %v4758_v25  ;;  %v12625_v1 = vmax.f32 %v12624_v0, 0.0  ;;  %v12626_v2 = vld [vmem:[#allocation38_spill] sm:$0xff]  ;;  %v12628_v46 = vld [vmem:[#allocation55_spill] sm:$0xff]  ;;  %v3500_v58 = vmax.f32 %v2476_v36, 0.0  ;;  %v2285_v42 = vadd.f32 %v10203_v14, %v12616_v34  ;;  %v4635_v36 = vld [vmem:[%s11615_s3 + $0x9c0] sm:$0xff] }
 0x32b   : > { %12619 = vst [vmem:[#allocation71_spill] sm:$0xff] %v10405_v51  ;;  %v4450_v61 = vadd.f32 %v12621_v3, %v4278_v40  ;;  %v4946_v53 = vadd.f32 %v12622_v60, %v4775_v47  ;;  %v12627_v25 = vmax.f32 %v12626_v2, 0.0  ;;  %v12629_v9 = vmax.f32 %v12628_v46, 0.0  ;;  %v12630_v60 = vld [vmem:[#allocation66_spill] sm:$0xff]  ;;  %v4121_v47 = vld [vmem:[%s11615_s3 + $0x438] sm:$0xff] }
 0x32c   : > { %12620 = vst [vmem:[#allocation62_spill] sm:$0xff] %v10407_v43  ;;  %v3799_v17 = vmax.f32 %v12625_v1, %v3479_v48  ;;  %v3341_v41 = vmax.f32 %v12630_v60, 0.0  ;;  %v4119_v16 = vld [vmem:[%s11615_s3 + $0x428] sm:$0xff]  ;;  %v2478_v6 = vadd.f32 %v10209_v56, %v12616_v34  ;;  %v10438_v48 = vpop.f32.mrb[12].mxu0  ;;  %v4138_v1 = vld [vmem:[%s11615_s3 + $0x4c0] sm:$0xff]  ;;  %v12635_v46 = vld [vmem:[#allocation67_spill] sm:$0xff] }
 0x32d   : > { %v3801_v19 = vmax.f32 %v12627_v25, %v3481_v55  ;;  %v3818_v18 = vmax.f32 %v12629_v9, %v3498_v4  ;;  %v4616_v40 = vld [vmem:[%s11615_s3 + $0x928] sm:$0xff]  ;;  %v4280_v55 = vmul.f32 %v4120_v57, %v3960_v39  ;;  %v10452_v56 = vpop.f32.mrb[13].mxu0  ;;  %v10454_v25 = vpop.f32.mrb[12].mxu1  ;;  %v4618_v57 = vld [vmem:[%s11615_s3 + $0x938] sm:$0xff]  ;;  %v12636_v9 = vmax.f32 %v12635_v46, 0.0 }
 0x32e   : > { %v12631_v4 = vld [vmem:[#allocation65_spill] sm:$0xff]  ;;  %v12633_v2 = vld [vmem:[#allocation6_spill] sm:$0xff]  ;;  %v10462_v43 = vpop.f32.mrb[14].mxu0  ;;  %v10464_v51 = vpop.f32.mrb[13].mxu1  ;;  %v12639_v46 = vld [vmem:[#allocation60_spill] sm:$0xff] }
 0x32f   : > { %v3959_v3 = vmax.f32 %v12631_v4, %v3799_v17  ;;  %v3961_v0 = vmax.f32 %v12632_v12, %v3801_v19  ;;  %v10450_v14 = vadd.f32 %v10236_v20, %v12633_v2  ;;  %v12634_v17 = vld [vmem:[#allocation75_spill] sm:$0xff]  ;;  %v3820_v60 = vmax.f32 %v12636_v9, %v3500_v58  ;;  %v10469_v5 = vpop.f32.mrb[15].mxu0 }
 0x330   : > { %v3978_v19 = vmax.f32 %v12634_v17, %v3818_v18  ;;  %v3499_v4 = vmax.f32 %v2285_v42, 0.0  ;;  %v3501_v12 = vmax.f32 %v2478_v6, 0.0  ;;  %v4777_v20 = vmul.f32 %v4617_v54, %v3960_v39  ;;  %v10471_v18 = vpop.f32.mrb[14].mxu1  ;;  %v12638_v42 = vld [vmem:[#allocation57_spill] sm:$0xff] }
 0x331   : > { %v4279_v34 = vmul.f32 %v4119_v16, %v3959_v3  ;;  %v4776_v11 = vmul.f32 %v4616_v40, %v3959_v3  ;;  %v4281_v59 = vmul.f32 %v4121_v47, %v3961_v0  ;;  %12637 = vst [vmem:[#allocation74_spill] sm:$0xff] %v10471_v18  ;;  %v3980_v6 = vmax.f32 %v12638_v42, %v3820_v60  ;;  %v10476_v26 = vpop.f32.mrb[15].mxu1  ;;  %v4637_v40 = vld [vmem:[%s11615_s3 + $0x9d0] sm:$0xff]  ;;  %v12641_v3 = vld [vmem:[#allocation48_spill] sm:$0xff] }
 0x332   : > { %v4298_v17 = vmul.f32 %v4138_v1, %v3978_v19  ;;  %v4795_v58 = vmul.f32 %v4635_v36, %v3978_v19  ;;  %v12640_v9 = vmax.f32 %v12639_v46, 0.0  ;;  %v4778_v16 = vmul.f32 %v4618_v57, %v3961_v0  ;;  %v12642_v18 = vld [vmem:[#allocation50_spill] sm:$0xff]  ;;  %v12643_v0 = vld [vmem:[#allocation40_spill] sm:$0xff] }
 0x333   : > { %v4451_v39 = vadd.f32 %v4450_v61, %v4279_v34  ;;  %v4947_v54 = vadd.f32 %v4946_v53, %v4776_v11  ;;  %v3821_v47 = vmax.f32 %v3341_v41, %v3501_v12  ;;  %v4300_v36 = vmul.f32 %v4140_v50, %v3980_v6  ;;  %v4139_v19 = vld [vmem:[%s11615_s3 + $0x4c8] sm:$0xff]  ;;  %v12644_v41 = vld [vmem:[#allocation52_spill] sm:$0xff] }
 0x334   : > { %v3819_v29 = vmax.f32 %v12640_v9, %v3499_v4  ;;  %v4472_v33 = vadd.f32 %v12641_v3, %v4298_v17  ;;  %v4968_v1 = vadd.f32 %v12642_v18, %v4795_v58  ;;  %v4636_v34 = vld [vmem:[%s11615_s3 + $0x9c8] sm:$0xff]  ;;  %v4141_v50 = vld [vmem:[%s11615_s3 + $0x4d8] sm:$0xff]  ;;  %v4797_v12 = vmul.f32 %v4637_v40, %v3980_v6  ;;  %v10516_v9 = vpop.f32.mrb[16].mxu1 }
 0x335   : > { %v4452_v53 = vadd.f32 %v4451_v39, %v4280_v55  ;;  %v4948_v61 = vadd.f32 %v4947_v54, %v4777_v20  ;;  %v3981_v60 = vmax.f32 %v12644_v41, %v3821_v47  ;;  %v4638_v4 = vld [vmem:[%s11615_s3 + $0x9d8] sm:$0xff]  ;;  %v10500_v18 = vadd.f32 %v10247_v49, %v12633_v2  ;;  %v10510_v20 = vpop.f32.mrb[16].mxu0  ;;  %v10525_v40 = vpop.f32.mrb[17].mxu1 }
 0x336   : > { %v3979_v57 = vmax.f32 %v12643_v0, %v3819_v29  ;;  %v12645_v17 = vld [vmem:[#allocation7_spill] sm:$0xff]  ;;  %v10508_v29 = vadd.f32 %v10249_v35, %v12633_v2  ;;  %v10518_v49 = vpop.f32.mrb[17].mxu0 }
 0x337   : > { %v10504_v55 = vadd.f32 %v10258_v62, %v12645_v17  ;;  %v10512_v58 = vadd.f32 %v4452_v53, %v4281_v59  ;;  %v10514_v42 = vadd.f32 %v4948_v61, %v4778_v16  ;;  %v4301_v39 = vmul.f32 %v4141_v50, %v3981_v60  ;;  %v10527_v59 = vpop.f32.mrb[18].mxu0  ;;  %v12662_v62 = vld [vmem:[#allocation8_spill] sm:$0xff] }
 0x338   : > { %v4299_v46 = vmul.f32 %v4139_v19, %v3979_v57  ;;  %v4796_v6 = vmul.f32 %v4636_v34, %v3979_v57  ;;  %v4798_v54 = vmul.f32 %v4638_v4, %v3981_v60  ;;  %v10523_v35 = vadd.f32 %v10268_v8, %v12645_v17  ;;  %v10531_v34 = vpop.f32.mrb[18].mxu1  ;;  %v10533_v53 = vpop.f32.mrb[19].mxu0 }
 0x339   : > { %12646 = vst [vmem:[#allocation43_spill] sm:$0xff] %v10512_v58  ;;  %12647 = vst [vmem:[#allocation36_spill] sm:$0xff] %v10514_v42  ;;  %v10537_v61 = vadd.f32 %v10260_v7, %v12633_v2  ;;  %v10541_v8 = vadd.f32 %v10270_v24, %v12645_v17  ;;  %v10551_v57 = vpop.f32.mrb[19].mxu1  ;;  %v12649_v2 = vld [vmem:[#allocation17_spill] sm:$0xff]  ;;  %v2748_v3 = vadd.f32 %v10516_v9, %v12662_v62  ;;  %v12665_v9 = vmax.f32 %v10450_v14, 0.0 }
 0x33a   : > { %v4473_v16 = vadd.f32 %v4472_v33, %v4299_v46  ;;  %v4969_v47 = vadd.f32 %v4968_v1, %v4796_v6  ;;  %v10545_v33 = vadd.f32 %v10273_v38, %v12645_v17  ;;  %v12648_v1 = vld [vmem:[#allocation13_spill] sm:$0xff]  ;;  %v10559_v24 = vadd.f32 %v10326_v10, %v12649_v2 }
 0x33b   : > { %v10549_v0 = vadd.f32 %v10305_v44, %v12648_v1  ;;  %v10555_v7 = vadd.f32 %v10321_v52, %v12648_v1  ;;  %v10573_v10 = vadd.f32 %v10323_v13, %v12648_v1  ;;  %v10577_v46 = vadd.f32 %v10330_v28, %v12649_v2 }
 0x33c   : > { %v4474_v41 = vadd.f32 %v4473_v16, %v4300_v36  ;;  %v4970_v60 = vadd.f32 %v4969_v47, %v4797_v12  ;;  %v10581_v6 = vadd.f32 %v10328_v32, %v12648_v1  ;;  %v10592_v13 = vadd.f32 %v10341_v27, %v12649_v2  ;;  %v12652_v47 = vld [vmem:[#allocation21_spill] sm:$0xff]  ;;  %v10602_v1 = vpop.f32.mrb[20].mxu1 }
 0x33d   : > { %v10596_v28 = vadd.f32 %v10367_v30, %v12652_v47  ;;  %v10600_v32 = vadd.f32 %v10379_v23, %v12652_v47  ;;  %v12653_v27 = vld [vmem:[#allocation25_spill] sm:$0xff]  ;;  %v10613_v30 = vpop.f32.mrb[21].mxu1  ;;  %v10635_v23 = vadd.f32 %v10387_v15, %v12652_v47 }
 0x33e   : > { %v10565_v17 = vadd.f32 %v4474_v41, %v4301_v39  ;;  %v10567_v36 = vadd.f32 %v4970_v60, %v4798_v54  ;;  %v10585_v39 = vadd.f32 %v10332_v45, %v12649_v2  ;;  %v10587_v54 = vpop.f32.mrb[20].mxu0  ;;  %v10611_v2 = vadd.f32 %v10385_v37, %v12653_v27  ;;  %v10621_v50 = vpop.f32.mrb[22].mxu1  ;;  %v12656_v15 = vld [vmem:[#allocation33_spill] sm:$0xff] }
 0x33f   : > { %v10604_v45 = vpop.f32.mrb[21].mxu0  ;;  %v10627_v37 = vadd.f32 %v10381_v31, %v12652_v47  ;;  %v10631_v16 = vadd.f32 %v10397_v63, %v12653_v27  ;;  %v10639_v44 = vadd.f32 %v10399_v21, %v12653_v27  ;;  %v10641_v41 = vpop.f32.mrb[23].mxu1  ;;  %v10645_v12 = vadd.f32 %v10401_v22, %v12653_v27  ;;  %v12654_v31 = vld [vmem:[#allocation29_spill] sm:$0xff]  ;;  %v12660_v27 = vld [vmem:[#allocation74_spill] sm:$0xff] }
 0x340   : > { %12650 = vst [vmem:[#allocation54_spill] sm:$0xff] %v10565_v17  ;;  %12651 = vst [vmem:[#allocation61_spill] sm:$0xff] %v10567_v36  ;;  %v10615_v52 = vpop.f32.mrb[22].mxu0  ;;  %v10649_v4 = vadd.f32 %v10438_v48, %v12654_v31  ;;  %v10653_v63 = vadd.f32 %v10452_v56, %v12654_v31  ;;  %v10657_v47 = vadd.f32 %v10462_v43, %v12656_v15 }
 0x341   : > { %v10623_v60 = vpop.f32.mrb[23].mxu0  ;;  %v10669_v43 = vadd.f32 %v10454_v25, %v12654_v31  ;;  %v10673_v21 = vadd.f32 %v10469_v5, %v12656_v15  ;;  %v10677_v38 = vadd.f32 %v10464_v51, %v12654_v31  ;;  %v10681_v22 = vadd.f32 %v12660_v27, %v12656_v15  ;;  %v12664_v31 = vld [vmem:[#allocation10_spill] sm:$0xff] }
 0x342   : > { %12655 = vst [vmem:[#allocation39_spill] sm:$0xff] %v10653_v63  ;;  %12657 = vst [vmem:[#allocation44_spill] sm:$0xff] %v10657_v47  ;;  %v10683_v48 = vpop.f32.mrb[24].mxu0  ;;  %v2555_v25 = vadd.f32 %v10510_v20, %v12662_v62  ;;  %v2557_v5 = vadd.f32 %v10518_v49, %v12662_v62  ;;  %v2767_v19 = vpop.f32.mrb[24].mxu1  ;;  %v10697_v56 = vadd.f32 %v10476_v26, %v12656_v15  ;;  %v3044_v49 = vmax.f32 %v2748_v3, 0.0  ;;  %v12668_v63 = vld [vmem:[#allocation16_spill] sm:$0xff] }
 0x343   : > { %12658 = vst [vmem:[#allocation63_spill] sm:$0xff] %v10673_v21  ;;  %12659 = vst [vmem:[#allocation37_spill] sm:$0xff] %v10677_v38  ;;  %v2576_v51 = vpop.f32.mrb[25].mxu0  ;;  %v10699_v36 = vpop.f32.mrb[25].mxu1  ;;  %v2750_v27 = vadd.f32 %v10525_v40, %v12662_v62  ;;  %v2559_v11 = vadd.f32 %v10527_v59, %v12664_v31  ;;  %v2752_v26 = vadd.f32 %v10531_v34, %v12664_v31  ;;  %v12666_v3 = vmax.f32 %v10508_v29, 0.0 }
 0x344   : > { %12661 = vst [vmem:[#allocation72_spill] sm:$0xff] %v10681_v22  ;;  %12663 = vst [vmem:[#allocation5_spill] sm:$0xff] %v10697_v56  ;;  %v10701_v20 = vpop.f32.mrb[26].mxu0  ;;  %v3042_v42 = vmax.f32 %v2555_v25, 0.0  ;;  %v3043_v17 = vmax.f32 %v2557_v5, 0.0  ;;  %v2771_v58 = vpop.f32.mrb[26].mxu1  ;;  %v2561_v15 = vadd.f32 %v10533_v53, %v12664_v31  ;;  %v2754_v59 = vadd.f32 %v10551_v57, %v12664_v31 }
 0x345   : > { %v2580_v47 = vpop.f32.mrb[27].mxu0  ;;  %v2773_v21 = vpop.f32.mrb[27].mxu1  ;;  %v10718_v5 = vmax.f32 %v12666_v3, %v3044_v49  ;;  %v12667_v62 = vmax.f32 %v10500_v18, 0.0  ;;  %v3045_v34 = vmax.f32 %v2750_v27, 0.0  ;;  %v3062_v22 = vmax.f32 %v2559_v11, 0.0 }
 0x346   : > { %v10714_v25 = vmax.f32 %v12665_v9, %v3042_v42  ;;  %v3064_v38 = vmax.f32 %v2752_v26, 0.0  ;;  %v3063_v53 = vmax.f32 %v2561_v15, 0.0  ;;  %v3065_v56 = vmax.f32 %v2754_v59, 0.0 }
 0x347   : > { %v10722_v40 = vmax.f32 %v12667_v62, %v3043_v17  ;;  %v2565_v14 = vadd.f32 %v10587_v54, %v12668_v63  ;;  %v2758_v29 = vadd.f32 %v10602_v1, %v12668_v63  ;;  %v2567_v42 = vadd.f32 %v10604_v45, %v12668_v63 }
 0x348   : > { %v12669_v18 = vmax.f32 %v10537_v61, 0.0  ;;  %v12670_v57 = vmax.f32 %v10504_v55, 0.0  ;;  %v12671_v11 = vmax.f32 %v10541_v8, 0.0  ;;  %v12672_v54 = vmax.f32 %v10523_v35, 0.0  ;;  %v12674_v8 = vld [vmem:[#allocation20_spill] sm:$0xff] }
 0x349   : > { %v12673_v49 = vmax.f32 %v10545_v33, 0.0  ;;  %v3082_v61 = vmax.f32 %v2565_v14, 0.0  ;;  %v3084_v26 = vmax.f32 %v2758_v29, 0.0  ;;  %v3083_v15 = vmax.f32 %v2567_v42, 0.0 }
 0x34a   : > { %v10734_v17 = vmax.f32 %v12669_v18, %v3045_v34  ;;  %v10738_v31 = vmax.f32 %v12670_v57, %v3062_v22  ;;  %v10742_v27 = vmax.f32 %v12671_v11, %v3064_v38  ;;  %v10746_v9 = vmax.f32 %v12672_v54, %v3063_v53  ;;  %v2584_v1 = vpop.f32.mrb[28].mxu0  ;;  %v2777_v3 = vpop.f32.mrb[28].mxu1  ;;  %v12678_v54 = vld [vmem:[#allocation24_spill] sm:$0xff] }
 0x34b   : > { %v10750_v45 = vmax.f32 %v12673_v49, %v3065_v56  ;;  %v2586_v55 = vpop.f32.mrb[29].mxu0  ;;  %v2760_v22 = vadd.f32 %v10613_v30, %v12668_v63  ;;  %v2569_v38 = vadd.f32 %v10615_v52, %v12674_v8  ;;  %v2762_v35 = vadd.f32 %v10621_v50, %v12674_v8  ;;  %v2779_v33 = vpop.f32.mrb[29].mxu1 }
 0x34c   : > { %v2571_v62 = vadd.f32 %v10623_v60, %v12674_v8  ;;  %v2588_v56 = vpop.f32.mrb[30].mxu0  ;;  %v12675_v59 = vmax.f32 %v10549_v0, 0.0  ;;  %v12676_v53 = vmax.f32 %v10573_v10, 0.0  ;;  %v12677_v30 = vmax.f32 %v10555_v7, 0.0  ;;  %v2781_v52 = vpop.f32.mrb[30].mxu1 }
 0x34d   : > { %v2764_v50 = vadd.f32 %v10641_v41, %v12674_v8  ;;  %v2590_v29 = vpop.f32.mrb[31].mxu0  ;;  %v3085_v60 = vmax.f32 %v2760_v22, 0.0  ;;  %v3102_v42 = vmax.f32 %v2569_v38, 0.0  ;;  %v3104_v18 = vmax.f32 %v2762_v35, 0.0  ;;  %v2783_v0 = vpop.f32.mrb[31].mxu1 }
 0x34e   : > { %v10762_v34 = vmax.f32 %v12675_v59, %v3082_v61  ;;  %v10766_v14 = vmax.f32 %v12676_v53, %v3084_v26  ;;  %v10770_v63 = vmax.f32 %v12677_v30, %v3083_v15  ;;  %v3103_v57 = vmax.f32 %v2571_v62, 0.0  ;;  %v12684_v59 = vld [vmem:[#allocation28_spill] sm:$0xff] }
 0x34f   : > { %v3105_v11 = vmax.f32 %v2764_v50, 0.0  ;;  %v2575_v10 = vadd.f32 %v10683_v48, %v12678_v54  ;;  %v2768_v49 = vadd.f32 %v2767_v19, %v12678_v54  ;;  %v2577_v7 = vadd.f32 %v2576_v51, %v12678_v54 }
 0x350   : > { %v12679_v61 = vmax.f32 %v10581_v6, 0.0  ;;  %v12680_v41 = vmax.f32 %v10559_v24, 0.0  ;;  %v12681_v22 = vmax.f32 %v10585_v39, 0.0  ;;  %v12682_v38 = vmax.f32 %v10577_v46, 0.0 }
 0x351   : > { %v12683_v19 = vmax.f32 %v10592_v13, 0.0  ;;  %v3122_v51 = vmax.f32 %v2575_v10, 0.0  ;;  %v3124_v6 = vmax.f32 %v2768_v49, 0.0  ;;  %v3123_v62 = vmax.f32 %v2577_v7, 0.0 }
 0x352   : > { %v10780_v26 = vmax.f32 %v12679_v61, %v3085_v60  ;;  %v10784_v15 = vmax.f32 %v12680_v41, %v3102_v42  ;;  %v10788_v8 = vmax.f32 %v12681_v22, %v3104_v18  ;;  %v10792_v35 = vmax.f32 %v12682_v38, %v3103_v57  ;;  %v2594_v46 = vpop.f32.mrb[32].mxu0  ;;  %v12690_v61 = vld [vmem:[#allocation32_spill] sm:$0xff] }
 0x353   : > { %v10796_v48 = vmax.f32 %v12683_v19, %v3105_v11  ;;  %v2770_v24 = vadd.f32 %v10699_v36, %v12678_v54  ;;  %v2579_v53 = vadd.f32 %v10701_v20, %v12684_v59  ;;  %v2772_v39 = vadd.f32 %v2771_v58, %v12684_v59  ;;  %v2787_v20 = vpop.f32.mrb[32].mxu1  ;;  %v2596_v11 = vpop.f32.mrb[33].mxu0 }
 0x354   : > { %v2581_v30 = vadd.f32 %v2580_v47, %v12684_v59  ;;  %v12685_v50 = vmax.f32 %v10596_v28, 0.0  ;;  %v12686_v13 = vmax.f32 %v10627_v37, 0.0  ;;  %v12688_v18 = vmax.f32 %v10600_v32, 0.0  ;;  %v2789_v49 = vpop.f32.mrb[33].mxu1  ;;  %v2598_v28 = vpop.f32.mrb[34].mxu0 }
 0x355   : > { %v2774_v36 = vadd.f32 %v2773_v21, %v12684_v59  ;;  %v3125_v58 = vmax.f32 %v2770_v24, 0.0  ;;  %v3142_v54 = vmax.f32 %v2579_v53, 0.0  ;;  %v3144_v47 = vmax.f32 %v2772_v39, 0.0  ;;  %v2791_v32 = vpop.f32.mrb[34].mxu1  ;;  %v2600_v38 = vpop.f32.mrb[35].mxu0 }
 0x356   : > { %v10806_v60 = vmax.f32 %v12685_v50, %v3122_v51  ;;  %v10810_v42 = vmax.f32 %v12686_v13, %v3124_v6  ;;  %v10814_v57 = vmax.f32 %v12688_v18, %v3123_v62  ;;  %v3143_v10 = vmax.f32 %v2581_v30, 0.0  ;;  %v12701_v50 = vld [vmem:[#allocation41_spill] sm:$0xff] }
 0x357   : > { %v3145_v7 = vmax.f32 %v2774_v36, 0.0  ;;  %v2585_v41 = vadd.f32 %v2584_v1, %v12690_v61  ;;  %v2778_v37 = vadd.f32 %v2777_v3, %v12690_v61  ;;  %v2587_v22 = vadd.f32 %v2586_v55, %v12690_v61  ;;  %v2793_v3 = vpop.f32.mrb[35].mxu1 }
 0x358   : > { %12687 = vst [vmem:[#allocation35_spill] sm:$0xff] %v10810_v42  ;;  %12689 = vst [vmem:[#allocation59_spill] sm:$0xff] %v10814_v57  ;;  %v12691_v19 = vmax.f32 %v10635_v23, 0.0  ;;  %v12693_v51 = vmax.f32 %v10611_v2, 0.0  ;;  %v12695_v62 = vmax.f32 %v10639_v44, 0.0  ;;  %v12697_v1 = vmax.f32 %v10631_v16, 0.0 }
 0x359   : > { %v12699_v55 = vmax.f32 %v10645_v12, 0.0  ;;  %v3162_v23 = vmax.f32 %v2585_v41, 0.0  ;;  %v3164_v39 = vmax.f32 %v2778_v37, 0.0  ;;  %v3163_v30 = vmax.f32 %v2587_v22, 0.0 }
 0x35a   : > { %v10822_v21 = vmax.f32 %v12691_v19, %v3125_v58  ;;  %v10826_v6 = vmax.f32 %v12693_v51, %v3142_v54  ;;  %v10830_v24 = vmax.f32 %v12695_v62, %v3144_v47  ;;  %v10834_v59 = vmax.f32 %v12697_v1, %v3143_v10  ;;  %v12706_v54 = vld [vmem:[#allocation39_spill] sm:$0xff]  ;;  %v2604_v41 = vpop.f32.mrb[36].mxu0  ;;  %v2797_v22 = vpop.f32.mrb[36].mxu1  ;;  %v12710_v51 = vld [vmem:[#allocation37_spill] sm:$0xff]  ;;  %v12713_v1 = vld [vmem:[#allocation44_spill] sm:$0xff] }
 0x35b   : > { %v10838_v53 = vmax.f32 %v12699_v55, %v3145_v7  ;;  %v2780_v2 = vadd.f32 %v2779_v33, %v12690_v61  ;;  %v2589_v13 = vadd.f32 %v2588_v56, %v12701_v50  ;;  %v2782_v44 = vadd.f32 %v2781_v52, %v12701_v50  ;;  %v2606_v19 = vpop.f32.mrb[37].mxu0 }
 0x35c   : > { %12692 = vst [vmem:[#allocation77_spill] sm:$0xff] %v10822_v21  ;;  %12694 = vst [vmem:[#allocation46_spill] sm:$0xff] %v10826_v6  ;;  %v2591_v18 = vadd.f32 %v2590_v29, %v12701_v50  ;;  %v12702_v16 = vmax.f32 %v10649_v4, 0.0  ;;  %v12704_v58 = vmax.f32 %v10669_v43, 0.0  ;;  %v12707_v47 = vmax.f32 %v12706_v54, 0.0  ;;  %v12709_v29 = vld [vmem:[#allocation5_spill] sm:$0xff] }
 0x35d   : > { %12696 = vst [vmem:[#allocation80_spill] sm:$0xff] %v10830_v24  ;;  %12698 = vst [vmem:[#allocation73_spill] sm:$0xff] %v10834_v59  ;;  %v2784_v33 = vadd.f32 %v2783_v0, %v12701_v50  ;;  %v3165_v7 = vmax.f32 %v2780_v2, 0.0  ;;  %v3182_v56 = vmax.f32 %v2589_v13, 0.0  ;;  %v3184_v61 = vmax.f32 %v2782_v44, 0.0  ;;  %v12719_v2 = vld [vmem:[#allocation63_spill] sm:$0xff] }
 0x35e   : > { %12700 = vst [vmem:[#allocation49_spill] sm:$0xff] %v10838_v53  ;;  %v10846_v36 = vmax.f32 %v12702_v16, %v3162_v23  ;;  %v10850_v12 = vmax.f32 %v12704_v58, %v3164_v39  ;;  %v10854_v10 = vmax.f32 %v12707_v47, %v3163_v30  ;;  %v3183_v52 = vmax.f32 %v2591_v18, 0.0  ;;  %v12716_v39 = vld [vmem:[#allocation72_spill] sm:$0xff]  ;;  %v2799_v44 = vpop.f32.mrb[37].mxu1  ;;  %v2608_v18 = vpop.f32.mrb[38].mxu0 }
 0x35f   : > { %v3025_v37 = vmax.f32 %v12709_v29, 0.0  ;;  %v3185_v4 = vmax.f32 %v2784_v33, 0.0  ;;  %v12711_v43 = vmax.f32 %v12710_v51, 0.0  ;;  %v12714_v55 = vmax.f32 %v12713_v1, 0.0  ;;  %v2801_v58 = vpop.f32.mrb[38].mxu1  ;;  %v2610_v54 = vpop.f32.mrb[39].mxu0 }
 0x360   : > { %12703 = vst [vmem:[#allocation76_spill] sm:$0xff] %v10846_v36  ;;  %12705 = vst [vmem:[#allocation42_spill] sm:$0xff] %v10850_v12  ;;  %v12717_v0 = vmax.f32 %v12716_v39, 0.0  ;;  %v12720_v50 = vmax.f32 %v12719_v2, 0.0  ;;  %v2803_v47 = vpop.f32.mrb[39].mxu1 }
 0x361   : > { %12708 = vst [vmem:[#allocation38_spill] sm:$0xff] %v10854_v10  ;;  %v10860_v62 = vmax.f32 %v12711_v43, %v3165_v7  ;;  %v10864_v23 = vmax.f32 %v12714_v55, %v3182_v56  ;;  %v10874_v16 = vmax.f32 %v3025_v37, %v3185_v4  ;;  %v12723_v56 = vld [vmem:[#allocation9_spill] sm:$0xff]  ;;  %v12724_v4 = vld [vmem:[#allocation12_spill] sm:$0xff]  ;;  %v12728_v10 = vld [vmem:[#allocation27_spill] sm:$0xff] }
 0x362   : > { %v10868_v30 = vmax.f32 %v12717_v0, %v3184_v61  ;;  %v10872_v13 = vmax.f32 %v12720_v50, %v3183_v52  ;;  %v2614_v33 = vpop.f32.mrb[40].mxu0  ;;  %v2807_v7 = vpop.f32.mrb[40].mxu1  ;;  %v10877_v51 = vadd.f32 %v2594_v46, %v12723_v56  ;;  %v10880_v61 = vadd.f32 %v2787_v20, %v12723_v56  ;;  %v12725_v50 = vld [vmem:[#allocation15_spill] sm:$0xff] }
 0x363   : > { %12712 = vst [vmem:[#allocation55_spill] sm:$0xff] %v10860_v62  ;;  %12715 = vst [vmem:[#allocation66_spill] sm:$0xff] %v10864_v23  ;;  %v2616_v29 = vpop.f32.mrb[41].mxu0  ;;  %v2809_v43 = vpop.f32.mrb[41].mxu1  ;;  %v10883_v52 = vadd.f32 %v2596_v11, %v12723_v56  ;;  %v10886_v37 = vadd.f32 %v2789_v49, %v12723_v56  ;;  %v10889_v55 = vadd.f32 %v2598_v28, %v12724_v4 }
 0x364   : > { %12718 = vst [vmem:[#allocation65_spill] sm:$0xff] %v10868_v30  ;;  %12721 = vst [vmem:[#allocation45_spill] sm:$0xff] %v10872_v13  ;;  %v2618_v1 = vpop.f32.mrb[42].mxu0  ;;  %v10892_v39 = vadd.f32 %v2791_v32, %v12724_v4  ;;  %v2811_v0 = vpop.f32.mrb[42].mxu1  ;;  %v10895_v2 = vadd.f32 %v2600_v38, %v12724_v4  ;;  %v10898_v20 = vadd.f32 %v2793_v3, %v12724_v4  ;;  %v12726_v32 = vld [vmem:[#allocation19_spill] sm:$0xff] }
 0x365   : > { %12722 = vst [vmem:[#allocation6_spill] sm:$0xff] %v10874_v16  ;;  %v2620_v46 = vpop.f32.mrb[43].mxu0  ;;  %v10901_v11 = vadd.f32 %v2604_v41, %v12725_v50  ;;  %v2813_v16 = vpop.f32.mrb[43].mxu1  ;;  %v10904_v49 = vadd.f32 %v2797_v22, %v12725_v50  ;;  %v10907_v28 = vadd.f32 %v2606_v19, %v12725_v50  ;;  %v10912_v38 = vadd.f32 %v2799_v44, %v12725_v50  ;;  %v12738_v19 = vld [vmem:[#allocation58_spill] sm:$0xff] }
 0x366   : > { %v10922_v23 = vadd.f32 %v2608_v18, %v12726_v32  ;;  %v10927_v4 = vadd.f32 %v2801_v58, %v12726_v32  ;;  %v10930_v41 = vadd.f32 %v2610_v54, %v12726_v32  ;;  %v10934_v30 = vadd.f32 %v2803_v47, %v12726_v32  ;;  %v12727_v18 = vld [vmem:[#allocation23_spill] sm:$0xff] }
 0x367   : > { %v10937_v3 = vadd.f32 %v2614_v33, %v12727_v18  ;;  %v10940_v44 = vadd.f32 %v2807_v7, %v12727_v18  ;;  %v10943_v58 = vadd.f32 %v2616_v29, %v12727_v18  ;;  %v10946_v54 = vadd.f32 %v2809_v43, %v12727_v18  ;;  %v12733_v29 = vld [vmem:[#allocation31_spill] sm:$0xff] }
 0x368   : > { %v10949_v12 = vadd.f32 %v2618_v1, %v12728_v10  ;;  %v10952_v47 = vadd.f32 %v2811_v0, %v12728_v10  ;;  %v10956_v7 = vadd.f32 %v2620_v46, %v12728_v10  ;;  %v10959_v36 = vadd.f32 %v2813_v16, %v12728_v10  ;;  %v12739_v18 = vld [vmem:[#allocation11_spill] sm:$0xff] }
 0x36a   : > { %v2624_v56 = vpop.f32.mrb[44].mxu0  ;;  %v2817_v13 = vpop.f32.mrb[44].mxu1  ;;  %12729 = vst [vmem:[#allocation75_spill] sm:$0xff] %v10949_v12  ;;  %12730 = vst [vmem:[#allocation67_spill] sm:$0xff] %v10952_v47 }
 0x36b   : > { %v2626_v22 = vpop.f32.mrb[45].mxu0  ;;  %v2819_v50 = vpop.f32.mrb[45].mxu1  ;;  %12731 = vst [vmem:[#allocation57_spill] sm:$0xff] %v10956_v7  ;;  %12732 = vst [vmem:[#allocation60_spill] sm:$0xff] %v10959_v36  ;;  %v10962_v53 = vadd.f32 %v2624_v56, %v12733_v29  ;;  %v10967_v0 = vadd.f32 %v2817_v13, %v12733_v29 }
 0x36c   : > { %v2628_v62 = vpop.f32.mrb[46].mxu0  ;;  %v2821_v32 = vpop.f32.mrb[46].mxu1  ;;  %v10970_v59 = vadd.f32 %v2626_v22, %v12733_v29  ;;  %v10976_v16 = vadd.f32 %v2819_v50, %v12733_v29 }
 0x36d   : > { %v2630_v33 = vpop.f32.mrb[47].mxu0  ;;  %12734 = vst [vmem:[#allocation48_spill] sm:$0xff] %v10962_v53  ;;  %v2823_v43 = vpop.f32.mrb[47].mxu1  ;;  %12735 = vst [vmem:[#allocation50_spill] sm:$0xff] %v10967_v0  ;;  %v10986_v6 = vadd.f32 %v2628_v62, %v12738_v19  ;;  %v10991_v1 = vadd.f32 %v2821_v32, %v12738_v19 }
 0x36e   : > { %12736 = vst [vmem:[#allocation40_spill] sm:$0xff] %v10970_v59  ;;  %12737 = vst [vmem:[#allocation52_spill] sm:$0xff] %v10976_v16  ;;  %v10996_v24 = vadd.f32 %v2630_v33, %v12738_v19  ;;  %v11001_v29 = vadd.f32 %v2823_v43, %v12738_v19 }
 0x373   : > { %v2634_v10 = vpop.f32.mrb[48].mxu0  ;;  %v2827_v13 = vpop.f32.mrb[48].mxu1 }
 0x374   : > { %v2635_v56 = vadd.f32 %v2634_v10, %v12739_v18  ;;  %v2636_v21 = vpop.f32.mrb[49].mxu0  ;;  %v2828_v62 = vadd.f32 %v2827_v13, %v12739_v18  ;;  %v2829_v53 = vpop.f32.mrb[49].mxu1  ;;  %v12740_v10 = vld [vmem:[#allocation14_spill] sm:$0xff] }
 0x375   : > { %v2637_v46 = vadd.f32 %v2636_v21, %v12739_v18  ;;  %v2638_v50 = vpop.f32.mrb[50].mxu0  ;;  %v2830_v59 = vadd.f32 %v2829_v53, %v12739_v18  ;;  %v2831_v36 = vpop.f32.mrb[50].mxu1  ;;  %v12741_v21 = vmax.f32 %v10877_v51, 0.0  ;;  %v12742_v53 = vmax.f32 %v10880_v61, 0.0  ;;  %v4499_v61 = vld [vmem:[%s11615_s3 + $0x580] sm:$0xff] }
 0x376   : > { %v3362_v32 = vmax.f32 %v2635_v56, 0.0  ;;  %v2639_v0 = vadd.f32 %v2638_v50, %v12740_v10  ;;  %v2640_v7 = vpop.f32.mrb[51].mxu0  ;;  %v3364_v22 = vmax.f32 %v2828_v62, 0.0  ;;  %v2832_v33 = vadd.f32 %v2831_v36, %v12740_v10  ;;  %v2833_v47 = vpop.f32.mrb[51].mxu1 }
 0x377   : > { %v3363_v16 = vmax.f32 %v2637_v46, 0.0  ;;  %v2641_v13 = vadd.f32 %v2640_v7, %v12740_v10  ;;  %v3365_v42 = vmax.f32 %v2830_v59, 0.0  ;;  %v2834_v43 = vadd.f32 %v2833_v47, %v12740_v10  ;;  %v4002_v47 = vld [vmem:[%s11615_s3 + $0x80] sm:$0xff]  ;;  %v4003_v10 = vld [vmem:[%s11615_s3 + $0x88] sm:$0xff] }
 0x378   : > { %v3682_v57 = vmax.f32 %v12741_v21, %v3362_v32  ;;  %v3382_v19 = vmax.f32 %v2639_v0, 0.0  ;;  %v3684_v18 = vmax.f32 %v12742_v53, %v3364_v22  ;;  %v12743_v56 = vmax.f32 %v10883_v52, 0.0  ;;  %v12782_v22 = vld [vmem:[#allocation47_spill] sm:$0xff] }
 0x379   : > { %v3384_v62 = vmax.f32 %v2832_v33, 0.0  ;;  %v3383_v46 = vmax.f32 %v2641_v13, 0.0  ;;  %v12744_v7 = vmax.f32 %v10886_v37, 0.0  ;;  %v12745_v51 = vmax.f32 %v10889_v55, 0.0 }
 0x37a   : > { %v3683_v50 = vmax.f32 %v12743_v56, %v3363_v16  ;;  %v3842_v36 = vmax.f32 %v10714_v25, %v3682_v57  ;;  %v3385_v59 = vmax.f32 %v2834_v43, 0.0  ;;  %v11026_v52 = vmax.f32 %v10718_v5, %v3684_v18  ;;  %v4500_v5 = vld [vmem:[%s11615_s3 + $0x588] sm:$0xff] }
 0x37b   : > { %v3685_v12 = vmax.f32 %v12744_v7, %v3365_v42  ;;  %v3702_v32 = vmax.f32 %v12745_v51, %v3382_v19  ;;  %v12746_v57 = vmax.f32 %v10892_v39, 0.0  ;;  %v12747_v37 = vmax.f32 %v10895_v2, 0.0  ;;  %v2644_v0 = vpop.f32.mrb[52].mxu0  ;;  %v2837_v2 = vpop.f32.mrb[52].mxu1 }
 0x37c   : > { %v3843_v25 = vmax.f32 %v10722_v40, %v3683_v50  ;;  %v2646_v33 = vpop.f32.mrb[53].mxu0  ;;  %v2839_v53 = vpop.f32.mrb[53].mxu1  ;;  %v11051_v56 = vmul.f32 %v4002_v47, %v3842_v36  ;;  %v11053_v50 = vmul.f32 %v4499_v61, %v3842_v36 }
 0x37d   : > { %v3704_v42 = vmax.f32 %v12746_v57, %v3384_v62  ;;  %v3703_v55 = vmax.f32 %v12747_v37, %v3383_v46  ;;  %v11042_v40 = vmax.f32 %v10734_v17, %v3685_v12  ;;  %v3862_v39 = vmax.f32 %v10738_v31, %v3702_v32  ;;  %v2648_v18 = vpop.f32.mrb[54].mxu0  ;;  %v12749_v12 = vld [vmem:[#allocation18_spill] sm:$0xff]  ;;  %v2841_v46 = vpop.f32.mrb[54].mxu1 }
 0x37e   : > { %v12748_v17 = vmax.f32 %v10898_v20, 0.0  ;;  %v2645_v62 = vadd.f32 %v2644_v0, %v12749_v12  ;;  %v2650_v7 = vpop.f32.mrb[55].mxu0  ;;  %v11058_v51 = vmul.f32 %v4003_v10, %v3843_v25  ;;  %v11060_v32 = vmul.f32 %v4500_v5, %v3843_v25  ;;  %v2843_v57 = vpop.f32.mrb[55].mxu1 }
 0x37f   : > { %v11048_v19 = vmax.f32 %v10742_v27, %v3704_v42  ;;  %v3863_v43 = vmax.f32 %v10746_v9, %v3703_v55  ;;  %v2838_v27 = vadd.f32 %v2837_v2, %v12749_v12  ;;  %v2647_v9 = vadd.f32 %v2646_v33, %v12749_v12 }
 0x380   : > { %v3705_v31 = vmax.f32 %v12748_v17, %v3385_v59  ;;  %v3402_v36 = vmax.f32 %v2645_v62, 0.0  ;;  %v2840_v20 = vadd.f32 %v2839_v53, %v12749_v12  ;;  %v12750_v59 = vld [vmem:[#allocation22_spill] sm:$0xff]  ;;  %v12751_v0 = vmax.f32 %v10901_v11, 0.0  ;;  %v4519_v53 = vld [vmem:[%s11615_s3 + $0x620] sm:$0xff] }
 0x381   : > { %v2649_v61 = vadd.f32 %v2648_v18, %v12750_v59  ;;  %v3404_v42 = vmax.f32 %v2838_v27, 0.0  ;;  %v3403_v37 = vmax.f32 %v2647_v9, 0.0  ;;  %v2842_v55 = vadd.f32 %v2841_v46, %v12750_v59  ;;  %v4520_v27 = vld [vmem:[%s11615_s3 + $0x628] sm:$0xff] }
 0x382   : > { %v11065_v47 = vmax.f32 %v10750_v45, %v3705_v31  ;;  %v2651_v25 = vadd.f32 %v2650_v7, %v12750_v59  ;;  %v3722_v10 = vmax.f32 %v12751_v0, %v3402_v36  ;;  %v3405_v5 = vmax.f32 %v2840_v20, 0.0  ;;  %v4022_v45 = vld [vmem:[%s11615_s3 + $0x120] sm:$0xff]  ;;  %v4023_v7 = vld [vmem:[%s11615_s3 + $0x128] sm:$0xff] }
 0x383   : > { %v3422_v2 = vmax.f32 %v2649_v61, 0.0  ;;  %v2844_v33 = vadd.f32 %v2843_v57, %v12750_v59  ;;  %v12752_v18 = vmax.f32 %v10904_v49, 0.0  ;;  %v12753_v31 = vmax.f32 %v10907_v28, 0.0 }
 0x384   : > { %v3424_v11 = vmax.f32 %v2842_v55, 0.0  ;;  %v3423_v62 = vmax.f32 %v2651_v25, 0.0  ;;  %v3882_v9 = vmax.f32 %v10762_v34, %v3722_v10  ;;  %v12754_v57 = vmax.f32 %v10912_v38, 0.0 }
 0x385   : > { %v3724_v17 = vmax.f32 %v12752_v18, %v3404_v42  ;;  %v3723_v12 = vmax.f32 %v12753_v31, %v3403_v37  ;;  %v12755_v36 = vmax.f32 %v10922_v23, 0.0  ;;  %v3425_v20 = vmax.f32 %v2844_v33, 0.0  ;;  %v4042_v42 = vld [vmem:[%s11615_s3 + $0x1c0] sm:$0xff]  ;;  %v4043_v18 = vld [vmem:[%s11615_s3 + $0x1c8] sm:$0xff] }
 0x386   : > { %v2654_v46 = vpop.f32.mrb[56].mxu0  ;;  %v3725_v49 = vmax.f32 %v12754_v57, %v3405_v5  ;;  %v4539_v37 = vld [vmem:[%s11615_s3 + $0x6c0] sm:$0xff]  ;;  %v12756_v38 = vmax.f32 %v10927_v4, 0.0  ;;  %v12757_v25 = vmax.f32 %v10930_v41, 0.0  ;;  %v11111_v33 = vmul.f32 %v4519_v53, %v3862_v39 }
 0x387   : > { %v3742_v28 = vmax.f32 %v12755_v36, %v3422_v2  ;;  %v2847_v59 = vpop.f32.mrb[56].mxu1  ;;  %v2656_v61 = vpop.f32.mrb[57].mxu0  ;;  %v11102_v55 = vmax.f32 %v10766_v14, %v3724_v17  ;;  %v3883_v34 = vmax.f32 %v10770_v63, %v3723_v12  ;;  %v11109_v2 = vmul.f32 %v4022_v45, %v3862_v39  ;;  %v4540_v14 = vld [vmem:[%s11615_s3 + $0x6c8] sm:$0xff] }
 0x388   : > { %v3744_v23 = vmax.f32 %v12756_v38, %v3424_v11  ;;  %v3743_v0 = vmax.f32 %v12757_v25, %v3423_v62  ;;  %v2849_v10 = vpop.f32.mrb[57].mxu1  ;;  %v2658_v5 = vpop.f32.mrb[58].mxu0  ;;  %v11120_v63 = vmax.f32 %v10780_v26, %v3725_v49  ;;  %v11123_v31 = vmul.f32 %v4023_v7, %v3863_v43 }
 0x389   : > { %v3902_v4 = vmax.f32 %v10784_v15, %v3742_v28  ;;  %v2851_v41 = vpop.f32.mrb[58].mxu1  ;;  %v2660_v17 = vpop.f32.mrb[59].mxu0  ;;  %v11125_v45 = vmul.f32 %v4520_v27, %v3863_v43  ;;  %v11131_v11 = vmul.f32 %v4042_v42, %v3882_v9  ;;  %v11133_v62 = vmul.f32 %v4539_v37, %v3882_v9  ;;  %v12759_v15 = vld [vmem:[#allocation26_spill] sm:$0xff] }
 0x38a   : > { %v11128_v39 = vmax.f32 %v10788_v8, %v3744_v23  ;;  %v3903_v53 = vmax.f32 %v10792_v35, %v3743_v0  ;;  %v2853_v12 = vpop.f32.mrb[59].mxu1  ;;  %v12758_v26 = vmax.f32 %v10934_v30, 0.0  ;;  %v2655_v49 = vadd.f32 %v2654_v46, %v12759_v15  ;;  %v12760_v28 = vld [vmem:[#allocation30_spill] sm:$0xff] }
 0x38b   : > { %v11138_v36 = vmul.f32 %v4043_v18, %v3883_v34  ;;  %v11140_v7 = vmul.f32 %v4540_v14, %v3883_v34  ;;  %v2848_v43 = vadd.f32 %v2847_v59, %v12759_v15  ;;  %v2657_v8 = vadd.f32 %v2656_v61, %v12759_v15 }
 0x38c   : > { %v3745_v57 = vmax.f32 %v12758_v26, %v3425_v20  ;;  %v3442_v27 = vmax.f32 %v2655_v49, 0.0  ;;  %v2850_v9 = vadd.f32 %v2849_v10, %v12759_v15  ;;  %v2659_v42 = vadd.f32 %v2658_v5, %v12760_v28  ;;  %v4062_v10 = vld [vmem:[%s11615_s3 + $0x260] sm:$0xff]  ;;  %v4063_v15 = vld [vmem:[%s11615_s3 + $0x268] sm:$0xff] }
 0x38d   : > { %v3444_v30 = vmax.f32 %v2848_v43, 0.0  ;;  %v3443_v20 = vmax.f32 %v2657_v8, 0.0  ;;  %v2852_v46 = vadd.f32 %v2851_v41, %v12760_v28  ;;  %v2661_v37 = vadd.f32 %v2660_v17, %v12760_v28  ;;  %v4559_v5 = vld [vmem:[%s11615_s3 + $0x760] sm:$0xff]  ;;  %v4560_v49 = vld [vmem:[%s11615_s3 + $0x768] sm:$0xff] }
 0x38e   : > { %v11145_v35 = vmax.f32 %v10796_v48, %v3745_v57  ;;  %v11151_v34 = vpop.f32.mrb[60].mxu0  ;;  %v12761_v59 = vmax.f32 %v10937_v3, 0.0  ;;  %v3445_v38 = vmax.f32 %v2850_v9, 0.0  ;;  %v3462_v48 = vmax.f32 %v2659_v42, 0.0 }
 0x38f   : > { %v2854_v23 = vadd.f32 %v2853_v12, %v12760_v28  ;;  %v11156_v25 = vpop.f32.mrb[60].mxu1  ;;  %v11158_v0 = vpop.f32.mrb[61].mxu0  ;;  %v12762_v18 = vmax.f32 %v10940_v44, 0.0  ;;  %v12763_v14 = vmax.f32 %v10943_v58, 0.0  ;;  %v3464_v17 = vmax.f32 %v2852_v46, 0.0  ;;  %v12765_v58 = vld [vmem:[#allocation75_spill] sm:$0xff] }
 0x390   : > { %v3762_v61 = vmax.f32 %v12761_v59, %v3442_v27  ;;  %v3463_v12 = vmax.f32 %v2661_v37, 0.0  ;;  %v2859_v26 = vpop.f32.mrb[61].mxu1  ;;  %v11170_v57 = vpop.f32.mrb[62].mxu0  ;;  %v12764_v44 = vmax.f32 %v10946_v54, 0.0  ;;  %v12766_v27 = vmax.f32 %v12765_v58, 0.0  ;;  %v4579_v46 = vld [vmem:[%s11615_s3 + $0x800] sm:$0xff] }
 0x391   : > { %v3764_v3 = vmax.f32 %v12762_v18, %v3444_v30  ;;  %v3763_v41 = vmax.f32 %v12763_v14, %v3443_v20  ;;  %v3465_v28 = vmax.f32 %v2854_v23, 0.0  ;;  %v11183_v42 = vpop.f32.mrb[62].mxu1  ;;  %v11185_v30 = vpop.f32.mrb[63].mxu0  ;;  %v4082_v20 = vld [vmem:[%s11615_s3 + $0x300] sm:$0xff]  ;;  %v12768_v54 = vld [vmem:[#allocation59_spill] sm:$0xff]  ;;  %v11208_v21 = vmul.f32 %v4559_v5, %v3902_v4 }
 0x392   : > { %v3922_v43 = vmax.f32 %v10806_v60, %v3762_v61  ;;  %v3765_v8 = vmax.f32 %v12764_v44, %v3445_v38  ;;  %v3782_v9 = vmax.f32 %v12766_v27, %v3462_v48  ;;  %v12767_v60 = vld [vmem:[#allocation35_spill] sm:$0xff]  ;;  %v4083_v61 = vld [vmem:[%s11615_s3 + $0x308] sm:$0xff]  ;;  %v11204_v58 = vpop.f32.mrb[63].mxu1  ;;  %v11206_v27 = vmul.f32 %v4062_v10, %v3902_v4 }
 0x393   : > { %v11194_v37 = vmax.f32 %v12767_v60, %v3764_v3  ;;  %v3923_v59 = vmax.f32 %v12768_v54, %v3763_v41  ;;  %v12769_v38 = vld [vmem:[#allocation67_spill] sm:$0xff]  ;;  %v12771_v18 = vld [vmem:[#allocation57_spill] sm:$0xff]  ;;  %v12774_v54 = vld [vmem:[#allocation46_spill] sm:$0xff]  ;;  %v11225_v4 = vmul.f32 %v4063_v15, %v3903_v53  ;;  %v11227_v5 = vmul.f32 %v4560_v49, %v3903_v53 }
 0x394   : > { %v12770_v48 = vmax.f32 %v12769_v38, 0.0  ;;  %v12772_v14 = vmax.f32 %v12771_v18, 0.0  ;;  %v4580_v3 = vld [vmem:[%s11615_s3 + $0x808] sm:$0xff]  ;;  %v11217_v13 = vmax.f32 %v12774_v54, %v3782_v9  ;;  %v4005_v10 = vld [vmem:[%s11615_s3 + $0x98] sm:$0xff]  ;;  %v4024_v9 = vld [vmem:[%s11615_s3 + $0x130] sm:$0xff]  ;;  %v11243_v15 = vmul.f32 %v4579_v46, %v3922_v43 }
 0x395   : > { %v12773_v41 = vld [vmem:[#allocation77_spill] sm:$0xff]  ;;  %v4025_v18 = vld [vmem:[%s11615_s3 + $0x138] sm:$0xff]  ;;  %v11245_v53 = vmul.f32 %v4083_v61, %v3923_v59  ;;  %v4344_v16 = vadd.f32 %v12782_v22, %v11109_v2 }
 0x396   : > { %v3784_v23 = vmax.f32 %v12770_v48, %v3464_v17  ;;  %v3783_v44 = vmax.f32 %v12772_v14, %v3463_v12  ;;  %v11214_v60 = vmax.f32 %v12773_v41, %v3765_v8  ;;  %v4004_v17 = vld [vmem:[%s11615_s3 + $0x90] sm:$0xff]  ;;  %v12775_v12 = vld [vmem:[#allocation80_spill] sm:$0xff]  ;;  %v12776_v8 = vld [vmem:[#allocation73_spill] sm:$0xff]  ;;  %v11241_v14 = vmul.f32 %v4082_v20, %v3922_v43 }
 0x397   : > { %v12777_v49 = vld [vmem:[#allocation60_spill] sm:$0xff]  ;;  %v4164_v20 = vmul.f32 %v4004_v17, %v11026_v52  ;;  %v4165_v43 = vmul.f32 %v4005_v10, %v11042_v40 }
 0x398   : > { %v11230_v38 = vmax.f32 %v12775_v12, %v3784_v23  ;;  %v11233_v48 = vmax.f32 %v12776_v8, %v3783_v44  ;;  %v12778_v23 = vmax.f32 %v12777_v49, 0.0  ;;  %v4501_v44 = vld [vmem:[%s11615_s3 + $0x590] sm:$0xff]  ;;  %v4502_v54 = vld [vmem:[%s11615_s3 + $0x598] sm:$0xff]  ;;  %v11255_v12 = vmul.f32 %v4580_v3, %v3923_v59  ;;  %v12781_v8 = vld [vmem:[#allocation49_spill] sm:$0xff] }
 0x399   : > { %v12780_v46 = vld [vmem:[#allocation64_spill] sm:$0xff]  ;;  %v4325_v3 = vsel %vm4324_vm1, %v4165_v43, 0.0  ;;  %v4661_v17 = vmul.f32 %v4501_v44, %v11026_v52  ;;  %v4662_v10 = vmul.f32 %v4502_v54, %v11042_v40 }
 0x39a   : > { %v3785_v41 = vmax.f32 %v12778_v23, %v3465_v28  ;;  %12779 = vst [vmem:[#allocation7_spill] sm:$0xff] %v11255_v12  ;;  %v4321_v61 = vadd.f32 %v12780_v46, %v11051_v56  ;;  %v4184_v28 = vmul.f32 %v4024_v9, %v11048_v19  ;;  %v4185_v23 = vmul.f32 %v4025_v18, %v11065_v47  ;;  %v12783_v46 = vld [vmem:[#allocation81_spill] sm:$0xff]  ;;  %v12785_v43 = vld [vmem:[#allocation56_spill] sm:$0xff] }
 0x39b   : > { %v4345_v56 = vadd.f32 %v4344_v16, %v11123_v31  ;;  %v4818_v9 = vadd.f32 %v12783_v46, %v11053_v50  ;;  %v4821_v22 = vsel %vm4324_vm1, %v4662_v10, 0.0  ;;  %v4103_v46 = vld [vmem:[%s11615_s3 + $0x3a8] sm:$0xff] }
 0x39c   : > { %v11262_v49 = vmax.f32 %v12781_v8, %v3785_v41  ;;  %v4322_v59 = vadd.f32 %v4321_v61, %v11058_v51  ;;  %v4347_v41 = vsel %vm4324_vm1, %v4185_v23, 0.0  ;;  %v12784_v8 = vld [vmem:[#allocation34_spill] sm:$0xff]  ;;  %v12786_v23 = vld [vmem:[#allocation48_spill] sm:$0xff] }
 0x39d   : > { %v2665_v18 = vadd.f32 %v11151_v34, %v12784_v8  ;;  %v2858_v51 = vadd.f32 %v11156_v25, %v12784_v8  ;;  %v2667_v52 = vadd.f32 %v11158_v0, %v12784_v8  ;;  %v4346_v40 = vadd.f32 %v4345_v56, %v4184_v28  ;;  %v4102_v0 = vld [vmem:[%s11615_s3 + $0x3a0] sm:$0xff] }
 0x39e   : > { %v4323_v12 = vadd.f32 %v4322_v59, %v4164_v20  ;;  %v4819_v16 = vadd.f32 %v4818_v9, %v11060_v32  ;;  %v2860_v31 = vadd.f32 %v2859_v26, %v12784_v8  ;;  %v2669_v34 = vadd.f32 %v11170_v57, %v12785_v43  ;;  %v4599_v32 = vld [vmem:[%s11615_s3 + $0x8a0] sm:$0xff]  ;;  %v12788_v26 = vld [vmem:[#allocation50_spill] sm:$0xff] }
 0x39f   : > { %v3482_v2 = vmax.f32 %v2665_v18, 0.0  ;;  %v3484_v50 = vmax.f32 %v2858_v51, 0.0  ;;  %v3483_v54 = vmax.f32 %v2667_v52, 0.0  ;;  %v4348_v20 = vadd.f32 %v4347_v41, %v4346_v40  ;;  %v4600_v9 = vld [vmem:[%s11615_s3 + $0x8a8] sm:$0xff]  ;;  %v12792_v18 = vld [vmem:[#allocation76_spill] sm:$0xff] }
 0x3a0   : > { %v4326_v44 = vadd.f32 %v4325_v3, %v4323_v12  ;;  %v4820_v61 = vadd.f32 %v4819_v16, %v4661_v17  ;;  %v12787_v59 = vmax.f32 %v12786_v23, 0.0  ;;  %v3485_v10 = vmax.f32 %v2860_v31, 0.0  ;;  %v12790_v3 = vld [vmem:[#allocation40_spill] sm:$0xff]  ;;  %v12795_v31 = vld [vmem:[#allocation42_spill] sm:$0xff] }
 0x3a1   : > { %v12789_v12 = vmax.f32 %v12788_v26, 0.0  ;;  %v12791_v57 = vmax.f32 %v12790_v3, 0.0  ;;  %v3502_v17 = vmax.f32 %v2669_v34, 0.0  ;;  %v2862_v41 = vadd.f32 %v11183_v42, %v12785_v43  ;;  %4349 = vadd.xlane.f32.xlu1 %v4348_v20  ;;  %v12793_v52 = vld [vmem:[#allocation52_spill] sm:$0xff] }
 0x3a2   : > { %v3802_v25 = vmax.f32 %v12787_v59, %v3482_v2  ;;  %4327 = vadd.xlane.f32.xlu0 %v4326_v44  ;;  %v4822_v8 = vadd.f32 %v4821_v22, %v4820_v61  ;;  %v12794_v40 = vmax.f32 %v12793_v52, 0.0  ;;  %v2671_v2 = vadd.f32 %v11185_v30, %v12785_v43  ;;  %v4122_v42 = vld [vmem:[%s11615_s3 + $0x440] sm:$0xff]  ;;  %v4045_v61 = vld [vmem:[%s11615_s3 + $0x1d8] sm:$0xff] }
 0x3a3   : > { %v3804_v28 = vmax.f32 %v12789_v12, %v3484_v50  ;;  %v3803_v56 = vmax.f32 %v12791_v57, %v3483_v54  ;;  %v12796_v50 = vld [vmem:[#allocation38_spill] sm:$0xff]  ;;  %v12797_v34 = vmax.f32 %v10986_v6, 0.0  ;;  %v3504_v20 = vmax.f32 %v2862_v41, 0.0  ;;  %v4619_v59 = vld [vmem:[%s11615_s3 + $0x940] sm:$0xff] }
 0x3a4   : > { %v3962_v51 = vmax.f32 %v12792_v18, %v3802_v25  ;;  %v3805_v16 = vmax.f32 %v12794_v40, %v3485_v10  ;;  %v11325_v23 = vmul.f32 %v4102_v0, %v11217_v13  ;;  %v11328_v30 = vmul.f32 %v4599_v32, %v11217_v13  ;;  %v4123_v6 = vld [vmem:[%s11615_s3 + $0x448] sm:$0xff]  ;;  %v12798_v25 = vld [vmem:[#allocation55_spill] sm:$0xff]  ;;  %v4639_v41 = vld [vmem:[%s11615_s3 + $0x9e0] sm:$0xff] }
 0x3a5   : > { %v11316_v44 = vmax.f32 %v12795_v31, %v3804_v28  ;;  %v3963_v54 = vmax.f32 %v12796_v50, %v3803_v56  ;;  %v3822_v22 = vmax.f32 %v12797_v34, %v3502_v17  ;;  %v3503_v26 = vmax.f32 %v2671_v2, 0.0  ;;  %v4620_v13 = vld [vmem:[%s11615_s3 + $0x948] sm:$0xff]  ;;  %v4044_v56 = vld [vmem:[%s11615_s3 + $0x1d0] sm:$0xff] }
 0x3a6   : > { %v11337_v10 = vmax.f32 %v12798_v25, %v3805_v16  ;;  %v11340_v12 = vmul.f32 %v4103_v46, %v11233_v48  ;;  %v11343_v0 = vmul.f32 %v4600_v9, %v11233_v48  ;;  %4823 = vadd.xlane.f32.xlu0 %v4822_v8  ;;  %v12799_v32 = vld [vmem:[#allocation66_spill] sm:$0xff]  ;;  %v12800_v3 = vmax.f32 %v10991_v1, 0.0  ;;  %v4142_v48 = vld [vmem:[%s11615_s3 + $0x4e0] sm:$0xff]  ;;  %v12803_v2 = vld [vmem:[#allocation79_spill] sm:$0xff] }
 0x3a7   : > { %v3982_v28 = vmax.f32 %v12799_v32, %v3822_v22  ;;  %v11354_v17 = vmul.f32 %v4122_v42, %v3962_v51  ;;  %v12801_v46 = vmax.f32 %v10996_v24, 0.0  ;;  %v2864_v1 = vadd.f32 %v11204_v58, %v12785_v43  ;;  %v12802_v40 = vld [vmem:[#allocation65_spill] sm:$0xff]  ;;  %v4522_v24 = vld [vmem:[%s11615_s3 + $0x638] sm:$0xff]  ;;  %v4064_v25 = vld [vmem:[%s11615_s3 + $0x270] sm:$0xff] }
 0x3a8   : > { %v3824_v57 = vmax.f32 %v12800_v3, %v3504_v20  ;;  %v4205_v8 = vmul.f32 %v4045_v61, %v11120_v63  ;;  %v11367_v18 = vmul.f32 %v4619_v59, %v3962_v51  ;;  %v11369_v52 = vmul.f32 %v4123_v6, %v3963_v54  ;;  %v4065_v58 = vld [vmem:[%s11615_s3 + $0x278] sm:$0xff]  ;;  %v12804_v51 = vld [vmem:[#allocation45_spill] sm:$0xff]  ;;  %v12805_v59 = vld [vmem:[#allocation78_spill] sm:$0xff] }
 0x3a9   : > { %v3823_v9 = vmax.f32 %v12801_v46, %v3503_v26  ;;  %v4366_v42 = vadd.f32 %v12803_v2, %v11131_v11  ;;  %v11382_v43 = vmul.f32 %v4620_v13, %v3963_v54  ;;  %v3505_v50 = vmax.f32 %v2864_v1, 0.0  ;;  %v4521_v11 = vld [vmem:[%s11615_s3 + $0x630] sm:$0xff]  ;;  %v4143_v61 = vld [vmem:[%s11615_s3 + $0x4e8] sm:$0xff]  ;;  %v4542_v26 = vld [vmem:[%s11615_s3 + $0x6d8] sm:$0xff] }
 0x3aa   : > { %v11372_v16 = vmax.f32 %v12802_v40, %v3824_v57  ;;  %v4204_v34 = vmul.f32 %v4044_v56, %v11102_v55  ;;  %v11391_v22 = vmul.f32 %v4142_v48, %v3982_v28  ;;  %v11393_v20 = vmul.f32 %v4639_v41, %v3982_v28  ;;  %v12807_v48 = vld [vmem:[#allocation51_spill] sm:$0xff]  ;;  %v12809_v2 = vld [vmem:[#allocation53_spill] sm:$0xff] }
 0x3ab   : > { %v11385_v31 = vmax.f32 %v12804_v51, %v3823_v9  ;;  %v4367_v54 = vadd.f32 %v4366_v42, %v11138_v36  ;;  %v4840_v6 = vadd.f32 %v12805_v59, %v11111_v33  ;;  %v12806_v13 = vmax.f32 %v11001_v29, 0.0  ;;  %v4085_v46 = vld [vmem:[%s11615_s3 + $0x318] sm:$0xff]  ;;  %v12808_v9 = vld [vmem:[#allocation6_spill] sm:$0xff] }
 0x3ac   : > { %v4369_v28 = vsel %vm4324_vm1, %v4205_v8, 0.0  ;;  %v4682_v3 = vmul.f32 %v4522_v24, %v11065_v47  ;;  %v4225_v36 = vmul.f32 %v4065_v58, %v11145_v35  ;;  %v4681_v33 = vmul.f32 %v4521_v11, %v11048_v19  ;;  %v4541_v19 = vld [vmem:[%s11615_s3 + $0x6d0] sm:$0xff] }
 0x3ad   : > { %v3825_v32 = vmax.f32 %v12806_v13, %v3505_v50  ;;  %v4368_v57 = vadd.f32 %v4367_v54, %v4204_v34  ;;  %v4841_v56 = vadd.f32 %v4840_v6, %v11125_v45  ;;  %v4388_v41 = vadd.f32 %v12807_v48, %v11206_v27  ;;  %v4084_v24 = vld [vmem:[%s11615_s3 + $0x310] sm:$0xff]  ;;  %v12810_v34 = vld [vmem:[#allocation69_spill] sm:$0xff] }
 0x3ae   : > { %v11420_v29 = vmul.f32 %v4143_v61, %v11385_v31  ;;  %v4224_v47 = vmul.f32 %v4064_v25, %v11128_v39  ;;  %v4702_v45 = vmul.f32 %v4542_v26, %v11120_v63  ;;  %v4862_v42 = vadd.f32 %v12809_v2, %v11133_v62  ;;  %v4562_v62 = vld [vmem:[%s11615_s3 + $0x778] sm:$0xff] }
 0x3af   : > { %v11423_v1 = vmax.f32 %v12808_v9, %v3825_v32  ;;  %v4370_v8 = vadd.f32 %v4369_v28, %v4368_v57  ;;  %v4842_v27 = vadd.f32 %v4841_v56, %v4681_v33  ;;  %v4389_v40 = vadd.f32 %v4388_v41, %v11225_v4  ;;  %v4561_v4 = vld [vmem:[%s11615_s3 + $0x770] sm:$0xff]  ;;  %v12811_v26 = vld [vmem:[#allocation68_spill] sm:$0xff] }
 0x3b0   : > { %v4843_v58 = vsel %vm4324_vm1, %v4682_v3, 0.0  ;;  %v4391_v51 = vsel %vm4324_vm1, %v4225_v36, 0.0  ;;  %v4245_v50 = vmul.f32 %v4085_v46, %v11214_v60  ;;  %v4410_v63 = vadd.f32 %v12810_v34, %v11241_v14  ;;  %v4104_v32 = vld [vmem:[%s11615_s3 + $0x3b0] sm:$0xff]  ;;  %v4105_v28 = vld [vmem:[%s11615_s3 + $0x3b8] sm:$0xff] }
 0x3b1   : > { %4371 = vadd.xlane.f32.xlu1 %v4370_v8  ;;  %v4844_v11 = vadd.f32 %v4843_v58, %v4842_v27  ;;  %v4390_v61 = vadd.f32 %v4389_v40, %v4224_v47  ;;  %v4701_v54 = vmul.f32 %v4541_v19, %v11102_v55  ;;  %v4863_v59 = vadd.f32 %v4862_v42, %v11140_v7  ;;  %v4582_v55 = vld [vmem:[%s11615_s3 + $0x818] sm:$0xff]  ;;  %v4581_v46 = vld [vmem:[%s11615_s3 + $0x810] sm:$0xff] }
 0x3b2   : > { %v4865_v6 = vsel %vm4324_vm1, %v4702_v45, 0.0  ;;  %v4244_v25 = vmul.f32 %v4084_v24, %v11194_v37  ;;  %v4411_v14 = vadd.f32 %v4410_v63, %v11245_v53  ;;  %v4884_v13 = vadd.f32 %v12811_v26, %v11208_v21  ;;  %v4640_v21 = vld [vmem:[%s11615_s3 + $0x9e8] sm:$0xff]  ;;  %v12812_v48 = vld [vmem:[#allocation71_spill] sm:$0xff] }
 0x3b3   : > { %4845 = vadd.xlane.f32.xlu0 %v4844_v11  ;;  %v4392_v7 = vadd.f32 %v4391_v51, %v4390_v61  ;;  %v4864_v3 = vadd.f32 %v4863_v59, %v4701_v54  ;;  %v4721_v53 = vmul.f32 %v4561_v4, %v11128_v39  ;;  %v4722_v36 = vmul.f32 %v4562_v62, %v11145_v35  ;;  %v4125_v19 = vld [vmem:[%s11615_s3 + $0x458] sm:$0xff]  ;;  %v12813_v8 = vld [vmem:[#allocation70_spill] sm:$0xff] }
 0x3b4   : > { %v4412_v57 = vadd.f32 %v4411_v14, %v4244_v25  ;;  %v4413_v33 = vsel %vm4324_vm1, %v4245_v50, 0.0  ;;  %v4885_v56 = vadd.f32 %v4884_v13, %v11227_v5  ;;  %v4432_v41 = vadd.f32 %v12812_v48, %v11325_v23  ;;  %v4124_v40 = vld [vmem:[%s11615_s3 + $0x450] sm:$0xff]  ;;  %v4145_v54 = vld [vmem:[%s11615_s3 + $0x4f8] sm:$0xff] }
 0x3b5   : > { %4393 = vadd.xlane.f32.xlu1 %v4392_v7  ;;  %v4866_v39 = vadd.f32 %v4865_v6, %v4864_v3  ;;  %v4264_v35 = vmul.f32 %v4104_v32, %v11230_v38  ;;  %v4265_v9 = vmul.f32 %v4105_v28, %v11262_v49  ;;  %v4742_v47 = vmul.f32 %v4582_v55, %v11214_v60  ;;  %v12814_v24 = vld [vmem:[#allocation43_spill] sm:$0xff]  ;;  %v12816_v62 = vld [vmem:[#allocation62_spill] sm:$0xff] }
 0x3b6   : > { %v4414_v5 = vadd.f32 %v4413_v33, %v4412_v57  ;;  %v4886_v45 = vadd.f32 %v4885_v56, %v4721_v53  ;;  %v4433_v23 = vadd.f32 %v4432_v41, %v11340_v12  ;;  %v4906_v27 = vadd.f32 %v12813_v8, %v11243_v15  ;;  %v4602_v12 = vld [vmem:[%s11615_s3 + $0x8b8] sm:$0xff]  ;;  %v4144_v61 = vld [vmem:[%s11615_s3 + $0x4f0] sm:$0xff] }
 0x3b7   : > { %v4800_v2 = vmul.f32 %v4640_v21, %v11385_v31  ;;  %4867 = vadd.xlane.f32.xlu0 %v4866_v39  ;;  %v4887_v60 = vsel %vm4324_vm1, %v4722_v36, 0.0  ;;  %v4741_v42 = vmul.f32 %v4581_v46, %v11194_v37  ;;  %v4454_v58 = vadd.f32 %v12814_v24, %v11354_v17  ;;  %v12815_v50 = vld [vmem:[#allocation7_spill] sm:$0xff]  ;;  %v12817_v13 = vld [vmem:[#allocation54_spill] sm:$0xff]  ;;  %v12818_v21 = vld [vmem:[#allocation36_spill] sm:$0xff] }
 0x3b8   : > { %v4888_v51 = vadd.f32 %v4887_v60, %v4886_v45  ;;  %v4434_v15 = vadd.f32 %v4433_v23, %v4264_v35  ;;  %v4907_v34 = vadd.f32 %v4906_v27, %v12815_v50  ;;  %v4285_v63 = vmul.f32 %v4125_v19, %v11337_v10  ;;  %v4601_v31 = vld [vmem:[%s11615_s3 + $0x8b0] sm:$0xff]  ;;  %v4622_v55 = vld [vmem:[%s11615_s3 + $0x958] sm:$0xff]  ;;  %v12819_v46 = vld [vmem:[#allocation61_spill] sm:$0xff] }
 0x3b9   : > { %4415 = vadd.xlane.f32.xlu1 %v4414_v5  ;;  %v4435_v37 = vsel %vm4324_vm1, %v4265_v9, 0.0  ;;  %v4284_v4 = vmul.f32 %v4124_v40, %v11316_v44  ;;  %v4455_v17 = vadd.f32 %v4454_v58, %v11369_v52  ;;  %v4928_v11 = vadd.f32 %v12816_v62, %v11328_v30  ;;  %v4621_v28 = vld [vmem:[%s11615_s3 + $0x950] sm:$0xff] }
 0x3ba   : > { %v4436_v59 = vadd.f32 %v4435_v37, %v4434_v15  ;;  %v4908_v6 = vadd.f32 %v4907_v34, %v4741_v42  ;;  %v4909_v25 = vsel %vm4324_vm1, %v4742_v47, 0.0  ;;  %v4762_v14 = vmul.f32 %v4602_v12, %v11262_v49  ;;  %v4641_v33 = vld [vmem:[%s11615_s3 + $0x9f0] sm:$0xff] }
 0x3bb   : > { %4889 = vadd.xlane.f32.xlu0 %v4888_v51  ;;  %v4456_v26 = vadd.f32 %v4455_v17, %v4284_v4  ;;  %v4761_v52 = vmul.f32 %v4601_v31, %v11230_v38  ;;  %v4929_v30 = vadd.f32 %v4928_v11, %v11343_v0  ;;  %v4476_v32 = vadd.f32 %v12817_v13, %v11391_v22  ;;  %v4642_v0 = vld [vmem:[%s11615_s3 + $0x9f8] sm:$0xff] }
 0x3bc   : > { %v4910_v7 = vadd.f32 %v4909_v25, %v4908_v6  ;;  %v4457_v49 = vsel %vm4324_vm1, %v4285_v63, 0.0  ;;  %v4304_v3 = vmul.f32 %v4144_v61, %v11372_v16  ;;  %v4305_v38 = vmul.f32 %v4145_v54, %v11423_v1 }
 0x3bd   : > { %4437 = vadd.xlane.f32.xlu1 %v4436_v59  ;;  %v4458_v22 = vadd.f32 %v4457_v49, %v4456_v26  ;;  %v4930_v53 = vadd.f32 %v4929_v30, %v4761_v52  ;;  %v4477_v36 = vadd.f32 %v4476_v32, %v11420_v29  ;;  %v4950_v57 = vadd.f32 %v12818_v21, %v11367_v18 }
 0x3be   : > { %v4931_v56 = vsel %vm4324_vm1, %v4762_v14, 0.0  ;;  %v4781_v48 = vmul.f32 %v4621_v28, %v11316_v44  ;;  %v4782_v41 = vmul.f32 %v4622_v55, %v11337_v10  ;;  %v4972_v39 = vadd.f32 %v12819_v46, %v11393_v20 }
 0x3bf   : > { %4911 = vadd.xlane.f32.xlu0 %v4910_v7  ;;  %v4932_v35 = vadd.f32 %v4931_v56, %v4930_v53  ;;  %v4478_v9 = vadd.f32 %v4477_v36, %v4304_v3  ;;  %v4951_v29 = vadd.f32 %v4950_v57, %v11382_v43  ;;  %v4802_v18 = vmul.f32 %v4642_v0, %v11423_v1 }
 0x3c0   : > { %v4479_v47 = vsel %vm4324_vm1, %v4305_v38, 0.0  ;;  %v4801_v19 = vmul.f32 %v4641_v33, %v11372_v16  ;;  %v4973_v5 = vadd.f32 %v4972_v39, %v4800_v2  ;;  %v4953_v10 = vsel %vm4324_vm1, %v4782_v41, 0.0  ;;  %v5010_v33 = vld [vmem:[%s11616_s4] sm:$0x1] }
 0x3c1   : > { %4459 = vadd.xlane.f32.xlu1 %v4458_v22  ;;  %v4480_v45 = vadd.f32 %v4479_v47, %v4478_v9  ;;  %v4952_v44 = vadd.f32 %v4951_v29, %v4781_v48  ;;  %v4975_v8 = vsel %vm4324_vm1, %v4802_v18, 0.0 }
 0x3c2   : > { %v4974_v23 = vadd.f32 %v4973_v5, %v4801_v19 }
 0x3c3   : > { %4933 = vadd.xlane.f32.xlu0 %v4932_v35  ;;  %v4954_v20 = vadd.f32 %v4953_v10, %v4952_v44 }
 0x3c4   : > { %v4976_v27 = vadd.f32 %v4975_v8, %v4974_v23 }
 0x3c5   : > { %4481 = vadd.xlane.f32.xlu1 %v4480_v45 }
 0x3c7   : > { %4955 = vadd.xlane.f32.xlu0 %v4954_v20 }
 0x3cb   : > { %4977 = vadd.xlane.f32.xlu0 %v4976_v27 }
 0x42e   : > { %v4350_v1 = vpop.xlane.xlu1 %4349 }
 0x42f   : > { %v4328_v43 = vpop.xlane.xlu0 %4327 }
 0x433   : > { %v4824_v40 = vpop.xlane.xlu0 %4823 }
 0x434   : > { %v4980_v51 = vsel %vm4979_vm2, %v4328_v43, %v4824_v40 }
 0x435   : > { %v4989_v37 = vsel %vm4988_vm3, %v4980_v51, 0.0 }
 0x43e   : > { %v4372_v60 = vpop.xlane.xlu1 %4371 }
 0x440   : > { %v4846_v16 = vpop.xlane.xlu0 %4845 }
 0x441   : > { %v4981_v12 = vsel %vm4979_vm2, %v4350_v1, %v4846_v16 }
 0x442   : > { %v4394_v2 = vpop.xlane.xlu1 %4393  ;;  %v4990_v50 = vsel %vm4988_vm3, %v4981_v12, 0.0 }
 0x443   : > { %v4991_v17 = vadd.f32 %v4990_v50, %v4989_v37 }
 0x444   : > { %v4868_v42 = vpop.xlane.xlu0 %4867 }
 0x445   : > { %v4982_v15 = vsel %vm4979_vm2, %v4372_v60, %v4868_v42 }
 0x446   : > { %v4416_v24 = vpop.xlane.xlu1 %4415  ;;  %v4992_v4 = vsel %vm4988_vm3, %v4982_v15, 0.0 }
 0x447   : > { %v4993_v54 = vadd.f32 %v4992_v4, %v4991_v17 }
 0x448   : > { %v4890_v58 = vpop.xlane.xlu0 %4889 }
 0x449   : > { %v4983_v31 = vsel %vm4979_vm2, %v4394_v2, %v4890_v58 }
 0x44a   : > { %v4438_v34 = vpop.xlane.xlu1 %4437  ;;  %v4994_v11 = vsel %vm4988_vm3, %v4983_v31, 0.0 }
 0x44b   : > { %v4995_v14 = vadd.f32 %v4994_v11, %v4993_v54 }
 0x44c   : > { %v4912_v63 = vpop.xlane.xlu0 %4911 }
 0x44d   : > { %v4984_v62 = vsel %vm4979_vm2, %v4416_v24, %v4912_v63 }
 0x44e   : > { %v4996_v6 = vsel %vm4988_vm3, %v4984_v62, 0.0  ;;  %v4460_v25 = vpop.xlane.xlu1 %4459 }
 0x44f   : > { %v4997_v30 = vadd.f32 %v4996_v6, %v4995_v14 }
 0x450   : > { %v4934_v61 = vpop.xlane.xlu0 %4933 }
 0x451   : > { %v4985_v59 = vsel %vm4979_vm2, %v4438_v34, %v4934_v61 }
 0x452   : > { %v4998_v26 = vsel %vm4988_vm3, %v4985_v59, 0.0  ;;  %v4482_v55 = vpop.xlane.xlu1 %4481 }
 0x453   : > { %v4999_v28 = vadd.f32 %v4998_v26, %v4997_v30 }
 0x454   : > { %v4956_v52 = vpop.xlane.xlu0 %4955 }
 0x455   : > { %v4986_v13 = vsel %vm4979_vm2, %v4460_v25, %v4956_v52 }
 0x456   : > { %v5000_v32 = vsel %vm4988_vm3, %v4986_v13, 0.0 }
 0x457   : > { %v5001_v49 = vadd.f32 %v5000_v32, %v4999_v28 }
 0x458   : > { %v4978_v7 = vpop.xlane.xlu0 %4977 }
 0x459   : > { %v4987_v3 = vsel %vm4979_vm2, %v4482_v55, %v4978_v7 }
 0x45a   : > { %v5002_v38 = vsel %vm4988_vm3, %v4987_v3, 0.0 }
 0x45b   : > { %v5003_v0 = vadd.f32 %v5002_v38, %v5001_v49 }
 0x45d   : > { %v5004_v22 = vrot.slane %v5003_v0, 4 }
 0x45f   : > { %v5005_v53 = vadd.f32 %v5004_v22, %v5003_v0 }
 0x461   : > { %v5006_v36 = vrot.slane %v5005_v53, 2 }
 0x463   : > { %v5007_v21 = vadd.f32 %v5006_v36, %v5005_v53 }
 0x465   : > { %v5008_v57 = vrot.slane %v5007_v21, 1 }
 0x467   : > { %v5009_v56 = vadd.f32 %v5008_v57, %v5007_v21 }
 0x469   : > { %v5011_v48 = vadd.f32 %v5010_v33, %v5009_v56 }
 0x46b   : > { %5013 = vst.msk [vmem:[%s216_s8] sm:$0x1] %vm5012_vm4, %v5011_v48 }
 0x46c   : > { %5534 = shalt.err (!%p5531_p3)
}
 0x46d   : > { %s5535_s17 = scalar_lea.hbm %s11570_s12, 16  ;;  %s5539_s26 = scalar_lea.hbm %s11617_s5, 32 }
 0x46e   : > { %p5536_p4 = scmp.ne.s32.totalorder %s11570_s12, %s5535_s17  ;;  %p5540_p9 = scmp.lt.u32.totalorder %s11570_s12, %s11617_s5 }
 0x46f   : > { %p5541_p10 = scmp.lt.u32.totalorder %s5539_s26, %s5535_s17  ;;  %p5543_p12 = scmp.lt.u32.totalorder %s5535_s17, %s11570_s12 }
 0x470   : > { %p5537_p7 = pnand %p5536_p4, %p5655_p5 }
 0x471   : > { %p5542_p11 = por %p5541_p10, %p5540_p9 }
 0x472   : > { %p5538_p8 = pneg %p5537_p7 }
 0x473   : > { %p5544_p13 = por %p5543_p12, %p5542_p11 }
 0x475   : > { %p5545_p0 = pnand %p5544_p13, %p5538_p8 }
 0x477   : > { %5548 = shalt.err (!%p5545_p0)
}
 0x478   : > { %5327 = dma.vmem_to_hbm [thread:$0]  (%p5655_p5), %s11572_s10, 16, %s11570_s12, %s5015_s13  }
 0x479 PF: > { %p5333_p1 = scmp.ge.s32.totalorder %s5583_s21, 2  ;;  %s5039_s7 = sand.u32 1, %s5571_s18  }
 0x47a   : > { %s5040_s8 = scalar_lea.sflag [#allocation3], %s5039_s7 }
 0x47b   : > { %p5330_p2 = pnand %p5333_p1, %p5659_p6 }
 0x47d   : > { %5566 = dma.done.wait (!%p5330_p2), %s5040_s8, 16  }
 0x47e   : > { %5568 = vsyncadd (!%p5330_p2), %s5040_s8, 4294967280  ;;  %p15_p3 = scmp.ge.s32.totalorder %s5642_s24, 4   ;;  %s12820_s18 = smov %s5575_s19 }
 0x47f   : > { %s12821_s19 = smov %s5579_s20  ;;  %s12822_s20 = smov %s5653_s27 }
 0x480   : > { %s12823_s21 = smov %s5642_s24  ;;  %17 = sbr.rel (!%p15_p3) target bundleno = 3 (0x3), region = 75 }
 0x487   :  { %5044 = vsyncpa [#allocation3], 1 }
 0x488   :  { %5046 = vsyncpa [#allocation3 + $0x1], 1 }

</bundles_post_ra>
